<compile_context>
chip_gen: v7x
topology: tpu7x:2x2x1
jax: 0.10.0
libtpu: 0.0.40
codegen_flags: <defaults>
</compile_context>

<pallas_src>
import functools

import jax
import jax.numpy as jnp
from jax import lax
from jax.experimental import pallas as pl
from jax.experimental.pallas import tpu as pltpu


_K = 4                                # conv kernel size everywhere
_BN_EPS = 1e-5
_LEAKY = 0.2
_VMEM_LIMIT = 48 * 1024 * 1024        # fits v7x (64 MiB) with headroom; fine on v5e/v6e
_BN_TILE_BYTES = 2 * 1024 * 1024      # target block bytes for the elementwise BN/act pass


# Sub-pixel (phase) tap table for ConvTranspose2d(k=4, s=2, p=1).  Output row 2a+r only
# uses kernel rows kh with kh == r+1 (mod 2); each entry is (kh, start offset of the
# matching slice in the 1-padded input).
_PHASE_TAPS = {0: ((1, 1), (3, 0)), 1: ((0, 2), (2, 1))}


def _convT_offsets():
    offs = []
    for r in range(2):
        for s in range(2):
            offs.append(tuple((hs, ws)
                              for (_, hs) in _PHASE_TAPS[r]
                              for (_, ws) in _PHASE_TAPS[s]))
    return tuple(offs)


# Conv2d(k=4,s=2,p=1) after space-to-depth == 2x2-tap stride-1 conv: taps (u, v).
_ENC_OFFS = (((0, 0), (0, 1), (1, 0), (1, 1)),)
_DEC_OFFS = _convT_offsets()


# ----------------------------- Pallas kernels -----------------------------

def _conv_tap_bn_stats_kernel(zp_ref, w_ref, y_ref, stats_ref, *, offs, h_out, w_out):
    """Fused tap-assembly conv / conv-transpose phases + BatchNorm batch statistics.

    zp_ref:    (1, Ha, Wa, K)           bf16  padded (and s2d'd for Conv2d) activation
    w_ref:     (P, 4, K, C)             bf16  per-phase / per-tap weight matrices
    y_ref:     (1, P, h_out, w_out, C)  bf16  pre-BN conv output
    stats_ref: (1, 2, C)                f32   per-image (sum, sum_sq) over phases/pixels
    """
    n_phases = w_ref.shape[0]
    c_out = w_ref.shape[-1]
    s1 = jnp.zeros((1, c_out), jnp.float32)
    s2 = jnp.zeros((1, c_out), jnp.float32)
    for p in range(n_phases):                       # static unroll (1 or 4 phases)
        taps = offs[p]

        def row_body(a, carry, p=p, taps=taps):
            c1, c2 = carry
            acc = jnp.zeros((w_out, c_out), jnp.float32)
            for t in range(4):                      # static unroll: 4 taps
                dh, dw = taps[t]
                lhs = zp_ref[0, pl.ds(a + dh, 1), pl.ds(dw, w_out), :][0]   # (w_out, K)
                acc = acc + jnp.dot(lhs, w_ref[p, t],
                                    preferred_element_type=jnp.float32)
            y_ref[0, p, pl.ds(a, 1), :, :] = acc[None].astype(y_ref.dtype)
            # BN stats from the f32 accumulator (precision unchanged by the bf16 store).
            c1 = c1 + jnp.sum(acc, axis=0, keepdims=True)
            c2 = c2 + jnp.sum(acc * acc, axis=0, keepdims=True)
            return c1, c2

        s1, s2 = lax.fori_loop(0, h_out, row_body, (s1, s2))
    stats_ref[0, pl.ds(0, 1), :] = s1
    stats_ref[0, pl.ds(1, 1), :] = s2


def _bn_act_kernel(y_ref, sc_ref, sh_ref, o_ref, *, leaky_slope):
    """Per-channel BN scale/shift + activation (bf16 in, f32 math, bf16 out)."""
    y = y_ref[...].astype(jnp.float32) * sc_ref[...] + sh_ref[...]
    if leaky_slope is None:
        y = jnp.maximum(y, 0.0)                       # ReLU
    else:
        y = jnp.where(y >= 0.0, y, leaky_slope * y)   # LeakyReLU(0.2)
    o_ref[...] = y.astype(o_ref.dtype)


def _convT_out_kernel(zt_ref, w_ref, b_ref, o_ref, *, offs, h_out, w_out):
    """Output ConvTranspose + bias + tanh, channel-major so stores are lane-dense.

    zt_ref: (1, Ha, K, Wa)             bf16  padded input, channels on the sublane axis
    w_ref:  (4, 4, C, K)               bf16  transposed per-phase / per-tap weights
    b_ref:  (C, 1)                     f32
    o_ref:  (1, 2, 2, h_out, C, w_out) f32
    """
    b = b_ref[...]
    c_out = b.shape[0]
    for p in range(4):
        r, s = p // 2, p % 2
        taps = offs[p]

        def row_body(a, carry, p=p, r=r, s=s, taps=taps):
            acc = jnp.zeros((c_out, w_out), jnp.float32)
            for t in range(4):
                dh, dw = taps[t]
                lhs_t = zt_ref[0, pl.ds(a + dh, 1), :, pl.ds(dw, w_out)][0]   # (K, w_out)
                acc = acc + jnp.dot(w_ref[p, t], lhs_t,
                                    preferred_element_type=jnp.float32)
            out = jnp.tanh(acc + b)
            o_ref[0, r, s, pl.ds(a, 1), :, :] = out[None].astype(o_ref.dtype)
            return carry

        lax.fori_loop(0, h_out, row_body, 0)


# ----------------------------- kernel wrappers -----------------------------

def _conv_taps_bn_stats(zp, w, offs, h_out, w_out):
    N, Ha, Wa, K = zp.shape
    P, _, _, C = w.shape
    kernel = functools.partial(_conv_tap_bn_stats_kernel, offs=offs,
                               h_out=h_out, w_out=w_out)
    return pl.pallas_call(
        kernel,
        out_shape=(jax.ShapeDtypeStruct((N, P, h_out, w_out, C), jnp.bfloat16),
                   jax.ShapeDtypeStruct((N, 2, C), jnp.float32)),
        grid=(N,),
        in_specs=[
            pl.BlockSpec((1, Ha, Wa, K), lambda n: (n, 0, 0, 0)),
            # TODO(synk): single-buffer the constant weight block (pl.Buffered(1)) to halve
            # weight VMEM for the deep layers on v7x's 64 MiB VMEM.
            pl.BlockSpec((P, 4, K, C), lambda n: (0, 0, 0, 0)),
        ],
        out_specs=(
            pl.BlockSpec((1, P, h_out, w_out, C), lambda n: (n, 0, 0, 0, 0)),
            pl.BlockSpec((1, 2, C), lambda n: (n, 0, 0)),      # per-image stats partials
        ),
        compiler_params=pltpu.CompilerParams(
            dimension_semantics=("parallel",),
            vmem_limit_bytes=_VMEM_LIMIT),
    )(zp, w)


def _bn_scale_shift(stats, gamma, beta, count, eps=_BN_EPS):
    """Reduce per-image stats partials and fold BN into per-channel scale/shift."""
    s = jnp.sum(stats, axis=0)                                    # (2, C)
    mean = s[0] / count
    var = jnp.maximum(s[1] / count - mean * mean, 0.0)            # biased (training-mode) var
    scale = gamma * lax.rsqrt(var + eps)
    shift = beta - mean * scale
    return (scale.reshape(1, -1).astype(jnp.float32),
            shift.reshape(1, -1).astype(jnp.float32))


def _bn_act(y, scale, shift, *, leaky_slope):
    N, P, H, W, C = y.shape
    th = H                                       # large row-block tiles for this pure-BW pass
    while th > 1 and th % 2 == 0 and th * W * C * 2 > _BN_TILE_BYTES:
        th //= 2
    kernel = functools.partial(_bn_act_kernel, leaky_slope=leaky_slope)
    return pl.pallas_call(
        kernel,
        out_shape=jax.ShapeDtypeStruct((N, P, H, W, C), jnp.bfloat16),
        grid=(N, P, H // th),
        in_specs=[
            pl.BlockSpec((1, 1, th, W, C), lambda n, p, i: (n, p, i, 0, 0)),
            pl.BlockSpec((1, C), lambda n, p, i: (0, 0)),
            pl.BlockSpec((1, C), lambda n, p, i: (0, 0)),
        ],
        out_specs=pl.BlockSpec((1, 1, th, W, C), lambda n, p, i: (n, p, i, 0, 0)),
        compiler_params=pltpu.CompilerParams(
            dimension_semantics=("parallel", "parallel", "parallel"),
            vmem_limit_bytes=_VMEM_LIMIT),
    )(y, scale, shift)


def _convT_bias_tanh(zt, wT, bias, h_out, w_out):
    N, Ha, K, Wa = zt.shape
    C = wT.shape[2]
    kernel = functools.partial(_convT_out_kernel, offs=_DEC_OFFS,
                               h_out=h_out, w_out=w_out)
    return pl.pallas_call(
        kernel,
        out_shape=jax.ShapeDtypeStruct((N, 2, 2, h_out, C, w_out), jnp.float32),
        grid=(N,),
        in_specs=[
            pl.BlockSpec((1, Ha, K, Wa), lambda n: (n, 0, 0, 0)),
            pl.BlockSpec((4, 4, C, K), lambda n: (0, 0, 0, 0)),
            pl.BlockSpec((C, 1), lambda n: (0, 0)),
        ],
        out_specs=pl.BlockSpec((1, 2, 2, h_out, C, w_out),
                               lambda n: (n, 0, 0, 0, 0, 0)),
        compiler_params=pltpu.CompilerParams(
            dimension_semantics=("parallel",),
            vmem_limit_bytes=_VMEM_LIMIT),
    )(zt, wT, bias)


# ----------------------------- cheap JAX layout glue (NHWC) -----------------------------

def _space_to_depth_pad(x):
    """x (N,H,W,C) -> z (N,H/2+1,W/2+1,4C); z[n,a,b,(r,s,c)] = pad1(x)[n, 2a+r, 2b+s, c]."""
    N, H, W, C = x.shape
    xp = jnp.pad(x, ((0, 0), (1, 1), (1, 1), (0, 0)))
    z = xp.reshape(N, H // 2 + 1, 2, W // 2 + 1, 2, C)
    z = jnp.transpose(z, (0, 1, 3, 2, 4, 5))
    return z.reshape(N, H // 2 + 1, W // 2 + 1, 4 * C)


def _interleave_phases(y):
    """(N, 4, H, W, C) per-phase (p = 2r+s) activations -> (N, 2H, 2W, C)."""
    N, _, H, W, C = y.shape
    y = y.reshape(N, 2, 2, H, W, C)
    y = jnp.transpose(y, (0, 3, 1, 4, 2, 5))       # (N, H, r, W, s, C)
    return y.reshape(N, 2 * H, 2 * W, C)


# ----------------------------- weight reshaping -----------------------------

def _enc_weight(w):
    """Conv2d weight (Cout, Cin, 4, 4) -> (1 phase, 4 taps, 4*Cin, Cout) matching the
    space-to-depth layout: tap t = 2u+v, K rows ordered (r, s, ci)."""
    cout, cin = w.shape[0], w.shape[1]
    wk = jnp.transpose(w, (2, 3, 1, 0))            # (kh, kw, ci, co)
    wk = wk.reshape(2, 2, 2, 2, cin, cout)         # (u, r, v, s, ci, co); kh=2u+r, kw=2v+s
    wk = jnp.transpose(wk, (0, 2, 1, 3, 4, 5))     # (u, v, r, s, ci, co)
    return wk.reshape(1, 4, 4 * cin, cout).astype(jnp.bfloat16)


def _dec_weight(w):
    """ConvTranspose2d weight (Cin, Cout, 4, 4) -> (4 phases, 4 taps, Cin, Cout)."""
    mats = []
    for r in range(2):
        for s in range(2):
            taps = [w[:, :, kh, kw]
                    for (kh, _) in _PHASE_TAPS[r]
                    for (kw, _) in _PHASE_TAPS[s]]
            mats.append(jnp.stack(taps, axis=0))
    return jnp.stack(mats, axis=0).astype(jnp.bfloat16)


def _out_weight(w):
    """ConvTranspose2d weight -> (4, 4, Cout, Cin): per-tap transposed for the
    channel-major (lane-dense) output matmul."""
    return jnp.transpose(_dec_weight(w), (0, 1, 3, 2))


# ----------------------------- layers / forward -----------------------------

def _encoder_block(x, layer):
    N, H, W, _ = x.shape
    Ho, Wo = H // 2, W // 2
    z = _space_to_depth_pad(x)
    y, stats = _conv_taps_bn_stats(z, layer["w"], _ENC_OFFS, Ho, Wo)
    scale, shift = _bn_scale_shift(stats, layer["gamma"], layer["beta"], N * Ho * Wo)
    act = _bn_act(y, scale, shift, leaky_slope=_LEAKY)
    return act[:, 0]                               # (N, Ho, Wo, Cout)


def _decoder_block(x, layer):
    N, H, W, _ = x.shape
    zp = jnp.pad(x, ((0, 0), (1, 1), (1, 1), (0, 0)))
    y, stats = _conv_taps_bn_stats(zp, layer["w"], _DEC_OFFS, H, W)
    scale, shift = _bn_scale_shift(stats, layer["gamma"], layer["beta"], N * 4 * H * W)
    act = _bn_act(y, scale, shift, leaky_slope=None)
    # TODO(synk): have the BN/act kernel write the interleaved (N,2H,2W,C) layout directly
    # to remove this XLA transpose copy.
    return _interleave_phases(act)                 # (N, 2H, 2W, Cout)


def _output_block(x, layer):
    N, H, W, _ = x.shape
    zt = jnp.pad(jnp.transpose(x, (0, 1, 3, 2)), ((0, 0), (1, 1), (0, 0), (1, 1)))
    o = _convT_bias_tanh(zt, layer["w"], layer["b"], H, W)        # (N,2,2,H,C,W) f32
    C = layer["w"].shape[2]
    o = jnp.transpose(o, (0, 4, 3, 1, 5, 2))                      # (N, C, H, r, W, s)
    return o.reshape(N, C, 2 * H, 2 * W)                          # NCHW directly


def loom_generator_forward(params, x_nchw):
    h = jnp.transpose(x_nchw, (0, 2, 3, 1)).astype(jnp.bfloat16)  # NCHW -> NHWC once
    for layer in params["encoders"]:      # enc1..enc4 + bottleneck
        h = _encoder_block(h, layer)
    for layer in params["decoders"]:      # dec4..dec1
        h = _decoder_block(h, layer)
    return _output_block(h, params["output"])                     # (N, 3, H, W) NCHW


# ----------------------------- deterministic init -----------------------------

def init_params(key, input_channels=3, output_channels=3, features=4):
    """Deterministic synthetic weights, same shapes as the PyTorch module
    (with `features` shrunk for a small runnable example)."""
    keys = iter(jax.random.split(key, 64))

    def conv_layer(cin, cout):
        return {"w": 0.05 * jax.random.normal(next(keys), (cout, cin, _K, _K), jnp.float32),
                "b": 0.05 * jax.random.normal(next(keys), (cout,), jnp.float32),
                "gamma": 1.0 + 0.1 * jax.random.normal(next(keys), (cout,), jnp.float32),
                "beta": 0.1 * jax.random.normal(next(keys), (cout,), jnp.float32)}

    def convT_layer(cin, cout, with_bn=True):
        p = {"w": 0.05 * jax.random.normal(next(keys), (cin, cout, _K, _K), jnp.float32),
             "b": 0.05 * jax.random.normal(next(keys), (cout,), jnp.float32)}
        if with_bn:
            p["gamma"] = 1.0 + 0.1 * jax.random.normal(next(keys), (cout,), jnp.float32)
            p["beta"] = 0.1 * jax.random.normal(next(keys), (cout,), jnp.float32)
        return p

    f = features
    encoders = [conv_layer(input_channels, f), conv_layer(f, f * 2),
                conv_layer(f * 2, f * 4), conv_layer(f * 4, f * 8),
                conv_layer(f * 8, f * 16)]
    decoders = [convT_layer(f * 16, f * 8), convT_layer(f * 8, f * 4),
                convT_layer(f * 4, f * 2), convT_layer(f * 2, f)]
    output = convT_layer(f, output_channels, with_bn=False)
    return {"encoders": encoders, "decoders": decoders, "output": output}


def prepare_params(raw):
    """Reshape weights into per-phase / per-tap matmul form (bf16) once, up front.
    Conv/ConvT bias before BatchNorm cancels exactly in the normalization -> dropped."""
    def enc(p):
        return {"w": _enc_weight(p["w"]),
                "gamma": p["gamma"].astype(jnp.float32),
                "beta": p["beta"].astype(jnp.float32)}

    def dec(p):
        return {"w": _dec_weight(p["w"]),
                "gamma": p["gamma"].astype(jnp.float32),
                "beta": p["beta"].astype(jnp.float32)}

    out = {"w": _out_weight(raw["output"]["w"]),
           "b": raw["output"]["b"].reshape(-1, 1).astype(jnp.float32)}
    return {"encoders": [enc(p) for p in raw["encoders"]],
            "decoders": [dec(p) for p in raw["decoders"]],
            "output": out}


# ----------------------------- main -----------------------------

if __name__ == "__main__":
    key = jax.random.PRNGKey(0)
    kx, kp = jax.random.split(key)

    # Small shapes: batch=2, channels=3, spatial=32 (min size for 5 stride-2 stages).
    x = jax.random.normal(kx, (2, 3, 32, 32), jnp.float32)
    params = prepare_params(init_params(kp, input_channels=3, output_channels=3, features=4))

    fwd = jax.jit(loom_generator_forward)
    out = jax.block_until_ready(fwd(params, x))

    assert out.shape == (2, 3, 32, 32), out.shape
    assert bool(jnp.all(jnp.isfinite(out)))
    assert bool(jnp.all(jnp.abs(out) <= 1.0))   # tanh output range
    print("KERNEL_OK")
</pallas_src>

<mosaic_0001>
module attributes {stable_mosaic.version = 11 : i64} {
  func.func @_conv_tap_bn_stats_kernel(%arg0: i32, %arg1: memref<1x17x17x12xbf16, #tpu.memory_space<vmem>>, %arg2: memref<1x4x12x4xbf16, #tpu.memory_space<vmem>>, %arg3: memref<1x1x16x16x4xbf16, #tpu.memory_space<vmem>>, %arg4: memref<1x2x4xf32, #tpu.memory_space<vmem>>) attributes {dimension_semantics = [#tpu.dimension_semantics<parallel>], iteration_bounds = array<i64: 2>, scalar_prefetch = 0 : i64, scratch_operands = 0 : i64, tpu.core_type = #tpu.core_type<tc>, window_params = [{transform_indices = @transform_0, window_bounds = array<i64: 1, 17, 17, 12>}, {pipeline_mode = #tpu.pipeline_mode<synchronous>, transform_indices = @transform_1, window_bounds = array<i64: 1, 4, 12, 4>}, {transform_indices = @transform_2, window_bounds = array<i64: 1, 1, 16, 16, 4>}, {transform_indices = @transform_3, window_bounds = array<i64: 1, 2, 4>}]} {
    %cst = arith.constant 0.000000e+00 : f32
    %0 = vector.broadcast %cst : f32 to vector<1x4xf32>
    %cst_0 = arith.constant 0.000000e+00 : f32
    %1 = vector.broadcast %cst_0 : f32 to vector<1x4xf32>
    %c0_i32 = arith.constant 0 : i32
    %c16_i32 = arith.constant 16 : i32
    %2 = arith.addi %c0_i32, %c16_i32 : i32
    %c1_i32 = arith.constant 1 : i32
    %3:2 = scf.for %arg5 = %c0_i32 to %2 step %c1_i32 iter_args(%arg6 = %0, %arg7 = %1) -> (vector<1x4xf32>, vector<1x4xf32>)  : i32 {
      %cst_6 = arith.constant 0.000000e+00 : f32
      %10 = vector.broadcast %cst_6 : f32 to vector<16x4xf32>
      %c0_i32_7 = arith.constant 0 : i32
      %11 = arith.addi %arg5, %c0_i32_7 : i32
      %c0_8 = arith.constant 0 : index
      %12 = arith.index_cast %11 : i32 to index
      %c0_9 = arith.constant 0 : index
      %c0_10 = arith.constant 0 : index
      %13 = vector.load %arg1[%c0_8, %12, %c0_9, %c0_10] : memref<1x17x17x12xbf16, #tpu.memory_space<vmem>>, vector<1x1x16x12xbf16>
      %14 = vector.shape_cast %13 : vector<1x1x16x12xbf16> to vector<1x16x12xbf16>
      %15 = vector.shape_cast %14 : vector<1x16x12xbf16> to vector<16x12xbf16>
      %c0_11 = arith.constant 0 : index
      %c0_12 = arith.constant 0 : index
      %c0_13 = arith.constant 0 : index
      %c0_14 = arith.constant 0 : index
      %16 = vector.load %arg2[%c0_11, %c0_12, %c0_13, %c0_14] : memref<1x4x12x4xbf16, #tpu.memory_space<vmem>>, vector<1x1x12x4xbf16>
      %17 = vector.shape_cast %16 : vector<1x1x12x4xbf16> to vector<12x4xbf16>
      %cst_15 = arith.constant dense<0.000000e+00> : vector<16x4xf32>
      %18 = tpu.matmul %15, %17, %cst_15 {dimension_numbers = #tpu.dot_dimension_numbers<[1], [0], [0], [1], [0, 0, 1, 1], [], []>} : vector<16x12xbf16>, vector<12x4xbf16>, vector<16x4xf32> -> vector<16x4xf32>
      %19 = arith.addf %10, %18 : vector<16x4xf32>
      %c0_i32_16 = arith.constant 0 : i32
      %20 = arith.addi %arg5, %c0_i32_16 : i32
      %c0_17 = arith.constant 0 : index
      %21 = arith.index_cast %20 : i32 to index
      %c1_18 = arith.constant 1 : index
      %c0_19 = arith.constant 0 : index
      %22 = vector.load %arg1[%c0_17, %21, %c1_18, %c0_19] : memref<1x17x17x12xbf16, #tpu.memory_space<vmem>>, vector<1x1x16x12xbf16>
      %23 = vector.shape_cast %22 : vector<1x1x16x12xbf16> to vector<1x16x12xbf16>
      %24 = vector.shape_cast %23 : vector<1x16x12xbf16> to vector<16x12xbf16>
      %c0_20 = arith.constant 0 : index
      %c1_21 = arith.constant 1 : index
      %c0_22 = arith.constant 0 : index
      %c0_23 = arith.constant 0 : index
      %25 = vector.load %arg2[%c0_20, %c1_21, %c0_22, %c0_23] : memref<1x4x12x4xbf16, #tpu.memory_space<vmem>>, vector<1x1x12x4xbf16>
      %26 = vector.shape_cast %25 : vector<1x1x12x4xbf16> to vector<12x4xbf16>
      %cst_24 = arith.constant dense<0.000000e+00> : vector<16x4xf32>
      %27 = tpu.matmul %24, %26, %cst_24 {dimension_numbers = #tpu.dot_dimension_numbers<[1], [0], [0], [1], [0, 0, 1, 1], [], []>} : vector<16x12xbf16>, vector<12x4xbf16>, vector<16x4xf32> -> vector<16x4xf32>
      %28 = arith.addf %19, %27 : vector<16x4xf32>
      %c1_i32_25 = arith.constant 1 : i32
      %29 = arith.addi %arg5, %c1_i32_25 : i32
      %c0_26 = arith.constant 0 : index
      %30 = arith.index_cast %29 : i32 to index
      %c0_27 = arith.constant 0 : index
      %c0_28 = arith.constant 0 : index
      %31 = vector.load %arg1[%c0_26, %30, %c0_27, %c0_28] : memref<1x17x17x12xbf16, #tpu.memory_space<vmem>>, vector<1x1x16x12xbf16>
      %32 = vector.shape_cast %31 : vector<1x1x16x12xbf16> to vector<1x16x12xbf16>
      %33 = vector.shape_cast %32 : vector<1x16x12xbf16> to vector<16x12xbf16>
      %c0_29 = arith.constant 0 : index
      %c2 = arith.constant 2 : index
      %c0_30 = arith.constant 0 : index
      %c0_31 = arith.constant 0 : index
      %34 = vector.load %arg2[%c0_29, %c2, %c0_30, %c0_31] : memref<1x4x12x4xbf16, #tpu.memory_space<vmem>>, vector<1x1x12x4xbf16>
      %35 = vector.shape_cast %34 : vector<1x1x12x4xbf16> to vector<12x4xbf16>
      %cst_32 = arith.constant dense<0.000000e+00> : vector<16x4xf32>
      %36 = tpu.matmul %33, %35, %cst_32 {dimension_numbers = #tpu.dot_dimension_numbers<[1], [0], [0], [1], [0, 0, 1, 1], [], []>} : vector<16x12xbf16>, vector<12x4xbf16>, vector<16x4xf32> -> vector<16x4xf32>
      %37 = arith.addf %28, %36 : vector<16x4xf32>
      %c1_i32_33 = arith.constant 1 : i32
      %38 = arith.addi %arg5, %c1_i32_33 : i32
      %c0_34 = arith.constant 0 : index
      %39 = arith.index_cast %38 : i32 to index
      %c1_35 = arith.constant 1 : index
      %c0_36 = arith.constant 0 : index
      %40 = vector.load %arg1[%c0_34, %39, %c1_35, %c0_36] : memref<1x17x17x12xbf16, #tpu.memory_space<vmem>>, vector<1x1x16x12xbf16>
      %41 = vector.shape_cast %40 : vector<1x1x16x12xbf16> to vector<1x16x12xbf16>
      %42 = vector.shape_cast %41 : vector<1x16x12xbf16> to vector<16x12xbf16>
      %c0_37 = arith.constant 0 : index
      %c3 = arith.constant 3 : index
      %c0_38 = arith.constant 0 : index
      %c0_39 = arith.constant 0 : index
      %43 = vector.load %arg2[%c0_37, %c3, %c0_38, %c0_39] : memref<1x4x12x4xbf16, #tpu.memory_space<vmem>>, vector<1x1x12x4xbf16>
      %44 = vector.shape_cast %43 : vector<1x1x12x4xbf16> to vector<12x4xbf16>
      %cst_40 = arith.constant dense<0.000000e+00> : vector<16x4xf32>
      %45 = tpu.matmul %42, %44, %cst_40 {dimension_numbers = #tpu.dot_dimension_numbers<[1], [0], [0], [1], [0, 0, 1, 1], [], []>} : vector<16x12xbf16>, vector<12x4xbf16>, vector<16x4xf32> -> vector<16x4xf32>
      %46 = arith.addf %37, %45 : vector<16x4xf32>
      %47 = vector.shape_cast %46 : vector<16x4xf32> to vector<1x16x4xf32>
      %48 = arith.truncf %47 : vector<1x16x4xf32> to vector<1x16x4xbf16>
      %c0_41 = arith.constant 0 : index
      %c0_42 = arith.constant 0 : index
      %49 = arith.index_cast %arg5 : i32 to index
      %c0_43 = arith.constant 0 : index
      %c0_44 = arith.constant 0 : index
      %50 = vector.load %arg3[%c0_41, %c0_42, %49, %c0_43, %c0_44] : memref<1x1x16x16x4xbf16, #tpu.memory_space<vmem>>, vector<1x1x1x16x4xbf16>
      %51 = vector.shape_cast %50 : vector<1x1x1x16x4xbf16> to vector<1x16x4xbf16>
      %52 = vector.shape_cast %48 : vector<1x16x4xbf16> to vector<1x1x1x16x4xbf16>
      tpu.vector_store %arg3[%c0_41, %c0_42, %49, %c0_43, %c0_44], %52 {strides = array<i32>} : memref<1x1x16x16x4xbf16, #tpu.memory_space<vmem>>, vector<1x1x1x16x4xbf16>,
      %cst_45 = arith.constant dense<0.000000e+00> : vector<4xf32>
      %53 = vector.multi_reduction <add>, %46, %cst_45 [0] : vector<16x4xf32> to vector<4xf32>
      %54 = vector.shape_cast %53 : vector<4xf32> to vector<1x4xf32>
      %55 = arith.addf %arg6, %54 : vector<1x4xf32>
      %56 = arith.mulf %46, %46 : vector<16x4xf32>
      %cst_46 = arith.constant dense<0.000000e+00> : vector<4xf32>
      %57 = vector.multi_reduction <add>, %56, %cst_46 [0] : vector<16x4xf32> to vector<4xf32>
      %58 = vector.shape_cast %57 : vector<4xf32> to vector<1x4xf32>
      %59 = arith.addf %arg7, %58 : vector<1x4xf32>
      scf.yield %55, %59 : vector<1x4xf32>, vector<1x4xf32>
    }
    %c16_i32_1 = arith.constant 16 : i32
    %c0 = arith.constant 0 : index
    %c0_2 = arith.constant 0 : index
    %c0_3 = arith.constant 0 : index
    %4 = vector.load %arg4[%c0, %c0_2, %c0_3] : memref<1x2x4xf32, #tpu.memory_space<vmem>>, vector<1x1x4xf32>
    %5 = vector.shape_cast %4 : vector<1x1x4xf32> to vector<1x4xf32>
    %6 = vector.shape_cast %3#0 : vector<1x4xf32> to vector<1x1x4xf32>
    tpu.vector_store %arg4[%c0, %c0_2, %c0_3], %6 {strides = array<i32>} : memref<1x2x4xf32, #tpu.memory_space<vmem>>, vector<1x1x4xf32>,
    %c0_4 = arith.constant 0 : index
    %c1 = arith.constant 1 : index
    %c0_5 = arith.constant 0 : index
    %7 = vector.load %arg4[%c0_4, %c1, %c0_5] : memref<1x2x4xf32, #tpu.memory_space<vmem>>, vector<1x1x4xf32>
    %8 = vector.shape_cast %7 : vector<1x1x4xf32> to vector<1x4xf32>
    %9 = vector.shape_cast %3#1 : vector<1x4xf32> to vector<1x1x4xf32>
    tpu.vector_store %arg4[%c0_4, %c1, %c0_5], %9 {strides = array<i32>} : memref<1x2x4xf32, #tpu.memory_space<vmem>>, vector<1x1x4xf32>,
    return
  }
  func.func @transform_0(%arg0: i32) -> (i32, i32, i32, i32) {
    %c0_i32 = arith.constant 0 : i32
    %c0_i32_0 = arith.constant 0 : i32
    %c0_i32_1 = arith.constant 0 : i32
    %c0_i32_2 = arith.constant 0 : i32
    return %arg0, %c0_i32, %c0_i32_0, %c0_i32_1 : i32, i32, i32, i32
  }
  func.func @transform_1(%arg0: i32) -> (i32, i32, i32, i32) {
    %c0_i32 = arith.constant 0 : i32
    %c0_i32_0 = arith.constant 0 : i32
    %c0_i32_1 = arith.constant 0 : i32
    %c0_i32_2 = arith.constant 0 : i32
    %c0_i32_3 = arith.constant 0 : i32
    return %c0_i32, %c0_i32_0, %c0_i32_1, %c0_i32_2 : i32, i32, i32, i32
  }
  func.func @transform_2(%arg0: i32) -> (i32, i32, i32, i32, i32) {
    %c0_i32 = arith.constant 0 : i32
    %c0_i32_0 = arith.constant 0 : i32
    %c0_i32_1 = arith.constant 0 : i32
    %c0_i32_2 = arith.constant 0 : i32
    %c0_i32_3 = arith.constant 0 : i32
    return %arg0, %c0_i32, %c0_i32_0, %c0_i32_1, %c0_i32_2 : i32, i32, i32, i32, i32
  }
  func.func @transform_3(%arg0: i32) -> (i32, i32, i32) {
    %c0_i32 = arith.constant 0 : i32
    %c0_i32_0 = arith.constant 0 : i32
    %c0_i32_1 = arith.constant 0 : i32
    return %arg0, %c0_i32, %c0_i32_0 : i32, i32, i32
  }
}

module attributes {stable_mosaic.version = 11 : i64} {
  func.func @_bn_act_kernel(%arg0: i32, %arg1: i32, %arg2: i32, %arg3: memref<1x1x16x16x4xbf16, #tpu.memory_space<vmem>>, %arg4: memref<1x4xf32, #tpu.memory_space<vmem>>, %arg5: memref<1x4xf32, #tpu.memory_space<vmem>>, %arg6: memref<1x1x16x16x4xbf16, #tpu.memory_space<vmem>>) attributes {dimension_semantics = [#tpu.dimension_semantics<parallel>, #tpu.dimension_semantics<parallel>, #tpu.dimension_semantics<parallel>], iteration_bounds = array<i64: 2, 1, 1>, scalar_prefetch = 0 : i64, scratch_operands = 0 : i64, tpu.core_type = #tpu.core_type<tc>, window_params = [{transform_indices = @transform_0, window_bounds = array<i64: 1, 1, 16, 16, 4>}, {pipeline_mode = #tpu.pipeline_mode<synchronous>, transform_indices = @transform_1, window_bounds = array<i64: 1, 4>}, {pipeline_mode = #tpu.pipeline_mode<synchronous>, transform_indices = @transform_2, window_bounds = array<i64: 1, 4>}, {transform_indices = @transform_3, window_bounds = array<i64: 1, 1, 16, 16, 4>}]} {
    %c0 = arith.constant 0 : index
    %c0_0 = arith.constant 0 : index
    %c0_1 = arith.constant 0 : index
    %c0_2 = arith.constant 0 : index
    %c0_3 = arith.constant 0 : index
    %0 = vector.load %arg3[%c0, %c0_0, %c0_1, %c0_2, %c0_3] : memref<1x1x16x16x4xbf16, #tpu.memory_space<vmem>>, vector<1x1x16x16x4xbf16>
    %1 = arith.extf %0 : vector<1x1x16x16x4xbf16> to vector<1x1x16x16x4xf32>
    %c0_4 = arith.constant 0 : index
    %c0_5 = arith.constant 0 : index
    %2 = vector.load %arg4[%c0_4, %c0_5] : memref<1x4xf32, #tpu.memory_space<vmem>>, vector<1x4xf32>
    %3 = vector.shape_cast %2 : vector<1x4xf32> to vector<1x1x1x1x4xf32>
    %4 = vector.broadcast %3 : vector<1x1x1x1x4xf32> to vector<1x1x16x16x4xf32>
    %5 = arith.mulf %1, %4 : vector<1x1x16x16x4xf32>
    %c0_6 = arith.constant 0 : index
    %c0_7 = arith.constant 0 : index
    %6 = vector.load %arg5[%c0_6, %c0_7] : memref<1x4xf32, #tpu.memory_space<vmem>>, vector<1x4xf32>
    %7 = vector.shape_cast %6 : vector<1x4xf32> to vector<1x1x1x1x4xf32>
    %8 = vector.broadcast %7 : vector<1x1x1x1x4xf32> to vector<1x1x16x16x4xf32>
    %9 = arith.addf %5, %8 : vector<1x1x16x16x4xf32>
    %cst = arith.constant 0.000000e+00 : f32
    %10 = vector.broadcast %cst : f32 to vector<1x1x16x16x4xf32>
    %11 = arith.cmpf oge, %9, %10 : vector<1x1x16x16x4xf32>
    %cst_8 = arith.constant 2.000000e-01 : f32
    %12 = vector.broadcast %cst_8 : f32 to vector<1x1x16x16x4xf32>
    %13 = arith.mulf %12, %9 : vector<1x1x16x16x4xf32>
    %14 = arith.select %11, %9, %13 : vector<1x1x16x16x4xi1>, vector<1x1x16x16x4xf32>
    %15 = arith.truncf %14 : vector<1x1x16x16x4xf32> to vector<1x1x16x16x4xbf16>
    %c0_9 = arith.constant 0 : index
    %c0_10 = arith.constant 0 : index
    %c0_11 = arith.constant 0 : index
    %c0_12 = arith.constant 0 : index
    %c0_13 = arith.constant 0 : index
    %16 = vector.load %arg6[%c0_9, %c0_10, %c0_11, %c0_12, %c0_13] : memref<1x1x16x16x4xbf16, #tpu.memory_space<vmem>>, vector<1x1x16x16x4xbf16>
    tpu.vector_store %arg6[%c0_9, %c0_10, %c0_11, %c0_12, %c0_13], %15 {strides = array<i32>} : memref<1x1x16x16x4xbf16, #tpu.memory_space<vmem>>, vector<1x1x16x16x4xbf16>,
    return
  }
  func.func @transform_0(%arg0: i32, %arg1: i32, %arg2: i32) -> (i32, i32, i32, i32, i32) {
    %c0_i32 = arith.constant 0 : i32
    %c0_i32_0 = arith.constant 0 : i32
    %c0_i32_1 = arith.constant 0 : i32
    return %arg0, %arg1, %arg2, %c0_i32, %c0_i32_0 : i32, i32, i32, i32, i32
  }
  func.func @transform_1(%arg0: i32, %arg1: i32, %arg2: i32) -> (i32, i32) {
    %c0_i32 = arith.constant 0 : i32
    %c0_i32_0 = arith.constant 0 : i32
    %c0_i32_1 = arith.constant 0 : i32
    return %c0_i32, %c0_i32_0 : i32, i32
  }
  func.func @transform_2(%arg0: i32, %arg1: i32, %arg2: i32) -> (i32, i32) {
    %c0_i32 = arith.constant 0 : i32
    %c0_i32_0 = arith.constant 0 : i32
    %c0_i32_1 = arith.constant 0 : i32
    return %c0_i32, %c0_i32_0 : i32, i32
  }
  func.func @transform_3(%arg0: i32, %arg1: i32, %arg2: i32) -> (i32, i32, i32, i32, i32) {
    %c0_i32 = arith.constant 0 : i32
    %c0_i32_0 = arith.constant 0 : i32
    %c0_i32_1 = arith.constant 0 : i32
    return %arg0, %arg1, %arg2, %c0_i32, %c0_i32_0 : i32, i32, i32, i32, i32
  }
}

module attributes {stable_mosaic.version = 11 : i64} {
  func.func @_conv_tap_bn_stats_kernel(%arg0: i32, %arg1: memref<1x9x9x16xbf16, #tpu.memory_space<vmem>>, %arg2: memref<1x4x16x8xbf16, #tpu.memory_space<vmem>>, %arg3: memref<1x1x8x8x8xbf16, #tpu.memory_space<vmem>>, %arg4: memref<1x2x8xf32, #tpu.memory_space<vmem>>) attributes {dimension_semantics = [#tpu.dimension_semantics<parallel>], iteration_bounds = array<i64: 2>, scalar_prefetch = 0 : i64, scratch_operands = 0 : i64, tpu.core_type = #tpu.core_type<tc>, window_params = [{transform_indices = @transform_0, window_bounds = array<i64: 1, 9, 9, 16>}, {pipeline_mode = #tpu.pipeline_mode<synchronous>, transform_indices = @transform_1, window_bounds = array<i64: 1, 4, 16, 8>}, {transform_indices = @transform_2, window_bounds = array<i64: 1, 1, 8, 8, 8>}, {transform_indices = @transform_3, window_bounds = array<i64: 1, 2, 8>}]} {
    %cst = arith.constant 0.000000e+00 : f32
    %0 = vector.broadcast %cst : f32 to vector<1x8xf32>
    %cst_0 = arith.constant 0.000000e+00 : f32
    %1 = vector.broadcast %cst_0 : f32 to vector<1x8xf32>
    %c0_i32 = arith.constant 0 : i32
    %c8_i32 = arith.constant 8 : i32
    %2 = arith.addi %c0_i32, %c8_i32 : i32
    %c1_i32 = arith.constant 1 : i32
    %3:2 = scf.for %arg5 = %c0_i32 to %2 step %c1_i32 iter_args(%arg6 = %0, %arg7 = %1) -> (vector<1x8xf32>, vector<1x8xf32>)  : i32 {
      %cst_6 = arith.constant 0.000000e+00 : f32
      %10 = vector.broadcast %cst_6 : f32 to vector<8x8xf32>
      %c0_i32_7 = arith.constant 0 : i32
      %11 = arith.addi %arg5, %c0_i32_7 : i32
      %c0_8 = arith.constant 0 : index
      %12 = arith.index_cast %11 : i32 to index
      %c0_9 = arith.constant 0 : index
      %c0_10 = arith.constant 0 : index
      %13 = vector.load %arg1[%c0_8, %12, %c0_9, %c0_10] : memref<1x9x9x16xbf16, #tpu.memory_space<vmem>>, vector<1x1x8x16xbf16>
      %14 = vector.shape_cast %13 : vector<1x1x8x16xbf16> to vector<1x8x16xbf16>
      %15 = vector.shape_cast %14 : vector<1x8x16xbf16> to vector<8x16xbf16>
      %c0_11 = arith.constant 0 : index
      %c0_12 = arith.constant 0 : index
      %c0_13 = arith.constant 0 : index
      %c0_14 = arith.constant 0 : index
      %16 = vector.load %arg2[%c0_11, %c0_12, %c0_13, %c0_14] : memref<1x4x16x8xbf16, #tpu.memory_space<vmem>>, vector<1x1x16x8xbf16>
      %17 = vector.shape_cast %16 : vector<1x1x16x8xbf16> to vector<16x8xbf16>
      %cst_15 = arith.constant dense<0.000000e+00> : vector<8x8xf32>
      %18 = tpu.matmul %15, %17, %cst_15 {dimension_numbers = #tpu.dot_dimension_numbers<[1], [0], [0], [1], [0, 0, 1, 1], [], []>} : vector<8x16xbf16>, vector<16x8xbf16>, vector<8x8xf32> -> vector<8x8xf32>
      %19 = arith.addf %10, %18 : vector<8x8xf32>
      %c0_i32_16 = arith.constant 0 : i32
      %20 = arith.addi %arg5, %c0_i32_16 : i32
      %c0_17 = arith.constant 0 : index
      %21 = arith.index_cast %20 : i32 to index
      %c1_18 = arith.constant 1 : index
      %c0_19 = arith.constant 0 : index
      %22 = vector.load %arg1[%c0_17, %21, %c1_18, %c0_19] : memref<1x9x9x16xbf16, #tpu.memory_space<vmem>>, vector<1x1x8x16xbf16>
      %23 = vector.shape_cast %22 : vector<1x1x8x16xbf16> to vector<1x8x16xbf16>
      %24 = vector.shape_cast %23 : vector<1x8x16xbf16> to vector<8x16xbf16>
      %c0_20 = arith.constant 0 : index
      %c1_21 = arith.constant 1 : index
      %c0_22 = arith.constant 0 : index
      %c0_23 = arith.constant 0 : index
      %25 = vector.load %arg2[%c0_20, %c1_21, %c0_22, %c0_23] : memref<1x4x16x8xbf16, #tpu.memory_space<vmem>>, vector<1x1x16x8xbf16>
      %26 = vector.shape_cast %25 : vector<1x1x16x8xbf16> to vector<16x8xbf16>
      %cst_24 = arith.constant dense<0.000000e+00> : vector<8x8xf32>
      %27 = tpu.matmul %24, %26, %cst_24 {dimension_numbers = #tpu.dot_dimension_numbers<[1], [0], [0], [1], [0, 0, 1, 1], [], []>} : vector<8x16xbf16>, vector<16x8xbf16>, vector<8x8xf32> -> vector<8x8xf32>
      %28 = arith.addf %19, %27 : vector<8x8xf32>
      %c1_i32_25 = arith.constant 1 : i32
      %29 = arith.addi %arg5, %c1_i32_25 : i32
      %c0_26 = arith.constant 0 : index
      %30 = arith.index_cast %29 : i32 to index
      %c0_27 = arith.constant 0 : index
      %c0_28 = arith.constant 0 : index
      %31 = vector.load %arg1[%c0_26, %30, %c0_27, %c0_28] : memref<1x9x9x16xbf16, #tpu.memory_space<vmem>>, vector<1x1x8x16xbf16>
      %32 = vector.shape_cast %31 : vector<1x1x8x16xbf16> to vector<1x8x16xbf16>
      %33 = vector.shape_cast %32 : vector<1x8x16xbf16> to vector<8x16xbf16>
      %c0_29 = arith.constant 0 : index
      %c2 = arith.constant 2 : index
      %c0_30 = arith.constant 0 : index
      %c0_31 = arith.constant 0 : index
      %34 = vector.load %arg2[%c0_29, %c2, %c0_30, %c0_31] : memref<1x4x16x8xbf16, #tpu.memory_space<vmem>>, vector<1x1x16x8xbf16>
      %35 = vector.shape_cast %34 : vector<1x1x16x8xbf16> to vector<16x8xbf16>
      %cst_32 = arith.constant dense<0.000000e+00> : vector<8x8xf32>
      %36 = tpu.matmul %33, %35, %cst_32 {dimension_numbers = #tpu.dot_dimension_numbers<[1], [0], [0], [1], [0, 0, 1, 1], [], []>} : vector<8x16xbf16>, vector<16x8xbf16>, vector<8x8xf32> -> vector<8x8xf32>
      %37 = arith.addf %28, %36 : vector<8x8xf32>
      %c1_i32_33 = arith.constant 1 : i32
      %38 = arith.addi %arg5, %c1_i32_33 : i32
      %c0_34 = arith.constant 0 : index
      %39 = arith.index_cast %38 : i32 to index
      %c1_35 = arith.constant 1 : index
      %c0_36 = arith.constant 0 : index
      %40 = vector.load %arg1[%c0_34, %39, %c1_35, %c0_36] : memref<1x9x9x16xbf16, #tpu.memory_space<vmem>>, vector<1x1x8x16xbf16>
      %41 = vector.shape_cast %40 : vector<1x1x8x16xbf16> to vector<1x8x16xbf16>
      %42 = vector.shape_cast %41 : vector<1x8x16xbf16> to vector<8x16xbf16>
      %c0_37 = arith.constant 0 : index
      %c3 = arith.constant 3 : index
      %c0_38 = arith.constant 0 : index
      %c0_39 = arith.constant 0 : index
      %43 = vector.load %arg2[%c0_37, %c3, %c0_38, %c0_39] : memref<1x4x16x8xbf16, #tpu.memory_space<vmem>>, vector<1x1x16x8xbf16>
      %44 = vector.shape_cast %43 : vector<1x1x16x8xbf16> to vector<16x8xbf16>
      %cst_40 = arith.constant dense<0.000000e+00> : vector<8x8xf32>
      %45 = tpu.matmul %42, %44, %cst_40 {dimension_numbers = #tpu.dot_dimension_numbers<[1], [0], [0], [1], [0, 0, 1, 1], [], []>} : vector<8x16xbf16>, vector<16x8xbf16>, vector<8x8xf32> -> vector<8x8xf32>
      %46 = arith.addf %37, %45 : vector<8x8xf32>
      %47 = vector.shape_cast %46 : vector<8x8xf32> to vector<1x8x8xf32>
      %48 = arith.truncf %47 : vector<1x8x8xf32> to vector<1x8x8xbf16>
      %c0_41 = arith.constant 0 : index
      %c0_42 = arith.constant 0 : index
      %49 = arith.index_cast %arg5 : i32 to index
      %c0_43 = arith.constant 0 : index
      %c0_44 = arith.constant 0 : index
      %50 = vector.load %arg3[%c0_41, %c0_42, %49, %c0_43, %c0_44] : memref<1x1x8x8x8xbf16, #tpu.memory_space<vmem>>, vector<1x1x1x8x8xbf16>
      %51 = vector.shape_cast %50 : vector<1x1x1x8x8xbf16> to vector<1x8x8xbf16>
      %52 = vector.shape_cast %48 : vector<1x8x8xbf16> to vector<1x1x1x8x8xbf16>
      tpu.vector_store %arg3[%c0_41, %c0_42, %49, %c0_43, %c0_44], %52 {strides = array<i32>} : memref<1x1x8x8x8xbf16, #tpu.memory_space<vmem>>, vector<1x1x1x8x8xbf16>,
      %cst_45 = arith.constant dense<0.000000e+00> : vector<8xf32>
      %53 = vector.multi_reduction <add>, %46, %cst_45 [0] : vector<8x8xf32> to vector<8xf32>
      %54 = vector.shape_cast %53 : vector<8xf32> to vector<1x8xf32>
      %55 = arith.addf %arg6, %54 : vector<1x8xf32>
      %56 = arith.mulf %46, %46 : vector<8x8xf32>
      %cst_46 = arith.constant dense<0.000000e+00> : vector<8xf32>
      %57 = vector.multi_reduction <add>, %56, %cst_46 [0] : vector<8x8xf32> to vector<8xf32>
      %58 = vector.shape_cast %57 : vector<8xf32> to vector<1x8xf32>
      %59 = arith.addf %arg7, %58 : vector<1x8xf32>
      scf.yield %55, %59 : vector<1x8xf32>, vector<1x8xf32>
    }
    %c8_i32_1 = arith.constant 8 : i32
    %c0 = arith.constant 0 : index
    %c0_2 = arith.constant 0 : index
    %c0_3 = arith.constant 0 : index
    %4 = vector.load %arg4[%c0, %c0_2, %c0_3] : memref<1x2x8xf32, #tpu.memory_space<vmem>>, vector<1x1x8xf32>
    %5 = vector.shape_cast %4 : vector<1x1x8xf32> to vector<1x8xf32>
    %6 = vector.shape_cast %3#0 : vector<1x8xf32> to vector<1x1x8xf32>
    tpu.vector_store %arg4[%c0, %c0_2, %c0_3], %6 {strides = array<i32>} : memref<1x2x8xf32, #tpu.memory_space<vmem>>, vector<1x1x8xf32>,
    %c0_4 = arith.constant 0 : index
    %c1 = arith.constant 1 : index
    %c0_5 = arith.constant 0 : index
    %7 = vector.load %arg4[%c0_4, %c1, %c0_5] : memref<1x2x8xf32, #tpu.memory_space<vmem>>, vector<1x1x8xf32>
    %8 = vector.shape_cast %7 : vector<1x1x8xf32> to vector<1x8xf32>
    %9 = vector.shape_cast %3#1 : vector<1x8xf32> to vector<1x1x8xf32>
    tpu.vector_store %arg4[%c0_4, %c1, %c0_5], %9 {strides = array<i32>} : memref<1x2x8xf32, #tpu.memory_space<vmem>>, vector<1x1x8xf32>,
    return
  }
  func.func @transform_0(%arg0: i32) -> (i32, i32, i32, i32) {
    %c0_i32 = arith.constant 0 : i32
    %c0_i32_0 = arith.constant 0 : i32
    %c0_i32_1 = arith.constant 0 : i32
    %c0_i32_2 = arith.constant 0 : i32
    return %arg0, %c0_i32, %c0_i32_0, %c0_i32_1 : i32, i32, i32, i32
  }
  func.func @transform_1(%arg0: i32) -> (i32, i32, i32, i32) {
    %c0_i32 = arith.constant 0 : i32
    %c0_i32_0 = arith.constant 0 : i32
    %c0_i32_1 = arith.constant 0 : i32
    %c0_i32_2 = arith.constant 0 : i32
    %c0_i32_3 = arith.constant 0 : i32
    return %c0_i32, %c0_i32_0, %c0_i32_1, %c0_i32_2 : i32, i32, i32, i32
  }
  func.func @transform_2(%arg0: i32) -> (i32, i32, i32, i32, i32) {
    %c0_i32 = arith.constant 0 : i32
    %c0_i32_0 = arith.constant 0 : i32
    %c0_i32_1 = arith.constant 0 : i32
    %c0_i32_2 = arith.constant 0 : i32
    %c0_i32_3 = arith.constant 0 : i32
    return %arg0, %c0_i32, %c0_i32_0, %c0_i32_1, %c0_i32_2 : i32, i32, i32, i32, i32
  }
  func.func @transform_3(%arg0: i32) -> (i32, i32, i32) {
    %c0_i32 = arith.constant 0 : i32
    %c0_i32_0 = arith.constant 0 : i32
    %c0_i32_1 = arith.constant 0 : i32
    return %arg0, %c0_i32, %c0_i32_0 : i32, i32, i32
  }
}

module attributes {stable_mosaic.version = 11 : i64} {
  func.func @_bn_act_kernel(%arg0: i32, %arg1: i32, %arg2: i32, %arg3: memref<1x1x8x8x8xbf16, #tpu.memory_space<vmem>>, %arg4: memref<1x8xf32, #tpu.memory_space<vmem>>, %arg5: memref<1x8xf32, #tpu.memory_space<vmem>>, %arg6: memref<1x1x8x8x8xbf16, #tpu.memory_space<vmem>>) attributes {dimension_semantics = [#tpu.dimension_semantics<parallel>, #tpu.dimension_semantics<parallel>, #tpu.dimension_semantics<parallel>], iteration_bounds = array<i64: 2, 1, 1>, scalar_prefetch = 0 : i64, scratch_operands = 0 : i64, tpu.core_type = #tpu.core_type<tc>, window_params = [{transform_indices = @transform_0, window_bounds = array<i64: 1, 1, 8, 8, 8>}, {pipeline_mode = #tpu.pipeline_mode<synchronous>, transform_indices = @transform_1, window_bounds = array<i64: 1, 8>}, {pipeline_mode = #tpu.pipeline_mode<synchronous>, transform_indices = @transform_2, window_bounds = array<i64: 1, 8>}, {transform_indices = @transform_3, window_bounds = array<i64: 1, 1, 8, 8, 8>}]} {
    %c0 = arith.constant 0 : index
    %c0_0 = arith.constant 0 : index
    %c0_1 = arith.constant 0 : index
    %c0_2 = arith.constant 0 : index
    %c0_3 = arith.constant 0 : index
    %0 = vector.load %arg3[%c0, %c0_0, %c0_1, %c0_2, %c0_3] : memref<1x1x8x8x8xbf16, #tpu.memory_space<vmem>>, vector<1x1x8x8x8xbf16>
    %1 = arith.extf %0 : vector<1x1x8x8x8xbf16> to vector<1x1x8x8x8xf32>
    %c0_4 = arith.constant 0 : index
    %c0_5 = arith.constant 0 : index
    %2 = vector.load %arg4[%c0_4, %c0_5] : memref<1x8xf32, #tpu.memory_space<vmem>>, vector<1x8xf32>
    %3 = vector.shape_cast %2 : vector<1x8xf32> to vector<1x1x1x1x8xf32>
    %4 = vector.broadcast %3 : vector<1x1x1x1x8xf32> to vector<1x1x8x8x8xf32>
    %5 = arith.mulf %1, %4 : vector<1x1x8x8x8xf32>
    %c0_6 = arith.constant 0 : index
    %c0_7 = arith.constant 0 : index
    %6 = vector.load %arg5[%c0_6, %c0_7] : memref<1x8xf32, #tpu.memory_space<vmem>>, vector<1x8xf32>
    %7 = vector.shape_cast %6 : vector<1x8xf32> to vector<1x1x1x1x8xf32>
    %8 = vector.broadcast %7 : vector<1x1x1x1x8xf32> to vector<1x1x8x8x8xf32>
    %9 = arith.addf %5, %8 : vector<1x1x8x8x8xf32>
    %cst = arith.constant 0.000000e+00 : f32
    %10 = vector.broadcast %cst : f32 to vector<1x1x8x8x8xf32>
    %11 = arith.cmpf oge, %9, %10 : vector<1x1x8x8x8xf32>
    %cst_8 = arith.constant 2.000000e-01 : f32
    %12 = vector.broadcast %cst_8 : f32 to vector<1x1x8x8x8xf32>
    %13 = arith.mulf %12, %9 : vector<1x1x8x8x8xf32>
    %14 = arith.select %11, %9, %13 : vector<1x1x8x8x8xi1>, vector<1x1x8x8x8xf32>
    %15 = arith.truncf %14 : vector<1x1x8x8x8xf32> to vector<1x1x8x8x8xbf16>
    %c0_9 = arith.constant 0 : index
    %c0_10 = arith.constant 0 : index
    %c0_11 = arith.constant 0 : index
    %c0_12 = arith.constant 0 : index
    %c0_13 = arith.constant 0 : index
    %16 = vector.load %arg6[%c0_9, %c0_10, %c0_11, %c0_12, %c0_13] : memref<1x1x8x8x8xbf16, #tpu.memory_space<vmem>>, vector<1x1x8x8x8xbf16>
    tpu.vector_store %arg6[%c0_9, %c0_10, %c0_11, %c0_12, %c0_13], %15 {strides = array<i32>} : memref<1x1x8x8x8xbf16, #tpu.memory_space<vmem>>, vector<1x1x8x8x8xbf16>,
    return
  }
  func.func @transform_0(%arg0: i32, %arg1: i32, %arg2: i32) -> (i32, i32, i32, i32, i32) {
    %c0_i32 = arith.constant 0 : i32
    %c0_i32_0 = arith.constant 0 : i32
    %c0_i32_1 = arith.constant 0 : i32
    return %arg0, %arg1, %arg2, %c0_i32, %c0_i32_0 : i32, i32, i32, i32, i32
  }
  func.func @transform_1(%arg0: i32, %arg1: i32, %arg2: i32) -> (i32, i32) {
    %c0_i32 = arith.constant 0 : i32
    %c0_i32_0 = arith.constant 0 : i32
    %c0_i32_1 = arith.constant 0 : i32
    return %c0_i32, %c0_i32_0 : i32, i32
  }
  func.func @transform_2(%arg0: i32, %arg1: i32, %arg2: i32) -> (i32, i32) {
    %c0_i32 = arith.constant 0 : i32
    %c0_i32_0 = arith.constant 0 : i32
    %c0_i32_1 = arith.constant 0 : i32
    return %c0_i32, %c0_i32_0 : i32, i32
  }
  func.func @transform_3(%arg0: i32, %arg1: i32, %arg2: i32) -> (i32, i32, i32, i32, i32) {
    %c0_i32 = arith.constant 0 : i32
    %c0_i32_0 = arith.constant 0 : i32
    %c0_i32_1 = arith.constant 0 : i32
    return %arg0, %arg1, %arg2, %c0_i32, %c0_i32_0 : i32, i32, i32, i32, i32
  }
}

module attributes {stable_mosaic.version = 11 : i64} {
  func.func @_conv_tap_bn_stats_kernel(%arg0: i32, %arg1: memref<1x5x5x32xbf16, #tpu.memory_space<vmem>>, %arg2: memref<1x4x32x16xbf16, #tpu.memory_space<vmem>>, %arg3: memref<1x1x4x4x16xbf16, #tpu.memory_space<vmem>>, %arg4: memref<1x2x16xf32, #tpu.memory_space<vmem>>) attributes {dimension_semantics = [#tpu.dimension_semantics<parallel>], iteration_bounds = array<i64: 2>, scalar_prefetch = 0 : i64, scratch_operands = 0 : i64, tpu.core_type = #tpu.core_type<tc>, window_params = [{transform_indices = @transform_0, window_bounds = array<i64: 1, 5, 5, 32>}, {pipeline_mode = #tpu.pipeline_mode<synchronous>, transform_indices = @transform_1, window_bounds = array<i64: 1, 4, 32, 16>}, {transform_indices = @transform_2, window_bounds = array<i64: 1, 1, 4, 4, 16>}, {transform_indices = @transform_3, window_bounds = array<i64: 1, 2, 16>}]} {
    %cst = arith.constant 0.000000e+00 : f32
    %0 = vector.broadcast %cst : f32 to vector<1x16xf32>
    %cst_0 = arith.constant 0.000000e+00 : f32
    %1 = vector.broadcast %cst_0 : f32 to vector<1x16xf32>
    %c0_i32 = arith.constant 0 : i32
    %c4_i32 = arith.constant 4 : i32
    %2 = arith.addi %c0_i32, %c4_i32 : i32
    %c1_i32 = arith.constant 1 : i32
    %3:2 = scf.for %arg5 = %c0_i32 to %2 step %c1_i32 iter_args(%arg6 = %0, %arg7 = %1) -> (vector<1x16xf32>, vector<1x16xf32>)  : i32 {
      %cst_6 = arith.constant 0.000000e+00 : f32
      %10 = vector.broadcast %cst_6 : f32 to vector<4x16xf32>
      %c0_i32_7 = arith.constant 0 : i32
      %11 = arith.addi %arg5, %c0_i32_7 : i32
      %c0_8 = arith.constant 0 : index
      %12 = arith.index_cast %11 : i32 to index
      %c0_9 = arith.constant 0 : index
      %c0_10 = arith.constant 0 : index
      %13 = vector.load %arg1[%c0_8, %12, %c0_9, %c0_10] : memref<1x5x5x32xbf16, #tpu.memory_space<vmem>>, vector<1x1x4x32xbf16>
      %14 = vector.shape_cast %13 : vector<1x1x4x32xbf16> to vector<1x4x32xbf16>
      %15 = vector.shape_cast %14 : vector<1x4x32xbf16> to vector<4x32xbf16>
      %c0_11 = arith.constant 0 : index
      %c0_12 = arith.constant 0 : index
      %c0_13 = arith.constant 0 : index
      %c0_14 = arith.constant 0 : index
      %16 = vector.load %arg2[%c0_11, %c0_12, %c0_13, %c0_14] : memref<1x4x32x16xbf16, #tpu.memory_space<vmem>>, vector<1x1x32x16xbf16>
      %17 = vector.shape_cast %16 : vector<1x1x32x16xbf16> to vector<32x16xbf16>
      %cst_15 = arith.constant dense<0.000000e+00> : vector<4x16xf32>
      %18 = tpu.matmul %15, %17, %cst_15 {dimension_numbers = #tpu.dot_dimension_numbers<[1], [0], [0], [1], [0, 0, 1, 1], [], []>} : vector<4x32xbf16>, vector<32x16xbf16>, vector<4x16xf32> -> vector<4x16xf32>
      %19 = arith.addf %10, %18 : vector<4x16xf32>
      %c0_i32_16 = arith.constant 0 : i32
      %20 = arith.addi %arg5, %c0_i32_16 : i32
      %c0_17 = arith.constant 0 : index
      %21 = arith.index_cast %20 : i32 to index
      %c1_18 = arith.constant 1 : index
      %c0_19 = arith.constant 0 : index
      %22 = vector.load %arg1[%c0_17, %21, %c1_18, %c0_19] : memref<1x5x5x32xbf16, #tpu.memory_space<vmem>>, vector<1x1x4x32xbf16>
      %23 = vector.shape_cast %22 : vector<1x1x4x32xbf16> to vector<1x4x32xbf16>
      %24 = vector.shape_cast %23 : vector<1x4x32xbf16> to vector<4x32xbf16>
      %c0_20 = arith.constant 0 : index
      %c1_21 = arith.constant 1 : index
      %c0_22 = arith.constant 0 : index
      %c0_23 = arith.constant 0 : index
      %25 = vector.load %arg2[%c0_20, %c1_21, %c0_22, %c0_23] : memref<1x4x32x16xbf16, #tpu.memory_space<vmem>>, vector<1x1x32x16xbf16>
      %26 = vector.shape_cast %25 : vector<1x1x32x16xbf16> to vector<32x16xbf16>
      %cst_24 = arith.constant dense<0.000000e+00> : vector<4x16xf32>
      %27 = tpu.matmul %24, %26, %cst_24 {dimension_numbers = #tpu.dot_dimension_numbers<[1], [0], [0], [1], [0, 0, 1, 1], [], []>} : vector<4x32xbf16>, vector<32x16xbf16>, vector<4x16xf32> -> vector<4x16xf32>
      %28 = arith.addf %19, %27 : vector<4x16xf32>
      %c1_i32_25 = arith.constant 1 : i32
      %29 = arith.addi %arg5, %c1_i32_25 : i32
      %c0_26 = arith.constant 0 : index
      %30 = arith.index_cast %29 : i32 to index
      %c0_27 = arith.constant 0 : index
      %c0_28 = arith.constant 0 : index
      %31 = vector.load %arg1[%c0_26, %30, %c0_27, %c0_28] : memref<1x5x5x32xbf16, #tpu.memory_space<vmem>>, vector<1x1x4x32xbf16>
      %32 = vector.shape_cast %31 : vector<1x1x4x32xbf16> to vector<1x4x32xbf16>
      %33 = vector.shape_cast %32 : vector<1x4x32xbf16> to vector<4x32xbf16>
      %c0_29 = arith.constant 0 : index
      %c2 = arith.constant 2 : index
      %c0_30 = arith.constant 0 : index
      %c0_31 = arith.constant 0 : index
      %34 = vector.load %arg2[%c0_29, %c2, %c0_30, %c0_31] : memref<1x4x32x16xbf16, #tpu.memory_space<vmem>>, vector<1x1x32x16xbf16>
      %35 = vector.shape_cast %34 : vector<1x1x32x16xbf16> to vector<32x16xbf16>
      %cst_32 = arith.constant dense<0.000000e+00> : vector<4x16xf32>
      %36 = tpu.matmul %33, %35, %cst_32 {dimension_numbers = #tpu.dot_dimension_numbers<[1], [0], [0], [1], [0, 0, 1, 1], [], []>} : vector<4x32xbf16>, vector<32x16xbf16>, vector<4x16xf32> -> vector<4x16xf32>
      %37 = arith.addf %28, %36 : vector<4x16xf32>
      %c1_i32_33 = arith.constant 1 : i32
      %38 = arith.addi %arg5, %c1_i32_33 : i32
      %c0_34 = arith.constant 0 : index
      %39 = arith.index_cast %38 : i32 to index
      %c1_35 = arith.constant 1 : index
      %c0_36 = arith.constant 0 : index
      %40 = vector.load %arg1[%c0_34, %39, %c1_35, %c0_36] : memref<1x5x5x32xbf16, #tpu.memory_space<vmem>>, vector<1x1x4x32xbf16>
      %41 = vector.shape_cast %40 : vector<1x1x4x32xbf16> to vector<1x4x32xbf16>
      %42 = vector.shape_cast %41 : vector<1x4x32xbf16> to vector<4x32xbf16>
      %c0_37 = arith.constant 0 : index
      %c3 = arith.constant 3 : index
      %c0_38 = arith.constant 0 : index
      %c0_39 = arith.constant 0 : index
      %43 = vector.load %arg2[%c0_37, %c3, %c0_38, %c0_39] : memref<1x4x32x16xbf16, #tpu.memory_space<vmem>>, vector<1x1x32x16xbf16>
      %44 = vector.shape_cast %43 : vector<1x1x32x16xbf16> to vector<32x16xbf16>
      %cst_40 = arith.constant dense<0.000000e+00> : vector<4x16xf32>
      %45 = tpu.matmul %42, %44, %cst_40 {dimension_numbers = #tpu.dot_dimension_numbers<[1], [0], [0], [1], [0, 0, 1, 1], [], []>} : vector<4x32xbf16>, vector<32x16xbf16>, vector<4x16xf32> -> vector<4x16xf32>
      %46 = arith.addf %37, %45 : vector<4x16xf32>
      %47 = vector.shape_cast %46 : vector<4x16xf32> to vector<1x4x16xf32>
      %48 = arith.truncf %47 : vector<1x4x16xf32> to vector<1x4x16xbf16>
      %c0_41 = arith.constant 0 : index
      %c0_42 = arith.constant 0 : index
      %49 = arith.index_cast %arg5 : i32 to index
      %c0_43 = arith.constant 0 : index
      %c0_44 = arith.constant 0 : index
      %50 = vector.load %arg3[%c0_41, %c0_42, %49, %c0_43, %c0_44] : memref<1x1x4x4x16xbf16, #tpu.memory_space<vmem>>, vector<1x1x1x4x16xbf16>
      %51 = vector.shape_cast %50 : vector<1x1x1x4x16xbf16> to vector<1x4x16xbf16>
      %52 = vector.shape_cast %48 : vector<1x4x16xbf16> to vector<1x1x1x4x16xbf16>
      tpu.vector_store %arg3[%c0_41, %c0_42, %49, %c0_43, %c0_44], %52 {strides = array<i32>} : memref<1x1x4x4x16xbf16, #tpu.memory_space<vmem>>, vector<1x1x1x4x16xbf16>,
      %cst_45 = arith.constant dense<0.000000e+00> : vector<16xf32>
      %53 = vector.multi_reduction <add>, %46, %cst_45 [0] : vector<4x16xf32> to vector<16xf32>
      %54 = vector.shape_cast %53 : vector<16xf32> to vector<1x16xf32>
      %55 = arith.addf %arg6, %54 : vector<1x16xf32>
      %56 = arith.mulf %46, %46 : vector<4x16xf32>
      %cst_46 = arith.constant dense<0.000000e+00> : vector<16xf32>
      %57 = vector.multi_reduction <add>, %56, %cst_46 [0] : vector<4x16xf32> to vector<16xf32>
      %58 = vector.shape_cast %57 : vector<16xf32> to vector<1x16xf32>
      %59 = arith.addf %arg7, %58 : vector<1x16xf32>
      scf.yield %55, %59 : vector<1x16xf32>, vector<1x16xf32>
    }
    %c4_i32_1 = arith.constant 4 : i32
    %c0 = arith.constant 0 : index
    %c0_2 = arith.constant 0 : index
    %c0_3 = arith.constant 0 : index
    %4 = vector.load %arg4[%c0, %c0_2, %c0_3] : memref<1x2x16xf32, #tpu.memory_space<vmem>>, vector<1x1x16xf32>
    %5 = vector.shape_cast %4 : vector<1x1x16xf32> to vector<1x16xf32>
    %6 = vector.shape_cast %3#0 : vector<1x16xf32> to vector<1x1x16xf32>
    tpu.vector_store %arg4[%c0, %c0_2, %c0_3], %6 {strides = array<i32>} : memref<1x2x16xf32, #tpu.memory_space<vmem>>, vector<1x1x16xf32>,
    %c0_4 = arith.constant 0 : index
    %c1 = arith.constant 1 : index
    %c0_5 = arith.constant 0 : index
    %7 = vector.load %arg4[%c0_4, %c1, %c0_5] : memref<1x2x16xf32, #tpu.memory_space<vmem>>, vector<1x1x16xf32>
    %8 = vector.shape_cast %7 : vector<1x1x16xf32> to vector<1x16xf32>
    %9 = vector.shape_cast %3#1 : vector<1x16xf32> to vector<1x1x16xf32>
    tpu.vector_store %arg4[%c0_4, %c1, %c0_5], %9 {strides = array<i32>} : memref<1x2x16xf32, #tpu.memory_space<vmem>>, vector<1x1x16xf32>,
    return
  }
  func.func @transform_0(%arg0: i32) -> (i32, i32, i32, i32) {
    %c0_i32 = arith.constant 0 : i32
    %c0_i32_0 = arith.constant 0 : i32
    %c0_i32_1 = arith.constant 0 : i32
    %c0_i32_2 = arith.constant 0 : i32
    return %arg0, %c0_i32, %c0_i32_0, %c0_i32_1 : i32, i32, i32, i32
  }
  func.func @transform_1(%arg0: i32) -> (i32, i32, i32, i32) {
    %c0_i32 = arith.constant 0 : i32
    %c0_i32_0 = arith.constant 0 : i32
    %c0_i32_1 = arith.constant 0 : i32
    %c0_i32_2 = arith.constant 0 : i32
    %c0_i32_3 = arith.constant 0 : i32
    return %c0_i32, %c0_i32_0, %c0_i32_1, %c0_i32_2 : i32, i32, i32, i32
  }
  func.func @transform_2(%arg0: i32) -> (i32, i32, i32, i32, i32) {
    %c0_i32 = arith.constant 0 : i32
    %c0_i32_0 = arith.constant 0 : i32
    %c0_i32_1 = arith.constant 0 : i32
    %c0_i32_2 = arith.constant 0 : i32
    %c0_i32_3 = arith.constant 0 : i32
    return %arg0, %c0_i32, %c0_i32_0, %c0_i32_1, %c0_i32_2 : i32, i32, i32, i32, i32
  }
  func.func @transform_3(%arg0: i32) -> (i32, i32, i32) {
    %c0_i32 = arith.constant 0 : i32
    %c0_i32_0 = arith.constant 0 : i32
    %c0_i32_1 = arith.constant 0 : i32
    return %arg0, %c0_i32, %c0_i32_0 : i32, i32, i32
  }
}

module attributes {stable_mosaic.version = 11 : i64} {
  func.func @_bn_act_kernel(%arg0: i32, %arg1: i32, %arg2: i32, %arg3: memref<1x1x4x4x16xbf16, #tpu.memory_space<vmem>>, %arg4: memref<1x16xf32, #tpu.memory_space<vmem>>, %arg5: memref<1x16xf32, #tpu.memory_space<vmem>>, %arg6: memref<1x1x4x4x16xbf16, #tpu.memory_space<vmem>>) attributes {dimension_semantics = [#tpu.dimension_semantics<parallel>, #tpu.dimension_semantics<parallel>, #tpu.dimension_semantics<parallel>], iteration_bounds = array<i64: 2, 1, 1>, scalar_prefetch = 0 : i64, scratch_operands = 0 : i64, tpu.core_type = #tpu.core_type<tc>, window_params = [{transform_indices = @transform_0, window_bounds = array<i64: 1, 1, 4, 4, 16>}, {pipeline_mode = #tpu.pipeline_mode<synchronous>, transform_indices = @transform_1, window_bounds = array<i64: 1, 16>}, {pipeline_mode = #tpu.pipeline_mode<synchronous>, transform_indices = @transform_2, window_bounds = array<i64: 1, 16>}, {transform_indices = @transform_3, window_bounds = array<i64: 1, 1, 4, 4, 16>}]} {
    %c0 = arith.constant 0 : index
    %c0_0 = arith.constant 0 : index
    %c0_1 = arith.constant 0 : index
    %c0_2 = arith.constant 0 : index
    %c0_3 = arith.constant 0 : index
    %0 = vector.load %arg3[%c0, %c0_0, %c0_1, %c0_2, %c0_3] : memref<1x1x4x4x16xbf16, #tpu.memory_space<vmem>>, vector<1x1x4x4x16xbf16>
    %1 = arith.extf %0 : vector<1x1x4x4x16xbf16> to vector<1x1x4x4x16xf32>
    %c0_4 = arith.constant 0 : index
    %c0_5 = arith.constant 0 : index
    %2 = vector.load %arg4[%c0_4, %c0_5] : memref<1x16xf32, #tpu.memory_space<vmem>>, vector<1x16xf32>
    %3 = vector.shape_cast %2 : vector<1x16xf32> to vector<1x1x1x1x16xf32>
    %4 = vector.broadcast %3 : vector<1x1x1x1x16xf32> to vector<1x1x4x4x16xf32>
    %5 = arith.mulf %1, %4 : vector<1x1x4x4x16xf32>
    %c0_6 = arith.constant 0 : index
    %c0_7 = arith.constant 0 : index
    %6 = vector.load %arg5[%c0_6, %c0_7] : memref<1x16xf32, #tpu.memory_space<vmem>>, vector<1x16xf32>
    %7 = vector.shape_cast %6 : vector<1x16xf32> to vector<1x1x1x1x16xf32>
    %8 = vector.broadcast %7 : vector<1x1x1x1x16xf32> to vector<1x1x4x4x16xf32>
    %9 = arith.addf %5, %8 : vector<1x1x4x4x16xf32>
    %cst = arith.constant 0.000000e+00 : f32
    %10 = vector.broadcast %cst : f32 to vector<1x1x4x4x16xf32>
    %11 = arith.cmpf oge, %9, %10 : vector<1x1x4x4x16xf32>
    %cst_8 = arith.constant 2.000000e-01 : f32
    %12 = vector.broadcast %cst_8 : f32 to vector<1x1x4x4x16xf32>
    %13 = arith.mulf %12, %9 : vector<1x1x4x4x16xf32>
    %14 = arith.select %11, %9, %13 : vector<1x1x4x4x16xi1>, vector<1x1x4x4x16xf32>
    %15 = arith.truncf %14 : vector<1x1x4x4x16xf32> to vector<1x1x4x4x16xbf16>
    %c0_9 = arith.constant 0 : index
    %c0_10 = arith.constant 0 : index
    %c0_11 = arith.constant 0 : index
    %c0_12 = arith.constant 0 : index
    %c0_13 = arith.constant 0 : index
    %16 = vector.load %arg6[%c0_9, %c0_10, %c0_11, %c0_12, %c0_13] : memref<1x1x4x4x16xbf16, #tpu.memory_space<vmem>>, vector<1x1x4x4x16xbf16>
    tpu.vector_store %arg6[%c0_9, %c0_10, %c0_11, %c0_12, %c0_13], %15 {strides = array<i32>} : memref<1x1x4x4x16xbf16, #tpu.memory_space<vmem>>, vector<1x1x4x4x16xbf16>,
    return
  }
  func.func @transform_0(%arg0: i32, %arg1: i32, %arg2: i32) -> (i32, i32, i32, i32, i32) {
    %c0_i32 = arith.constant 0 : i32
    %c0_i32_0 = arith.constant 0 : i32
    %c0_i32_1 = arith.constant 0 : i32
    return %arg0, %arg1, %arg2, %c0_i32, %c0_i32_0 : i32, i32, i32, i32, i32
  }
  func.func @transform_1(%arg0: i32, %arg1: i32, %arg2: i32) -> (i32, i32) {
    %c0_i32 = arith.constant 0 : i32
    %c0_i32_0 = arith.constant 0 : i32
    %c0_i32_1 = arith.constant 0 : i32
    return %c0_i32, %c0_i32_0 : i32, i32
  }
  func.func @transform_2(%arg0: i32, %arg1: i32, %arg2: i32) -> (i32, i32) {
    %c0_i32 = arith.constant 0 : i32
    %c0_i32_0 = arith.constant 0 : i32
    %c0_i32_1 = arith.constant 0 : i32
    return %c0_i32, %c0_i32_0 : i32, i32
  }
  func.func @transform_3(%arg0: i32, %arg1: i32, %arg2: i32) -> (i32, i32, i32, i32, i32) {
    %c0_i32 = arith.constant 0 : i32
    %c0_i32_0 = arith.constant 0 : i32
    %c0_i32_1 = arith.constant 0 : i32
    return %arg0, %arg1, %arg2, %c0_i32, %c0_i32_0 : i32, i32, i32, i32, i32
  }
}

module attributes {stable_mosaic.version = 11 : i64} {
  func.func @_conv_tap_bn_stats_kernel(%arg0: i32, %arg1: memref<1x3x3x64xbf16, #tpu.memory_space<vmem>>, %arg2: memref<1x4x64x32xbf16, #tpu.memory_space<vmem>>, %arg3: memref<1x1x2x2x32xbf16, #tpu.memory_space<vmem>>, %arg4: memref<1x2x32xf32, #tpu.memory_space<vmem>>) attributes {dimension_semantics = [#tpu.dimension_semantics<parallel>], iteration_bounds = array<i64: 2>, scalar_prefetch = 0 : i64, scratch_operands = 0 : i64, tpu.core_type = #tpu.core_type<tc>, window_params = [{transform_indices = @transform_0, window_bounds = array<i64: 1, 3, 3, 64>}, {pipeline_mode = #tpu.pipeline_mode<synchronous>, transform_indices = @transform_1, window_bounds = array<i64: 1, 4, 64, 32>}, {transform_indices = @transform_2, window_bounds = array<i64: 1, 1, 2, 2, 32>}, {transform_indices = @transform_3, window_bounds = array<i64: 1, 2, 32>}]} {
    %cst = arith.constant 0.000000e+00 : f32
    %0 = vector.broadcast %cst : f32 to vector<1x32xf32>
    %cst_0 = arith.constant 0.000000e+00 : f32
    %1 = vector.broadcast %cst_0 : f32 to vector<1x32xf32>
    %c0_i32 = arith.constant 0 : i32
    %c2_i32 = arith.constant 2 : i32
    %2 = arith.addi %c0_i32, %c2_i32 : i32
    %c1_i32 = arith.constant 1 : i32
    %3:2 = scf.for %arg5 = %c0_i32 to %2 step %c1_i32 iter_args(%arg6 = %0, %arg7 = %1) -> (vector<1x32xf32>, vector<1x32xf32>)  : i32 {
      %cst_6 = arith.constant 0.000000e+00 : f32
      %10 = vector.broadcast %cst_6 : f32 to vector<2x32xf32>
      %c0_i32_7 = arith.constant 0 : i32
      %11 = arith.addi %arg5, %c0_i32_7 : i32
      %c0_8 = arith.constant 0 : index
      %12 = arith.index_cast %11 : i32 to index
      %c0_9 = arith.constant 0 : index
      %c0_10 = arith.constant 0 : index
      %13 = vector.load %arg1[%c0_8, %12, %c0_9, %c0_10] : memref<1x3x3x64xbf16, #tpu.memory_space<vmem>>, vector<1x1x2x64xbf16>
      %14 = vector.shape_cast %13 : vector<1x1x2x64xbf16> to vector<1x2x64xbf16>
      %15 = vector.shape_cast %14 : vector<1x2x64xbf16> to vector<2x64xbf16>
      %c0_11 = arith.constant 0 : index
      %c0_12 = arith.constant 0 : index
      %c0_13 = arith.constant 0 : index
      %c0_14 = arith.constant 0 : index
      %16 = vector.load %arg2[%c0_11, %c0_12, %c0_13, %c0_14] : memref<1x4x64x32xbf16, #tpu.memory_space<vmem>>, vector<1x1x64x32xbf16>
      %17 = vector.shape_cast %16 : vector<1x1x64x32xbf16> to vector<64x32xbf16>
      %cst_15 = arith.constant dense<0.000000e+00> : vector<2x32xf32>
      %18 = tpu.matmul %15, %17, %cst_15 {dimension_numbers = #tpu.dot_dimension_numbers<[1], [0], [0], [1], [0, 0, 1, 1], [], []>} : vector<2x64xbf16>, vector<64x32xbf16>, vector<2x32xf32> -> vector<2x32xf32>
      %19 = arith.addf %10, %18 : vector<2x32xf32>
      %c0_i32_16 = arith.constant 0 : i32
      %20 = arith.addi %arg5, %c0_i32_16 : i32
      %c0_17 = arith.constant 0 : index
      %21 = arith.index_cast %20 : i32 to index
      %c1_18 = arith.constant 1 : index
      %c0_19 = arith.constant 0 : index
      %22 = vector.load %arg1[%c0_17, %21, %c1_18, %c0_19] : memref<1x3x3x64xbf16, #tpu.memory_space<vmem>>, vector<1x1x2x64xbf16>
      %23 = vector.shape_cast %22 : vector<1x1x2x64xbf16> to vector<1x2x64xbf16>
      %24 = vector.shape_cast %23 : vector<1x2x64xbf16> to vector<2x64xbf16>
      %c0_20 = arith.constant 0 : index
      %c1_21 = arith.constant 1 : index
      %c0_22 = arith.constant 0 : index
      %c0_23 = arith.constant 0 : index
      %25 = vector.load %arg2[%c0_20, %c1_21, %c0_22, %c0_23] : memref<1x4x64x32xbf16, #tpu.memory_space<vmem>>, vector<1x1x64x32xbf16>
      %26 = vector.shape_cast %25 : vector<1x1x64x32xbf16> to vector<64x32xbf16>
      %cst_24 = arith.constant dense<0.000000e+00> : vector<2x32xf32>
      %27 = tpu.matmul %24, %26, %cst_24 {dimension_numbers = #tpu.dot_dimension_numbers<[1], [0], [0], [1], [0, 0, 1, 1], [], []>} : vector<2x64xbf16>, vector<64x32xbf16>, vector<2x32xf32> -> vector<2x32xf32>
      %28 = arith.addf %19, %27 : vector<2x32xf32>
      %c1_i32_25 = arith.constant 1 : i32
      %29 = arith.addi %arg5, %c1_i32_25 : i32
      %c0_26 = arith.constant 0 : index
      %30 = arith.index_cast %29 : i32 to index
      %c0_27 = arith.constant 0 : index
      %c0_28 = arith.constant 0 : index
      %31 = vector.load %arg1[%c0_26, %30, %c0_27, %c0_28] : memref<1x3x3x64xbf16, #tpu.memory_space<vmem>>, vector<1x1x2x64xbf16>
      %32 = vector.shape_cast %31 : vector<1x1x2x64xbf16> to vector<1x2x64xbf16>
      %33 = vector.shape_cast %32 : vector<1x2x64xbf16> to vector<2x64xbf16>
      %c0_29 = arith.constant 0 : index
      %c2 = arith.constant 2 : index
      %c0_30 = arith.constant 0 : index
      %c0_31 = arith.constant 0 : index
      %34 = vector.load %arg2[%c0_29, %c2, %c0_30, %c0_31] : memref<1x4x64x32xbf16, #tpu.memory_space<vmem>>, vector<1x1x64x32xbf16>
      %35 = vector.shape_cast %34 : vector<1x1x64x32xbf16> to vector<64x32xbf16>
      %cst_32 = arith.constant dense<0.000000e+00> : vector<2x32xf32>
      %36 = tpu.matmul %33, %35, %cst_32 {dimension_numbers = #tpu.dot_dimension_numbers<[1], [0], [0], [1], [0, 0, 1, 1], [], []>} : vector<2x64xbf16>, vector<64x32xbf16>, vector<2x32xf32> -> vector<2x32xf32>
      %37 = arith.addf %28, %36 : vector<2x32xf32>
      %c1_i32_33 = arith.constant 1 : i32
      %38 = arith.addi %arg5, %c1_i32_33 : i32
      %c0_34 = arith.constant 0 : index
      %39 = arith.index_cast %38 : i32 to index
      %c1_35 = arith.constant 1 : index
      %c0_36 = arith.constant 0 : index
      %40 = vector.load %arg1[%c0_34, %39, %c1_35, %c0_36] : memref<1x3x3x64xbf16, #tpu.memory_space<vmem>>, vector<1x1x2x64xbf16>
      %41 = vector.shape_cast %40 : vector<1x1x2x64xbf16> to vector<1x2x64xbf16>
      %42 = vector.shape_cast %41 : vector<1x2x64xbf16> to vector<2x64xbf16>
      %c0_37 = arith.constant 0 : index
      %c3 = arith.constant 3 : index
      %c0_38 = arith.constant 0 : index
      %c0_39 = arith.constant 0 : index
      %43 = vector.load %arg2[%c0_37, %c3, %c0_38, %c0_39] : memref<1x4x64x32xbf16, #tpu.memory_space<vmem>>, vector<1x1x64x32xbf16>
      %44 = vector.shape_cast %43 : vector<1x1x64x32xbf16> to vector<64x32xbf16>
      %cst_40 = arith.constant dense<0.000000e+00> : vector<2x32xf32>
      %45 = tpu.matmul %42, %44, %cst_40 {dimension_numbers = #tpu.dot_dimension_numbers<[1], [0], [0], [1], [0, 0, 1, 1], [], []>} : vector<2x64xbf16>, vector<64x32xbf16>, vector<2x32xf32> -> vector<2x32xf32>
      %46 = arith.addf %37, %45 : vector<2x32xf32>
      %47 = vector.shape_cast %46 : vector<2x32xf32> to vector<1x2x32xf32>
      %48 = arith.truncf %47 : vector<1x2x32xf32> to vector<1x2x32xbf16>
      %c0_41 = arith.constant 0 : index
      %c0_42 = arith.constant 0 : index
      %49 = arith.index_cast %arg5 : i32 to index
      %c0_43 = arith.constant 0 : index
      %c0_44 = arith.constant 0 : index
      %50 = vector.load %arg3[%c0_41, %c0_42, %49, %c0_43, %c0_44] : memref<1x1x2x2x32xbf16, #tpu.memory_space<vmem>>, vector<1x1x1x2x32xbf16>
      %51 = vector.shape_cast %50 : vector<1x1x1x2x32xbf16> to vector<1x2x32xbf16>
      %52 = vector.shape_cast %48 : vector<1x2x32xbf16> to vector<1x1x1x2x32xbf16>
      tpu.vector_store %arg3[%c0_41, %c0_42, %49, %c0_43, %c0_44], %52 {strides = array<i32>} : memref<1x1x2x2x32xbf16, #tpu.memory_space<vmem>>, vector<1x1x1x2x32xbf16>,
      %cst_45 = arith.constant dense<0.000000e+00> : vector<32xf32>
      %53 = vector.multi_reduction <add>, %46, %cst_45 [0] : vector<2x32xf32> to vector<32xf32>
      %54 = vector.shape_cast %53 : vector<32xf32> to vector<1x32xf32>
      %55 = arith.addf %arg6, %54 : vector<1x32xf32>
      %56 = arith.mulf %46, %46 : vector<2x32xf32>
      %cst_46 = arith.constant dense<0.000000e+00> : vector<32xf32>
      %57 = vector.multi_reduction <add>, %56, %cst_46 [0] : vector<2x32xf32> to vector<32xf32>
      %58 = vector.shape_cast %57 : vector<32xf32> to vector<1x32xf32>
      %59 = arith.addf %arg7, %58 : vector<1x32xf32>
      scf.yield %55, %59 : vector<1x32xf32>, vector<1x32xf32>
    }
    %c2_i32_1 = arith.constant 2 : i32
    %c0 = arith.constant 0 : index
    %c0_2 = arith.constant 0 : index
    %c0_3 = arith.constant 0 : index
    %4 = vector.load %arg4[%c0, %c0_2, %c0_3] : memref<1x2x32xf32, #tpu.memory_space<vmem>>, vector<1x1x32xf32>
    %5 = vector.shape_cast %4 : vector<1x1x32xf32> to vector<1x32xf32>
    %6 = vector.shape_cast %3#0 : vector<1x32xf32> to vector<1x1x32xf32>
    tpu.vector_store %arg4[%c0, %c0_2, %c0_3], %6 {strides = array<i32>} : memref<1x2x32xf32, #tpu.memory_space<vmem>>, vector<1x1x32xf32>,
    %c0_4 = arith.constant 0 : index
    %c1 = arith.constant 1 : index
    %c0_5 = arith.constant 0 : index
    %7 = vector.load %arg4[%c0_4, %c1, %c0_5] : memref<1x2x32xf32, #tpu.memory_space<vmem>>, vector<1x1x32xf32>
    %8 = vector.shape_cast %7 : vector<1x1x32xf32> to vector<1x32xf32>
    %9 = vector.shape_cast %3#1 : vector<1x32xf32> to vector<1x1x32xf32>
    tpu.vector_store %arg4[%c0_4, %c1, %c0_5], %9 {strides = array<i32>} : memref<1x2x32xf32, #tpu.memory_space<vmem>>, vector<1x1x32xf32>,
    return
  }
  func.func @transform_0(%arg0: i32) -> (i32, i32, i32, i32) {
    %c0_i32 = arith.constant 0 : i32
    %c0_i32_0 = arith.constant 0 : i32
    %c0_i32_1 = arith.constant 0 : i32
    %c0_i32_2 = arith.constant 0 : i32
    return %arg0, %c0_i32, %c0_i32_0, %c0_i32_1 : i32, i32, i32, i32
  }
  func.func @transform_1(%arg0: i32) -> (i32, i32, i32, i32) {
    %c0_i32 = arith.constant 0 : i32
    %c0_i32_0 = arith.constant 0 : i32
    %c0_i32_1 = arith.constant 0 : i32
    %c0_i32_2 = arith.constant 0 : i32
    %c0_i32_3 = arith.constant 0 : i32
    return %c0_i32, %c0_i32_0, %c0_i32_1, %c0_i32_2 : i32, i32, i32, i32
  }
  func.func @transform_2(%arg0: i32) -> (i32, i32, i32, i32, i32) {
    %c0_i32 = arith.constant 0 : i32
    %c0_i32_0 = arith.constant 0 : i32
    %c0_i32_1 = arith.constant 0 : i32
    %c0_i32_2 = arith.constant 0 : i32
    %c0_i32_3 = arith.constant 0 : i32
    return %arg0, %c0_i32, %c0_i32_0, %c0_i32_1, %c0_i32_2 : i32, i32, i32, i32, i32
  }
  func.func @transform_3(%arg0: i32) -> (i32, i32, i32) {
    %c0_i32 = arith.constant 0 : i32
    %c0_i32_0 = arith.constant 0 : i32
    %c0_i32_1 = arith.constant 0 : i32
    return %arg0, %c0_i32, %c0_i32_0 : i32, i32, i32
  }
}

module attributes {stable_mosaic.version = 11 : i64} {
  func.func @_bn_act_kernel(%arg0: i32, %arg1: i32, %arg2: i32, %arg3: memref<1x1x2x2x32xbf16, #tpu.memory_space<vmem>>, %arg4: memref<1x32xf32, #tpu.memory_space<vmem>>, %arg5: memref<1x32xf32, #tpu.memory_space<vmem>>, %arg6: memref<1x1x2x2x32xbf16, #tpu.memory_space<vmem>>) attributes {dimension_semantics = [#tpu.dimension_semantics<parallel>, #tpu.dimension_semantics<parallel>, #tpu.dimension_semantics<parallel>], iteration_bounds = array<i64: 2, 1, 1>, scalar_prefetch = 0 : i64, scratch_operands = 0 : i64, tpu.core_type = #tpu.core_type<tc>, window_params = [{transform_indices = @transform_0, window_bounds = array<i64: 1, 1, 2, 2, 32>}, {pipeline_mode = #tpu.pipeline_mode<synchronous>, transform_indices = @transform_1, window_bounds = array<i64: 1, 32>}, {pipeline_mode = #tpu.pipeline_mode<synchronous>, transform_indices = @transform_2, window_bounds = array<i64: 1, 32>}, {transform_indices = @transform_3, window_bounds = array<i64: 1, 1, 2, 2, 32>}]} {
    %c0 = arith.constant 0 : index
    %c0_0 = arith.constant 0 : index
    %c0_1 = arith.constant 0 : index
    %c0_2 = arith.constant 0 : index
    %c0_3 = arith.constant 0 : index
    %0 = vector.load %arg3[%c0, %c0_0, %c0_1, %c0_2, %c0_3] : memref<1x1x2x2x32xbf16, #tpu.memory_space<vmem>>, vector<1x1x2x2x32xbf16>
    %1 = arith.extf %0 : vector<1x1x2x2x32xbf16> to vector<1x1x2x2x32xf32>
    %c0_4 = arith.constant 0 : index
    %c0_5 = arith.constant 0 : index
    %2 = vector.load %arg4[%c0_4, %c0_5] : memref<1x32xf32, #tpu.memory_space<vmem>>, vector<1x32xf32>
    %3 = vector.shape_cast %2 : vector<1x32xf32> to vector<1x1x1x1x32xf32>
    %4 = vector.broadcast %3 : vector<1x1x1x1x32xf32> to vector<1x1x2x2x32xf32>
    %5 = arith.mulf %1, %4 : vector<1x1x2x2x32xf32>
    %c0_6 = arith.constant 0 : index
    %c0_7 = arith.constant 0 : index
    %6 = vector.load %arg5[%c0_6, %c0_7] : memref<1x32xf32, #tpu.memory_space<vmem>>, vector<1x32xf32>
    %7 = vector.shape_cast %6 : vector<1x32xf32> to vector<1x1x1x1x32xf32>
    %8 = vector.broadcast %7 : vector<1x1x1x1x32xf32> to vector<1x1x2x2x32xf32>
    %9 = arith.addf %5, %8 : vector<1x1x2x2x32xf32>
    %cst = arith.constant 0.000000e+00 : f32
    %10 = vector.broadcast %cst : f32 to vector<1x1x2x2x32xf32>
    %11 = arith.cmpf oge, %9, %10 : vector<1x1x2x2x32xf32>
    %cst_8 = arith.constant 2.000000e-01 : f32
    %12 = vector.broadcast %cst_8 : f32 to vector<1x1x2x2x32xf32>
    %13 = arith.mulf %12, %9 : vector<1x1x2x2x32xf32>
    %14 = arith.select %11, %9, %13 : vector<1x1x2x2x32xi1>, vector<1x1x2x2x32xf32>
    %15 = arith.truncf %14 : vector<1x1x2x2x32xf32> to vector<1x1x2x2x32xbf16>
    %c0_9 = arith.constant 0 : index
    %c0_10 = arith.constant 0 : index
    %c0_11 = arith.constant 0 : index
    %c0_12 = arith.constant 0 : index
    %c0_13 = arith.constant 0 : index
    %16 = vector.load %arg6[%c0_9, %c0_10, %c0_11, %c0_12, %c0_13] : memref<1x1x2x2x32xbf16, #tpu.memory_space<vmem>>, vector<1x1x2x2x32xbf16>
    tpu.vector_store %arg6[%c0_9, %c0_10, %c0_11, %c0_12, %c0_13], %15 {strides = array<i32>} : memref<1x1x2x2x32xbf16, #tpu.memory_space<vmem>>, vector<1x1x2x2x32xbf16>,
    return
  }
  func.func @transform_0(%arg0: i32, %arg1: i32, %arg2: i32) -> (i32, i32, i32, i32, i32) {
    %c0_i32 = arith.constant 0 : i32
    %c0_i32_0 = arith.constant 0 : i32
    %c0_i32_1 = arith.constant 0 : i32
    return %arg0, %arg1, %arg2, %c0_i32, %c0_i32_0 : i32, i32, i32, i32, i32
  }
  func.func @transform_1(%arg0: i32, %arg1: i32, %arg2: i32) -> (i32, i32) {
    %c0_i32 = arith.constant 0 : i32
    %c0_i32_0 = arith.constant 0 : i32
    %c0_i32_1 = arith.constant 0 : i32
    return %c0_i32, %c0_i32_0 : i32, i32
  }
  func.func @transform_2(%arg0: i32, %arg1: i32, %arg2: i32) -> (i32, i32) {
    %c0_i32 = arith.constant 0 : i32
    %c0_i32_0 = arith.constant 0 : i32
    %c0_i32_1 = arith.constant 0 : i32
    return %c0_i32, %c0_i32_0 : i32, i32
  }
  func.func @transform_3(%arg0: i32, %arg1: i32, %arg2: i32) -> (i32, i32, i32, i32, i32) {
    %c0_i32 = arith.constant 0 : i32
    %c0_i32_0 = arith.constant 0 : i32
    %c0_i32_1 = arith.constant 0 : i32
    return %arg0, %arg1, %arg2, %c0_i32, %c0_i32_0 : i32, i32, i32, i32, i32
  }
}

module attributes {stable_mosaic.version = 11 : i64} {
  func.func @_conv_tap_bn_stats_kernel(%arg0: i32, %arg1: memref<1x2x2x128xbf16, #tpu.memory_space<vmem>>, %arg2: memref<1x4x128x64xbf16, #tpu.memory_space<vmem>>, %arg3: memref<1x1x1x1x64xbf16, #tpu.memory_space<vmem>>, %arg4: memref<1x2x64xf32, #tpu.memory_space<vmem>>) attributes {dimension_semantics = [#tpu.dimension_semantics<parallel>], iteration_bounds = array<i64: 2>, scalar_prefetch = 0 : i64, scratch_operands = 0 : i64, tpu.core_type = #tpu.core_type<tc>, window_params = [{transform_indices = @transform_0, window_bounds = array<i64: 1, 2, 2, 128>}, {pipeline_mode = #tpu.pipeline_mode<synchronous>, transform_indices = @transform_1, window_bounds = array<i64: 1, 4, 128, 64>}, {transform_indices = @transform_2, window_bounds = array<i64: 1, 1, 1, 1, 64>}, {transform_indices = @transform_3, window_bounds = array<i64: 1, 2, 64>}]} {
    %cst = arith.constant 0.000000e+00 : f32
    %0 = vector.broadcast %cst : f32 to vector<1x64xf32>
    %cst_0 = arith.constant 0.000000e+00 : f32
    %1 = vector.broadcast %cst_0 : f32 to vector<1x64xf32>
    %c0_i32 = arith.constant 0 : i32
    %cst_1 = arith.constant 0.000000e+00 : f32
    %2 = vector.broadcast %cst_1 : f32 to vector<1x64xf32>
    %c0_i32_2 = arith.constant 0 : i32
    %3 = arith.addi %c0_i32, %c0_i32_2 : i32
    %c0 = arith.constant 0 : index
    %4 = arith.index_cast %3 : i32 to index
    %c0_3 = arith.constant 0 : index
    %c0_4 = arith.constant 0 : index
    %5 = vector.load %arg1[%c0, %4, %c0_3, %c0_4] : memref<1x2x2x128xbf16, #tpu.memory_space<vmem>>, vector<1x1x1x128xbf16>
    %6 = vector.shape_cast %5 : vector<1x1x1x128xbf16> to vector<1x1x128xbf16>
    %7 = vector.shape_cast %6 : vector<1x1x128xbf16> to vector<1x128xbf16>
    %c0_5 = arith.constant 0 : index
    %c0_6 = arith.constant 0 : index
    %c0_7 = arith.constant 0 : index
    %c0_8 = arith.constant 0 : index
    %8 = vector.load %arg2[%c0_5, %c0_6, %c0_7, %c0_8] : memref<1x4x128x64xbf16, #tpu.memory_space<vmem>>, vector<1x1x128x64xbf16>
    %9 = vector.shape_cast %8 : vector<1x1x128x64xbf16> to vector<128x64xbf16>
    %cst_9 = arith.constant dense<0.000000e+00> : vector<1x64xf32>
    %10 = tpu.matmul %7, %9, %cst_9 {dimension_numbers = #tpu.dot_dimension_numbers<[1], [0], [0], [1], [0, 0, 1, 1], [], []>} : vector<1x128xbf16>, vector<128x64xbf16>, vector<1x64xf32> -> vector<1x64xf32>
    %11 = arith.addf %2, %10 : vector<1x64xf32>
    %c0_i32_10 = arith.constant 0 : i32
    %12 = arith.addi %c0_i32, %c0_i32_10 : i32
    %c0_11 = arith.constant 0 : index
    %13 = arith.index_cast %12 : i32 to index
    %c1 = arith.constant 1 : index
    %c0_12 = arith.constant 0 : index
    %14 = vector.load %arg1[%c0_11, %13, %c1, %c0_12] : memref<1x2x2x128xbf16, #tpu.memory_space<vmem>>, vector<1x1x1x128xbf16>
    %15 = vector.shape_cast %14 : vector<1x1x1x128xbf16> to vector<1x1x128xbf16>
    %16 = vector.shape_cast %15 : vector<1x1x128xbf16> to vector<1x128xbf16>
    %c0_13 = arith.constant 0 : index
    %c1_14 = arith.constant 1 : index
    %c0_15 = arith.constant 0 : index
    %c0_16 = arith.constant 0 : index
    %17 = vector.load %arg2[%c0_13, %c1_14, %c0_15, %c0_16] : memref<1x4x128x64xbf16, #tpu.memory_space<vmem>>, vector<1x1x128x64xbf16>
    %18 = vector.shape_cast %17 : vector<1x1x128x64xbf16> to vector<128x64xbf16>
    %cst_17 = arith.constant dense<0.000000e+00> : vector<1x64xf32>
    %19 = tpu.matmul %16, %18, %cst_17 {dimension_numbers = #tpu.dot_dimension_numbers<[1], [0], [0], [1], [0, 0, 1, 1], [], []>} : vector<1x128xbf16>, vector<128x64xbf16>, vector<1x64xf32> -> vector<1x64xf32>
    %20 = arith.addf %11, %19 : vector<1x64xf32>
    %c1_i32 = arith.constant 1 : i32
    %21 = arith.addi %c0_i32, %c1_i32 : i32
    %c0_18 = arith.constant 0 : index
    %22 = arith.index_cast %21 : i32 to index
    %c0_19 = arith.constant 0 : index
    %c0_20 = arith.constant 0 : index
    %23 = vector.load %arg1[%c0_18, %22, %c0_19, %c0_20] : memref<1x2x2x128xbf16, #tpu.memory_space<vmem>>, vector<1x1x1x128xbf16>
    %24 = vector.shape_cast %23 : vector<1x1x1x128xbf16> to vector<1x1x128xbf16>
    %25 = vector.shape_cast %24 : vector<1x1x128xbf16> to vector<1x128xbf16>
    %c0_21 = arith.constant 0 : index
    %c2 = arith.constant 2 : index
    %c0_22 = arith.constant 0 : index
    %c0_23 = arith.constant 0 : index
    %26 = vector.load %arg2[%c0_21, %c2, %c0_22, %c0_23] : memref<1x4x128x64xbf16, #tpu.memory_space<vmem>>, vector<1x1x128x64xbf16>
    %27 = vector.shape_cast %26 : vector<1x1x128x64xbf16> to vector<128x64xbf16>
    %cst_24 = arith.constant dense<0.000000e+00> : vector<1x64xf32>
    %28 = tpu.matmul %25, %27, %cst_24 {dimension_numbers = #tpu.dot_dimension_numbers<[1], [0], [0], [1], [0, 0, 1, 1], [], []>} : vector<1x128xbf16>, vector<128x64xbf16>, vector<1x64xf32> -> vector<1x64xf32>
    %29 = arith.addf %20, %28 : vector<1x64xf32>
    %c1_i32_25 = arith.constant 1 : i32
    %30 = arith.addi %c0_i32, %c1_i32_25 : i32
    %c0_26 = arith.constant 0 : index
    %31 = arith.index_cast %30 : i32 to index
    %c1_27 = arith.constant 1 : index
    %c0_28 = arith.constant 0 : index
    %32 = vector.load %arg1[%c0_26, %31, %c1_27, %c0_28] : memref<1x2x2x128xbf16, #tpu.memory_space<vmem>>, vector<1x1x1x128xbf16>
    %33 = vector.shape_cast %32 : vector<1x1x1x128xbf16> to vector<1x1x128xbf16>
    %34 = vector.shape_cast %33 : vector<1x1x128xbf16> to vector<1x128xbf16>
    %c0_29 = arith.constant 0 : index
    %c3 = arith.constant 3 : index
    %c0_30 = arith.constant 0 : index
    %c0_31 = arith.constant 0 : index
    %35 = vector.load %arg2[%c0_29, %c3, %c0_30, %c0_31] : memref<1x4x128x64xbf16, #tpu.memory_space<vmem>>, vector<1x1x128x64xbf16>
    %36 = vector.shape_cast %35 : vector<1x1x128x64xbf16> to vector<128x64xbf16>
    %cst_32 = arith.constant dense<0.000000e+00> : vector<1x64xf32>
    %37 = tpu.matmul %34, %36, %cst_32 {dimension_numbers = #tpu.dot_dimension_numbers<[1], [0], [0], [1], [0, 0, 1, 1], [], []>} : vector<1x128xbf16>, vector<128x64xbf16>, vector<1x64xf32> -> vector<1x64xf32>
    %38 = arith.addf %29, %37 : vector<1x64xf32>
    %39 = vector.shape_cast %38 : vector<1x64xf32> to vector<1x1x64xf32>
    %40 = arith.truncf %39 : vector<1x1x64xf32> to vector<1x1x64xbf16>
    %c0_33 = arith.constant 0 : index
    %c0_34 = arith.constant 0 : index
    %41 = arith.index_cast %c0_i32 : i32 to index
    %c0_35 = arith.constant 0 : index
    %c0_36 = arith.constant 0 : index
    %42 = vector.load %arg3[%c0_33, %c0_34, %41, %c0_35, %c0_36] : memref<1x1x1x1x64xbf16, #tpu.memory_space<vmem>>, vector<1x1x1x1x64xbf16>
    %43 = vector.shape_cast %42 : vector<1x1x1x1x64xbf16> to vector<1x1x64xbf16>
    %44 = vector.shape_cast %40 : vector<1x1x64xbf16> to vector<1x1x1x1x64xbf16>
    tpu.vector_store %arg3[%c0_33, %c0_34, %41, %c0_35, %c0_36], %44 {strides = array<i32>} : memref<1x1x1x1x64xbf16, #tpu.memory_space<vmem>>, vector<1x1x1x1x64xbf16>,
    %cst_37 = arith.constant dense<0.000000e+00> : vector<64xf32>
    %45 = vector.multi_reduction <add>, %38, %cst_37 [0] : vector<1x64xf32> to vector<64xf32>
    %46 = vector.shape_cast %45 : vector<64xf32> to vector<1x64xf32>
    %47 = arith.addf %0, %46 : vector<1x64xf32>
    %48 = arith.mulf %38, %38 : vector<1x64xf32>
    %cst_38 = arith.constant dense<0.000000e+00> : vector<64xf32>
    %49 = vector.multi_reduction <add>, %48, %cst_38 [0] : vector<1x64xf32> to vector<64xf32>
    %50 = vector.shape_cast %49 : vector<64xf32> to vector<1x64xf32>
    %51 = arith.addf %1, %50 : vector<1x64xf32>
    %c1_i32_39 = arith.constant 1 : i32
    %c0_40 = arith.constant 0 : index
    %c0_41 = arith.constant 0 : index
    %c0_42 = arith.constant 0 : index
    %52 = vector.load %arg4[%c0_40, %c0_41, %c0_42] : memref<1x2x64xf32, #tpu.memory_space<vmem>>, vector<1x1x64xf32>
    %53 = vector.shape_cast %52 : vector<1x1x64xf32> to vector<1x64xf32>
    %54 = vector.shape_cast %47 : vector<1x64xf32> to vector<1x1x64xf32>
    tpu.vector_store %arg4[%c0_40, %c0_41, %c0_42], %54 {strides = array<i32>} : memref<1x2x64xf32, #tpu.memory_space<vmem>>, vector<1x1x64xf32>,
    %c0_43 = arith.constant 0 : index
    %c1_44 = arith.constant 1 : index
    %c0_45 = arith.constant 0 : index
    %55 = vector.load %arg4[%c0_43, %c1_44, %c0_45] : memref<1x2x64xf32, #tpu.memory_space<vmem>>, vector<1x1x64xf32>
    %56 = vector.shape_cast %55 : vector<1x1x64xf32> to vector<1x64xf32>
    %57 = vector.shape_cast %51 : vector<1x64xf32> to vector<1x1x64xf32>
    tpu.vector_store %arg4[%c0_43, %c1_44, %c0_45], %57 {strides = array<i32>} : memref<1x2x64xf32, #tpu.memory_space<vmem>>, vector<1x1x64xf32>,
    return
  }
  func.func @transform_0(%arg0: i32) -> (i32, i32, i32, i32) {
    %c0_i32 = arith.constant 0 : i32
    %c0_i32_0 = arith.constant 0 : i32
    %c0_i32_1 = arith.constant 0 : i32
    %c0_i32_2 = arith.constant 0 : i32
    return %arg0, %c0_i32, %c0_i32_0, %c0_i32_1 : i32, i32, i32, i32
  }
  func.func @transform_1(%arg0: i32) -> (i32, i32, i32, i32) {
    %c0_i32 = arith.constant 0 : i32
    %c0_i32_0 = arith.constant 0 : i32
    %c0_i32_1 = arith.constant 0 : i32
    %c0_i32_2 = arith.constant 0 : i32
    %c0_i32_3 = arith.constant 0 : i32
    return %c0_i32, %c0_i32_0, %c0_i32_1, %c0_i32_2 : i32, i32, i32, i32
  }
  func.func @transform_2(%arg0: i32) -> (i32, i32, i32, i32, i32) {
    %c0_i32 = arith.constant 0 : i32
    %c0_i32_0 = arith.constant 0 : i32
    %c0_i32_1 = arith.constant 0 : i32
    %c0_i32_2 = arith.constant 0 : i32
    %c0_i32_3 = arith.constant 0 : i32
    return %arg0, %c0_i32, %c0_i32_0, %c0_i32_1, %c0_i32_2 : i32, i32, i32, i32, i32
  }
  func.func @transform_3(%arg0: i32) -> (i32, i32, i32) {
    %c0_i32 = arith.constant 0 : i32
    %c0_i32_0 = arith.constant 0 : i32
    %c0_i32_1 = arith.constant 0 : i32
    return %arg0, %c0_i32, %c0_i32_0 : i32, i32, i32
  }
}

module attributes {stable_mosaic.version = 11 : i64} {
  func.func @_bn_act_kernel(%arg0: i32, %arg1: i32, %arg2: i32, %arg3: memref<1x1x1x1x64xbf16, #tpu.memory_space<vmem>>, %arg4: memref<1x64xf32, #tpu.memory_space<vmem>>, %arg5: memref<1x64xf32, #tpu.memory_space<vmem>>, %arg6: memref<1x1x1x1x64xbf16, #tpu.memory_space<vmem>>) attributes {dimension_semantics = [#tpu.dimension_semantics<parallel>, #tpu.dimension_semantics<parallel>, #tpu.dimension_semantics<parallel>], iteration_bounds = array<i64: 2, 1, 1>, scalar_prefetch = 0 : i64, scratch_operands = 0 : i64, tpu.core_type = #tpu.core_type<tc>, window_params = [{transform_indices = @transform_0, window_bounds = array<i64: 1, 1, 1, 1, 64>}, {pipeline_mode = #tpu.pipeline_mode<synchronous>, transform_indices = @transform_1, window_bounds = array<i64: 1, 64>}, {pipeline_mode = #tpu.pipeline_mode<synchronous>, transform_indices = @transform_2, window_bounds = array<i64: 1, 64>}, {transform_indices = @transform_3, window_bounds = array<i64: 1, 1, 1, 1, 64>}]} {
    %c0 = arith.constant 0 : index
    %c0_0 = arith.constant 0 : index
    %c0_1 = arith.constant 0 : index
    %c0_2 = arith.constant 0 : index
    %c0_3 = arith.constant 0 : index
    %0 = vector.load %arg3[%c0, %c0_0, %c0_1, %c0_2, %c0_3] : memref<1x1x1x1x64xbf16, #tpu.memory_space<vmem>>, vector<1x1x1x1x64xbf16>
    %1 = arith.extf %0 : vector<1x1x1x1x64xbf16> to vector<1x1x1x1x64xf32>
    %c0_4 = arith.constant 0 : index
    %c0_5 = arith.constant 0 : index
    %2 = vector.load %arg4[%c0_4, %c0_5] : memref<1x64xf32, #tpu.memory_space<vmem>>, vector<1x64xf32>
    %3 = vector.shape_cast %2 : vector<1x64xf32> to vector<1x1x1x1x64xf32>
    %4 = arith.mulf %1, %3 : vector<1x1x1x1x64xf32>
    %c0_6 = arith.constant 0 : index
    %c0_7 = arith.constant 0 : index
    %5 = vector.load %arg5[%c0_6, %c0_7] : memref<1x64xf32, #tpu.memory_space<vmem>>, vector<1x64xf32>
    %6 = vector.shape_cast %5 : vector<1x64xf32> to vector<1x1x1x1x64xf32>
    %7 = arith.addf %4, %6 : vector<1x1x1x1x64xf32>
    %cst = arith.constant 0.000000e+00 : f32
    %8 = vector.broadcast %cst : f32 to vector<1x1x1x1x64xf32>
    %9 = arith.cmpf oge, %7, %8 : vector<1x1x1x1x64xf32>
    %cst_8 = arith.constant 2.000000e-01 : f32
    %10 = vector.broadcast %cst_8 : f32 to vector<1x1x1x1x64xf32>
    %11 = arith.mulf %10, %7 : vector<1x1x1x1x64xf32>
    %12 = arith.select %9, %7, %11 : vector<1x1x1x1x64xi1>, vector<1x1x1x1x64xf32>
    %13 = arith.truncf %12 : vector<1x1x1x1x64xf32> to vector<1x1x1x1x64xbf16>
    %c0_9 = arith.constant 0 : index
    %c0_10 = arith.constant 0 : index
    %c0_11 = arith.constant 0 : index
    %c0_12 = arith.constant 0 : index
    %c0_13 = arith.constant 0 : index
    %14 = vector.load %arg6[%c0_9, %c0_10, %c0_11, %c0_12, %c0_13] : memref<1x1x1x1x64xbf16, #tpu.memory_space<vmem>>, vector<1x1x1x1x64xbf16>
    tpu.vector_store %arg6[%c0_9, %c0_10, %c0_11, %c0_12, %c0_13], %13 {strides = array<i32>} : memref<1x1x1x1x64xbf16, #tpu.memory_space<vmem>>, vector<1x1x1x1x64xbf16>,
    return
  }
  func.func @transform_0(%arg0: i32, %arg1: i32, %arg2: i32) -> (i32, i32, i32, i32, i32) {
    %c0_i32 = arith.constant 0 : i32
    %c0_i32_0 = arith.constant 0 : i32
    %c0_i32_1 = arith.constant 0 : i32
    return %arg0, %arg1, %arg2, %c0_i32, %c0_i32_0 : i32, i32, i32, i32, i32
  }
  func.func @transform_1(%arg0: i32, %arg1: i32, %arg2: i32) -> (i32, i32) {
    %c0_i32 = arith.constant 0 : i32
    %c0_i32_0 = arith.constant 0 : i32
    %c0_i32_1 = arith.constant 0 : i32
    return %c0_i32, %c0_i32_0 : i32, i32
  }
  func.func @transform_2(%arg0: i32, %arg1: i32, %arg2: i32) -> (i32, i32) {
    %c0_i32 = arith.constant 0 : i32
    %c0_i32_0 = arith.constant 0 : i32
    %c0_i32_1 = arith.constant 0 : i32
    return %c0_i32, %c0_i32_0 : i32, i32
  }
  func.func @transform_3(%arg0: i32, %arg1: i32, %arg2: i32) -> (i32, i32, i32, i32, i32) {
    %c0_i32 = arith.constant 0 : i32
    %c0_i32_0 = arith.constant 0 : i32
    %c0_i32_1 = arith.constant 0 : i32
    return %arg0, %arg1, %arg2, %c0_i32, %c0_i32_0 : i32, i32, i32, i32, i32
  }
}

module attributes {stable_mosaic.version = 11 : i64} {
  func.func @_conv_tap_bn_stats_kernel(%arg0: i32, %arg1: memref<1x3x3x64xbf16, #tpu.memory_space<vmem>>, %arg2: memref<4x4x64x32xbf16, #tpu.memory_space<vmem>>, %arg3: memref<1x4x1x1x32xbf16, #tpu.memory_space<vmem>>, %arg4: memref<1x2x32xf32, #tpu.memory_space<vmem>>) attributes {dimension_semantics = [#tpu.dimension_semantics<parallel>], iteration_bounds = array<i64: 2>, scalar_prefetch = 0 : i64, scratch_operands = 0 : i64, tpu.core_type = #tpu.core_type<tc>, window_params = [{transform_indices = @transform_0, window_bounds = array<i64: 1, 3, 3, 64>}, {pipeline_mode = #tpu.pipeline_mode<synchronous>, transform_indices = @transform_1, window_bounds = array<i64: 4, 4, 64, 32>}, {transform_indices = @transform_2, window_bounds = array<i64: 1, 4, 1, 1, 32>}, {transform_indices = @transform_3, window_bounds = array<i64: 1, 2, 32>}]} {
    %cst = arith.constant 0.000000e+00 : f32
    %0 = vector.broadcast %cst : f32 to vector<1x32xf32>
    %cst_0 = arith.constant 0.000000e+00 : f32
    %1 = vector.broadcast %cst_0 : f32 to vector<1x32xf32>
    %c0_i32 = arith.constant 0 : i32
    %cst_1 = arith.constant 0.000000e+00 : f32
    %2 = vector.broadcast %cst_1 : f32 to vector<1x32xf32>
    %c1_i32 = arith.constant 1 : i32
    %3 = arith.addi %c0_i32, %c1_i32 : i32
    %c0 = arith.constant 0 : index
    %4 = arith.index_cast %3 : i32 to index
    %c1 = arith.constant 1 : index
    %c0_2 = arith.constant 0 : index
    %5 = vector.load %arg1[%c0, %4, %c1, %c0_2] : memref<1x3x3x64xbf16, #tpu.memory_space<vmem>>, vector<1x1x1x64xbf16>
    %6 = vector.shape_cast %5 : vector<1x1x1x64xbf16> to vector<1x1x64xbf16>
    %7 = vector.shape_cast %6 : vector<1x1x64xbf16> to vector<1x64xbf16>
    %c0_3 = arith.constant 0 : index
    %c0_4 = arith.constant 0 : index
    %c0_5 = arith.constant 0 : index
    %c0_6 = arith.constant 0 : index
    %8 = vector.load %arg2[%c0_3, %c0_4, %c0_5, %c0_6] : memref<4x4x64x32xbf16, #tpu.memory_space<vmem>>, vector<1x1x64x32xbf16>
    %9 = vector.shape_cast %8 : vector<1x1x64x32xbf16> to vector<64x32xbf16>
    %cst_7 = arith.constant dense<0.000000e+00> : vector<1x32xf32>
    %10 = tpu.matmul %7, %9, %cst_7 {dimension_numbers = #tpu.dot_dimension_numbers<[1], [0], [0], [1], [0, 0, 1, 1], [], []>} : vector<1x64xbf16>, vector<64x32xbf16>, vector<1x32xf32> -> vector<1x32xf32>
    %11 = arith.addf %2, %10 : vector<1x32xf32>
    %c1_i32_8 = arith.constant 1 : i32
    %12 = arith.addi %c0_i32, %c1_i32_8 : i32
    %c0_9 = arith.constant 0 : index
    %13 = arith.index_cast %12 : i32 to index
    %c0_10 = arith.constant 0 : index
    %c0_11 = arith.constant 0 : index
    %14 = vector.load %arg1[%c0_9, %13, %c0_10, %c0_11] : memref<1x3x3x64xbf16, #tpu.memory_space<vmem>>, vector<1x1x1x64xbf16>
    %15 = vector.shape_cast %14 : vector<1x1x1x64xbf16> to vector<1x1x64xbf16>
    %16 = vector.shape_cast %15 : vector<1x1x64xbf16> to vector<1x64xbf16>
    %c0_12 = arith.constant 0 : index
    %c1_13 = arith.constant 1 : index
    %c0_14 = arith.constant 0 : index
    %c0_15 = arith.constant 0 : index
    %17 = vector.load %arg2[%c0_12, %c1_13, %c0_14, %c0_15] : memref<4x4x64x32xbf16, #tpu.memory_space<vmem>>, vector<1x1x64x32xbf16>
    %18 = vector.shape_cast %17 : vector<1x1x64x32xbf16> to vector<64x32xbf16>
    %cst_16 = arith.constant dense<0.000000e+00> : vector<1x32xf32>
    %19 = tpu.matmul %16, %18, %cst_16 {dimension_numbers = #tpu.dot_dimension_numbers<[1], [0], [0], [1], [0, 0, 1, 1], [], []>} : vector<1x64xbf16>, vector<64x32xbf16>, vector<1x32xf32> -> vector<1x32xf32>
    %20 = arith.addf %11, %19 : vector<1x32xf32>
    %c0_i32_17 = arith.constant 0 : i32
    %21 = arith.addi %c0_i32, %c0_i32_17 : i32
    %c0_18 = arith.constant 0 : index
    %22 = arith.index_cast %21 : i32 to index
    %c1_19 = arith.constant 1 : index
    %c0_20 = arith.constant 0 : index
    %23 = vector.load %arg1[%c0_18, %22, %c1_19, %c0_20] : memref<1x3x3x64xbf16, #tpu.memory_space<vmem>>, vector<1x1x1x64xbf16>
    %24 = vector.shape_cast %23 : vector<1x1x1x64xbf16> to vector<1x1x64xbf16>
    %25 = vector.shape_cast %24 : vector<1x1x64xbf16> to vector<1x64xbf16>
    %c0_21 = arith.constant 0 : index
    %c2 = arith.constant 2 : index
    %c0_22 = arith.constant 0 : index
    %c0_23 = arith.constant 0 : index
    %26 = vector.load %arg2[%c0_21, %c2, %c0_22, %c0_23] : memref<4x4x64x32xbf16, #tpu.memory_space<vmem>>, vector<1x1x64x32xbf16>
    %27 = vector.shape_cast %26 : vector<1x1x64x32xbf16> to vector<64x32xbf16>
    %cst_24 = arith.constant dense<0.000000e+00> : vector<1x32xf32>
    %28 = tpu.matmul %25, %27, %cst_24 {dimension_numbers = #tpu.dot_dimension_numbers<[1], [0], [0], [1], [0, 0, 1, 1], [], []>} : vector<1x64xbf16>, vector<64x32xbf16>, vector<1x32xf32> -> vector<1x32xf32>
    %29 = arith.addf %20, %28 : vector<1x32xf32>
    %c0_i32_25 = arith.constant 0 : i32
    %30 = arith.addi %c0_i32, %c0_i32_25 : i32
    %c0_26 = arith.constant 0 : index
    %31 = arith.index_cast %30 : i32 to index
    %c0_27 = arith.constant 0 : index
    %c0_28 = arith.constant 0 : index
    %32 = vector.load %arg1[%c0_26, %31, %c0_27, %c0_28] : memref<1x3x3x64xbf16, #tpu.memory_space<vmem>>, vector<1x1x1x64xbf16>
    %33 = vector.shape_cast %32 : vector<1x1x1x64xbf16> to vector<1x1x64xbf16>
    %34 = vector.shape_cast %33 : vector<1x1x64xbf16> to vector<1x64xbf16>
    %c0_29 = arith.constant 0 : index
    %c3 = arith.constant 3 : index
    %c0_30 = arith.constant 0 : index
    %c0_31 = arith.constant 0 : index
    %35 = vector.load %arg2[%c0_29, %c3, %c0_30, %c0_31] : memref<4x4x64x32xbf16, #tpu.memory_space<vmem>>, vector<1x1x64x32xbf16>
    %36 = vector.shape_cast %35 : vector<1x1x64x32xbf16> to vector<64x32xbf16>
    %cst_32 = arith.constant dense<0.000000e+00> : vector<1x32xf32>
    %37 = tpu.matmul %34, %36, %cst_32 {dimension_numbers = #tpu.dot_dimension_numbers<[1], [0], [0], [1], [0, 0, 1, 1], [], []>} : vector<1x64xbf16>, vector<64x32xbf16>, vector<1x32xf32> -> vector<1x32xf32>
    %38 = arith.addf %29, %37 : vector<1x32xf32>
    %39 = vector.shape_cast %38 : vector<1x32xf32> to vector<1x1x32xf32>
    %40 = arith.truncf %39 : vector<1x1x32xf32> to vector<1x1x32xbf16>
    %c0_33 = arith.constant 0 : index
    %c0_34 = arith.constant 0 : index
    %41 = arith.index_cast %c0_i32 : i32 to index
    %c0_35 = arith.constant 0 : index
    %c0_36 = arith.constant 0 : index
    %42 = vector.load %arg3[%c0_33, %c0_34, %41, %c0_35, %c0_36] : memref<1x4x1x1x32xbf16, #tpu.memory_space<vmem>>, vector<1x1x1x1x32xbf16>
    %43 = vector.shape_cast %42 : vector<1x1x1x1x32xbf16> to vector<1x1x32xbf16>
    %44 = vector.shape_cast %40 : vector<1x1x32xbf16> to vector<1x1x1x1x32xbf16>
    tpu.vector_store %arg3[%c0_33, %c0_34, %41, %c0_35, %c0_36], %44 {strides = array<i32>} : memref<1x4x1x1x32xbf16, #tpu.memory_space<vmem>>, vector<1x1x1x1x32xbf16>,
    %cst_37 = arith.constant dense<0.000000e+00> : vector<32xf32>
    %45 = vector.multi_reduction <add>, %38, %cst_37 [0] : vector<1x32xf32> to vector<32xf32>
    %46 = vector.shape_cast %45 : vector<32xf32> to vector<1x32xf32>
    %47 = arith.addf %0, %46 : vector<1x32xf32>
    %48 = arith.mulf %38, %38 : vector<1x32xf32>
    %cst_38 = arith.constant dense<0.000000e+00> : vector<32xf32>
    %49 = vector.multi_reduction <add>, %48, %cst_38 [0] : vector<1x32xf32> to vector<32xf32>
    %50 = vector.shape_cast %49 : vector<32xf32> to vector<1x32xf32>
    %51 = arith.addf %1, %50 : vector<1x32xf32>
    %c1_i32_39 = arith.constant 1 : i32
    %c0_i32_40 = arith.constant 0 : i32
    %cst_41 = arith.constant 0.000000e+00 : f32
    %52 = vector.broadcast %cst_41 : f32 to vector<1x32xf32>
    %c1_i32_42 = arith.constant 1 : i32
    %53 = arith.addi %c0_i32_40, %c1_i32_42 : i32
    %c0_43 = arith.constant 0 : index
    %54 = arith.index_cast %53 : i32 to index
    %c2_44 = arith.constant 2 : index
    %c0_45 = arith.constant 0 : index
    %55 = vector.load %arg1[%c0_43, %54, %c2_44, %c0_45] : memref<1x3x3x64xbf16, #tpu.memory_space<vmem>>, vector<1x1x1x64xbf16>
    %56 = vector.shape_cast %55 : vector<1x1x1x64xbf16> to vector<1x1x64xbf16>
    %57 = vector.shape_cast %56 : vector<1x1x64xbf16> to vector<1x64xbf16>
    %c1_46 = arith.constant 1 : index
    %c0_47 = arith.constant 0 : index
    %c0_48 = arith.constant 0 : index
    %c0_49 = arith.constant 0 : index
    %58 = vector.load %arg2[%c1_46, %c0_47, %c0_48, %c0_49] : memref<4x4x64x32xbf16, #tpu.memory_space<vmem>>, vector<1x1x64x32xbf16>
    %59 = vector.shape_cast %58 : vector<1x1x64x32xbf16> to vector<64x32xbf16>
    %cst_50 = arith.constant dense<0.000000e+00> : vector<1x32xf32>
    %60 = tpu.matmul %57, %59, %cst_50 {dimension_numbers = #tpu.dot_dimension_numbers<[1], [0], [0], [1], [0, 0, 1, 1], [], []>} : vector<1x64xbf16>, vector<64x32xbf16>, vector<1x32xf32> -> vector<1x32xf32>
    %61 = arith.addf %52, %60 : vector<1x32xf32>
    %c1_i32_51 = arith.constant 1 : i32
    %62 = arith.addi %c0_i32_40, %c1_i32_51 : i32
    %c0_52 = arith.constant 0 : index
    %63 = arith.index_cast %62 : i32 to index
    %c1_53 = arith.constant 1 : index
    %c0_54 = arith.constant 0 : index
    %64 = vector.load %arg1[%c0_52, %63, %c1_53, %c0_54] : memref<1x3x3x64xbf16, #tpu.memory_space<vmem>>, vector<1x1x1x64xbf16>
    %65 = vector.shape_cast %64 : vector<1x1x1x64xbf16> to vector<1x1x64xbf16>
    %66 = vector.shape_cast %65 : vector<1x1x64xbf16> to vector<1x64xbf16>
    %c1_55 = arith.constant 1 : index
    %c1_56 = arith.constant 1 : index
    %c0_57 = arith.constant 0 : index
    %c0_58 = arith.constant 0 : index
    %67 = vector.load %arg2[%c1_55, %c1_56, %c0_57, %c0_58] : memref<4x4x64x32xbf16, #tpu.memory_space<vmem>>, vector<1x1x64x32xbf16>
    %68 = vector.shape_cast %67 : vector<1x1x64x32xbf16> to vector<64x32xbf16>
    %cst_59 = arith.constant dense<0.000000e+00> : vector<1x32xf32>
    %69 = tpu.matmul %66, %68, %cst_59 {dimension_numbers = #tpu.dot_dimension_numbers<[1], [0], [0], [1], [0, 0, 1, 1], [], []>} : vector<1x64xbf16>, vector<64x32xbf16>, vector<1x32xf32> -> vector<1x32xf32>
    %70 = arith.addf %61, %69 : vector<1x32xf32>
    %c0_i32_60 = arith.constant 0 : i32
    %71 = arith.addi %c0_i32_40, %c0_i32_60 : i32
    %c0_61 = arith.constant 0 : index
    %72 = arith.index_cast %71 : i32 to index
    %c2_62 = arith.constant 2 : index
    %c0_63 = arith.constant 0 : index
    %73 = vector.load %arg1[%c0_61, %72, %c2_62, %c0_63] : memref<1x3x3x64xbf16, #tpu.memory_space<vmem>>, vector<1x1x1x64xbf16>
    %74 = vector.shape_cast %73 : vector<1x1x1x64xbf16> to vector<1x1x64xbf16>
    %75 = vector.shape_cast %74 : vector<1x1x64xbf16> to vector<1x64xbf16>
    %c1_64 = arith.constant 1 : index
    %c2_65 = arith.constant 2 : index
    %c0_66 = arith.constant 0 : index
    %c0_67 = arith.constant 0 : index
    %76 = vector.load %arg2[%c1_64, %c2_65, %c0_66, %c0_67] : memref<4x4x64x32xbf16, #tpu.memory_space<vmem>>, vector<1x1x64x32xbf16>
    %77 = vector.shape_cast %76 : vector<1x1x64x32xbf16> to vector<64x32xbf16>
    %cst_68 = arith.constant dense<0.000000e+00> : vector<1x32xf32>
    %78 = tpu.matmul %75, %77, %cst_68 {dimension_numbers = #tpu.dot_dimension_numbers<[1], [0], [0], [1], [0, 0, 1, 1], [], []>} : vector<1x64xbf16>, vector<64x32xbf16>, vector<1x32xf32> -> vector<1x32xf32>
    %79 = arith.addf %70, %78 : vector<1x32xf32>
    %c0_i32_69 = arith.constant 0 : i32
    %80 = arith.addi %c0_i32_40, %c0_i32_69 : i32
    %c0_70 = arith.constant 0 : index
    %81 = arith.index_cast %80 : i32 to index
    %c1_71 = arith.constant 1 : index
    %c0_72 = arith.constant 0 : index
    %82 = vector.load %arg1[%c0_70, %81, %c1_71, %c0_72] : memref<1x3x3x64xbf16, #tpu.memory_space<vmem>>, vector<1x1x1x64xbf16>
    %83 = vector.shape_cast %82 : vector<1x1x1x64xbf16> to vector<1x1x64xbf16>
    %84 = vector.shape_cast %83 : vector<1x1x64xbf16> to vector<1x64xbf16>
    %c1_73 = arith.constant 1 : index
    %c3_74 = arith.constant 3 : index
    %c0_75 = arith.constant 0 : index
    %c0_76 = arith.constant 0 : index
    %85 = vector.load %arg2[%c1_73, %c3_74, %c0_75, %c0_76] : memref<4x4x64x32xbf16, #tpu.memory_space<vmem>>, vector<1x1x64x32xbf16>
    %86 = vector.shape_cast %85 : vector<1x1x64x32xbf16> to vector<64x32xbf16>
    %cst_77 = arith.constant dense<0.000000e+00> : vector<1x32xf32>
    %87 = tpu.matmul %84, %86, %cst_77 {dimension_numbers = #tpu.dot_dimension_numbers<[1], [0], [0], [1], [0, 0, 1, 1], [], []>} : vector<1x64xbf16>, vector<64x32xbf16>, vector<1x32xf32> -> vector<1x32xf32>
    %88 = arith.addf %79, %87 : vector<1x32xf32>
    %89 = vector.shape_cast %88 : vector<1x32xf32> to vector<1x1x32xf32>
    %90 = arith.truncf %89 : vector<1x1x32xf32> to vector<1x1x32xbf16>
    %c0_78 = arith.constant 0 : index
    %c1_79 = arith.constant 1 : index
    %91 = arith.index_cast %c0_i32_40 : i32 to index
    %c0_80 = arith.constant 0 : index
    %c0_81 = arith.constant 0 : index
    %92 = vector.load %arg3[%c0_78, %c1_79, %91, %c0_80, %c0_81] : memref<1x4x1x1x32xbf16, #tpu.memory_space<vmem>>, vector<1x1x1x1x32xbf16>
    %93 = vector.shape_cast %92 : vector<1x1x1x1x32xbf16> to vector<1x1x32xbf16>
    %94 = vector.shape_cast %90 : vector<1x1x32xbf16> to vector<1x1x1x1x32xbf16>
    tpu.vector_store %arg3[%c0_78, %c1_79, %91, %c0_80, %c0_81], %94 {strides = array<i32>} : memref<1x4x1x1x32xbf16, #tpu.memory_space<vmem>>, vector<1x1x1x1x32xbf16>,
    %cst_82 = arith.constant dense<0.000000e+00> : vector<32xf32>
    %95 = vector.multi_reduction <add>, %88, %cst_82 [0] : vector<1x32xf32> to vector<32xf32>
    %96 = vector.shape_cast %95 : vector<32xf32> to vector<1x32xf32>
    %97 = arith.addf %47, %96 : vector<1x32xf32>
    %98 = arith.mulf %88, %88 : vector<1x32xf32>
    %cst_83 = arith.constant dense<0.000000e+00> : vector<32xf32>
    %99 = vector.multi_reduction <add>, %98, %cst_83 [0] : vector<1x32xf32> to vector<32xf32>
    %100 = vector.shape_cast %99 : vector<32xf32> to vector<1x32xf32>
    %101 = arith.addf %51, %100 : vector<1x32xf32>
    %c1_i32_84 = arith.constant 1 : i32
    %c0_i32_85 = arith.constant 0 : i32
    %cst_86 = arith.constant 0.000000e+00 : f32
    %102 = vector.broadcast %cst_86 : f32 to vector<1x32xf32>
    %c2_i32 = arith.constant 2 : i32
    %103 = arith.addi %c0_i32_85, %c2_i32 : i32
    %c0_87 = arith.constant 0 : index
    %104 = arith.index_cast %103 : i32 to index
    %c1_88 = arith.constant 1 : index
    %c0_89 = arith.constant 0 : index
    %105 = vector.load %arg1[%c0_87, %104, %c1_88, %c0_89] : memref<1x3x3x64xbf16, #tpu.memory_space<vmem>>, vector<1x1x1x64xbf16>
    %106 = vector.shape_cast %105 : vector<1x1x1x64xbf16> to vector<1x1x64xbf16>
    %107 = vector.shape_cast %106 : vector<1x1x64xbf16> to vector<1x64xbf16>
    %c2_90 = arith.constant 2 : index
    %c0_91 = arith.constant 0 : index
    %c0_92 = arith.constant 0 : index
    %c0_93 = arith.constant 0 : index
    %108 = vector.load %arg2[%c2_90, %c0_91, %c0_92, %c0_93] : memref<4x4x64x32xbf16, #tpu.memory_space<vmem>>, vector<1x1x64x32xbf16>
    %109 = vector.shape_cast %108 : vector<1x1x64x32xbf16> to vector<64x32xbf16>
    %cst_94 = arith.constant dense<0.000000e+00> : vector<1x32xf32>
    %110 = tpu.matmul %107, %109, %cst_94 {dimension_numbers = #tpu.dot_dimension_numbers<[1], [0], [0], [1], [0, 0, 1, 1], [], []>} : vector<1x64xbf16>, vector<64x32xbf16>, vector<1x32xf32> -> vector<1x32xf32>
    %111 = arith.addf %102, %110 : vector<1x32xf32>
    %c2_i32_95 = arith.constant 2 : i32
    %112 = arith.addi %c0_i32_85, %c2_i32_95 : i32
    %c0_96 = arith.constant 0 : index
    %113 = arith.index_cast %112 : i32 to index
    %c0_97 = arith.constant 0 : index
    %c0_98 = arith.constant 0 : index
    %114 = vector.load %arg1[%c0_96, %113, %c0_97, %c0_98] : memref<1x3x3x64xbf16, #tpu.memory_space<vmem>>, vector<1x1x1x64xbf16>
    %115 = vector.shape_cast %114 : vector<1x1x1x64xbf16> to vector<1x1x64xbf16>
    %116 = vector.shape_cast %115 : vector<1x1x64xbf16> to vector<1x64xbf16>
    %c2_99 = arith.constant 2 : index
    %c1_100 = arith.constant 1 : index
    %c0_101 = arith.constant 0 : index
    %c0_102 = arith.constant 0 : index
    %117 = vector.load %arg2[%c2_99, %c1_100, %c0_101, %c0_102] : memref<4x4x64x32xbf16, #tpu.memory_space<vmem>>, vector<1x1x64x32xbf16>
    %118 = vector.shape_cast %117 : vector<1x1x64x32xbf16> to vector<64x32xbf16>
    %cst_103 = arith.constant dense<0.000000e+00> : vector<1x32xf32>
    %119 = tpu.matmul %116, %118, %cst_103 {dimension_numbers = #tpu.dot_dimension_numbers<[1], [0], [0], [1], [0, 0, 1, 1], [], []>} : vector<1x64xbf16>, vector<64x32xbf16>, vector<1x32xf32> -> vector<1x32xf32>
    %120 = arith.addf %111, %119 : vector<1x32xf32>
    %c1_i32_104 = arith.constant 1 : i32
    %121 = arith.addi %c0_i32_85, %c1_i32_104 : i32
    %c0_105 = arith.constant 0 : index
    %122 = arith.index_cast %121 : i32 to index
    %c1_106 = arith.constant 1 : index
    %c0_107 = arith.constant 0 : index
    %123 = vector.load %arg1[%c0_105, %122, %c1_106, %c0_107] : memref<1x3x3x64xbf16, #tpu.memory_space<vmem>>, vector<1x1x1x64xbf16>
    %124 = vector.shape_cast %123 : vector<1x1x1x64xbf16> to vector<1x1x64xbf16>
    %125 = vector.shape_cast %124 : vector<1x1x64xbf16> to vector<1x64xbf16>
    %c2_108 = arith.constant 2 : index
    %c2_109 = arith.constant 2 : index
    %c0_110 = arith.constant 0 : index
    %c0_111 = arith.constant 0 : index
    %126 = vector.load %arg2[%c2_108, %c2_109, %c0_110, %c0_111] : memref<4x4x64x32xbf16, #tpu.memory_space<vmem>>, vector<1x1x64x32xbf16>
    %127 = vector.shape_cast %126 : vector<1x1x64x32xbf16> to vector<64x32xbf16>
    %cst_112 = arith.constant dense<0.000000e+00> : vector<1x32xf32>
    %128 = tpu.matmul %125, %127, %cst_112 {dimension_numbers = #tpu.dot_dimension_numbers<[1], [0], [0], [1], [0, 0, 1, 1], [], []>} : vector<1x64xbf16>, vector<64x32xbf16>, vector<1x32xf32> -> vector<1x32xf32>
    %129 = arith.addf %120, %128 : vector<1x32xf32>
    %c1_i32_113 = arith.constant 1 : i32
    %130 = arith.addi %c0_i32_85, %c1_i32_113 : i32
    %c0_114 = arith.constant 0 : index
    %131 = arith.index_cast %130 : i32 to index
    %c0_115 = arith.constant 0 : index
    %c0_116 = arith.constant 0 : index
    %132 = vector.load %arg1[%c0_114, %131, %c0_115, %c0_116] : memref<1x3x3x64xbf16, #tpu.memory_space<vmem>>, vector<1x1x1x64xbf16>
    %133 = vector.shape_cast %132 : vector<1x1x1x64xbf16> to vector<1x1x64xbf16>
    %134 = vector.shape_cast %133 : vector<1x1x64xbf16> to vector<1x64xbf16>
    %c2_117 = arith.constant 2 : index
    %c3_118 = arith.constant 3 : index
    %c0_119 = arith.constant 0 : index
    %c0_120 = arith.constant 0 : index
    %135 = vector.load %arg2[%c2_117, %c3_118, %c0_119, %c0_120] : memref<4x4x64x32xbf16, #tpu.memory_space<vmem>>, vector<1x1x64x32xbf16>
    %136 = vector.shape_cast %135 : vector<1x1x64x32xbf16> to vector<64x32xbf16>
    %cst_121 = arith.constant dense<0.000000e+00> : vector<1x32xf32>
    %137 = tpu.matmul %134, %136, %cst_121 {dimension_numbers = #tpu.dot_dimension_numbers<[1], [0], [0], [1], [0, 0, 1, 1], [], []>} : vector<1x64xbf16>, vector<64x32xbf16>, vector<1x32xf32> -> vector<1x32xf32>
    %138 = arith.addf %129, %137 : vector<1x32xf32>
    %139 = vector.shape_cast %138 : vector<1x32xf32> to vector<1x1x32xf32>
    %140 = arith.truncf %139 : vector<1x1x32xf32> to vector<1x1x32xbf16>
    %c0_122 = arith.constant 0 : index
    %c2_123 = arith.constant 2 : index
    %141 = arith.index_cast %c0_i32_85 : i32 to index
    %c0_124 = arith.constant 0 : index
    %c0_125 = arith.constant 0 : index
    %142 = vector.load %arg3[%c0_122, %c2_123, %141, %c0_124, %c0_125] : memref<1x4x1x1x32xbf16, #tpu.memory_space<vmem>>, vector<1x1x1x1x32xbf16>
    %143 = vector.shape_cast %142 : vector<1x1x1x1x32xbf16> to vector<1x1x32xbf16>
    %144 = vector.shape_cast %140 : vector<1x1x32xbf16> to vector<1x1x1x1x32xbf16>
    tpu.vector_store %arg3[%c0_122, %c2_123, %141, %c0_124, %c0_125], %144 {strides = array<i32>} : memref<1x4x1x1x32xbf16, #tpu.memory_space<vmem>>, vector<1x1x1x1x32xbf16>,
    %cst_126 = arith.constant dense<0.000000e+00> : vector<32xf32>
    %145 = vector.multi_reduction <add>, %138, %cst_126 [0] : vector<1x32xf32> to vector<32xf32>
    %146 = vector.shape_cast %145 : vector<32xf32> to vector<1x32xf32>
    %147 = arith.addf %97, %146 : vector<1x32xf32>
    %148 = arith.mulf %138, %138 : vector<1x32xf32>
    %cst_127 = arith.constant dense<0.000000e+00> : vector<32xf32>
    %149 = vector.multi_reduction <add>, %148, %cst_127 [0] : vector<1x32xf32> to vector<32xf32>
    %150 = vector.shape_cast %149 : vector<32xf32> to vector<1x32xf32>
    %151 = arith.addf %101, %150 : vector<1x32xf32>
    %c1_i32_128 = arith.constant 1 : i32
    %c0_i32_129 = arith.constant 0 : i32
    %cst_130 = arith.constant 0.000000e+00 : f32
    %152 = vector.broadcast %cst_130 : f32 to vector<1x32xf32>
    %c2_i32_131 = arith.constant 2 : i32
    %153 = arith.addi %c0_i32_129, %c2_i32_131 : i32
    %c0_132 = arith.constant 0 : index
    %154 = arith.index_cast %153 : i32 to index
    %c2_133 = arith.constant 2 : index
    %c0_134 = arith.constant 0 : index
    %155 = vector.load %arg1[%c0_132, %154, %c2_133, %c0_134] : memref<1x3x3x64xbf16, #tpu.memory_space<vmem>>, vector<1x1x1x64xbf16>
    %156 = vector.shape_cast %155 : vector<1x1x1x64xbf16> to vector<1x1x64xbf16>
    %157 = vector.shape_cast %156 : vector<1x1x64xbf16> to vector<1x64xbf16>
    %c3_135 = arith.constant 3 : index
    %c0_136 = arith.constant 0 : index
    %c0_137 = arith.constant 0 : index
    %c0_138 = arith.constant 0 : index
    %158 = vector.load %arg2[%c3_135, %c0_136, %c0_137, %c0_138] : memref<4x4x64x32xbf16, #tpu.memory_space<vmem>>, vector<1x1x64x32xbf16>
    %159 = vector.shape_cast %158 : vector<1x1x64x32xbf16> to vector<64x32xbf16>
    %cst_139 = arith.constant dense<0.000000e+00> : vector<1x32xf32>
    %160 = tpu.matmul %157, %159, %cst_139 {dimension_numbers = #tpu.dot_dimension_numbers<[1], [0], [0], [1], [0, 0, 1, 1], [], []>} : vector<1x64xbf16>, vector<64x32xbf16>, vector<1x32xf32> -> vector<1x32xf32>
    %161 = arith.addf %152, %160 : vector<1x32xf32>
    %c2_i32_140 = arith.constant 2 : i32
    %162 = arith.addi %c0_i32_129, %c2_i32_140 : i32
    %c0_141 = arith.constant 0 : index
    %163 = arith.index_cast %162 : i32 to index
    %c1_142 = arith.constant 1 : index
    %c0_143 = arith.constant 0 : index
    %164 = vector.load %arg1[%c0_141, %163, %c1_142, %c0_143] : memref<1x3x3x64xbf16, #tpu.memory_space<vmem>>, vector<1x1x1x64xbf16>
    %165 = vector.shape_cast %164 : vector<1x1x1x64xbf16> to vector<1x1x64xbf16>
    %166 = vector.shape_cast %165 : vector<1x1x64xbf16> to vector<1x64xbf16>
    %c3_144 = arith.constant 3 : index
    %c1_145 = arith.constant 1 : index
    %c0_146 = arith.constant 0 : index
    %c0_147 = arith.constant 0 : index
    %167 = vector.load %arg2[%c3_144, %c1_145, %c0_146, %c0_147] : memref<4x4x64x32xbf16, #tpu.memory_space<vmem>>, vector<1x1x64x32xbf16>
    %168 = vector.shape_cast %167 : vector<1x1x64x32xbf16> to vector<64x32xbf16>
    %cst_148 = arith.constant dense<0.000000e+00> : vector<1x32xf32>
    %169 = tpu.matmul %166, %168, %cst_148 {dimension_numbers = #tpu.dot_dimension_numbers<[1], [0], [0], [1], [0, 0, 1, 1], [], []>} : vector<1x64xbf16>, vector<64x32xbf16>, vector<1x32xf32> -> vector<1x32xf32>
    %170 = arith.addf %161, %169 : vector<1x32xf32>
    %c1_i32_149 = arith.constant 1 : i32
    %171 = arith.addi %c0_i32_129, %c1_i32_149 : i32
    %c0_150 = arith.constant 0 : index
    %172 = arith.index_cast %171 : i32 to index
    %c2_151 = arith.constant 2 : index
    %c0_152 = arith.constant 0 : index
    %173 = vector.load %arg1[%c0_150, %172, %c2_151, %c0_152] : memref<1x3x3x64xbf16, #tpu.memory_space<vmem>>, vector<1x1x1x64xbf16>
    %174 = vector.shape_cast %173 : vector<1x1x1x64xbf16> to vector<1x1x64xbf16>
    %175 = vector.shape_cast %174 : vector<1x1x64xbf16> to vector<1x64xbf16>
    %c3_153 = arith.constant 3 : index
    %c2_154 = arith.constant 2 : index
    %c0_155 = arith.constant 0 : index
    %c0_156 = arith.constant 0 : index
    %176 = vector.load %arg2[%c3_153, %c2_154, %c0_155, %c0_156] : memref<4x4x64x32xbf16, #tpu.memory_space<vmem>>, vector<1x1x64x32xbf16>
    %177 = vector.shape_cast %176 : vector<1x1x64x32xbf16> to vector<64x32xbf16>
    %cst_157 = arith.constant dense<0.000000e+00> : vector<1x32xf32>
    %178 = tpu.matmul %175, %177, %cst_157 {dimension_numbers = #tpu.dot_dimension_numbers<[1], [0], [0], [1], [0, 0, 1, 1], [], []>} : vector<1x64xbf16>, vector<64x32xbf16>, vector<1x32xf32> -> vector<1x32xf32>
    %179 = arith.addf %170, %178 : vector<1x32xf32>
    %c1_i32_158 = arith.constant 1 : i32
    %180 = arith.addi %c0_i32_129, %c1_i32_158 : i32
    %c0_159 = arith.constant 0 : index
    %181 = arith.index_cast %180 : i32 to index
    %c1_160 = arith.constant 1 : index
    %c0_161 = arith.constant 0 : index
    %182 = vector.load %arg1[%c0_159, %181, %c1_160, %c0_161] : memref<1x3x3x64xbf16, #tpu.memory_space<vmem>>, vector<1x1x1x64xbf16>
    %183 = vector.shape_cast %182 : vector<1x1x1x64xbf16> to vector<1x1x64xbf16>
    %184 = vector.shape_cast %183 : vector<1x1x64xbf16> to vector<1x64xbf16>
    %c3_162 = arith.constant 3 : index
    %c3_163 = arith.constant 3 : index
    %c0_164 = arith.constant 0 : index
    %c0_165 = arith.constant 0 : index
    %185 = vector.load %arg2[%c3_162, %c3_163, %c0_164, %c0_165] : memref<4x4x64x32xbf16, #tpu.memory_space<vmem>>, vector<1x1x64x32xbf16>
    %186 = vector.shape_cast %185 : vector<1x1x64x32xbf16> to vector<64x32xbf16>
    %cst_166 = arith.constant dense<0.000000e+00> : vector<1x32xf32>
    %187 = tpu.matmul %184, %186, %cst_166 {dimension_numbers = #tpu.dot_dimension_numbers<[1], [0], [0], [1], [0, 0, 1, 1], [], []>} : vector<1x64xbf16>, vector<64x32xbf16>, vector<1x32xf32> -> vector<1x32xf32>
    %188 = arith.addf %179, %187 : vector<1x32xf32>
    %189 = vector.shape_cast %188 : vector<1x32xf32> to vector<1x1x32xf32>
    %190 = arith.truncf %189 : vector<1x1x32xf32> to vector<1x1x32xbf16>
    %c0_167 = arith.constant 0 : index
    %c3_168 = arith.constant 3 : index
    %191 = arith.index_cast %c0_i32_129 : i32 to index
    %c0_169 = arith.constant 0 : index
    %c0_170 = arith.constant 0 : index
    %192 = vector.load %arg3[%c0_167, %c3_168, %191, %c0_169, %c0_170] : memref<1x4x1x1x32xbf16, #tpu.memory_space<vmem>>, vector<1x1x1x1x32xbf16>
    %193 = vector.shape_cast %192 : vector<1x1x1x1x32xbf16> to vector<1x1x32xbf16>
    %194 = vector.shape_cast %190 : vector<1x1x32xbf16> to vector<1x1x1x1x32xbf16>
    tpu.vector_store %arg3[%c0_167, %c3_168, %191, %c0_169, %c0_170], %194 {strides = array<i32>} : memref<1x4x1x1x32xbf16, #tpu.memory_space<vmem>>, vector<1x1x1x1x32xbf16>,
    %cst_171 = arith.constant dense<0.000000e+00> : vector<32xf32>
    %195 = vector.multi_reduction <add>, %188, %cst_171 [0] : vector<1x32xf32> to vector<32xf32>
    %196 = vector.shape_cast %195 : vector<32xf32> to vector<1x32xf32>
    %197 = arith.addf %147, %196 : vector<1x32xf32>
    %198 = arith.mulf %188, %188 : vector<1x32xf32>
    %cst_172 = arith.constant dense<0.000000e+00> : vector<32xf32>
    %199 = vector.multi_reduction <add>, %198, %cst_172 [0] : vector<1x32xf32> to vector<32xf32>
    %200 = vector.shape_cast %199 : vector<32xf32> to vector<1x32xf32>
    %201 = arith.addf %151, %200 : vector<1x32xf32>
    %c1_i32_173 = arith.constant 1 : i32
    %c0_174 = arith.constant 0 : index
    %c0_175 = arith.constant 0 : index
    %c0_176 = arith.constant 0 : index
    %202 = vector.load %arg4[%c0_174, %c0_175, %c0_176] : memref<1x2x32xf32, #tpu.memory_space<vmem>>, vector<1x1x32xf32>
    %203 = vector.shape_cast %202 : vector<1x1x32xf32> to vector<1x32xf32>
    %204 = vector.shape_cast %197 : vector<1x32xf32> to vector<1x1x32xf32>
    tpu.vector_store %arg4[%c0_174, %c0_175, %c0_176], %204 {strides = array<i32>} : memref<1x2x32xf32, #tpu.memory_space<vmem>>, vector<1x1x32xf32>,
    %c0_177 = arith.constant 0 : index
    %c1_178 = arith.constant 1 : index
    %c0_179 = arith.constant 0 : index
    %205 = vector.load %arg4[%c0_177, %c1_178, %c0_179] : memref<1x2x32xf32, #tpu.memory_space<vmem>>, vector<1x1x32xf32>
    %206 = vector.shape_cast %205 : vector<1x1x32xf32> to vector<1x32xf32>
    %207 = vector.shape_cast %201 : vector<1x32xf32> to vector<1x1x32xf32>
    tpu.vector_store %arg4[%c0_177, %c1_178, %c0_179], %207 {strides = array<i32>} : memref<1x2x32xf32, #tpu.memory_space<vmem>>, vector<1x1x32xf32>,
    return
  }
  func.func @transform_0(%arg0: i32) -> (i32, i32, i32, i32) {
    %c0_i32 = arith.constant 0 : i32
    %c0_i32_0 = arith.constant 0 : i32
    %c0_i32_1 = arith.constant 0 : i32
    %c0_i32_2 = arith.constant 0 : i32
    return %arg0, %c0_i32, %c0_i32_0, %c0_i32_1 : i32, i32, i32, i32
  }
  func.func @transform_1(%arg0: i32) -> (i32, i32, i32, i32) {
    %c0_i32 = arith.constant 0 : i32
    %c0_i32_0 = arith.constant 0 : i32
    %c0_i32_1 = arith.constant 0 : i32
    %c0_i32_2 = arith.constant 0 : i32
    %c0_i32_3 = arith.constant 0 : i32
    return %c0_i32, %c0_i32_0, %c0_i32_1, %c0_i32_2 : i32, i32, i32, i32
  }
  func.func @transform_2(%arg0: i32) -> (i32, i32, i32, i32, i32) {
    %c0_i32 = arith.constant 0 : i32
    %c0_i32_0 = arith.constant 0 : i32
    %c0_i32_1 = arith.constant 0 : i32
    %c0_i32_2 = arith.constant 0 : i32
    %c0_i32_3 = arith.constant 0 : i32
    return %arg0, %c0_i32, %c0_i32_0, %c0_i32_1, %c0_i32_2 : i32, i32, i32, i32, i32
  }
  func.func @transform_3(%arg0: i32) -> (i32, i32, i32) {
    %c0_i32 = arith.constant 0 : i32
    %c0_i32_0 = arith.constant 0 : i32
    %c0_i32_1 = arith.constant 0 : i32
    return %arg0, %c0_i32, %c0_i32_0 : i32, i32, i32
  }
}

module attributes {stable_mosaic.version = 11 : i64} {
  func.func @_bn_act_kernel(%arg0: i32, %arg1: i32, %arg2: i32, %arg3: memref<1x1x1x1x32xbf16, #tpu.memory_space<vmem>>, %arg4: memref<1x32xf32, #tpu.memory_space<vmem>>, %arg5: memref<1x32xf32, #tpu.memory_space<vmem>>, %arg6: memref<1x1x1x1x32xbf16, #tpu.memory_space<vmem>>) attributes {dimension_semantics = [#tpu.dimension_semantics<parallel>, #tpu.dimension_semantics<parallel>, #tpu.dimension_semantics<parallel>], iteration_bounds = array<i64: 2, 4, 1>, scalar_prefetch = 0 : i64, scratch_operands = 0 : i64, tpu.core_type = #tpu.core_type<tc>, window_params = [{transform_indices = @transform_0, window_bounds = array<i64: 1, 1, 1, 1, 32>}, {pipeline_mode = #tpu.pipeline_mode<synchronous>, transform_indices = @transform_1, window_bounds = array<i64: 1, 32>}, {pipeline_mode = #tpu.pipeline_mode<synchronous>, transform_indices = @transform_2, window_bounds = array<i64: 1, 32>}, {transform_indices = @transform_3, window_bounds = array<i64: 1, 1, 1, 1, 32>}]} {
    %c0 = arith.constant 0 : index
    %c0_0 = arith.constant 0 : index
    %c0_1 = arith.constant 0 : index
    %c0_2 = arith.constant 0 : index
    %c0_3 = arith.constant 0 : index
    %0 = vector.load %arg3[%c0, %c0_0, %c0_1, %c0_2, %c0_3] : memref<1x1x1x1x32xbf16, #tpu.memory_space<vmem>>, vector<1x1x1x1x32xbf16>
    %1 = arith.extf %0 : vector<1x1x1x1x32xbf16> to vector<1x1x1x1x32xf32>
    %c0_4 = arith.constant 0 : index
    %c0_5 = arith.constant 0 : index
    %2 = vector.load %arg4[%c0_4, %c0_5] : memref<1x32xf32, #tpu.memory_space<vmem>>, vector<1x32xf32>
    %3 = vector.shape_cast %2 : vector<1x32xf32> to vector<1x1x1x1x32xf32>
    %4 = arith.mulf %1, %3 : vector<1x1x1x1x32xf32>
    %c0_6 = arith.constant 0 : index
    %c0_7 = arith.constant 0 : index
    %5 = vector.load %arg5[%c0_6, %c0_7] : memref<1x32xf32, #tpu.memory_space<vmem>>, vector<1x32xf32>
    %6 = vector.shape_cast %5 : vector<1x32xf32> to vector<1x1x1x1x32xf32>
    %7 = arith.addf %4, %6 : vector<1x1x1x1x32xf32>
    %cst = arith.constant 0.000000e+00 : f32
    %8 = vector.broadcast %cst : f32 to vector<1x1x1x1x32xf32>
    %9 = arith.maximumf %7, %8 : vector<1x1x1x1x32xf32>
    %10 = arith.truncf %9 : vector<1x1x1x1x32xf32> to vector<1x1x1x1x32xbf16>
    %c0_8 = arith.constant 0 : index
    %c0_9 = arith.constant 0 : index
    %c0_10 = arith.constant 0 : index
    %c0_11 = arith.constant 0 : index
    %c0_12 = arith.constant 0 : index
    %11 = vector.load %arg6[%c0_8, %c0_9, %c0_10, %c0_11, %c0_12] : memref<1x1x1x1x32xbf16, #tpu.memory_space<vmem>>, vector<1x1x1x1x32xbf16>
    tpu.vector_store %arg6[%c0_8, %c0_9, %c0_10, %c0_11, %c0_12], %10 {strides = array<i32>} : memref<1x1x1x1x32xbf16, #tpu.memory_space<vmem>>, vector<1x1x1x1x32xbf16>,
    return
  }
  func.func @transform_0(%arg0: i32, %arg1: i32, %arg2: i32) -> (i32, i32, i32, i32, i32) {
    %c0_i32 = arith.constant 0 : i32
    %c0_i32_0 = arith.constant 0 : i32
    %c0_i32_1 = arith.constant 0 : i32
    return %arg0, %arg1, %arg2, %c0_i32, %c0_i32_0 : i32, i32, i32, i32, i32
  }
  func.func @transform_1(%arg0: i32, %arg1: i32, %arg2: i32) -> (i32, i32) {
    %c0_i32 = arith.constant 0 : i32
    %c0_i32_0 = arith.constant 0 : i32
    %c0_i32_1 = arith.constant 0 : i32
    return %c0_i32, %c0_i32_0 : i32, i32
  }
  func.func @transform_2(%arg0: i32, %arg1: i32, %arg2: i32) -> (i32, i32) {
    %c0_i32 = arith.constant 0 : i32
    %c0_i32_0 = arith.constant 0 : i32
    %c0_i32_1 = arith.constant 0 : i32
    return %c0_i32, %c0_i32_0 : i32, i32
  }
  func.func @transform_3(%arg0: i32, %arg1: i32, %arg2: i32) -> (i32, i32, i32, i32, i32) {
    %c0_i32 = arith.constant 0 : i32
    %c0_i32_0 = arith.constant 0 : i32
    %c0_i32_1 = arith.constant 0 : i32
    return %arg0, %arg1, %arg2, %c0_i32, %c0_i32_0 : i32, i32, i32, i32, i32
  }
}

module attributes {stable_mosaic.version = 11 : i64} {
  func.func @_conv_tap_bn_stats_kernel(%arg0: i32, %arg1: memref<1x4x4x32xbf16, #tpu.memory_space<vmem>>, %arg2: memref<4x4x32x16xbf16, #tpu.memory_space<vmem>>, %arg3: memref<1x4x2x2x16xbf16, #tpu.memory_space<vmem>>, %arg4: memref<1x2x16xf32, #tpu.memory_space<vmem>>) attributes {dimension_semantics = [#tpu.dimension_semantics<parallel>], iteration_bounds = array<i64: 2>, scalar_prefetch = 0 : i64, scratch_operands = 0 : i64, tpu.core_type = #tpu.core_type<tc>, window_params = [{transform_indices = @transform_0, window_bounds = array<i64: 1, 4, 4, 32>}, {pipeline_mode = #tpu.pipeline_mode<synchronous>, transform_indices = @transform_1, window_bounds = array<i64: 4, 4, 32, 16>}, {transform_indices = @transform_2, window_bounds = array<i64: 1, 4, 2, 2, 16>}, {transform_indices = @transform_3, window_bounds = array<i64: 1, 2, 16>}]} {
    %cst = arith.constant 0.000000e+00 : f32
    %0 = vector.broadcast %cst : f32 to vector<1x16xf32>
    %cst_0 = arith.constant 0.000000e+00 : f32
    %1 = vector.broadcast %cst_0 : f32 to vector<1x16xf32>
    %c0_i32 = arith.constant 0 : i32
    %c2_i32 = arith.constant 2 : i32
    %2 = arith.addi %c0_i32, %c2_i32 : i32
    %c1_i32 = arith.constant 1 : i32
    %3:2 = scf.for %arg5 = %c0_i32 to %2 step %c1_i32 iter_args(%arg6 = %0, %arg7 = %1) -> (vector<1x16xf32>, vector<1x16xf32>)  : i32 {
      %cst_18 = arith.constant 0.000000e+00 : f32
      %16 = vector.broadcast %cst_18 : f32 to vector<2x16xf32>
      %c1_i32_19 = arith.constant 1 : i32
      %17 = arith.addi %arg5, %c1_i32_19 : i32
      %c0_20 = arith.constant 0 : index
      %18 = arith.index_cast %17 : i32 to index
      %c1_21 = arith.constant 1 : index
      %c0_22 = arith.constant 0 : index
      %19 = vector.load %arg1[%c0_20, %18, %c1_21, %c0_22] : memref<1x4x4x32xbf16, #tpu.memory_space<vmem>>, vector<1x1x2x32xbf16>
      %20 = vector.shape_cast %19 : vector<1x1x2x32xbf16> to vector<1x2x32xbf16>
      %21 = vector.shape_cast %20 : vector<1x2x32xbf16> to vector<2x32xbf16>
      %c0_23 = arith.constant 0 : index
      %c0_24 = arith.constant 0 : index
      %c0_25 = arith.constant 0 : index
      %c0_26 = arith.constant 0 : index
      %22 = vector.load %arg2[%c0_23, %c0_24, %c0_25, %c0_26] : memref<4x4x32x16xbf16, #tpu.memory_space<vmem>>, vector<1x1x32x16xbf16>
      %23 = vector.shape_cast %22 : vector<1x1x32x16xbf16> to vector<32x16xbf16>
      %cst_27 = arith.constant dense<0.000000e+00> : vector<2x16xf32>
      %24 = tpu.matmul %21, %23, %cst_27 {dimension_numbers = #tpu.dot_dimension_numbers<[1], [0], [0], [1], [0, 0, 1, 1], [], []>} : vector<2x32xbf16>, vector<32x16xbf16>, vector<2x16xf32> -> vector<2x16xf32>
      %25 = arith.addf %16, %24 : vector<2x16xf32>
      %c1_i32_28 = arith.constant 1 : i32
      %26 = arith.addi %arg5, %c1_i32_28 : i32
      %c0_29 = arith.constant 0 : index
      %27 = arith.index_cast %26 : i32 to index
      %c0_30 = arith.constant 0 : index
      %c0_31 = arith.constant 0 : index
      %28 = vector.load %arg1[%c0_29, %27, %c0_30, %c0_31] : memref<1x4x4x32xbf16, #tpu.memory_space<vmem>>, vector<1x1x2x32xbf16>
      %29 = vector.shape_cast %28 : vector<1x1x2x32xbf16> to vector<1x2x32xbf16>
      %30 = vector.shape_cast %29 : vector<1x2x32xbf16> to vector<2x32xbf16>
      %c0_32 = arith.constant 0 : index
      %c1_33 = arith.constant 1 : index
      %c0_34 = arith.constant 0 : index
      %c0_35 = arith.constant 0 : index
      %31 = vector.load %arg2[%c0_32, %c1_33, %c0_34, %c0_35] : memref<4x4x32x16xbf16, #tpu.memory_space<vmem>>, vector<1x1x32x16xbf16>
      %32 = vector.shape_cast %31 : vector<1x1x32x16xbf16> to vector<32x16xbf16>
      %cst_36 = arith.constant dense<0.000000e+00> : vector<2x16xf32>
      %33 = tpu.matmul %30, %32, %cst_36 {dimension_numbers = #tpu.dot_dimension_numbers<[1], [0], [0], [1], [0, 0, 1, 1], [], []>} : vector<2x32xbf16>, vector<32x16xbf16>, vector<2x16xf32> -> vector<2x16xf32>
      %34 = arith.addf %25, %33 : vector<2x16xf32>
      %c0_i32_37 = arith.constant 0 : i32
      %35 = arith.addi %arg5, %c0_i32_37 : i32
      %c0_38 = arith.constant 0 : index
      %36 = arith.index_cast %35 : i32 to index
      %c1_39 = arith.constant 1 : index
      %c0_40 = arith.constant 0 : index
      %37 = vector.load %arg1[%c0_38, %36, %c1_39, %c0_40] : memref<1x4x4x32xbf16, #tpu.memory_space<vmem>>, vector<1x1x2x32xbf16>
      %38 = vector.shape_cast %37 : vector<1x1x2x32xbf16> to vector<1x2x32xbf16>
      %39 = vector.shape_cast %38 : vector<1x2x32xbf16> to vector<2x32xbf16>
      %c0_41 = arith.constant 0 : index
      %c2 = arith.constant 2 : index
      %c0_42 = arith.constant 0 : index
      %c0_43 = arith.constant 0 : index
      %40 = vector.load %arg2[%c0_41, %c2, %c0_42, %c0_43] : memref<4x4x32x16xbf16, #tpu.memory_space<vmem>>, vector<1x1x32x16xbf16>
      %41 = vector.shape_cast %40 : vector<1x1x32x16xbf16> to vector<32x16xbf16>
      %cst_44 = arith.constant dense<0.000000e+00> : vector<2x16xf32>
      %42 = tpu.matmul %39, %41, %cst_44 {dimension_numbers = #tpu.dot_dimension_numbers<[1], [0], [0], [1], [0, 0, 1, 1], [], []>} : vector<2x32xbf16>, vector<32x16xbf16>, vector<2x16xf32> -> vector<2x16xf32>
      %43 = arith.addf %34, %42 : vector<2x16xf32>
      %c0_i32_45 = arith.constant 0 : i32
      %44 = arith.addi %arg5, %c0_i32_45 : i32
      %c0_46 = arith.constant 0 : index
      %45 = arith.index_cast %44 : i32 to index
      %c0_47 = arith.constant 0 : index
      %c0_48 = arith.constant 0 : index
      %46 = vector.load %arg1[%c0_46, %45, %c0_47, %c0_48] : memref<1x4x4x32xbf16, #tpu.memory_space<vmem>>, vector<1x1x2x32xbf16>
      %47 = vector.shape_cast %46 : vector<1x1x2x32xbf16> to vector<1x2x32xbf16>
      %48 = vector.shape_cast %47 : vector<1x2x32xbf16> to vector<2x32xbf16>
      %c0_49 = arith.constant 0 : index
      %c3 = arith.constant 3 : index
      %c0_50 = arith.constant 0 : index
      %c0_51 = arith.constant 0 : index
      %49 = vector.load %arg2[%c0_49, %c3, %c0_50, %c0_51] : memref<4x4x32x16xbf16, #tpu.memory_space<vmem>>, vector<1x1x32x16xbf16>
      %50 = vector.shape_cast %49 : vector<1x1x32x16xbf16> to vector<32x16xbf16>
      %cst_52 = arith.constant dense<0.000000e+00> : vector<2x16xf32>
      %51 = tpu.matmul %48, %50, %cst_52 {dimension_numbers = #tpu.dot_dimension_numbers<[1], [0], [0], [1], [0, 0, 1, 1], [], []>} : vector<2x32xbf16>, vector<32x16xbf16>, vector<2x16xf32> -> vector<2x16xf32>
      %52 = arith.addf %43, %51 : vector<2x16xf32>
      %53 = vector.shape_cast %52 : vector<2x16xf32> to vector<1x2x16xf32>
      %54 = arith.truncf %53 : vector<1x2x16xf32> to vector<1x2x16xbf16>
      %c0_53 = arith.constant 0 : index
      %c0_54 = arith.constant 0 : index
      %55 = arith.index_cast %arg5 : i32 to index
      %c0_55 = arith.constant 0 : index
      %c0_56 = arith.constant 0 : index
      %56 = vector.load %arg3[%c0_53, %c0_54, %55, %c0_55, %c0_56] : memref<1x4x2x2x16xbf16, #tpu.memory_space<vmem>>, vector<1x1x1x2x16xbf16>
      %57 = vector.shape_cast %56 : vector<1x1x1x2x16xbf16> to vector<1x2x16xbf16>
      %58 = vector.shape_cast %54 : vector<1x2x16xbf16> to vector<1x1x1x2x16xbf16>
      tpu.vector_store %arg3[%c0_53, %c0_54, %55, %c0_55, %c0_56], %58 {strides = array<i32>} : memref<1x4x2x2x16xbf16, #tpu.memory_space<vmem>>, vector<1x1x1x2x16xbf16>,
      %cst_57 = arith.constant dense<0.000000e+00> : vector<16xf32>
      %59 = vector.multi_reduction <add>, %52, %cst_57 [0] : vector<2x16xf32> to vector<16xf32>
      %60 = vector.shape_cast %59 : vector<16xf32> to vector<1x16xf32>
      %61 = arith.addf %arg6, %60 : vector<1x16xf32>
      %62 = arith.mulf %52, %52 : vector<2x16xf32>
      %cst_58 = arith.constant dense<0.000000e+00> : vector<16xf32>
      %63 = vector.multi_reduction <add>, %62, %cst_58 [0] : vector<2x16xf32> to vector<16xf32>
      %64 = vector.shape_cast %63 : vector<16xf32> to vector<1x16xf32>
      %65 = arith.addf %arg7, %64 : vector<1x16xf32>
      scf.yield %61, %65 : vector<1x16xf32>, vector<1x16xf32>
    }
    %c2_i32_1 = arith.constant 2 : i32
    %c0_i32_2 = arith.constant 0 : i32
    %c2_i32_3 = arith.constant 2 : i32
    %4 = arith.addi %c0_i32_2, %c2_i32_3 : i32
    %c1_i32_4 = arith.constant 1 : i32
    %5:2 = scf.for %arg5 = %c0_i32_2 to %4 step %c1_i32_4 iter_args(%arg6 = %3#0, %arg7 = %3#1) -> (vector<1x16xf32>, vector<1x16xf32>)  : i32 {
      %cst_18 = arith.constant 0.000000e+00 : f32
      %16 = vector.broadcast %cst_18 : f32 to vector<2x16xf32>
      %c1_i32_19 = arith.constant 1 : i32
      %17 = arith.addi %arg5, %c1_i32_19 : i32
      %c0_20 = arith.constant 0 : index
      %18 = arith.index_cast %17 : i32 to index
      %c2 = arith.constant 2 : index
      %c0_21 = arith.constant 0 : index
      %19 = vector.load %arg1[%c0_20, %18, %c2, %c0_21] : memref<1x4x4x32xbf16, #tpu.memory_space<vmem>>, vector<1x1x2x32xbf16>
      %20 = vector.shape_cast %19 : vector<1x1x2x32xbf16> to vector<1x2x32xbf16>
      %21 = vector.shape_cast %20 : vector<1x2x32xbf16> to vector<2x32xbf16>
      %c1_22 = arith.constant 1 : index
      %c0_23 = arith.constant 0 : index
      %c0_24 = arith.constant 0 : index
      %c0_25 = arith.constant 0 : index
      %22 = vector.load %arg2[%c1_22, %c0_23, %c0_24, %c0_25] : memref<4x4x32x16xbf16, #tpu.memory_space<vmem>>, vector<1x1x32x16xbf16>
      %23 = vector.shape_cast %22 : vector<1x1x32x16xbf16> to vector<32x16xbf16>
      %cst_26 = arith.constant dense<0.000000e+00> : vector<2x16xf32>
      %24 = tpu.matmul %21, %23, %cst_26 {dimension_numbers = #tpu.dot_dimension_numbers<[1], [0], [0], [1], [0, 0, 1, 1], [], []>} : vector<2x32xbf16>, vector<32x16xbf16>, vector<2x16xf32> -> vector<2x16xf32>
      %25 = arith.addf %16, %24 : vector<2x16xf32>
      %c1_i32_27 = arith.constant 1 : i32
      %26 = arith.addi %arg5, %c1_i32_27 : i32
      %c0_28 = arith.constant 0 : index
      %27 = arith.index_cast %26 : i32 to index
      %c1_29 = arith.constant 1 : index
      %c0_30 = arith.constant 0 : index
      %28 = vector.load %arg1[%c0_28, %27, %c1_29, %c0_30] : memref<1x4x4x32xbf16, #tpu.memory_space<vmem>>, vector<1x1x2x32xbf16>
      %29 = vector.shape_cast %28 : vector<1x1x2x32xbf16> to vector<1x2x32xbf16>
      %30 = vector.shape_cast %29 : vector<1x2x32xbf16> to vector<2x32xbf16>
      %c1_31 = arith.constant 1 : index
      %c1_32 = arith.constant 1 : index
      %c0_33 = arith.constant 0 : index
      %c0_34 = arith.constant 0 : index
      %31 = vector.load %arg2[%c1_31, %c1_32, %c0_33, %c0_34] : memref<4x4x32x16xbf16, #tpu.memory_space<vmem>>, vector<1x1x32x16xbf16>
      %32 = vector.shape_cast %31 : vector<1x1x32x16xbf16> to vector<32x16xbf16>
      %cst_35 = arith.constant dense<0.000000e+00> : vector<2x16xf32>
      %33 = tpu.matmul %30, %32, %cst_35 {dimension_numbers = #tpu.dot_dimension_numbers<[1], [0], [0], [1], [0, 0, 1, 1], [], []>} : vector<2x32xbf16>, vector<32x16xbf16>, vector<2x16xf32> -> vector<2x16xf32>
      %34 = arith.addf %25, %33 : vector<2x16xf32>
      %c0_i32_36 = arith.constant 0 : i32
      %35 = arith.addi %arg5, %c0_i32_36 : i32
      %c0_37 = arith.constant 0 : index
      %36 = arith.index_cast %35 : i32 to index
      %c2_38 = arith.constant 2 : index
      %c0_39 = arith.constant 0 : index
      %37 = vector.load %arg1[%c0_37, %36, %c2_38, %c0_39] : memref<1x4x4x32xbf16, #tpu.memory_space<vmem>>, vector<1x1x2x32xbf16>
      %38 = vector.shape_cast %37 : vector<1x1x2x32xbf16> to vector<1x2x32xbf16>
      %39 = vector.shape_cast %38 : vector<1x2x32xbf16> to vector<2x32xbf16>
      %c1_40 = arith.constant 1 : index
      %c2_41 = arith.constant 2 : index
      %c0_42 = arith.constant 0 : index
      %c0_43 = arith.constant 0 : index
      %40 = vector.load %arg2[%c1_40, %c2_41, %c0_42, %c0_43] : memref<4x4x32x16xbf16, #tpu.memory_space<vmem>>, vector<1x1x32x16xbf16>
      %41 = vector.shape_cast %40 : vector<1x1x32x16xbf16> to vector<32x16xbf16>
      %cst_44 = arith.constant dense<0.000000e+00> : vector<2x16xf32>
      %42 = tpu.matmul %39, %41, %cst_44 {dimension_numbers = #tpu.dot_dimension_numbers<[1], [0], [0], [1], [0, 0, 1, 1], [], []>} : vector<2x32xbf16>, vector<32x16xbf16>, vector<2x16xf32> -> vector<2x16xf32>
      %43 = arith.addf %34, %42 : vector<2x16xf32>
      %c0_i32_45 = arith.constant 0 : i32
      %44 = arith.addi %arg5, %c0_i32_45 : i32
      %c0_46 = arith.constant 0 : index
      %45 = arith.index_cast %44 : i32 to index
      %c1_47 = arith.constant 1 : index
      %c0_48 = arith.constant 0 : index
      %46 = vector.load %arg1[%c0_46, %45, %c1_47, %c0_48] : memref<1x4x4x32xbf16, #tpu.memory_space<vmem>>, vector<1x1x2x32xbf16>
      %47 = vector.shape_cast %46 : vector<1x1x2x32xbf16> to vector<1x2x32xbf16>
      %48 = vector.shape_cast %47 : vector<1x2x32xbf16> to vector<2x32xbf16>
      %c1_49 = arith.constant 1 : index
      %c3 = arith.constant 3 : index
      %c0_50 = arith.constant 0 : index
      %c0_51 = arith.constant 0 : index
      %49 = vector.load %arg2[%c1_49, %c3, %c0_50, %c0_51] : memref<4x4x32x16xbf16, #tpu.memory_space<vmem>>, vector<1x1x32x16xbf16>
      %50 = vector.shape_cast %49 : vector<1x1x32x16xbf16> to vector<32x16xbf16>
      %cst_52 = arith.constant dense<0.000000e+00> : vector<2x16xf32>
      %51 = tpu.matmul %48, %50, %cst_52 {dimension_numbers = #tpu.dot_dimension_numbers<[1], [0], [0], [1], [0, 0, 1, 1], [], []>} : vector<2x32xbf16>, vector<32x16xbf16>, vector<2x16xf32> -> vector<2x16xf32>
      %52 = arith.addf %43, %51 : vector<2x16xf32>
      %53 = vector.shape_cast %52 : vector<2x16xf32> to vector<1x2x16xf32>
      %54 = arith.truncf %53 : vector<1x2x16xf32> to vector<1x2x16xbf16>
      %c0_53 = arith.constant 0 : index
      %c1_54 = arith.constant 1 : index
      %55 = arith.index_cast %arg5 : i32 to index
      %c0_55 = arith.constant 0 : index
      %c0_56 = arith.constant 0 : index
      %56 = vector.load %arg3[%c0_53, %c1_54, %55, %c0_55, %c0_56] : memref<1x4x2x2x16xbf16, #tpu.memory_space<vmem>>, vector<1x1x1x2x16xbf16>
      %57 = vector.shape_cast %56 : vector<1x1x1x2x16xbf16> to vector<1x2x16xbf16>
      %58 = vector.shape_cast %54 : vector<1x2x16xbf16> to vector<1x1x1x2x16xbf16>
      tpu.vector_store %arg3[%c0_53, %c1_54, %55, %c0_55, %c0_56], %58 {strides = array<i32>} : memref<1x4x2x2x16xbf16, #tpu.memory_space<vmem>>, vector<1x1x1x2x16xbf16>,
      %cst_57 = arith.constant dense<0.000000e+00> : vector<16xf32>
      %59 = vector.multi_reduction <add>, %52, %cst_57 [0] : vector<2x16xf32> to vector<16xf32>
      %60 = vector.shape_cast %59 : vector<16xf32> to vector<1x16xf32>
      %61 = arith.addf %arg6, %60 : vector<1x16xf32>
      %62 = arith.mulf %52, %52 : vector<2x16xf32>
      %cst_58 = arith.constant dense<0.000000e+00> : vector<16xf32>
      %63 = vector.multi_reduction <add>, %62, %cst_58 [0] : vector<2x16xf32> to vector<16xf32>
      %64 = vector.shape_cast %63 : vector<16xf32> to vector<1x16xf32>
      %65 = arith.addf %arg7, %64 : vector<1x16xf32>
      scf.yield %61, %65 : vector<1x16xf32>, vector<1x16xf32>
    }
    %c2_i32_5 = arith.constant 2 : i32
    %c0_i32_6 = arith.constant 0 : i32
    %c2_i32_7 = arith.constant 2 : i32
    %6 = arith.addi %c0_i32_6, %c2_i32_7 : i32
    %c1_i32_8 = arith.constant 1 : i32
    %7:2 = scf.for %arg5 = %c0_i32_6 to %6 step %c1_i32_8 iter_args(%arg6 = %5#0, %arg7 = %5#1) -> (vector<1x16xf32>, vector<1x16xf32>)  : i32 {
      %cst_18 = arith.constant 0.000000e+00 : f32
      %16 = vector.broadcast %cst_18 : f32 to vector<2x16xf32>
      %c2_i32_19 = arith.constant 2 : i32
      %17 = arith.addi %arg5, %c2_i32_19 : i32
      %c0_20 = arith.constant 0 : index
      %18 = arith.index_cast %17 : i32 to index
      %c1_21 = arith.constant 1 : index
      %c0_22 = arith.constant 0 : index
      %19 = vector.load %arg1[%c0_20, %18, %c1_21, %c0_22] : memref<1x4x4x32xbf16, #tpu.memory_space<vmem>>, vector<1x1x2x32xbf16>
      %20 = vector.shape_cast %19 : vector<1x1x2x32xbf16> to vector<1x2x32xbf16>
      %21 = vector.shape_cast %20 : vector<1x2x32xbf16> to vector<2x32xbf16>
      %c2 = arith.constant 2 : index
      %c0_23 = arith.constant 0 : index
      %c0_24 = arith.constant 0 : index
      %c0_25 = arith.constant 0 : index
      %22 = vector.load %arg2[%c2, %c0_23, %c0_24, %c0_25] : memref<4x4x32x16xbf16, #tpu.memory_space<vmem>>, vector<1x1x32x16xbf16>
      %23 = vector.shape_cast %22 : vector<1x1x32x16xbf16> to vector<32x16xbf16>
      %cst_26 = arith.constant dense<0.000000e+00> : vector<2x16xf32>
      %24 = tpu.matmul %21, %23, %cst_26 {dimension_numbers = #tpu.dot_dimension_numbers<[1], [0], [0], [1], [0, 0, 1, 1], [], []>} : vector<2x32xbf16>, vector<32x16xbf16>, vector<2x16xf32> -> vector<2x16xf32>
      %25 = arith.addf %16, %24 : vector<2x16xf32>
      %c2_i32_27 = arith.constant 2 : i32
      %26 = arith.addi %arg5, %c2_i32_27 : i32
      %c0_28 = arith.constant 0 : index
      %27 = arith.index_cast %26 : i32 to index
      %c0_29 = arith.constant 0 : index
      %c0_30 = arith.constant 0 : index
      %28 = vector.load %arg1[%c0_28, %27, %c0_29, %c0_30] : memref<1x4x4x32xbf16, #tpu.memory_space<vmem>>, vector<1x1x2x32xbf16>
      %29 = vector.shape_cast %28 : vector<1x1x2x32xbf16> to vector<1x2x32xbf16>
      %30 = vector.shape_cast %29 : vector<1x2x32xbf16> to vector<2x32xbf16>
      %c2_31 = arith.constant 2 : index
      %c1_32 = arith.constant 1 : index
      %c0_33 = arith.constant 0 : index
      %c0_34 = arith.constant 0 : index
      %31 = vector.load %arg2[%c2_31, %c1_32, %c0_33, %c0_34] : memref<4x4x32x16xbf16, #tpu.memory_space<vmem>>, vector<1x1x32x16xbf16>
      %32 = vector.shape_cast %31 : vector<1x1x32x16xbf16> to vector<32x16xbf16>
      %cst_35 = arith.constant dense<0.000000e+00> : vector<2x16xf32>
      %33 = tpu.matmul %30, %32, %cst_35 {dimension_numbers = #tpu.dot_dimension_numbers<[1], [0], [0], [1], [0, 0, 1, 1], [], []>} : vector<2x32xbf16>, vector<32x16xbf16>, vector<2x16xf32> -> vector<2x16xf32>
      %34 = arith.addf %25, %33 : vector<2x16xf32>
      %c1_i32_36 = arith.constant 1 : i32
      %35 = arith.addi %arg5, %c1_i32_36 : i32
      %c0_37 = arith.constant 0 : index
      %36 = arith.index_cast %35 : i32 to index
      %c1_38 = arith.constant 1 : index
      %c0_39 = arith.constant 0 : index
      %37 = vector.load %arg1[%c0_37, %36, %c1_38, %c0_39] : memref<1x4x4x32xbf16, #tpu.memory_space<vmem>>, vector<1x1x2x32xbf16>
      %38 = vector.shape_cast %37 : vector<1x1x2x32xbf16> to vector<1x2x32xbf16>
      %39 = vector.shape_cast %38 : vector<1x2x32xbf16> to vector<2x32xbf16>
      %c2_40 = arith.constant 2 : index
      %c2_41 = arith.constant 2 : index
      %c0_42 = arith.constant 0 : index
      %c0_43 = arith.constant 0 : index
      %40 = vector.load %arg2[%c2_40, %c2_41, %c0_42, %c0_43] : memref<4x4x32x16xbf16, #tpu.memory_space<vmem>>, vector<1x1x32x16xbf16>
      %41 = vector.shape_cast %40 : vector<1x1x32x16xbf16> to vector<32x16xbf16>
      %cst_44 = arith.constant dense<0.000000e+00> : vector<2x16xf32>
      %42 = tpu.matmul %39, %41, %cst_44 {dimension_numbers = #tpu.dot_dimension_numbers<[1], [0], [0], [1], [0, 0, 1, 1], [], []>} : vector<2x32xbf16>, vector<32x16xbf16>, vector<2x16xf32> -> vector<2x16xf32>
      %43 = arith.addf %34, %42 : vector<2x16xf32>
      %c1_i32_45 = arith.constant 1 : i32
      %44 = arith.addi %arg5, %c1_i32_45 : i32
      %c0_46 = arith.constant 0 : index
      %45 = arith.index_cast %44 : i32 to index
      %c0_47 = arith.constant 0 : index
      %c0_48 = arith.constant 0 : index
      %46 = vector.load %arg1[%c0_46, %45, %c0_47, %c0_48] : memref<1x4x4x32xbf16, #tpu.memory_space<vmem>>, vector<1x1x2x32xbf16>
      %47 = vector.shape_cast %46 : vector<1x1x2x32xbf16> to vector<1x2x32xbf16>
      %48 = vector.shape_cast %47 : vector<1x2x32xbf16> to vector<2x32xbf16>
      %c2_49 = arith.constant 2 : index
      %c3 = arith.constant 3 : index
      %c0_50 = arith.constant 0 : index
      %c0_51 = arith.constant 0 : index
      %49 = vector.load %arg2[%c2_49, %c3, %c0_50, %c0_51] : memref<4x4x32x16xbf16, #tpu.memory_space<vmem>>, vector<1x1x32x16xbf16>
      %50 = vector.shape_cast %49 : vector<1x1x32x16xbf16> to vector<32x16xbf16>
      %cst_52 = arith.constant dense<0.000000e+00> : vector<2x16xf32>
      %51 = tpu.matmul %48, %50, %cst_52 {dimension_numbers = #tpu.dot_dimension_numbers<[1], [0], [0], [1], [0, 0, 1, 1], [], []>} : vector<2x32xbf16>, vector<32x16xbf16>, vector<2x16xf32> -> vector<2x16xf32>
      %52 = arith.addf %43, %51 : vector<2x16xf32>
      %53 = vector.shape_cast %52 : vector<2x16xf32> to vector<1x2x16xf32>
      %54 = arith.truncf %53 : vector<1x2x16xf32> to vector<1x2x16xbf16>
      %c0_53 = arith.constant 0 : index
      %c2_54 = arith.constant 2 : index
      %55 = arith.index_cast %arg5 : i32 to index
      %c0_55 = arith.constant 0 : index
      %c0_56 = arith.constant 0 : index
      %56 = vector.load %arg3[%c0_53, %c2_54, %55, %c0_55, %c0_56] : memref<1x4x2x2x16xbf16, #tpu.memory_space<vmem>>, vector<1x1x1x2x16xbf16>
      %57 = vector.shape_cast %56 : vector<1x1x1x2x16xbf16> to vector<1x2x16xbf16>
      %58 = vector.shape_cast %54 : vector<1x2x16xbf16> to vector<1x1x1x2x16xbf16>
      tpu.vector_store %arg3[%c0_53, %c2_54, %55, %c0_55, %c0_56], %58 {strides = array<i32>} : memref<1x4x2x2x16xbf16, #tpu.memory_space<vmem>>, vector<1x1x1x2x16xbf16>,
      %cst_57 = arith.constant dense<0.000000e+00> : vector<16xf32>
      %59 = vector.multi_reduction <add>, %52, %cst_57 [0] : vector<2x16xf32> to vector<16xf32>
      %60 = vector.shape_cast %59 : vector<16xf32> to vector<1x16xf32>
      %61 = arith.addf %arg6, %60 : vector<1x16xf32>
      %62 = arith.mulf %52, %52 : vector<2x16xf32>
      %cst_58 = arith.constant dense<0.000000e+00> : vector<16xf32>
      %63 = vector.multi_reduction <add>, %62, %cst_58 [0] : vector<2x16xf32> to vector<16xf32>
      %64 = vector.shape_cast %63 : vector<16xf32> to vector<1x16xf32>
      %65 = arith.addf %arg7, %64 : vector<1x16xf32>
      scf.yield %61, %65 : vector<1x16xf32>, vector<1x16xf32>
    }
    %c2_i32_9 = arith.constant 2 : i32
    %c0_i32_10 = arith.constant 0 : i32
    %c2_i32_11 = arith.constant 2 : i32
    %8 = arith.addi %c0_i32_10, %c2_i32_11 : i32
    %c1_i32_12 = arith.constant 1 : i32
    %9:2 = scf.for %arg5 = %c0_i32_10 to %8 step %c1_i32_12 iter_args(%arg6 = %7#0, %arg7 = %7#1) -> (vector<1x16xf32>, vector<1x16xf32>)  : i32 {
      %cst_18 = arith.constant 0.000000e+00 : f32
      %16 = vector.broadcast %cst_18 : f32 to vector<2x16xf32>
      %c2_i32_19 = arith.constant 2 : i32
      %17 = arith.addi %arg5, %c2_i32_19 : i32
      %c0_20 = arith.constant 0 : index
      %18 = arith.index_cast %17 : i32 to index
      %c2 = arith.constant 2 : index
      %c0_21 = arith.constant 0 : index
      %19 = vector.load %arg1[%c0_20, %18, %c2, %c0_21] : memref<1x4x4x32xbf16, #tpu.memory_space<vmem>>, vector<1x1x2x32xbf16>
      %20 = vector.shape_cast %19 : vector<1x1x2x32xbf16> to vector<1x2x32xbf16>
      %21 = vector.shape_cast %20 : vector<1x2x32xbf16> to vector<2x32xbf16>
      %c3 = arith.constant 3 : index
      %c0_22 = arith.constant 0 : index
      %c0_23 = arith.constant 0 : index
      %c0_24 = arith.constant 0 : index
      %22 = vector.load %arg2[%c3, %c0_22, %c0_23, %c0_24] : memref<4x4x32x16xbf16, #tpu.memory_space<vmem>>, vector<1x1x32x16xbf16>
      %23 = vector.shape_cast %22 : vector<1x1x32x16xbf16> to vector<32x16xbf16>
      %cst_25 = arith.constant dense<0.000000e+00> : vector<2x16xf32>
      %24 = tpu.matmul %21, %23, %cst_25 {dimension_numbers = #tpu.dot_dimension_numbers<[1], [0], [0], [1], [0, 0, 1, 1], [], []>} : vector<2x32xbf16>, vector<32x16xbf16>, vector<2x16xf32> -> vector<2x16xf32>
      %25 = arith.addf %16, %24 : vector<2x16xf32>
      %c2_i32_26 = arith.constant 2 : i32
      %26 = arith.addi %arg5, %c2_i32_26 : i32
      %c0_27 = arith.constant 0 : index
      %27 = arith.index_cast %26 : i32 to index
      %c1_28 = arith.constant 1 : index
      %c0_29 = arith.constant 0 : index
      %28 = vector.load %arg1[%c0_27, %27, %c1_28, %c0_29] : memref<1x4x4x32xbf16, #tpu.memory_space<vmem>>, vector<1x1x2x32xbf16>
      %29 = vector.shape_cast %28 : vector<1x1x2x32xbf16> to vector<1x2x32xbf16>
      %30 = vector.shape_cast %29 : vector<1x2x32xbf16> to vector<2x32xbf16>
      %c3_30 = arith.constant 3 : index
      %c1_31 = arith.constant 1 : index
      %c0_32 = arith.constant 0 : index
      %c0_33 = arith.constant 0 : index
      %31 = vector.load %arg2[%c3_30, %c1_31, %c0_32, %c0_33] : memref<4x4x32x16xbf16, #tpu.memory_space<vmem>>, vector<1x1x32x16xbf16>
      %32 = vector.shape_cast %31 : vector<1x1x32x16xbf16> to vector<32x16xbf16>
      %cst_34 = arith.constant dense<0.000000e+00> : vector<2x16xf32>
      %33 = tpu.matmul %30, %32, %cst_34 {dimension_numbers = #tpu.dot_dimension_numbers<[1], [0], [0], [1], [0, 0, 1, 1], [], []>} : vector<2x32xbf16>, vector<32x16xbf16>, vector<2x16xf32> -> vector<2x16xf32>
      %34 = arith.addf %25, %33 : vector<2x16xf32>
      %c1_i32_35 = arith.constant 1 : i32
      %35 = arith.addi %arg5, %c1_i32_35 : i32
      %c0_36 = arith.constant 0 : index
      %36 = arith.index_cast %35 : i32 to index
      %c2_37 = arith.constant 2 : index
      %c0_38 = arith.constant 0 : index
      %37 = vector.load %arg1[%c0_36, %36, %c2_37, %c0_38] : memref<1x4x4x32xbf16, #tpu.memory_space<vmem>>, vector<1x1x2x32xbf16>
      %38 = vector.shape_cast %37 : vector<1x1x2x32xbf16> to vector<1x2x32xbf16>
      %39 = vector.shape_cast %38 : vector<1x2x32xbf16> to vector<2x32xbf16>
      %c3_39 = arith.constant 3 : index
      %c2_40 = arith.constant 2 : index
      %c0_41 = arith.constant 0 : index
      %c0_42 = arith.constant 0 : index
      %40 = vector.load %arg2[%c3_39, %c2_40, %c0_41, %c0_42] : memref<4x4x32x16xbf16, #tpu.memory_space<vmem>>, vector<1x1x32x16xbf16>
      %41 = vector.shape_cast %40 : vector<1x1x32x16xbf16> to vector<32x16xbf16>
      %cst_43 = arith.constant dense<0.000000e+00> : vector<2x16xf32>
      %42 = tpu.matmul %39, %41, %cst_43 {dimension_numbers = #tpu.dot_dimension_numbers<[1], [0], [0], [1], [0, 0, 1, 1], [], []>} : vector<2x32xbf16>, vector<32x16xbf16>, vector<2x16xf32> -> vector<2x16xf32>
      %43 = arith.addf %34, %42 : vector<2x16xf32>
      %c1_i32_44 = arith.constant 1 : i32
      %44 = arith.addi %arg5, %c1_i32_44 : i32
      %c0_45 = arith.constant 0 : index
      %45 = arith.index_cast %44 : i32 to index
      %c1_46 = arith.constant 1 : index
      %c0_47 = arith.constant 0 : index
      %46 = vector.load %arg1[%c0_45, %45, %c1_46, %c0_47] : memref<1x4x4x32xbf16, #tpu.memory_space<vmem>>, vector<1x1x2x32xbf16>
      %47 = vector.shape_cast %46 : vector<1x1x2x32xbf16> to vector<1x2x32xbf16>
      %48 = vector.shape_cast %47 : vector<1x2x32xbf16> to vector<2x32xbf16>
      %c3_48 = arith.constant 3 : index
      %c3_49 = arith.constant 3 : index
      %c0_50 = arith.constant 0 : index
      %c0_51 = arith.constant 0 : index
      %49 = vector.load %arg2[%c3_48, %c3_49, %c0_50, %c0_51] : memref<4x4x32x16xbf16, #tpu.memory_space<vmem>>, vector<1x1x32x16xbf16>
      %50 = vector.shape_cast %49 : vector<1x1x32x16xbf16> to vector<32x16xbf16>
      %cst_52 = arith.constant dense<0.000000e+00> : vector<2x16xf32>
      %51 = tpu.matmul %48, %50, %cst_52 {dimension_numbers = #tpu.dot_dimension_numbers<[1], [0], [0], [1], [0, 0, 1, 1], [], []>} : vector<2x32xbf16>, vector<32x16xbf16>, vector<2x16xf32> -> vector<2x16xf32>
      %52 = arith.addf %43, %51 : vector<2x16xf32>
      %53 = vector.shape_cast %52 : vector<2x16xf32> to vector<1x2x16xf32>
      %54 = arith.truncf %53 : vector<1x2x16xf32> to vector<1x2x16xbf16>
      %c0_53 = arith.constant 0 : index
      %c3_54 = arith.constant 3 : index
      %55 = arith.index_cast %arg5 : i32 to index
      %c0_55 = arith.constant 0 : index
      %c0_56 = arith.constant 0 : index
      %56 = vector.load %arg3[%c0_53, %c3_54, %55, %c0_55, %c0_56] : memref<1x4x2x2x16xbf16, #tpu.memory_space<vmem>>, vector<1x1x1x2x16xbf16>
      %57 = vector.shape_cast %56 : vector<1x1x1x2x16xbf16> to vector<1x2x16xbf16>
      %58 = vector.shape_cast %54 : vector<1x2x16xbf16> to vector<1x1x1x2x16xbf16>
      tpu.vector_store %arg3[%c0_53, %c3_54, %55, %c0_55, %c0_56], %58 {strides = array<i32>} : memref<1x4x2x2x16xbf16, #tpu.memory_space<vmem>>, vector<1x1x1x2x16xbf16>,
      %cst_57 = arith.constant dense<0.000000e+00> : vector<16xf32>
      %59 = vector.multi_reduction <add>, %52, %cst_57 [0] : vector<2x16xf32> to vector<16xf32>
      %60 = vector.shape_cast %59 : vector<16xf32> to vector<1x16xf32>
      %61 = arith.addf %arg6, %60 : vector<1x16xf32>
      %62 = arith.mulf %52, %52 : vector<2x16xf32>
      %cst_58 = arith.constant dense<0.000000e+00> : vector<16xf32>
      %63 = vector.multi_reduction <add>, %62, %cst_58 [0] : vector<2x16xf32> to vector<16xf32>
      %64 = vector.shape_cast %63 : vector<16xf32> to vector<1x16xf32>
      %65 = arith.addf %arg7, %64 : vector<1x16xf32>
      scf.yield %61, %65 : vector<1x16xf32>, vector<1x16xf32>
    }
    %c2_i32_13 = arith.constant 2 : i32
    %c0 = arith.constant 0 : index
    %c0_14 = arith.constant 0 : index
    %c0_15 = arith.constant 0 : index
    %10 = vector.load %arg4[%c0, %c0_14, %c0_15] : memref<1x2x16xf32, #tpu.memory_space<vmem>>, vector<1x1x16xf32>
    %11 = vector.shape_cast %10 : vector<1x1x16xf32> to vector<1x16xf32>
    %12 = vector.shape_cast %9#0 : vector<1x16xf32> to vector<1x1x16xf32>
    tpu.vector_store %arg4[%c0, %c0_14, %c0_15], %12 {strides = array<i32>} : memref<1x2x16xf32, #tpu.memory_space<vmem>>, vector<1x1x16xf32>,
    %c0_16 = arith.constant 0 : index
    %c1 = arith.constant 1 : index
    %c0_17 = arith.constant 0 : index
    %13 = vector.load %arg4[%c0_16, %c1, %c0_17] : memref<1x2x16xf32, #tpu.memory_space<vmem>>, vector<1x1x16xf32>
    %14 = vector.shape_cast %13 : vector<1x1x16xf32> to vector<1x16xf32>
    %15 = vector.shape_cast %9#1 : vector<1x16xf32> to vector<1x1x16xf32>
    tpu.vector_store %arg4[%c0_16, %c1, %c0_17], %15 {strides = array<i32>} : memref<1x2x16xf32, #tpu.memory_space<vmem>>, vector<1x1x16xf32>,
    return
  }
  func.func @transform_0(%arg0: i32) -> (i32, i32, i32, i32) {
    %c0_i32 = arith.constant 0 : i32
    %c0_i32_0 = arith.constant 0 : i32
    %c0_i32_1 = arith.constant 0 : i32
    %c0_i32_2 = arith.constant 0 : i32
    return %arg0, %c0_i32, %c0_i32_0, %c0_i32_1 : i32, i32, i32, i32
  }
  func.func @transform_1(%arg0: i32) -> (i32, i32, i32, i32) {
    %c0_i32 = arith.constant 0 : i32
    %c0_i32_0 = arith.constant 0 : i32
    %c0_i32_1 = arith.constant 0 : i32
    %c0_i32_2 = arith.constant 0 : i32
    %c0_i32_3 = arith.constant 0 : i32
    return %c0_i32, %c0_i32_0, %c0_i32_1, %c0_i32_2 : i32, i32, i32, i32
  }
  func.func @transform_2(%arg0: i32) -> (i32, i32, i32, i32, i32) {
    %c0_i32 = arith.constant 0 : i32
    %c0_i32_0 = arith.constant 0 : i32
    %c0_i32_1 = arith.constant 0 : i32
    %c0_i32_2 = arith.constant 0 : i32
    %c0_i32_3 = arith.constant 0 : i32
    return %arg0, %c0_i32, %c0_i32_0, %c0_i32_1, %c0_i32_2 : i32, i32, i32, i32, i32
  }
  func.func @transform_3(%arg0: i32) -> (i32, i32, i32) {
    %c0_i32 = arith.constant 0 : i32
    %c0_i32_0 = arith.constant 0 : i32
    %c0_i32_1 = arith.constant 0 : i32
    return %arg0, %c0_i32, %c0_i32_0 : i32, i32, i32
  }
}

module attributes {stable_mosaic.version = 11 : i64} {
  func.func @_bn_act_kernel(%arg0: i32, %arg1: i32, %arg2: i32, %arg3: memref<1x1x2x2x16xbf16, #tpu.memory_space<vmem>>, %arg4: memref<1x16xf32, #tpu.memory_space<vmem>>, %arg5: memref<1x16xf32, #tpu.memory_space<vmem>>, %arg6: memref<1x1x2x2x16xbf16, #tpu.memory_space<vmem>>) attributes {dimension_semantics = [#tpu.dimension_semantics<parallel>, #tpu.dimension_semantics<parallel>, #tpu.dimension_semantics<parallel>], iteration_bounds = array<i64: 2, 4, 1>, scalar_prefetch = 0 : i64, scratch_operands = 0 : i64, tpu.core_type = #tpu.core_type<tc>, window_params = [{transform_indices = @transform_0, window_bounds = array<i64: 1, 1, 2, 2, 16>}, {pipeline_mode = #tpu.pipeline_mode<synchronous>, transform_indices = @transform_1, window_bounds = array<i64: 1, 16>}, {pipeline_mode = #tpu.pipeline_mode<synchronous>, transform_indices = @transform_2, window_bounds = array<i64: 1, 16>}, {transform_indices = @transform_3, window_bounds = array<i64: 1, 1, 2, 2, 16>}]} {
    %c0 = arith.constant 0 : index
    %c0_0 = arith.constant 0 : index
    %c0_1 = arith.constant 0 : index
    %c0_2 = arith.constant 0 : index
    %c0_3 = arith.constant 0 : index
    %0 = vector.load %arg3[%c0, %c0_0, %c0_1, %c0_2, %c0_3] : memref<1x1x2x2x16xbf16, #tpu.memory_space<vmem>>, vector<1x1x2x2x16xbf16>
    %1 = arith.extf %0 : vector<1x1x2x2x16xbf16> to vector<1x1x2x2x16xf32>
    %c0_4 = arith.constant 0 : index
    %c0_5 = arith.constant 0 : index
    %2 = vector.load %arg4[%c0_4, %c0_5] : memref<1x16xf32, #tpu.memory_space<vmem>>, vector<1x16xf32>
    %3 = vector.shape_cast %2 : vector<1x16xf32> to vector<1x1x1x1x16xf32>
    %4 = vector.broadcast %3 : vector<1x1x1x1x16xf32> to vector<1x1x2x2x16xf32>
    %5 = arith.mulf %1, %4 : vector<1x1x2x2x16xf32>
    %c0_6 = arith.constant 0 : index
    %c0_7 = arith.constant 0 : index
    %6 = vector.load %arg5[%c0_6, %c0_7] : memref<1x16xf32, #tpu.memory_space<vmem>>, vector<1x16xf32>
    %7 = vector.shape_cast %6 : vector<1x16xf32> to vector<1x1x1x1x16xf32>
    %8 = vector.broadcast %7 : vector<1x1x1x1x16xf32> to vector<1x1x2x2x16xf32>
    %9 = arith.addf %5, %8 : vector<1x1x2x2x16xf32>
    %cst = arith.constant 0.000000e+00 : f32
    %10 = vector.broadcast %cst : f32 to vector<1x1x2x2x16xf32>
    %11 = arith.maximumf %9, %10 : vector<1x1x2x2x16xf32>
    %12 = arith.truncf %11 : vector<1x1x2x2x16xf32> to vector<1x1x2x2x16xbf16>
    %c0_8 = arith.constant 0 : index
    %c0_9 = arith.constant 0 : index
    %c0_10 = arith.constant 0 : index
    %c0_11 = arith.constant 0 : index
    %c0_12 = arith.constant 0 : index
    %13 = vector.load %arg6[%c0_8, %c0_9, %c0_10, %c0_11, %c0_12] : memref<1x1x2x2x16xbf16, #tpu.memory_space<vmem>>, vector<1x1x2x2x16xbf16>
    tpu.vector_store %arg6[%c0_8, %c0_9, %c0_10, %c0_11, %c0_12], %12 {strides = array<i32>} : memref<1x1x2x2x16xbf16, #tpu.memory_space<vmem>>, vector<1x1x2x2x16xbf16>,
    return
  }
  func.func @transform_0(%arg0: i32, %arg1: i32, %arg2: i32) -> (i32, i32, i32, i32, i32) {
    %c0_i32 = arith.constant 0 : i32
    %c0_i32_0 = arith.constant 0 : i32
    %c0_i32_1 = arith.constant 0 : i32
    return %arg0, %arg1, %arg2, %c0_i32, %c0_i32_0 : i32, i32, i32, i32, i32
  }
  func.func @transform_1(%arg0: i32, %arg1: i32, %arg2: i32) -> (i32, i32) {
    %c0_i32 = arith.constant 0 : i32
    %c0_i32_0 = arith.constant 0 : i32
    %c0_i32_1 = arith.constant 0 : i32
    return %c0_i32, %c0_i32_0 : i32, i32
  }
  func.func @transform_2(%arg0: i32, %arg1: i32, %arg2: i32) -> (i32, i32) {
    %c0_i32 = arith.constant 0 : i32
    %c0_i32_0 = arith.constant 0 : i32
    %c0_i32_1 = arith.constant 0 : i32
    return %c0_i32, %c0_i32_0 : i32, i32
  }
  func.func @transform_3(%arg0: i32, %arg1: i32, %arg2: i32) -> (i32, i32, i32, i32, i32) {
    %c0_i32 = arith.constant 0 : i32
    %c0_i32_0 = arith.constant 0 : i32
    %c0_i32_1 = arith.constant 0 : i32
    return %arg0, %arg1, %arg2, %c0_i32, %c0_i32_0 : i32, i32, i32, i32, i32
  }
}

module attributes {stable_mosaic.version = 11 : i64} {
  func.func @_conv_tap_bn_stats_kernel(%arg0: i32, %arg1: memref<1x6x6x16xbf16, #tpu.memory_space<vmem>>, %arg2: memref<4x4x16x8xbf16, #tpu.memory_space<vmem>>, %arg3: memref<1x4x4x4x8xbf16, #tpu.memory_space<vmem>>, %arg4: memref<1x2x8xf32, #tpu.memory_space<vmem>>) attributes {dimension_semantics = [#tpu.dimension_semantics<parallel>], iteration_bounds = array<i64: 2>, scalar_prefetch = 0 : i64, scratch_operands = 0 : i64, tpu.core_type = #tpu.core_type<tc>, window_params = [{transform_indices = @transform_0, window_bounds = array<i64: 1, 6, 6, 16>}, {pipeline_mode = #tpu.pipeline_mode<synchronous>, transform_indices = @transform_1, window_bounds = array<i64: 4, 4, 16, 8>}, {transform_indices = @transform_2, window_bounds = array<i64: 1, 4, 4, 4, 8>}, {transform_indices = @transform_3, window_bounds = array<i64: 1, 2, 8>}]} {
    %cst = arith.constant 0.000000e+00 : f32
    %0 = vector.broadcast %cst : f32 to vector<1x8xf32>
    %cst_0 = arith.constant 0.000000e+00 : f32
    %1 = vector.broadcast %cst_0 : f32 to vector<1x8xf32>
    %c0_i32 = arith.constant 0 : i32
    %c4_i32 = arith.constant 4 : i32
    %2 = arith.addi %c0_i32, %c4_i32 : i32
    %c1_i32 = arith.constant 1 : i32
    %3:2 = scf.for %arg5 = %c0_i32 to %2 step %c1_i32 iter_args(%arg6 = %0, %arg7 = %1) -> (vector<1x8xf32>, vector<1x8xf32>)  : i32 {
      %cst_18 = arith.constant 0.000000e+00 : f32
      %16 = vector.broadcast %cst_18 : f32 to vector<4x8xf32>
      %c1_i32_19 = arith.constant 1 : i32
      %17 = arith.addi %arg5, %c1_i32_19 : i32
      %c0_20 = arith.constant 0 : index
      %18 = arith.index_cast %17 : i32 to index
      %c1_21 = arith.constant 1 : index
      %c0_22 = arith.constant 0 : index
      %19 = vector.load %arg1[%c0_20, %18, %c1_21, %c0_22] : memref<1x6x6x16xbf16, #tpu.memory_space<vmem>>, vector<1x1x4x16xbf16>
      %20 = vector.shape_cast %19 : vector<1x1x4x16xbf16> to vector<1x4x16xbf16>
      %21 = vector.shape_cast %20 : vector<1x4x16xbf16> to vector<4x16xbf16>
      %c0_23 = arith.constant 0 : index
      %c0_24 = arith.constant 0 : index
      %c0_25 = arith.constant 0 : index
      %c0_26 = arith.constant 0 : index
      %22 = vector.load %arg2[%c0_23, %c0_24, %c0_25, %c0_26] : memref<4x4x16x8xbf16, #tpu.memory_space<vmem>>, vector<1x1x16x8xbf16>
      %23 = vector.shape_cast %22 : vector<1x1x16x8xbf16> to vector<16x8xbf16>
      %cst_27 = arith.constant dense<0.000000e+00> : vector<4x8xf32>
      %24 = tpu.matmul %21, %23, %cst_27 {dimension_numbers = #tpu.dot_dimension_numbers<[1], [0], [0], [1], [0, 0, 1, 1], [], []>} : vector<4x16xbf16>, vector<16x8xbf16>, vector<4x8xf32> -> vector<4x8xf32>
      %25 = arith.addf %16, %24 : vector<4x8xf32>
      %c1_i32_28 = arith.constant 1 : i32
      %26 = arith.addi %arg5, %c1_i32_28 : i32
      %c0_29 = arith.constant 0 : index
      %27 = arith.index_cast %26 : i32 to index
      %c0_30 = arith.constant 0 : index
      %c0_31 = arith.constant 0 : index
      %28 = vector.load %arg1[%c0_29, %27, %c0_30, %c0_31] : memref<1x6x6x16xbf16, #tpu.memory_space<vmem>>, vector<1x1x4x16xbf16>
      %29 = vector.shape_cast %28 : vector<1x1x4x16xbf16> to vector<1x4x16xbf16>
      %30 = vector.shape_cast %29 : vector<1x4x16xbf16> to vector<4x16xbf16>
      %c0_32 = arith.constant 0 : index
      %c1_33 = arith.constant 1 : index
      %c0_34 = arith.constant 0 : index
      %c0_35 = arith.constant 0 : index
      %31 = vector.load %arg2[%c0_32, %c1_33, %c0_34, %c0_35] : memref<4x4x16x8xbf16, #tpu.memory_space<vmem>>, vector<1x1x16x8xbf16>
      %32 = vector.shape_cast %31 : vector<1x1x16x8xbf16> to vector<16x8xbf16>
      %cst_36 = arith.constant dense<0.000000e+00> : vector<4x8xf32>
      %33 = tpu.matmul %30, %32, %cst_36 {dimension_numbers = #tpu.dot_dimension_numbers<[1], [0], [0], [1], [0, 0, 1, 1], [], []>} : vector<4x16xbf16>, vector<16x8xbf16>, vector<4x8xf32> -> vector<4x8xf32>
      %34 = arith.addf %25, %33 : vector<4x8xf32>
      %c0_i32_37 = arith.constant 0 : i32
      %35 = arith.addi %arg5, %c0_i32_37 : i32
      %c0_38 = arith.constant 0 : index
      %36 = arith.index_cast %35 : i32 to index
      %c1_39 = arith.constant 1 : index
      %c0_40 = arith.constant 0 : index
      %37 = vector.load %arg1[%c0_38, %36, %c1_39, %c0_40] : memref<1x6x6x16xbf16, #tpu.memory_space<vmem>>, vector<1x1x4x16xbf16>
      %38 = vector.shape_cast %37 : vector<1x1x4x16xbf16> to vector<1x4x16xbf16>
      %39 = vector.shape_cast %38 : vector<1x4x16xbf16> to vector<4x16xbf16>
      %c0_41 = arith.constant 0 : index
      %c2 = arith.constant 2 : index
      %c0_42 = arith.constant 0 : index
      %c0_43 = arith.constant 0 : index
      %40 = vector.load %arg2[%c0_41, %c2, %c0_42, %c0_43] : memref<4x4x16x8xbf16, #tpu.memory_space<vmem>>, vector<1x1x16x8xbf16>
      %41 = vector.shape_cast %40 : vector<1x1x16x8xbf16> to vector<16x8xbf16>
      %cst_44 = arith.constant dense<0.000000e+00> : vector<4x8xf32>
      %42 = tpu.matmul %39, %41, %cst_44 {dimension_numbers = #tpu.dot_dimension_numbers<[1], [0], [0], [1], [0, 0, 1, 1], [], []>} : vector<4x16xbf16>, vector<16x8xbf16>, vector<4x8xf32> -> vector<4x8xf32>
      %43 = arith.addf %34, %42 : vector<4x8xf32>
      %c0_i32_45 = arith.constant 0 : i32
      %44 = arith.addi %arg5, %c0_i32_45 : i32
      %c0_46 = arith.constant 0 : index
      %45 = arith.index_cast %44 : i32 to index
      %c0_47 = arith.constant 0 : index
      %c0_48 = arith.constant 0 : index
      %46 = vector.load %arg1[%c0_46, %45, %c0_47, %c0_48] : memref<1x6x6x16xbf16, #tpu.memory_space<vmem>>, vector<1x1x4x16xbf16>
      %47 = vector.shape_cast %46 : vector<1x1x4x16xbf16> to vector<1x4x16xbf16>
      %48 = vector.shape_cast %47 : vector<1x4x16xbf16> to vector<4x16xbf16>
      %c0_49 = arith.constant 0 : index
      %c3 = arith.constant 3 : index
      %c0_50 = arith.constant 0 : index
      %c0_51 = arith.constant 0 : index
      %49 = vector.load %arg2[%c0_49, %c3, %c0_50, %c0_51] : memref<4x4x16x8xbf16, #tpu.memory_space<vmem>>, vector<1x1x16x8xbf16>
      %50 = vector.shape_cast %49 : vector<1x1x16x8xbf16> to vector<16x8xbf16>
      %cst_52 = arith.constant dense<0.000000e+00> : vector<4x8xf32>
      %51 = tpu.matmul %48, %50, %cst_52 {dimension_numbers = #tpu.dot_dimension_numbers<[1], [0], [0], [1], [0, 0, 1, 1], [], []>} : vector<4x16xbf16>, vector<16x8xbf16>, vector<4x8xf32> -> vector<4x8xf32>
      %52 = arith.addf %43, %51 : vector<4x8xf32>
      %53 = vector.shape_cast %52 : vector<4x8xf32> to vector<1x4x8xf32>
      %54 = arith.truncf %53 : vector<1x4x8xf32> to vector<1x4x8xbf16>
      %c0_53 = arith.constant 0 : index
      %c0_54 = arith.constant 0 : index
      %55 = arith.index_cast %arg5 : i32 to index
      %c0_55 = arith.constant 0 : index
      %c0_56 = arith.constant 0 : index
      %56 = vector.load %arg3[%c0_53, %c0_54, %55, %c0_55, %c0_56] : memref<1x4x4x4x8xbf16, #tpu.memory_space<vmem>>, vector<1x1x1x4x8xbf16>
      %57 = vector.shape_cast %56 : vector<1x1x1x4x8xbf16> to vector<1x4x8xbf16>
      %58 = vector.shape_cast %54 : vector<1x4x8xbf16> to vector<1x1x1x4x8xbf16>
      tpu.vector_store %arg3[%c0_53, %c0_54, %55, %c0_55, %c0_56], %58 {strides = array<i32>} : memref<1x4x4x4x8xbf16, #tpu.memory_space<vmem>>, vector<1x1x1x4x8xbf16>,
      %cst_57 = arith.constant dense<0.000000e+00> : vector<8xf32>
      %59 = vector.multi_reduction <add>, %52, %cst_57 [0] : vector<4x8xf32> to vector<8xf32>
      %60 = vector.shape_cast %59 : vector<8xf32> to vector<1x8xf32>
      %61 = arith.addf %arg6, %60 : vector<1x8xf32>
      %62 = arith.mulf %52, %52 : vector<4x8xf32>
      %cst_58 = arith.constant dense<0.000000e+00> : vector<8xf32>
      %63 = vector.multi_reduction <add>, %62, %cst_58 [0] : vector<4x8xf32> to vector<8xf32>
      %64 = vector.shape_cast %63 : vector<8xf32> to vector<1x8xf32>
      %65 = arith.addf %arg7, %64 : vector<1x8xf32>
      scf.yield %61, %65 : vector<1x8xf32>, vector<1x8xf32>
    }
    %c4_i32_1 = arith.constant 4 : i32
    %c0_i32_2 = arith.constant 0 : i32
    %c4_i32_3 = arith.constant 4 : i32
    %4 = arith.addi %c0_i32_2, %c4_i32_3 : i32
    %c1_i32_4 = arith.constant 1 : i32
    %5:2 = scf.for %arg5 = %c0_i32_2 to %4 step %c1_i32_4 iter_args(%arg6 = %3#0, %arg7 = %3#1) -> (vector<1x8xf32>, vector<1x8xf32>)  : i32 {
      %cst_18 = arith.constant 0.000000e+00 : f32
      %16 = vector.broadcast %cst_18 : f32 to vector<4x8xf32>
      %c1_i32_19 = arith.constant 1 : i32
      %17 = arith.addi %arg5, %c1_i32_19 : i32
      %c0_20 = arith.constant 0 : index
      %18 = arith.index_cast %17 : i32 to index
      %c2 = arith.constant 2 : index
      %c0_21 = arith.constant 0 : index
      %19 = vector.load %arg1[%c0_20, %18, %c2, %c0_21] : memref<1x6x6x16xbf16, #tpu.memory_space<vmem>>, vector<1x1x4x16xbf16>
      %20 = vector.shape_cast %19 : vector<1x1x4x16xbf16> to vector<1x4x16xbf16>
      %21 = vector.shape_cast %20 : vector<1x4x16xbf16> to vector<4x16xbf16>
      %c1_22 = arith.constant 1 : index
      %c0_23 = arith.constant 0 : index
      %c0_24 = arith.constant 0 : index
      %c0_25 = arith.constant 0 : index
      %22 = vector.load %arg2[%c1_22, %c0_23, %c0_24, %c0_25] : memref<4x4x16x8xbf16, #tpu.memory_space<vmem>>, vector<1x1x16x8xbf16>
      %23 = vector.shape_cast %22 : vector<1x1x16x8xbf16> to vector<16x8xbf16>
      %cst_26 = arith.constant dense<0.000000e+00> : vector<4x8xf32>
      %24 = tpu.matmul %21, %23, %cst_26 {dimension_numbers = #tpu.dot_dimension_numbers<[1], [0], [0], [1], [0, 0, 1, 1], [], []>} : vector<4x16xbf16>, vector<16x8xbf16>, vector<4x8xf32> -> vector<4x8xf32>
      %25 = arith.addf %16, %24 : vector<4x8xf32>
      %c1_i32_27 = arith.constant 1 : i32
      %26 = arith.addi %arg5, %c1_i32_27 : i32
      %c0_28 = arith.constant 0 : index
      %27 = arith.index_cast %26 : i32 to index
      %c1_29 = arith.constant 1 : index
      %c0_30 = arith.constant 0 : index
      %28 = vector.load %arg1[%c0_28, %27, %c1_29, %c0_30] : memref<1x6x6x16xbf16, #tpu.memory_space<vmem>>, vector<1x1x4x16xbf16>
      %29 = vector.shape_cast %28 : vector<1x1x4x16xbf16> to vector<1x4x16xbf16>
      %30 = vector.shape_cast %29 : vector<1x4x16xbf16> to vector<4x16xbf16>
      %c1_31 = arith.constant 1 : index
      %c1_32 = arith.constant 1 : index
      %c0_33 = arith.constant 0 : index
      %c0_34 = arith.constant 0 : index
      %31 = vector.load %arg2[%c1_31, %c1_32, %c0_33, %c0_34] : memref<4x4x16x8xbf16, #tpu.memory_space<vmem>>, vector<1x1x16x8xbf16>
      %32 = vector.shape_cast %31 : vector<1x1x16x8xbf16> to vector<16x8xbf16>
      %cst_35 = arith.constant dense<0.000000e+00> : vector<4x8xf32>
      %33 = tpu.matmul %30, %32, %cst_35 {dimension_numbers = #tpu.dot_dimension_numbers<[1], [0], [0], [1], [0, 0, 1, 1], [], []>} : vector<4x16xbf16>, vector<16x8xbf16>, vector<4x8xf32> -> vector<4x8xf32>
      %34 = arith.addf %25, %33 : vector<4x8xf32>
      %c0_i32_36 = arith.constant 0 : i32
      %35 = arith.addi %arg5, %c0_i32_36 : i32
      %c0_37 = arith.constant 0 : index
      %36 = arith.index_cast %35 : i32 to index
      %c2_38 = arith.constant 2 : index
      %c0_39 = arith.constant 0 : index
      %37 = vector.load %arg1[%c0_37, %36, %c2_38, %c0_39] : memref<1x6x6x16xbf16, #tpu.memory_space<vmem>>, vector<1x1x4x16xbf16>
      %38 = vector.shape_cast %37 : vector<1x1x4x16xbf16> to vector<1x4x16xbf16>
      %39 = vector.shape_cast %38 : vector<1x4x16xbf16> to vector<4x16xbf16>
      %c1_40 = arith.constant 1 : index
      %c2_41 = arith.constant 2 : index
      %c0_42 = arith.constant 0 : index
      %c0_43 = arith.constant 0 : index
      %40 = vector.load %arg2[%c1_40, %c2_41, %c0_42, %c0_43] : memref<4x4x16x8xbf16, #tpu.memory_space<vmem>>, vector<1x1x16x8xbf16>
      %41 = vector.shape_cast %40 : vector<1x1x16x8xbf16> to vector<16x8xbf16>
      %cst_44 = arith.constant dense<0.000000e+00> : vector<4x8xf32>
      %42 = tpu.matmul %39, %41, %cst_44 {dimension_numbers = #tpu.dot_dimension_numbers<[1], [0], [0], [1], [0, 0, 1, 1], [], []>} : vector<4x16xbf16>, vector<16x8xbf16>, vector<4x8xf32> -> vector<4x8xf32>
      %43 = arith.addf %34, %42 : vector<4x8xf32>
      %c0_i32_45 = arith.constant 0 : i32
      %44 = arith.addi %arg5, %c0_i32_45 : i32
      %c0_46 = arith.constant 0 : index
      %45 = arith.index_cast %44 : i32 to index
      %c1_47 = arith.constant 1 : index
      %c0_48 = arith.constant 0 : index
      %46 = vector.load %arg1[%c0_46, %45, %c1_47, %c0_48] : memref<1x6x6x16xbf16, #tpu.memory_space<vmem>>, vector<1x1x4x16xbf16>
      %47 = vector.shape_cast %46 : vector<1x1x4x16xbf16> to vector<1x4x16xbf16>
      %48 = vector.shape_cast %47 : vector<1x4x16xbf16> to vector<4x16xbf16>
      %c1_49 = arith.constant 1 : index
      %c3 = arith.constant 3 : index
      %c0_50 = arith.constant 0 : index
      %c0_51 = arith.constant 0 : index
      %49 = vector.load %arg2[%c1_49, %c3, %c0_50, %c0_51] : memref<4x4x16x8xbf16, #tpu.memory_space<vmem>>, vector<1x1x16x8xbf16>
      %50 = vector.shape_cast %49 : vector<1x1x16x8xbf16> to vector<16x8xbf16>
      %cst_52 = arith.constant dense<0.000000e+00> : vector<4x8xf32>
      %51 = tpu.matmul %48, %50, %cst_52 {dimension_numbers = #tpu.dot_dimension_numbers<[1], [0], [0], [1], [0, 0, 1, 1], [], []>} : vector<4x16xbf16>, vector<16x8xbf16>, vector<4x8xf32> -> vector<4x8xf32>
      %52 = arith.addf %43, %51 : vector<4x8xf32>
      %53 = vector.shape_cast %52 : vector<4x8xf32> to vector<1x4x8xf32>
      %54 = arith.truncf %53 : vector<1x4x8xf32> to vector<1x4x8xbf16>
      %c0_53 = arith.constant 0 : index
      %c1_54 = arith.constant 1 : index
      %55 = arith.index_cast %arg5 : i32 to index
      %c0_55 = arith.constant 0 : index
      %c0_56 = arith.constant 0 : index
      %56 = vector.load %arg3[%c0_53, %c1_54, %55, %c0_55, %c0_56] : memref<1x4x4x4x8xbf16, #tpu.memory_space<vmem>>, vector<1x1x1x4x8xbf16>
      %57 = vector.shape_cast %56 : vector<1x1x1x4x8xbf16> to vector<1x4x8xbf16>
      %58 = vector.shape_cast %54 : vector<1x4x8xbf16> to vector<1x1x1x4x8xbf16>
      tpu.vector_store %arg3[%c0_53, %c1_54, %55, %c0_55, %c0_56], %58 {strides = array<i32>} : memref<1x4x4x4x8xbf16, #tpu.memory_space<vmem>>, vector<1x1x1x4x8xbf16>,
      %cst_57 = arith.constant dense<0.000000e+00> : vector<8xf32>
      %59 = vector.multi_reduction <add>, %52, %cst_57 [0] : vector<4x8xf32> to vector<8xf32>
      %60 = vector.shape_cast %59 : vector<8xf32> to vector<1x8xf32>
      %61 = arith.addf %arg6, %60 : vector<1x8xf32>
      %62 = arith.mulf %52, %52 : vector<4x8xf32>
      %cst_58 = arith.constant dense<0.000000e+00> : vector<8xf32>
      %63 = vector.multi_reduction <add>, %62, %cst_58 [0] : vector<4x8xf32> to vector<8xf32>
      %64 = vector.shape_cast %63 : vector<8xf32> to vector<1x8xf32>
      %65 = arith.addf %arg7, %64 : vector<1x8xf32>
      scf.yield %61, %65 : vector<1x8xf32>, vector<1x8xf32>
    }
    %c4_i32_5 = arith.constant 4 : i32
    %c0_i32_6 = arith.constant 0 : i32
    %c4_i32_7 = arith.constant 4 : i32
    %6 = arith.addi %c0_i32_6, %c4_i32_7 : i32
    %c1_i32_8 = arith.constant 1 : i32
    %7:2 = scf.for %arg5 = %c0_i32_6 to %6 step %c1_i32_8 iter_args(%arg6 = %5#0, %arg7 = %5#1) -> (vector<1x8xf32>, vector<1x8xf32>)  : i32 {
      %cst_18 = arith.constant 0.000000e+00 : f32
      %16 = vector.broadcast %cst_18 : f32 to vector<4x8xf32>
      %c2_i32 = arith.constant 2 : i32
      %17 = arith.addi %arg5, %c2_i32 : i32
      %c0_19 = arith.constant 0 : index
      %18 = arith.index_cast %17 : i32 to index
      %c1_20 = arith.constant 1 : index
      %c0_21 = arith.constant 0 : index
      %19 = vector.load %arg1[%c0_19, %18, %c1_20, %c0_21] : memref<1x6x6x16xbf16, #tpu.memory_space<vmem>>, vector<1x1x4x16xbf16>
      %20 = vector.shape_cast %19 : vector<1x1x4x16xbf16> to vector<1x4x16xbf16>
      %21 = vector.shape_cast %20 : vector<1x4x16xbf16> to vector<4x16xbf16>
      %c2 = arith.constant 2 : index
      %c0_22 = arith.constant 0 : index
      %c0_23 = arith.constant 0 : index
      %c0_24 = arith.constant 0 : index
      %22 = vector.load %arg2[%c2, %c0_22, %c0_23, %c0_24] : memref<4x4x16x8xbf16, #tpu.memory_space<vmem>>, vector<1x1x16x8xbf16>
      %23 = vector.shape_cast %22 : vector<1x1x16x8xbf16> to vector<16x8xbf16>
      %cst_25 = arith.constant dense<0.000000e+00> : vector<4x8xf32>
      %24 = tpu.matmul %21, %23, %cst_25 {dimension_numbers = #tpu.dot_dimension_numbers<[1], [0], [0], [1], [0, 0, 1, 1], [], []>} : vector<4x16xbf16>, vector<16x8xbf16>, vector<4x8xf32> -> vector<4x8xf32>
      %25 = arith.addf %16, %24 : vector<4x8xf32>
      %c2_i32_26 = arith.constant 2 : i32
      %26 = arith.addi %arg5, %c2_i32_26 : i32
      %c0_27 = arith.constant 0 : index
      %27 = arith.index_cast %26 : i32 to index
      %c0_28 = arith.constant 0 : index
      %c0_29 = arith.constant 0 : index
      %28 = vector.load %arg1[%c0_27, %27, %c0_28, %c0_29] : memref<1x6x6x16xbf16, #tpu.memory_space<vmem>>, vector<1x1x4x16xbf16>
      %29 = vector.shape_cast %28 : vector<1x1x4x16xbf16> to vector<1x4x16xbf16>
      %30 = vector.shape_cast %29 : vector<1x4x16xbf16> to vector<4x16xbf16>
      %c2_30 = arith.constant 2 : index
      %c1_31 = arith.constant 1 : index
      %c0_32 = arith.constant 0 : index
      %c0_33 = arith.constant 0 : index
      %31 = vector.load %arg2[%c2_30, %c1_31, %c0_32, %c0_33] : memref<4x4x16x8xbf16, #tpu.memory_space<vmem>>, vector<1x1x16x8xbf16>
      %32 = vector.shape_cast %31 : vector<1x1x16x8xbf16> to vector<16x8xbf16>
      %cst_34 = arith.constant dense<0.000000e+00> : vector<4x8xf32>
      %33 = tpu.matmul %30, %32, %cst_34 {dimension_numbers = #tpu.dot_dimension_numbers<[1], [0], [0], [1], [0, 0, 1, 1], [], []>} : vector<4x16xbf16>, vector<16x8xbf16>, vector<4x8xf32> -> vector<4x8xf32>
      %34 = arith.addf %25, %33 : vector<4x8xf32>
      %c1_i32_35 = arith.constant 1 : i32
      %35 = arith.addi %arg5, %c1_i32_35 : i32
      %c0_36 = arith.constant 0 : index
      %36 = arith.index_cast %35 : i32 to index
      %c1_37 = arith.constant 1 : index
      %c0_38 = arith.constant 0 : index
      %37 = vector.load %arg1[%c0_36, %36, %c1_37, %c0_38] : memref<1x6x6x16xbf16, #tpu.memory_space<vmem>>, vector<1x1x4x16xbf16>
      %38 = vector.shape_cast %37 : vector<1x1x4x16xbf16> to vector<1x4x16xbf16>
      %39 = vector.shape_cast %38 : vector<1x4x16xbf16> to vector<4x16xbf16>
      %c2_39 = arith.constant 2 : index
      %c2_40 = arith.constant 2 : index
      %c0_41 = arith.constant 0 : index
      %c0_42 = arith.constant 0 : index
      %40 = vector.load %arg2[%c2_39, %c2_40, %c0_41, %c0_42] : memref<4x4x16x8xbf16, #tpu.memory_space<vmem>>, vector<1x1x16x8xbf16>
      %41 = vector.shape_cast %40 : vector<1x1x16x8xbf16> to vector<16x8xbf16>
      %cst_43 = arith.constant dense<0.000000e+00> : vector<4x8xf32>
      %42 = tpu.matmul %39, %41, %cst_43 {dimension_numbers = #tpu.dot_dimension_numbers<[1], [0], [0], [1], [0, 0, 1, 1], [], []>} : vector<4x16xbf16>, vector<16x8xbf16>, vector<4x8xf32> -> vector<4x8xf32>
      %43 = arith.addf %34, %42 : vector<4x8xf32>
      %c1_i32_44 = arith.constant 1 : i32
      %44 = arith.addi %arg5, %c1_i32_44 : i32
      %c0_45 = arith.constant 0 : index
      %45 = arith.index_cast %44 : i32 to index
      %c0_46 = arith.constant 0 : index
      %c0_47 = arith.constant 0 : index
      %46 = vector.load %arg1[%c0_45, %45, %c0_46, %c0_47] : memref<1x6x6x16xbf16, #tpu.memory_space<vmem>>, vector<1x1x4x16xbf16>
      %47 = vector.shape_cast %46 : vector<1x1x4x16xbf16> to vector<1x4x16xbf16>
      %48 = vector.shape_cast %47 : vector<1x4x16xbf16> to vector<4x16xbf16>
      %c2_48 = arith.constant 2 : index
      %c3 = arith.constant 3 : index
      %c0_49 = arith.constant 0 : index
      %c0_50 = arith.constant 0 : index
      %49 = vector.load %arg2[%c2_48, %c3, %c0_49, %c0_50] : memref<4x4x16x8xbf16, #tpu.memory_space<vmem>>, vector<1x1x16x8xbf16>
      %50 = vector.shape_cast %49 : vector<1x1x16x8xbf16> to vector<16x8xbf16>
      %cst_51 = arith.constant dense<0.000000e+00> : vector<4x8xf32>
      %51 = tpu.matmul %48, %50, %cst_51 {dimension_numbers = #tpu.dot_dimension_numbers<[1], [0], [0], [1], [0, 0, 1, 1], [], []>} : vector<4x16xbf16>, vector<16x8xbf16>, vector<4x8xf32> -> vector<4x8xf32>
      %52 = arith.addf %43, %51 : vector<4x8xf32>
      %53 = vector.shape_cast %52 : vector<4x8xf32> to vector<1x4x8xf32>
      %54 = arith.truncf %53 : vector<1x4x8xf32> to vector<1x4x8xbf16>
      %c0_52 = arith.constant 0 : index
      %c2_53 = arith.constant 2 : index
      %55 = arith.index_cast %arg5 : i32 to index
      %c0_54 = arith.constant 0 : index
      %c0_55 = arith.constant 0 : index
      %56 = vector.load %arg3[%c0_52, %c2_53, %55, %c0_54, %c0_55] : memref<1x4x4x4x8xbf16, #tpu.memory_space<vmem>>, vector<1x1x1x4x8xbf16>
      %57 = vector.shape_cast %56 : vector<1x1x1x4x8xbf16> to vector<1x4x8xbf16>
      %58 = vector.shape_cast %54 : vector<1x4x8xbf16> to vector<1x1x1x4x8xbf16>
      tpu.vector_store %arg3[%c0_52, %c2_53, %55, %c0_54, %c0_55], %58 {strides = array<i32>} : memref<1x4x4x4x8xbf16, #tpu.memory_space<vmem>>, vector<1x1x1x4x8xbf16>,
      %cst_56 = arith.constant dense<0.000000e+00> : vector<8xf32>
      %59 = vector.multi_reduction <add>, %52, %cst_56 [0] : vector<4x8xf32> to vector<8xf32>
      %60 = vector.shape_cast %59 : vector<8xf32> to vector<1x8xf32>
      %61 = arith.addf %arg6, %60 : vector<1x8xf32>
      %62 = arith.mulf %52, %52 : vector<4x8xf32>
      %cst_57 = arith.constant dense<0.000000e+00> : vector<8xf32>
      %63 = vector.multi_reduction <add>, %62, %cst_57 [0] : vector<4x8xf32> to vector<8xf32>
      %64 = vector.shape_cast %63 : vector<8xf32> to vector<1x8xf32>
      %65 = arith.addf %arg7, %64 : vector<1x8xf32>
      scf.yield %61, %65 : vector<1x8xf32>, vector<1x8xf32>
    }
    %c4_i32_9 = arith.constant 4 : i32
    %c0_i32_10 = arith.constant 0 : i32
    %c4_i32_11 = arith.constant 4 : i32
    %8 = arith.addi %c0_i32_10, %c4_i32_11 : i32
    %c1_i32_12 = arith.constant 1 : i32
    %9:2 = scf.for %arg5 = %c0_i32_10 to %8 step %c1_i32_12 iter_args(%arg6 = %7#0, %arg7 = %7#1) -> (vector<1x8xf32>, vector<1x8xf32>)  : i32 {
      %cst_18 = arith.constant 0.000000e+00 : f32
      %16 = vector.broadcast %cst_18 : f32 to vector<4x8xf32>
      %c2_i32 = arith.constant 2 : i32
      %17 = arith.addi %arg5, %c2_i32 : i32
      %c0_19 = arith.constant 0 : index
      %18 = arith.index_cast %17 : i32 to index
      %c2 = arith.constant 2 : index
      %c0_20 = arith.constant 0 : index
      %19 = vector.load %arg1[%c0_19, %18, %c2, %c0_20] : memref<1x6x6x16xbf16, #tpu.memory_space<vmem>>, vector<1x1x4x16xbf16>
      %20 = vector.shape_cast %19 : vector<1x1x4x16xbf16> to vector<1x4x16xbf16>
      %21 = vector.shape_cast %20 : vector<1x4x16xbf16> to vector<4x16xbf16>
      %c3 = arith.constant 3 : index
      %c0_21 = arith.constant 0 : index
      %c0_22 = arith.constant 0 : index
      %c0_23 = arith.constant 0 : index
      %22 = vector.load %arg2[%c3, %c0_21, %c0_22, %c0_23] : memref<4x4x16x8xbf16, #tpu.memory_space<vmem>>, vector<1x1x16x8xbf16>
      %23 = vector.shape_cast %22 : vector<1x1x16x8xbf16> to vector<16x8xbf16>
      %cst_24 = arith.constant dense<0.000000e+00> : vector<4x8xf32>
      %24 = tpu.matmul %21, %23, %cst_24 {dimension_numbers = #tpu.dot_dimension_numbers<[1], [0], [0], [1], [0, 0, 1, 1], [], []>} : vector<4x16xbf16>, vector<16x8xbf16>, vector<4x8xf32> -> vector<4x8xf32>
      %25 = arith.addf %16, %24 : vector<4x8xf32>
      %c2_i32_25 = arith.constant 2 : i32
      %26 = arith.addi %arg5, %c2_i32_25 : i32
      %c0_26 = arith.constant 0 : index
      %27 = arith.index_cast %26 : i32 to index
      %c1_27 = arith.constant 1 : index
      %c0_28 = arith.constant 0 : index
      %28 = vector.load %arg1[%c0_26, %27, %c1_27, %c0_28] : memref<1x6x6x16xbf16, #tpu.memory_space<vmem>>, vector<1x1x4x16xbf16>
      %29 = vector.shape_cast %28 : vector<1x1x4x16xbf16> to vector<1x4x16xbf16>
      %30 = vector.shape_cast %29 : vector<1x4x16xbf16> to vector<4x16xbf16>
      %c3_29 = arith.constant 3 : index
      %c1_30 = arith.constant 1 : index
      %c0_31 = arith.constant 0 : index
      %c0_32 = arith.constant 0 : index
      %31 = vector.load %arg2[%c3_29, %c1_30, %c0_31, %c0_32] : memref<4x4x16x8xbf16, #tpu.memory_space<vmem>>, vector<1x1x16x8xbf16>
      %32 = vector.shape_cast %31 : vector<1x1x16x8xbf16> to vector<16x8xbf16>
      %cst_33 = arith.constant dense<0.000000e+00> : vector<4x8xf32>
      %33 = tpu.matmul %30, %32, %cst_33 {dimension_numbers = #tpu.dot_dimension_numbers<[1], [0], [0], [1], [0, 0, 1, 1], [], []>} : vector<4x16xbf16>, vector<16x8xbf16>, vector<4x8xf32> -> vector<4x8xf32>
      %34 = arith.addf %25, %33 : vector<4x8xf32>
      %c1_i32_34 = arith.constant 1 : i32
      %35 = arith.addi %arg5, %c1_i32_34 : i32
      %c0_35 = arith.constant 0 : index
      %36 = arith.index_cast %35 : i32 to index
      %c2_36 = arith.constant 2 : index
      %c0_37 = arith.constant 0 : index
      %37 = vector.load %arg1[%c0_35, %36, %c2_36, %c0_37] : memref<1x6x6x16xbf16, #tpu.memory_space<vmem>>, vector<1x1x4x16xbf16>
      %38 = vector.shape_cast %37 : vector<1x1x4x16xbf16> to vector<1x4x16xbf16>
      %39 = vector.shape_cast %38 : vector<1x4x16xbf16> to vector<4x16xbf16>
      %c3_38 = arith.constant 3 : index
      %c2_39 = arith.constant 2 : index
      %c0_40 = arith.constant 0 : index
      %c0_41 = arith.constant 0 : index
      %40 = vector.load %arg2[%c3_38, %c2_39, %c0_40, %c0_41] : memref<4x4x16x8xbf16, #tpu.memory_space<vmem>>, vector<1x1x16x8xbf16>
      %41 = vector.shape_cast %40 : vector<1x1x16x8xbf16> to vector<16x8xbf16>
      %cst_42 = arith.constant dense<0.000000e+00> : vector<4x8xf32>
      %42 = tpu.matmul %39, %41, %cst_42 {dimension_numbers = #tpu.dot_dimension_numbers<[1], [0], [0], [1], [0, 0, 1, 1], [], []>} : vector<4x16xbf16>, vector<16x8xbf16>, vector<4x8xf32> -> vector<4x8xf32>
      %43 = arith.addf %34, %42 : vector<4x8xf32>
      %c1_i32_43 = arith.constant 1 : i32
      %44 = arith.addi %arg5, %c1_i32_43 : i32
      %c0_44 = arith.constant 0 : index
      %45 = arith.index_cast %44 : i32 to index
      %c1_45 = arith.constant 1 : index
      %c0_46 = arith.constant 0 : index
      %46 = vector.load %arg1[%c0_44, %45, %c1_45, %c0_46] : memref<1x6x6x16xbf16, #tpu.memory_space<vmem>>, vector<1x1x4x16xbf16>
      %47 = vector.shape_cast %46 : vector<1x1x4x16xbf16> to vector<1x4x16xbf16>
      %48 = vector.shape_cast %47 : vector<1x4x16xbf16> to vector<4x16xbf16>
      %c3_47 = arith.constant 3 : index
      %c3_48 = arith.constant 3 : index
      %c0_49 = arith.constant 0 : index
      %c0_50 = arith.constant 0 : index
      %49 = vector.load %arg2[%c3_47, %c3_48, %c0_49, %c0_50] : memref<4x4x16x8xbf16, #tpu.memory_space<vmem>>, vector<1x1x16x8xbf16>
      %50 = vector.shape_cast %49 : vector<1x1x16x8xbf16> to vector<16x8xbf16>
      %cst_51 = arith.constant dense<0.000000e+00> : vector<4x8xf32>
      %51 = tpu.matmul %48, %50, %cst_51 {dimension_numbers = #tpu.dot_dimension_numbers<[1], [0], [0], [1], [0, 0, 1, 1], [], []>} : vector<4x16xbf16>, vector<16x8xbf16>, vector<4x8xf32> -> vector<4x8xf32>
      %52 = arith.addf %43, %51 : vector<4x8xf32>
      %53 = vector.shape_cast %52 : vector<4x8xf32> to vector<1x4x8xf32>
      %54 = arith.truncf %53 : vector<1x4x8xf32> to vector<1x4x8xbf16>
      %c0_52 = arith.constant 0 : index
      %c3_53 = arith.constant 3 : index
      %55 = arith.index_cast %arg5 : i32 to index
      %c0_54 = arith.constant 0 : index
      %c0_55 = arith.constant 0 : index
      %56 = vector.load %arg3[%c0_52, %c3_53, %55, %c0_54, %c0_55] : memref<1x4x4x4x8xbf16, #tpu.memory_space<vmem>>, vector<1x1x1x4x8xbf16>
      %57 = vector.shape_cast %56 : vector<1x1x1x4x8xbf16> to vector<1x4x8xbf16>
      %58 = vector.shape_cast %54 : vector<1x4x8xbf16> to vector<1x1x1x4x8xbf16>
      tpu.vector_store %arg3[%c0_52, %c3_53, %55, %c0_54, %c0_55], %58 {strides = array<i32>} : memref<1x4x4x4x8xbf16, #tpu.memory_space<vmem>>, vector<1x1x1x4x8xbf16>,
      %cst_56 = arith.constant dense<0.000000e+00> : vector<8xf32>
      %59 = vector.multi_reduction <add>, %52, %cst_56 [0] : vector<4x8xf32> to vector<8xf32>
      %60 = vector.shape_cast %59 : vector<8xf32> to vector<1x8xf32>
      %61 = arith.addf %arg6, %60 : vector<1x8xf32>
      %62 = arith.mulf %52, %52 : vector<4x8xf32>
      %cst_57 = arith.constant dense<0.000000e+00> : vector<8xf32>
      %63 = vector.multi_reduction <add>, %62, %cst_57 [0] : vector<4x8xf32> to vector<8xf32>
      %64 = vector.shape_cast %63 : vector<8xf32> to vector<1x8xf32>
      %65 = arith.addf %arg7, %64 : vector<1x8xf32>
      scf.yield %61, %65 : vector<1x8xf32>, vector<1x8xf32>
    }
    %c4_i32_13 = arith.constant 4 : i32
    %c0 = arith.constant 0 : index
    %c0_14 = arith.constant 0 : index
    %c0_15 = arith.constant 0 : index
    %10 = vector.load %arg4[%c0, %c0_14, %c0_15] : memref<1x2x8xf32, #tpu.memory_space<vmem>>, vector<1x1x8xf32>
    %11 = vector.shape_cast %10 : vector<1x1x8xf32> to vector<1x8xf32>
    %12 = vector.shape_cast %9#0 : vector<1x8xf32> to vector<1x1x8xf32>
    tpu.vector_store %arg4[%c0, %c0_14, %c0_15], %12 {strides = array<i32>} : memref<1x2x8xf32, #tpu.memory_space<vmem>>, vector<1x1x8xf32>,
    %c0_16 = arith.constant 0 : index
    %c1 = arith.constant 1 : index
    %c0_17 = arith.constant 0 : index
    %13 = vector.load %arg4[%c0_16, %c1, %c0_17] : memref<1x2x8xf32, #tpu.memory_space<vmem>>, vector<1x1x8xf32>
    %14 = vector.shape_cast %13 : vector<1x1x8xf32> to vector<1x8xf32>
    %15 = vector.shape_cast %9#1 : vector<1x8xf32> to vector<1x1x8xf32>
    tpu.vector_store %arg4[%c0_16, %c1, %c0_17], %15 {strides = array<i32>} : memref<1x2x8xf32, #tpu.memory_space<vmem>>, vector<1x1x8xf32>,
    return
  }
  func.func @transform_0(%arg0: i32) -> (i32, i32, i32, i32) {
    %c0_i32 = arith.constant 0 : i32
    %c0_i32_0 = arith.constant 0 : i32
    %c0_i32_1 = arith.constant 0 : i32
    %c0_i32_2 = arith.constant 0 : i32
    return %arg0, %c0_i32, %c0_i32_0, %c0_i32_1 : i32, i32, i32, i32
  }
  func.func @transform_1(%arg0: i32) -> (i32, i32, i32, i32) {
    %c0_i32 = arith.constant 0 : i32
    %c0_i32_0 = arith.constant 0 : i32
    %c0_i32_1 = arith.constant 0 : i32
    %c0_i32_2 = arith.constant 0 : i32
    %c0_i32_3 = arith.constant 0 : i32
    return %c0_i32, %c0_i32_0, %c0_i32_1, %c0_i32_2 : i32, i32, i32, i32
  }
  func.func @transform_2(%arg0: i32) -> (i32, i32, i32, i32, i32) {
    %c0_i32 = arith.constant 0 : i32
    %c0_i32_0 = arith.constant 0 : i32
    %c0_i32_1 = arith.constant 0 : i32
    %c0_i32_2 = arith.constant 0 : i32
    %c0_i32_3 = arith.constant 0 : i32
    return %arg0, %c0_i32, %c0_i32_0, %c0_i32_1, %c0_i32_2 : i32, i32, i32, i32, i32
  }
  func.func @transform_3(%arg0: i32) -> (i32, i32, i32) {
    %c0_i32 = arith.constant 0 : i32
    %c0_i32_0 = arith.constant 0 : i32
    %c0_i32_1 = arith.constant 0 : i32
    return %arg0, %c0_i32, %c0_i32_0 : i32, i32, i32
  }
}

module attributes {stable_mosaic.version = 11 : i64} {
  func.func @_bn_act_kernel(%arg0: i32, %arg1: i32, %arg2: i32, %arg3: memref<1x1x4x4x8xbf16, #tpu.memory_space<vmem>>, %arg4: memref<1x8xf32, #tpu.memory_space<vmem>>, %arg5: memref<1x8xf32, #tpu.memory_space<vmem>>, %arg6: memref<1x1x4x4x8xbf16, #tpu.memory_space<vmem>>) attributes {dimension_semantics = [#tpu.dimension_semantics<parallel>, #tpu.dimension_semantics<parallel>, #tpu.dimension_semantics<parallel>], iteration_bounds = array<i64: 2, 4, 1>, scalar_prefetch = 0 : i64, scratch_operands = 0 : i64, tpu.core_type = #tpu.core_type<tc>, window_params = [{transform_indices = @transform_0, window_bounds = array<i64: 1, 1, 4, 4, 8>}, {pipeline_mode = #tpu.pipeline_mode<synchronous>, transform_indices = @transform_1, window_bounds = array<i64: 1, 8>}, {pipeline_mode = #tpu.pipeline_mode<synchronous>, transform_indices = @transform_2, window_bounds = array<i64: 1, 8>}, {transform_indices = @transform_3, window_bounds = array<i64: 1, 1, 4, 4, 8>}]} {
    %c0 = arith.constant 0 : index
    %c0_0 = arith.constant 0 : index
    %c0_1 = arith.constant 0 : index
    %c0_2 = arith.constant 0 : index
    %c0_3 = arith.constant 0 : index
    %0 = vector.load %arg3[%c0, %c0_0, %c0_1, %c0_2, %c0_3] : memref<1x1x4x4x8xbf16, #tpu.memory_space<vmem>>, vector<1x1x4x4x8xbf16>
    %1 = arith.extf %0 : vector<1x1x4x4x8xbf16> to vector<1x1x4x4x8xf32>
    %c0_4 = arith.constant 0 : index
    %c0_5 = arith.constant 0 : index
    %2 = vector.load %arg4[%c0_4, %c0_5] : memref<1x8xf32, #tpu.memory_space<vmem>>, vector<1x8xf32>
    %3 = vector.shape_cast %2 : vector<1x8xf32> to vector<1x1x1x1x8xf32>
    %4 = vector.broadcast %3 : vector<1x1x1x1x8xf32> to vector<1x1x4x4x8xf32>
    %5 = arith.mulf %1, %4 : vector<1x1x4x4x8xf32>
    %c0_6 = arith.constant 0 : index
    %c0_7 = arith.constant 0 : index
    %6 = vector.load %arg5[%c0_6, %c0_7] : memref<1x8xf32, #tpu.memory_space<vmem>>, vector<1x8xf32>
    %7 = vector.shape_cast %6 : vector<1x8xf32> to vector<1x1x1x1x8xf32>
    %8 = vector.broadcast %7 : vector<1x1x1x1x8xf32> to vector<1x1x4x4x8xf32>
    %9 = arith.addf %5, %8 : vector<1x1x4x4x8xf32>
    %cst = arith.constant 0.000000e+00 : f32
    %10 = vector.broadcast %cst : f32 to vector<1x1x4x4x8xf32>
    %11 = arith.maximumf %9, %10 : vector<1x1x4x4x8xf32>
    %12 = arith.truncf %11 : vector<1x1x4x4x8xf32> to vector<1x1x4x4x8xbf16>
    %c0_8 = arith.constant 0 : index
    %c0_9 = arith.constant 0 : index
    %c0_10 = arith.constant 0 : index
    %c0_11 = arith.constant 0 : index
    %c0_12 = arith.constant 0 : index
    %13 = vector.load %arg6[%c0_8, %c0_9, %c0_10, %c0_11, %c0_12] : memref<1x1x4x4x8xbf16, #tpu.memory_space<vmem>>, vector<1x1x4x4x8xbf16>
    tpu.vector_store %arg6[%c0_8, %c0_9, %c0_10, %c0_11, %c0_12], %12 {strides = array<i32>} : memref<1x1x4x4x8xbf16, #tpu.memory_space<vmem>>, vector<1x1x4x4x8xbf16>,
    return
  }
  func.func @transform_0(%arg0: i32, %arg1: i32, %arg2: i32) -> (i32, i32, i32, i32, i32) {
    %c0_i32 = arith.constant 0 : i32
    %c0_i32_0 = arith.constant 0 : i32
    %c0_i32_1 = arith.constant 0 : i32
    return %arg0, %arg1, %arg2, %c0_i32, %c0_i32_0 : i32, i32, i32, i32, i32
  }
  func.func @transform_1(%arg0: i32, %arg1: i32, %arg2: i32) -> (i32, i32) {
    %c0_i32 = arith.constant 0 : i32
    %c0_i32_0 = arith.constant 0 : i32
    %c0_i32_1 = arith.constant 0 : i32
    return %c0_i32, %c0_i32_0 : i32, i32
  }
  func.func @transform_2(%arg0: i32, %arg1: i32, %arg2: i32) -> (i32, i32) {
    %c0_i32 = arith.constant 0 : i32
    %c0_i32_0 = arith.constant 0 : i32
    %c0_i32_1 = arith.constant 0 : i32
    return %c0_i32, %c0_i32_0 : i32, i32
  }
  func.func @transform_3(%arg0: i32, %arg1: i32, %arg2: i32) -> (i32, i32, i32, i32, i32) {
    %c0_i32 = arith.constant 0 : i32
    %c0_i32_0 = arith.constant 0 : i32
    %c0_i32_1 = arith.constant 0 : i32
    return %arg0, %arg1, %arg2, %c0_i32, %c0_i32_0 : i32, i32, i32, i32, i32
  }
}

module attributes {stable_mosaic.version = 11 : i64} {
  func.func @_bn_act_kernel(%arg0: i32, %arg1: i32, %arg2: i32, %arg3: memref<1x1x8x8x4xbf16, #tpu.memory_space<vmem>>, %arg4: memref<1x4xf32, #tpu.memory_space<vmem>>, %arg5: memref<1x4xf32, #tpu.memory_space<vmem>>, %arg6: memref<1x1x8x8x4xbf16, #tpu.memory_space<vmem>>) attributes {dimension_semantics = [#tpu.dimension_semantics<parallel>, #tpu.dimension_semantics<parallel>, #tpu.dimension_semantics<parallel>], iteration_bounds = array<i64: 2, 4, 1>, scalar_prefetch = 0 : i64, scratch_operands = 0 : i64, tpu.core_type = #tpu.core_type<tc>, window_params = [{transform_indices = @transform_0, window_bounds = array<i64: 1, 1, 8, 8, 4>}, {pipeline_mode = #tpu.pipeline_mode<synchronous>, transform_indices = @transform_1, window_bounds = array<i64: 1, 4>}, {pipeline_mode = #tpu.pipeline_mode<synchronous>, transform_indices = @transform_2, window_bounds = array<i64: 1, 4>}, {transform_indices = @transform_3, window_bounds = array<i64: 1, 1, 8, 8, 4>}]} {
    %c0 = arith.constant 0 : index
    %c0_0 = arith.constant 0 : index
    %c0_1 = arith.constant 0 : index
    %c0_2 = arith.constant 0 : index
    %c0_3 = arith.constant 0 : index
    %0 = vector.load %arg3[%c0, %c0_0, %c0_1, %c0_2, %c0_3] : memref<1x1x8x8x4xbf16, #tpu.memory_space<vmem>>, vector<1x1x8x8x4xbf16>
    %1 = arith.extf %0 : vector<1x1x8x8x4xbf16> to vector<1x1x8x8x4xf32>
    %c0_4 = arith.constant 0 : index
    %c0_5 = arith.constant 0 : index
    %2 = vector.load %arg4[%c0_4, %c0_5] : memref<1x4xf32, #tpu.memory_space<vmem>>, vector<1x4xf32>
    %3 = vector.shape_cast %2 : vector<1x4xf32> to vector<1x1x1x1x4xf32>
    %4 = vector.broadcast %3 : vector<1x1x1x1x4xf32> to vector<1x1x8x8x4xf32>
    %5 = arith.mulf %1, %4 : vector<1x1x8x8x4xf32>
    %c0_6 = arith.constant 0 : index
    %c0_7 = arith.constant 0 : index
    %6 = vector.load %arg5[%c0_6, %c0_7] : memref<1x4xf32, #tpu.memory_space<vmem>>, vector<1x4xf32>
    %7 = vector.shape_cast %6 : vector<1x4xf32> to vector<1x1x1x1x4xf32>
    %8 = vector.broadcast %7 : vector<1x1x1x1x4xf32> to vector<1x1x8x8x4xf32>
    %9 = arith.addf %5, %8 : vector<1x1x8x8x4xf32>
    %cst = arith.constant 0.000000e+00 : f32
    %10 = vector.broadcast %cst : f32 to vector<1x1x8x8x4xf32>
    %11 = arith.maximumf %9, %10 : vector<1x1x8x8x4xf32>
    %12 = arith.truncf %11 : vector<1x1x8x8x4xf32> to vector<1x1x8x8x4xbf16>
    %c0_8 = arith.constant 0 : index
    %c0_9 = arith.constant 0 : index
    %c0_10 = arith.constant 0 : index
    %c0_11 = arith.constant 0 : index
    %c0_12 = arith.constant 0 : index
    %13 = vector.load %arg6[%c0_8, %c0_9, %c0_10, %c0_11, %c0_12] : memref<1x1x8x8x4xbf16, #tpu.memory_space<vmem>>, vector<1x1x8x8x4xbf16>
    tpu.vector_store %arg6[%c0_8, %c0_9, %c0_10, %c0_11, %c0_12], %12 {strides = array<i32>} : memref<1x1x8x8x4xbf16, #tpu.memory_space<vmem>>, vector<1x1x8x8x4xbf16>,
    return
  }
  func.func @transform_0(%arg0: i32, %arg1: i32, %arg2: i32) -> (i32, i32, i32, i32, i32) {
    %c0_i32 = arith.constant 0 : i32
    %c0_i32_0 = arith.constant 0 : i32
    %c0_i32_1 = arith.constant 0 : i32
    return %arg0, %arg1, %arg2, %c0_i32, %c0_i32_0 : i32, i32, i32, i32, i32
  }
  func.func @transform_1(%arg0: i32, %arg1: i32, %arg2: i32) -> (i32, i32) {
    %c0_i32 = arith.constant 0 : i32
    %c0_i32_0 = arith.constant 0 : i32
    %c0_i32_1 = arith.constant 0 : i32
    return %c0_i32, %c0_i32_0 : i32, i32
  }
  func.func @transform_2(%arg0: i32, %arg1: i32, %arg2: i32) -> (i32, i32) {
    %c0_i32 = arith.constant 0 : i32
    %c0_i32_0 = arith.constant 0 : i32
    %c0_i32_1 = arith.constant 0 : i32
    return %c0_i32, %c0_i32_0 : i32, i32
  }
  func.func @transform_3(%arg0: i32, %arg1: i32, %arg2: i32) -> (i32, i32, i32, i32, i32) {
    %c0_i32 = arith.constant 0 : i32
    %c0_i32_0 = arith.constant 0 : i32
    %c0_i32_1 = arith.constant 0 : i32
    return %arg0, %arg1, %arg2, %c0_i32, %c0_i32_0 : i32, i32, i32, i32, i32
  }
}

module attributes {stable_mosaic.version = 11 : i64} {
  func.func @_conv_tap_bn_stats_kernel(%arg0: i32, %arg1: memref<1x10x10x8xbf16, #tpu.memory_space<vmem>>, %arg2: memref<4x4x8x4xbf16, #tpu.memory_space<vmem>>, %arg3: memref<1x4x8x8x4xbf16, #tpu.memory_space<vmem>>, %arg4: memref<1x2x4xf32, #tpu.memory_space<vmem>>) attributes {dimension_semantics = [#tpu.dimension_semantics<parallel>], iteration_bounds = array<i64: 2>, scalar_prefetch = 0 : i64, scratch_operands = 0 : i64, tpu.core_type = #tpu.core_type<tc>, window_params = [{transform_indices = @transform_0, window_bounds = array<i64: 1, 10, 10, 8>}, {pipeline_mode = #tpu.pipeline_mode<synchronous>, transform_indices = @transform_1, window_bounds = array<i64: 4, 4, 8, 4>}, {transform_indices = @transform_2, window_bounds = array<i64: 1, 4, 8, 8, 4>}, {transform_indices = @transform_3, window_bounds = array<i64: 1, 2, 4>}]} {
    %cst = arith.constant 0.000000e+00 : f32
    %0 = vector.broadcast %cst : f32 to vector<1x4xf32>
    %cst_0 = arith.constant 0.000000e+00 : f32
    %1 = vector.broadcast %cst_0 : f32 to vector<1x4xf32>
    %c0_i32 = arith.constant 0 : i32
    %c8_i32 = arith.constant 8 : i32
    %2 = arith.addi %c0_i32, %c8_i32 : i32
    %c1_i32 = arith.constant 1 : i32
    %3:2 = scf.for %arg5 = %c0_i32 to %2 step %c1_i32 iter_args(%arg6 = %0, %arg7 = %1) -> (vector<1x4xf32>, vector<1x4xf32>)  : i32 {
      %cst_18 = arith.constant 0.000000e+00 : f32
      %16 = vector.broadcast %cst_18 : f32 to vector<8x4xf32>
      %c1_i32_19 = arith.constant 1 : i32
      %17 = arith.addi %arg5, %c1_i32_19 : i32
      %c0_20 = arith.constant 0 : index
      %18 = arith.index_cast %17 : i32 to index
      %c1_21 = arith.constant 1 : index
      %c0_22 = arith.constant 0 : index
      %19 = vector.load %arg1[%c0_20, %18, %c1_21, %c0_22] : memref<1x10x10x8xbf16, #tpu.memory_space<vmem>>, vector<1x1x8x8xbf16>
      %20 = vector.shape_cast %19 : vector<1x1x8x8xbf16> to vector<1x8x8xbf16>
      %21 = vector.shape_cast %20 : vector<1x8x8xbf16> to vector<8x8xbf16>
      %c0_23 = arith.constant 0 : index
      %c0_24 = arith.constant 0 : index
      %c0_25 = arith.constant 0 : index
      %c0_26 = arith.constant 0 : index
      %22 = vector.load %arg2[%c0_23, %c0_24, %c0_25, %c0_26] : memref<4x4x8x4xbf16, #tpu.memory_space<vmem>>, vector<1x1x8x4xbf16>
      %23 = vector.shape_cast %22 : vector<1x1x8x4xbf16> to vector<8x4xbf16>
      %cst_27 = arith.constant dense<0.000000e+00> : vector<8x4xf32>
      %24 = tpu.matmul %21, %23, %cst_27 {dimension_numbers = #tpu.dot_dimension_numbers<[1], [0], [0], [1], [0, 0, 1, 1], [], []>} : vector<8x8xbf16>, vector<8x4xbf16>, vector<8x4xf32> -> vector<8x4xf32>
      %25 = arith.addf %16, %24 : vector<8x4xf32>
      %c1_i32_28 = arith.constant 1 : i32
      %26 = arith.addi %arg5, %c1_i32_28 : i32
      %c0_29 = arith.constant 0 : index
      %27 = arith.index_cast %26 : i32 to index
      %c0_30 = arith.constant 0 : index
      %c0_31 = arith.constant 0 : index
      %28 = vector.load %arg1[%c0_29, %27, %c0_30, %c0_31] : memref<1x10x10x8xbf16, #tpu.memory_space<vmem>>, vector<1x1x8x8xbf16>
      %29 = vector.shape_cast %28 : vector<1x1x8x8xbf16> to vector<1x8x8xbf16>
      %30 = vector.shape_cast %29 : vector<1x8x8xbf16> to vector<8x8xbf16>
      %c0_32 = arith.constant 0 : index
      %c1_33 = arith.constant 1 : index
      %c0_34 = arith.constant 0 : index
      %c0_35 = arith.constant 0 : index
      %31 = vector.load %arg2[%c0_32, %c1_33, %c0_34, %c0_35] : memref<4x4x8x4xbf16, #tpu.memory_space<vmem>>, vector<1x1x8x4xbf16>
      %32 = vector.shape_cast %31 : vector<1x1x8x4xbf16> to vector<8x4xbf16>
      %cst_36 = arith.constant dense<0.000000e+00> : vector<8x4xf32>
      %33 = tpu.matmul %30, %32, %cst_36 {dimension_numbers = #tpu.dot_dimension_numbers<[1], [0], [0], [1], [0, 0, 1, 1], [], []>} : vector<8x8xbf16>, vector<8x4xbf16>, vector<8x4xf32> -> vector<8x4xf32>
      %34 = arith.addf %25, %33 : vector<8x4xf32>
      %c0_i32_37 = arith.constant 0 : i32
      %35 = arith.addi %arg5, %c0_i32_37 : i32
      %c0_38 = arith.constant 0 : index
      %36 = arith.index_cast %35 : i32 to index
      %c1_39 = arith.constant 1 : index
      %c0_40 = arith.constant 0 : index
      %37 = vector.load %arg1[%c0_38, %36, %c1_39, %c0_40] : memref<1x10x10x8xbf16, #tpu.memory_space<vmem>>, vector<1x1x8x8xbf16>
      %38 = vector.shape_cast %37 : vector<1x1x8x8xbf16> to vector<1x8x8xbf16>
      %39 = vector.shape_cast %38 : vector<1x8x8xbf16> to vector<8x8xbf16>
      %c0_41 = arith.constant 0 : index
      %c2 = arith.constant 2 : index
      %c0_42 = arith.constant 0 : index
      %c0_43 = arith.constant 0 : index
      %40 = vector.load %arg2[%c0_41, %c2, %c0_42, %c0_43] : memref<4x4x8x4xbf16, #tpu.memory_space<vmem>>, vector<1x1x8x4xbf16>
      %41 = vector.shape_cast %40 : vector<1x1x8x4xbf16> to vector<8x4xbf16>
      %cst_44 = arith.constant dense<0.000000e+00> : vector<8x4xf32>
      %42 = tpu.matmul %39, %41, %cst_44 {dimension_numbers = #tpu.dot_dimension_numbers<[1], [0], [0], [1], [0, 0, 1, 1], [], []>} : vector<8x8xbf16>, vector<8x4xbf16>, vector<8x4xf32> -> vector<8x4xf32>
      %43 = arith.addf %34, %42 : vector<8x4xf32>
      %c0_i32_45 = arith.constant 0 : i32
      %44 = arith.addi %arg5, %c0_i32_45 : i32
      %c0_46 = arith.constant 0 : index
      %45 = arith.index_cast %44 : i32 to index
      %c0_47 = arith.constant 0 : index
      %c0_48 = arith.constant 0 : index
      %46 = vector.load %arg1[%c0_46, %45, %c0_47, %c0_48] : memref<1x10x10x8xbf16, #tpu.memory_space<vmem>>, vector<1x1x8x8xbf16>
      %47 = vector.shape_cast %46 : vector<1x1x8x8xbf16> to vector<1x8x8xbf16>
      %48 = vector.shape_cast %47 : vector<1x8x8xbf16> to vector<8x8xbf16>
      %c0_49 = arith.constant 0 : index
      %c3 = arith.constant 3 : index
      %c0_50 = arith.constant 0 : index
      %c0_51 = arith.constant 0 : index
      %49 = vector.load %arg2[%c0_49, %c3, %c0_50, %c0_51] : memref<4x4x8x4xbf16, #tpu.memory_space<vmem>>, vector<1x1x8x4xbf16>
      %50 = vector.shape_cast %49 : vector<1x1x8x4xbf16> to vector<8x4xbf16>
      %cst_52 = arith.constant dense<0.000000e+00> : vector<8x4xf32>
      %51 = tpu.matmul %48, %50, %cst_52 {dimension_numbers = #tpu.dot_dimension_numbers<[1], [0], [0], [1], [0, 0, 1, 1], [], []>} : vector<8x8xbf16>, vector<8x4xbf16>, vector<8x4xf32> -> vector<8x4xf32>
      %52 = arith.addf %43, %51 : vector<8x4xf32>
      %53 = vector.shape_cast %52 : vector<8x4xf32> to vector<1x8x4xf32>
      %54 = arith.truncf %53 : vector<1x8x4xf32> to vector<1x8x4xbf16>
      %c0_53 = arith.constant 0 : index
      %c0_54 = arith.constant 0 : index
      %55 = arith.index_cast %arg5 : i32 to index
      %c0_55 = arith.constant 0 : index
      %c0_56 = arith.constant 0 : index
      %56 = vector.load %arg3[%c0_53, %c0_54, %55, %c0_55, %c0_56] : memref<1x4x8x8x4xbf16, #tpu.memory_space<vmem>>, vector<1x1x1x8x4xbf16>
      %57 = vector.shape_cast %56 : vector<1x1x1x8x4xbf16> to vector<1x8x4xbf16>
      %58 = vector.shape_cast %54 : vector<1x8x4xbf16> to vector<1x1x1x8x4xbf16>
      tpu.vector_store %arg3[%c0_53, %c0_54, %55, %c0_55, %c0_56], %58 {strides = array<i32>} : memref<1x4x8x8x4xbf16, #tpu.memory_space<vmem>>, vector<1x1x1x8x4xbf16>,
      %cst_57 = arith.constant dense<0.000000e+00> : vector<4xf32>
      %59 = vector.multi_reduction <add>, %52, %cst_57 [0] : vector<8x4xf32> to vector<4xf32>
      %60 = vector.shape_cast %59 : vector<4xf32> to vector<1x4xf32>
      %61 = arith.addf %arg6, %60 : vector<1x4xf32>
      %62 = arith.mulf %52, %52 : vector<8x4xf32>
      %cst_58 = arith.constant dense<0.000000e+00> : vector<4xf32>
      %63 = vector.multi_reduction <add>, %62, %cst_58 [0] : vector<8x4xf32> to vector<4xf32>
      %64 = vector.shape_cast %63 : vector<4xf32> to vector<1x4xf32>
      %65 = arith.addf %arg7, %64 : vector<1x4xf32>
      scf.yield %61, %65 : vector<1x4xf32>, vector<1x4xf32>
    }
    %c8_i32_1 = arith.constant 8 : i32
    %c0_i32_2 = arith.constant 0 : i32
    %c8_i32_3 = arith.constant 8 : i32
    %4 = arith.addi %c0_i32_2, %c8_i32_3 : i32
    %c1_i32_4 = arith.constant 1 : i32
    %5:2 = scf.for %arg5 = %c0_i32_2 to %4 step %c1_i32_4 iter_args(%arg6 = %3#0, %arg7 = %3#1) -> (vector<1x4xf32>, vector<1x4xf32>)  : i32 {
      %cst_18 = arith.constant 0.000000e+00 : f32
      %16 = vector.broadcast %cst_18 : f32 to vector<8x4xf32>
      %c1_i32_19 = arith.constant 1 : i32
      %17 = arith.addi %arg5, %c1_i32_19 : i32
      %c0_20 = arith.constant 0 : index
      %18 = arith.index_cast %17 : i32 to index
      %c2 = arith.constant 2 : index
      %c0_21 = arith.constant 0 : index
      %19 = vector.load %arg1[%c0_20, %18, %c2, %c0_21] : memref<1x10x10x8xbf16, #tpu.memory_space<vmem>>, vector<1x1x8x8xbf16>
      %20 = vector.shape_cast %19 : vector<1x1x8x8xbf16> to vector<1x8x8xbf16>
      %21 = vector.shape_cast %20 : vector<1x8x8xbf16> to vector<8x8xbf16>
      %c1_22 = arith.constant 1 : index
      %c0_23 = arith.constant 0 : index
      %c0_24 = arith.constant 0 : index
      %c0_25 = arith.constant 0 : index
      %22 = vector.load %arg2[%c1_22, %c0_23, %c0_24, %c0_25] : memref<4x4x8x4xbf16, #tpu.memory_space<vmem>>, vector<1x1x8x4xbf16>
      %23 = vector.shape_cast %22 : vector<1x1x8x4xbf16> to vector<8x4xbf16>
      %cst_26 = arith.constant dense<0.000000e+00> : vector<8x4xf32>
      %24 = tpu.matmul %21, %23, %cst_26 {dimension_numbers = #tpu.dot_dimension_numbers<[1], [0], [0], [1], [0, 0, 1, 1], [], []>} : vector<8x8xbf16>, vector<8x4xbf16>, vector<8x4xf32> -> vector<8x4xf32>
      %25 = arith.addf %16, %24 : vector<8x4xf32>
      %c1_i32_27 = arith.constant 1 : i32
      %26 = arith.addi %arg5, %c1_i32_27 : i32
      %c0_28 = arith.constant 0 : index
      %27 = arith.index_cast %26 : i32 to index
      %c1_29 = arith.constant 1 : index
      %c0_30 = arith.constant 0 : index
      %28 = vector.load %arg1[%c0_28, %27, %c1_29, %c0_30] : memref<1x10x10x8xbf16, #tpu.memory_space<vmem>>, vector<1x1x8x8xbf16>
      %29 = vector.shape_cast %28 : vector<1x1x8x8xbf16> to vector<1x8x8xbf16>
      %30 = vector.shape_cast %29 : vector<1x8x8xbf16> to vector<8x8xbf16>
      %c1_31 = arith.constant 1 : index
      %c1_32 = arith.constant 1 : index
      %c0_33 = arith.constant 0 : index
      %c0_34 = arith.constant 0 : index
      %31 = vector.load %arg2[%c1_31, %c1_32, %c0_33, %c0_34] : memref<4x4x8x4xbf16, #tpu.memory_space<vmem>>, vector<1x1x8x4xbf16>
      %32 = vector.shape_cast %31 : vector<1x1x8x4xbf16> to vector<8x4xbf16>
      %cst_35 = arith.constant dense<0.000000e+00> : vector<8x4xf32>
      %33 = tpu.matmul %30, %32, %cst_35 {dimension_numbers = #tpu.dot_dimension_numbers<[1], [0], [0], [1], [0, 0, 1, 1], [], []>} : vector<8x8xbf16>, vector<8x4xbf16>, vector<8x4xf32> -> vector<8x4xf32>
      %34 = arith.addf %25, %33 : vector<8x4xf32>
      %c0_i32_36 = arith.constant 0 : i32
      %35 = arith.addi %arg5, %c0_i32_36 : i32
      %c0_37 = arith.constant 0 : index
      %36 = arith.index_cast %35 : i32 to index
      %c2_38 = arith.constant 2 : index
      %c0_39 = arith.constant 0 : index
      %37 = vector.load %arg1[%c0_37, %36, %c2_38, %c0_39] : memref<1x10x10x8xbf16, #tpu.memory_space<vmem>>, vector<1x1x8x8xbf16>
      %38 = vector.shape_cast %37 : vector<1x1x8x8xbf16> to vector<1x8x8xbf16>
      %39 = vector.shape_cast %38 : vector<1x8x8xbf16> to vector<8x8xbf16>
      %c1_40 = arith.constant 1 : index
      %c2_41 = arith.constant 2 : index
      %c0_42 = arith.constant 0 : index
      %c0_43 = arith.constant 0 : index
      %40 = vector.load %arg2[%c1_40, %c2_41, %c0_42, %c0_43] : memref<4x4x8x4xbf16, #tpu.memory_space<vmem>>, vector<1x1x8x4xbf16>
      %41 = vector.shape_cast %40 : vector<1x1x8x4xbf16> to vector<8x4xbf16>
      %cst_44 = arith.constant dense<0.000000e+00> : vector<8x4xf32>
      %42 = tpu.matmul %39, %41, %cst_44 {dimension_numbers = #tpu.dot_dimension_numbers<[1], [0], [0], [1], [0, 0, 1, 1], [], []>} : vector<8x8xbf16>, vector<8x4xbf16>, vector<8x4xf32> -> vector<8x4xf32>
      %43 = arith.addf %34, %42 : vector<8x4xf32>
      %c0_i32_45 = arith.constant 0 : i32
      %44 = arith.addi %arg5, %c0_i32_45 : i32
      %c0_46 = arith.constant 0 : index
      %45 = arith.index_cast %44 : i32 to index
      %c1_47 = arith.constant 1 : index
      %c0_48 = arith.constant 0 : index
      %46 = vector.load %arg1[%c0_46, %45, %c1_47, %c0_48] : memref<1x10x10x8xbf16, #tpu.memory_space<vmem>>, vector<1x1x8x8xbf16>
      %47 = vector.shape_cast %46 : vector<1x1x8x8xbf16> to vector<1x8x8xbf16>
      %48 = vector.shape_cast %47 : vector<1x8x8xbf16> to vector<8x8xbf16>
      %c1_49 = arith.constant 1 : index
      %c3 = arith.constant 3 : index
      %c0_50 = arith.constant 0 : index
      %c0_51 = arith.constant 0 : index
      %49 = vector.load %arg2[%c1_49, %c3, %c0_50, %c0_51] : memref<4x4x8x4xbf16, #tpu.memory_space<vmem>>, vector<1x1x8x4xbf16>
      %50 = vector.shape_cast %49 : vector<1x1x8x4xbf16> to vector<8x4xbf16>
      %cst_52 = arith.constant dense<0.000000e+00> : vector<8x4xf32>
      %51 = tpu.matmul %48, %50, %cst_52 {dimension_numbers = #tpu.dot_dimension_numbers<[1], [0], [0], [1], [0, 0, 1, 1], [], []>} : vector<8x8xbf16>, vector<8x4xbf16>, vector<8x4xf32> -> vector<8x4xf32>
      %52 = arith.addf %43, %51 : vector<8x4xf32>
      %53 = vector.shape_cast %52 : vector<8x4xf32> to vector<1x8x4xf32>
      %54 = arith.truncf %53 : vector<1x8x4xf32> to vector<1x8x4xbf16>
      %c0_53 = arith.constant 0 : index
      %c1_54 = arith.constant 1 : index
      %55 = arith.index_cast %arg5 : i32 to index
      %c0_55 = arith.constant 0 : index
      %c0_56 = arith.constant 0 : index
      %56 = vector.load %arg3[%c0_53, %c1_54, %55, %c0_55, %c0_56] : memref<1x4x8x8x4xbf16, #tpu.memory_space<vmem>>, vector<1x1x1x8x4xbf16>
      %57 = vector.shape_cast %56 : vector<1x1x1x8x4xbf16> to vector<1x8x4xbf16>
      %58 = vector.shape_cast %54 : vector<1x8x4xbf16> to vector<1x1x1x8x4xbf16>
      tpu.vector_store %arg3[%c0_53, %c1_54, %55, %c0_55, %c0_56], %58 {strides = array<i32>} : memref<1x4x8x8x4xbf16, #tpu.memory_space<vmem>>, vector<1x1x1x8x4xbf16>,
      %cst_57 = arith.constant dense<0.000000e+00> : vector<4xf32>
      %59 = vector.multi_reduction <add>, %52, %cst_57 [0] : vector<8x4xf32> to vector<4xf32>
      %60 = vector.shape_cast %59 : vector<4xf32> to vector<1x4xf32>
      %61 = arith.addf %arg6, %60 : vector<1x4xf32>
      %62 = arith.mulf %52, %52 : vector<8x4xf32>
      %cst_58 = arith.constant dense<0.000000e+00> : vector<4xf32>
      %63 = vector.multi_reduction <add>, %62, %cst_58 [0] : vector<8x4xf32> to vector<4xf32>
      %64 = vector.shape_cast %63 : vector<4xf32> to vector<1x4xf32>
      %65 = arith.addf %arg7, %64 : vector<1x4xf32>
      scf.yield %61, %65 : vector<1x4xf32>, vector<1x4xf32>
    }
    %c8_i32_5 = arith.constant 8 : i32
    %c0_i32_6 = arith.constant 0 : i32
    %c8_i32_7 = arith.constant 8 : i32
    %6 = arith.addi %c0_i32_6, %c8_i32_7 : i32
    %c1_i32_8 = arith.constant 1 : i32
    %7:2 = scf.for %arg5 = %c0_i32_6 to %6 step %c1_i32_8 iter_args(%arg6 = %5#0, %arg7 = %5#1) -> (vector<1x4xf32>, vector<1x4xf32>)  : i32 {
      %cst_18 = arith.constant 0.000000e+00 : f32
      %16 = vector.broadcast %cst_18 : f32 to vector<8x4xf32>
      %c2_i32 = arith.constant 2 : i32
      %17 = arith.addi %arg5, %c2_i32 : i32
      %c0_19 = arith.constant 0 : index
      %18 = arith.index_cast %17 : i32 to index
      %c1_20 = arith.constant 1 : index
      %c0_21 = arith.constant 0 : index
      %19 = vector.load %arg1[%c0_19, %18, %c1_20, %c0_21] : memref<1x10x10x8xbf16, #tpu.memory_space<vmem>>, vector<1x1x8x8xbf16>
      %20 = vector.shape_cast %19 : vector<1x1x8x8xbf16> to vector<1x8x8xbf16>
      %21 = vector.shape_cast %20 : vector<1x8x8xbf16> to vector<8x8xbf16>
      %c2 = arith.constant 2 : index
      %c0_22 = arith.constant 0 : index
      %c0_23 = arith.constant 0 : index
      %c0_24 = arith.constant 0 : index
      %22 = vector.load %arg2[%c2, %c0_22, %c0_23, %c0_24] : memref<4x4x8x4xbf16, #tpu.memory_space<vmem>>, vector<1x1x8x4xbf16>
      %23 = vector.shape_cast %22 : vector<1x1x8x4xbf16> to vector<8x4xbf16>
      %cst_25 = arith.constant dense<0.000000e+00> : vector<8x4xf32>
      %24 = tpu.matmul %21, %23, %cst_25 {dimension_numbers = #tpu.dot_dimension_numbers<[1], [0], [0], [1], [0, 0, 1, 1], [], []>} : vector<8x8xbf16>, vector<8x4xbf16>, vector<8x4xf32> -> vector<8x4xf32>
      %25 = arith.addf %16, %24 : vector<8x4xf32>
      %c2_i32_26 = arith.constant 2 : i32
      %26 = arith.addi %arg5, %c2_i32_26 : i32
      %c0_27 = arith.constant 0 : index
      %27 = arith.index_cast %26 : i32 to index
      %c0_28 = arith.constant 0 : index
      %c0_29 = arith.constant 0 : index
      %28 = vector.load %arg1[%c0_27, %27, %c0_28, %c0_29] : memref<1x10x10x8xbf16, #tpu.memory_space<vmem>>, vector<1x1x8x8xbf16>
      %29 = vector.shape_cast %28 : vector<1x1x8x8xbf16> to vector<1x8x8xbf16>
      %30 = vector.shape_cast %29 : vector<1x8x8xbf16> to vector<8x8xbf16>
      %c2_30 = arith.constant 2 : index
      %c1_31 = arith.constant 1 : index
      %c0_32 = arith.constant 0 : index
      %c0_33 = arith.constant 0 : index
      %31 = vector.load %arg2[%c2_30, %c1_31, %c0_32, %c0_33] : memref<4x4x8x4xbf16, #tpu.memory_space<vmem>>, vector<1x1x8x4xbf16>
      %32 = vector.shape_cast %31 : vector<1x1x8x4xbf16> to vector<8x4xbf16>
      %cst_34 = arith.constant dense<0.000000e+00> : vector<8x4xf32>
      %33 = tpu.matmul %30, %32, %cst_34 {dimension_numbers = #tpu.dot_dimension_numbers<[1], [0], [0], [1], [0, 0, 1, 1], [], []>} : vector<8x8xbf16>, vector<8x4xbf16>, vector<8x4xf32> -> vector<8x4xf32>
      %34 = arith.addf %25, %33 : vector<8x4xf32>
      %c1_i32_35 = arith.constant 1 : i32
      %35 = arith.addi %arg5, %c1_i32_35 : i32
      %c0_36 = arith.constant 0 : index
      %36 = arith.index_cast %35 : i32 to index
      %c1_37 = arith.constant 1 : index
      %c0_38 = arith.constant 0 : index
      %37 = vector.load %arg1[%c0_36, %36, %c1_37, %c0_38] : memref<1x10x10x8xbf16, #tpu.memory_space<vmem>>, vector<1x1x8x8xbf16>
      %38 = vector.shape_cast %37 : vector<1x1x8x8xbf16> to vector<1x8x8xbf16>
      %39 = vector.shape_cast %38 : vector<1x8x8xbf16> to vector<8x8xbf16>
      %c2_39 = arith.constant 2 : index
      %c2_40 = arith.constant 2 : index
      %c0_41 = arith.constant 0 : index
      %c0_42 = arith.constant 0 : index
      %40 = vector.load %arg2[%c2_39, %c2_40, %c0_41, %c0_42] : memref<4x4x8x4xbf16, #tpu.memory_space<vmem>>, vector<1x1x8x4xbf16>
      %41 = vector.shape_cast %40 : vector<1x1x8x4xbf16> to vector<8x4xbf16>
      %cst_43 = arith.constant dense<0.000000e+00> : vector<8x4xf32>
      %42 = tpu.matmul %39, %41, %cst_43 {dimension_numbers = #tpu.dot_dimension_numbers<[1], [0], [0], [1], [0, 0, 1, 1], [], []>} : vector<8x8xbf16>, vector<8x4xbf16>, vector<8x4xf32> -> vector<8x4xf32>
      %43 = arith.addf %34, %42 : vector<8x4xf32>
      %c1_i32_44 = arith.constant 1 : i32
      %44 = arith.addi %arg5, %c1_i32_44 : i32
      %c0_45 = arith.constant 0 : index
      %45 = arith.index_cast %44 : i32 to index
      %c0_46 = arith.constant 0 : index
      %c0_47 = arith.constant 0 : index
      %46 = vector.load %arg1[%c0_45, %45, %c0_46, %c0_47] : memref<1x10x10x8xbf16, #tpu.memory_space<vmem>>, vector<1x1x8x8xbf16>
      %47 = vector.shape_cast %46 : vector<1x1x8x8xbf16> to vector<1x8x8xbf16>
      %48 = vector.shape_cast %47 : vector<1x8x8xbf16> to vector<8x8xbf16>
      %c2_48 = arith.constant 2 : index
      %c3 = arith.constant 3 : index
      %c0_49 = arith.constant 0 : index
      %c0_50 = arith.constant 0 : index
      %49 = vector.load %arg2[%c2_48, %c3, %c0_49, %c0_50] : memref<4x4x8x4xbf16, #tpu.memory_space<vmem>>, vector<1x1x8x4xbf16>
      %50 = vector.shape_cast %49 : vector<1x1x8x4xbf16> to vector<8x4xbf16>
      %cst_51 = arith.constant dense<0.000000e+00> : vector<8x4xf32>
      %51 = tpu.matmul %48, %50, %cst_51 {dimension_numbers = #tpu.dot_dimension_numbers<[1], [0], [0], [1], [0, 0, 1, 1], [], []>} : vector<8x8xbf16>, vector<8x4xbf16>, vector<8x4xf32> -> vector<8x4xf32>
      %52 = arith.addf %43, %51 : vector<8x4xf32>
      %53 = vector.shape_cast %52 : vector<8x4xf32> to vector<1x8x4xf32>
      %54 = arith.truncf %53 : vector<1x8x4xf32> to vector<1x8x4xbf16>
      %c0_52 = arith.constant 0 : index
      %c2_53 = arith.constant 2 : index
      %55 = arith.index_cast %arg5 : i32 to index
      %c0_54 = arith.constant 0 : index
      %c0_55 = arith.constant 0 : index
      %56 = vector.load %arg3[%c0_52, %c2_53, %55, %c0_54, %c0_55] : memref<1x4x8x8x4xbf16, #tpu.memory_space<vmem>>, vector<1x1x1x8x4xbf16>
      %57 = vector.shape_cast %56 : vector<1x1x1x8x4xbf16> to vector<1x8x4xbf16>
      %58 = vector.shape_cast %54 : vector<1x8x4xbf16> to vector<1x1x1x8x4xbf16>
      tpu.vector_store %arg3[%c0_52, %c2_53, %55, %c0_54, %c0_55], %58 {strides = array<i32>} : memref<1x4x8x8x4xbf16, #tpu.memory_space<vmem>>, vector<1x1x1x8x4xbf16>,
      %cst_56 = arith.constant dense<0.000000e+00> : vector<4xf32>
      %59 = vector.multi_reduction <add>, %52, %cst_56 [0] : vector<8x4xf32> to vector<4xf32>
      %60 = vector.shape_cast %59 : vector<4xf32> to vector<1x4xf32>
      %61 = arith.addf %arg6, %60 : vector<1x4xf32>
      %62 = arith.mulf %52, %52 : vector<8x4xf32>
      %cst_57 = arith.constant dense<0.000000e+00> : vector<4xf32>
      %63 = vector.multi_reduction <add>, %62, %cst_57 [0] : vector<8x4xf32> to vector<4xf32>
      %64 = vector.shape_cast %63 : vector<4xf32> to vector<1x4xf32>
      %65 = arith.addf %arg7, %64 : vector<1x4xf32>
      scf.yield %61, %65 : vector<1x4xf32>, vector<1x4xf32>
    }
    %c8_i32_9 = arith.constant 8 : i32
    %c0_i32_10 = arith.constant 0 : i32
    %c8_i32_11 = arith.constant 8 : i32
    %8 = arith.addi %c0_i32_10, %c8_i32_11 : i32
    %c1_i32_12 = arith.constant 1 : i32
    %9:2 = scf.for %arg5 = %c0_i32_10 to %8 step %c1_i32_12 iter_args(%arg6 = %7#0, %arg7 = %7#1) -> (vector<1x4xf32>, vector<1x4xf32>)  : i32 {
      %cst_18 = arith.constant 0.000000e+00 : f32
      %16 = vector.broadcast %cst_18 : f32 to vector<8x4xf32>
      %c2_i32 = arith.constant 2 : i32
      %17 = arith.addi %arg5, %c2_i32 : i32
      %c0_19 = arith.constant 0 : index
      %18 = arith.index_cast %17 : i32 to index
      %c2 = arith.constant 2 : index
      %c0_20 = arith.constant 0 : index
      %19 = vector.load %arg1[%c0_19, %18, %c2, %c0_20] : memref<1x10x10x8xbf16, #tpu.memory_space<vmem>>, vector<1x1x8x8xbf16>
      %20 = vector.shape_cast %19 : vector<1x1x8x8xbf16> to vector<1x8x8xbf16>
      %21 = vector.shape_cast %20 : vector<1x8x8xbf16> to vector<8x8xbf16>
      %c3 = arith.constant 3 : index
      %c0_21 = arith.constant 0 : index
      %c0_22 = arith.constant 0 : index
      %c0_23 = arith.constant 0 : index
      %22 = vector.load %arg2[%c3, %c0_21, %c0_22, %c0_23] : memref<4x4x8x4xbf16, #tpu.memory_space<vmem>>, vector<1x1x8x4xbf16>
      %23 = vector.shape_cast %22 : vector<1x1x8x4xbf16> to vector<8x4xbf16>
      %cst_24 = arith.constant dense<0.000000e+00> : vector<8x4xf32>
      %24 = tpu.matmul %21, %23, %cst_24 {dimension_numbers = #tpu.dot_dimension_numbers<[1], [0], [0], [1], [0, 0, 1, 1], [], []>} : vector<8x8xbf16>, vector<8x4xbf16>, vector<8x4xf32> -> vector<8x4xf32>
      %25 = arith.addf %16, %24 : vector<8x4xf32>
      %c2_i32_25 = arith.constant 2 : i32
      %26 = arith.addi %arg5, %c2_i32_25 : i32
      %c0_26 = arith.constant 0 : index
      %27 = arith.index_cast %26 : i32 to index
      %c1_27 = arith.constant 1 : index
      %c0_28 = arith.constant 0 : index
      %28 = vector.load %arg1[%c0_26, %27, %c1_27, %c0_28] : memref<1x10x10x8xbf16, #tpu.memory_space<vmem>>, vector<1x1x8x8xbf16>
      %29 = vector.shape_cast %28 : vector<1x1x8x8xbf16> to vector<1x8x8xbf16>
      %30 = vector.shape_cast %29 : vector<1x8x8xbf16> to vector<8x8xbf16>
      %c3_29 = arith.constant 3 : index
      %c1_30 = arith.constant 1 : index
      %c0_31 = arith.constant 0 : index
      %c0_32 = arith.constant 0 : index
      %31 = vector.load %arg2[%c3_29, %c1_30, %c0_31, %c0_32] : memref<4x4x8x4xbf16, #tpu.memory_space<vmem>>, vector<1x1x8x4xbf16>
      %32 = vector.shape_cast %31 : vector<1x1x8x4xbf16> to vector<8x4xbf16>
      %cst_33 = arith.constant dense<0.000000e+00> : vector<8x4xf32>
      %33 = tpu.matmul %30, %32, %cst_33 {dimension_numbers = #tpu.dot_dimension_numbers<[1], [0], [0], [1], [0, 0, 1, 1], [], []>} : vector<8x8xbf16>, vector<8x4xbf16>, vector<8x4xf32> -> vector<8x4xf32>
      %34 = arith.addf %25, %33 : vector<8x4xf32>
      %c1_i32_34 = arith.constant 1 : i32
      %35 = arith.addi %arg5, %c1_i32_34 : i32
      %c0_35 = arith.constant 0 : index
      %36 = arith.index_cast %35 : i32 to index
      %c2_36 = arith.constant 2 : index
      %c0_37 = arith.constant 0 : index
      %37 = vector.load %arg1[%c0_35, %36, %c2_36, %c0_37] : memref<1x10x10x8xbf16, #tpu.memory_space<vmem>>, vector<1x1x8x8xbf16>
      %38 = vector.shape_cast %37 : vector<1x1x8x8xbf16> to vector<1x8x8xbf16>
      %39 = vector.shape_cast %38 : vector<1x8x8xbf16> to vector<8x8xbf16>
      %c3_38 = arith.constant 3 : index
      %c2_39 = arith.constant 2 : index
      %c0_40 = arith.constant 0 : index
      %c0_41 = arith.constant 0 : index
      %40 = vector.load %arg2[%c3_38, %c2_39, %c0_40, %c0_41] : memref<4x4x8x4xbf16, #tpu.memory_space<vmem>>, vector<1x1x8x4xbf16>
      %41 = vector.shape_cast %40 : vector<1x1x8x4xbf16> to vector<8x4xbf16>
      %cst_42 = arith.constant dense<0.000000e+00> : vector<8x4xf32>
      %42 = tpu.matmul %39, %41, %cst_42 {dimension_numbers = #tpu.dot_dimension_numbers<[1], [0], [0], [1], [0, 0, 1, 1], [], []>} : vector<8x8xbf16>, vector<8x4xbf16>, vector<8x4xf32> -> vector<8x4xf32>
      %43 = arith.addf %34, %42 : vector<8x4xf32>
      %c1_i32_43 = arith.constant 1 : i32
      %44 = arith.addi %arg5, %c1_i32_43 : i32
      %c0_44 = arith.constant 0 : index
      %45 = arith.index_cast %44 : i32 to index
      %c1_45 = arith.constant 1 : index
      %c0_46 = arith.constant 0 : index
      %46 = vector.load %arg1[%c0_44, %45, %c1_45, %c0_46] : memref<1x10x10x8xbf16, #tpu.memory_space<vmem>>, vector<1x1x8x8xbf16>
      %47 = vector.shape_cast %46 : vector<1x1x8x8xbf16> to vector<1x8x8xbf16>
      %48 = vector.shape_cast %47 : vector<1x8x8xbf16> to vector<8x8xbf16>
      %c3_47 = arith.constant 3 : index
      %c3_48 = arith.constant 3 : index
      %c0_49 = arith.constant 0 : index
      %c0_50 = arith.constant 0 : index
      %49 = vector.load %arg2[%c3_47, %c3_48, %c0_49, %c0_50] : memref<4x4x8x4xbf16, #tpu.memory_space<vmem>>, vector<1x1x8x4xbf16>
      %50 = vector.shape_cast %49 : vector<1x1x8x4xbf16> to vector<8x4xbf16>
      %cst_51 = arith.constant dense<0.000000e+00> : vector<8x4xf32>
      %51 = tpu.matmul %48, %50, %cst_51 {dimension_numbers = #tpu.dot_dimension_numbers<[1], [0], [0], [1], [0, 0, 1, 1], [], []>} : vector<8x8xbf16>, vector<8x4xbf16>, vector<8x4xf32> -> vector<8x4xf32>
      %52 = arith.addf %43, %51 : vector<8x4xf32>
      %53 = vector.shape_cast %52 : vector<8x4xf32> to vector<1x8x4xf32>
      %54 = arith.truncf %53 : vector<1x8x4xf32> to vector<1x8x4xbf16>
      %c0_52 = arith.constant 0 : index
      %c3_53 = arith.constant 3 : index
      %55 = arith.index_cast %arg5 : i32 to index
      %c0_54 = arith.constant 0 : index
      %c0_55 = arith.constant 0 : index
      %56 = vector.load %arg3[%c0_52, %c3_53, %55, %c0_54, %c0_55] : memref<1x4x8x8x4xbf16, #tpu.memory_space<vmem>>, vector<1x1x1x8x4xbf16>
      %57 = vector.shape_cast %56 : vector<1x1x1x8x4xbf16> to vector<1x8x4xbf16>
      %58 = vector.shape_cast %54 : vector<1x8x4xbf16> to vector<1x1x1x8x4xbf16>
      tpu.vector_store %arg3[%c0_52, %c3_53, %55, %c0_54, %c0_55], %58 {strides = array<i32>} : memref<1x4x8x8x4xbf16, #tpu.memory_space<vmem>>, vector<1x1x1x8x4xbf16>,
      %cst_56 = arith.constant dense<0.000000e+00> : vector<4xf32>
      %59 = vector.multi_reduction <add>, %52, %cst_56 [0] : vector<8x4xf32> to vector<4xf32>
      %60 = vector.shape_cast %59 : vector<4xf32> to vector<1x4xf32>
      %61 = arith.addf %arg6, %60 : vector<1x4xf32>
      %62 = arith.mulf %52, %52 : vector<8x4xf32>
      %cst_57 = arith.constant dense<0.000000e+00> : vector<4xf32>
      %63 = vector.multi_reduction <add>, %62, %cst_57 [0] : vector<8x4xf32> to vector<4xf32>
      %64 = vector.shape_cast %63 : vector<4xf32> to vector<1x4xf32>
      %65 = arith.addf %arg7, %64 : vector<1x4xf32>
      scf.yield %61, %65 : vector<1x4xf32>, vector<1x4xf32>
    }
    %c8_i32_13 = arith.constant 8 : i32
    %c0 = arith.constant 0 : index
    %c0_14 = arith.constant 0 : index
    %c0_15 = arith.constant 0 : index
    %10 = vector.load %arg4[%c0, %c0_14, %c0_15] : memref<1x2x4xf32, #tpu.memory_space<vmem>>, vector<1x1x4xf32>
    %11 = vector.shape_cast %10 : vector<1x1x4xf32> to vector<1x4xf32>
    %12 = vector.shape_cast %9#0 : vector<1x4xf32> to vector<1x1x4xf32>
    tpu.vector_store %arg4[%c0, %c0_14, %c0_15], %12 {strides = array<i32>} : memref<1x2x4xf32, #tpu.memory_space<vmem>>, vector<1x1x4xf32>,
    %c0_16 = arith.constant 0 : index
    %c1 = arith.constant 1 : index
    %c0_17 = arith.constant 0 : index
    %13 = vector.load %arg4[%c0_16, %c1, %c0_17] : memref<1x2x4xf32, #tpu.memory_space<vmem>>, vector<1x1x4xf32>
    %14 = vector.shape_cast %13 : vector<1x1x4xf32> to vector<1x4xf32>
    %15 = vector.shape_cast %9#1 : vector<1x4xf32> to vector<1x1x4xf32>
    tpu.vector_store %arg4[%c0_16, %c1, %c0_17], %15 {strides = array<i32>} : memref<1x2x4xf32, #tpu.memory_space<vmem>>, vector<1x1x4xf32>,
    return
  }
  func.func @transform_0(%arg0: i32) -> (i32, i32, i32, i32) {
    %c0_i32 = arith.constant 0 : i32
    %c0_i32_0 = arith.constant 0 : i32
    %c0_i32_1 = arith.constant 0 : i32
    %c0_i32_2 = arith.constant 0 : i32
    return %arg0, %c0_i32, %c0_i32_0, %c0_i32_1 : i32, i32, i32, i32
  }
  func.func @transform_1(%arg0: i32) -> (i32, i32, i32, i32) {
    %c0_i32 = arith.constant 0 : i32
    %c0_i32_0 = arith.constant 0 : i32
    %c0_i32_1 = arith.constant 0 : i32
    %c0_i32_2 = arith.constant 0 : i32
    %c0_i32_3 = arith.constant 0 : i32
    return %c0_i32, %c0_i32_0, %c0_i32_1, %c0_i32_2 : i32, i32, i32, i32
  }
  func.func @transform_2(%arg0: i32) -> (i32, i32, i32, i32, i32) {
    %c0_i32 = arith.constant 0 : i32
    %c0_i32_0 = arith.constant 0 : i32
    %c0_i32_1 = arith.constant 0 : i32
    %c0_i32_2 = arith.constant 0 : i32
    %c0_i32_3 = arith.constant 0 : i32
    return %arg0, %c0_i32, %c0_i32_0, %c0_i32_1, %c0_i32_2 : i32, i32, i32, i32, i32
  }
  func.func @transform_3(%arg0: i32) -> (i32, i32, i32) {
    %c0_i32 = arith.constant 0 : i32
    %c0_i32_0 = arith.constant 0 : i32
    %c0_i32_1 = arith.constant 0 : i32
    return %arg0, %c0_i32, %c0_i32_0 : i32, i32, i32
  }
}

module attributes {stable_mosaic.version = 11 : i64} {
  func.func @_convT_out_kernel(%arg0: i32, %arg1: memref<1x18x4x18xbf16, #tpu.memory_space<vmem>>, %arg2: memref<4x4x3x4xbf16, #tpu.memory_space<vmem>>, %arg3: memref<3x1xf32, #tpu.memory_space<vmem>>, %arg4: memref<1x2x2x16x3x16xf32, #tpu.memory_space<vmem>>) attributes {dimension_semantics = [#tpu.dimension_semantics<parallel>], iteration_bounds = array<i64: 2>, scalar_prefetch = 0 : i64, scratch_operands = 0 : i64, tpu.core_type = #tpu.core_type<tc>, window_params = [{transform_indices = @transform_0, window_bounds = array<i64: 1, 18, 4, 18>}, {pipeline_mode = #tpu.pipeline_mode<synchronous>, transform_indices = @transform_1, window_bounds = array<i64: 4, 4, 3, 4>}, {pipeline_mode = #tpu.pipeline_mode<synchronous>, transform_indices = @transform_2, window_bounds = array<i64: 3, 1>}, {transform_indices = @transform_3, window_bounds = array<i64: 1, 2, 2, 16, 3, 16>}]} {
    %c0 = arith.constant 0 : index
    %c0_0 = arith.constant 0 : index
    %0 = vector.load %arg3[%c0, %c0_0] : memref<3x1xf32, #tpu.memory_space<vmem>>, vector<3x1xf32>
    %c0_i32 = arith.constant 0 : i32
    %c16_i32 = arith.constant 16 : i32
    %1 = arith.addi %c0_i32, %c16_i32 : i32
    %c1_i32 = arith.constant 1 : i32
    scf.for %arg5 = %c0_i32 to %1 step %c1_i32  : i32 {
      %cst = arith.constant 0.000000e+00 : f32
      %5 = vector.broadcast %cst : f32 to vector<3x16xf32>
      %c1_i32_14 = arith.constant 1 : i32
      %6 = arith.addi %arg5, %c1_i32_14 : i32
      %c0_15 = arith.constant 0 : index
      %7 = arith.index_cast %6 : i32 to index
      %c0_16 = arith.constant 0 : index
      %c1 = arith.constant 1 : index
      %8 = vector.load %arg1[%c0_15, %7, %c0_16, %c1] : memref<1x18x4x18xbf16, #tpu.memory_space<vmem>>, vector<1x1x4x16xbf16>
      %9 = vector.shape_cast %8 : vector<1x1x4x16xbf16> to vector<1x4x16xbf16>
      %10 = vector.shape_cast %9 : vector<1x4x16xbf16> to vector<4x16xbf16>
      %c0_17 = arith.constant 0 : index
      %c0_18 = arith.constant 0 : index
      %c0_19 = arith.constant 0 : index
      %c0_20 = arith.constant 0 : index
      %11 = vector.load %arg2[%c0_17, %c0_18, %c0_19, %c0_20] : memref<4x4x3x4xbf16, #tpu.memory_space<vmem>>, vector<1x1x3x4xbf16>
      %12 = vector.shape_cast %11 : vector<1x1x3x4xbf16> to vector<3x4xbf16>
      %cst_21 = arith.constant dense<0.000000e+00> : vector<3x16xf32>
      %13 = tpu.matmul %12, %10, %cst_21 {dimension_numbers = #tpu.dot_dimension_numbers<[1], [0], [0], [1], [0, 0, 1, 1], [], []>} : vector<3x4xbf16>, vector<4x16xbf16>, vector<3x16xf32> -> vector<3x16xf32>
      %14 = arith.addf %5, %13 : vector<3x16xf32>
      %c1_i32_22 = arith.constant 1 : i32
      %15 = arith.addi %arg5, %c1_i32_22 : i32
      %c0_23 = arith.constant 0 : index
      %16 = arith.index_cast %15 : i32 to index
      %c0_24 = arith.constant 0 : index
      %c0_25 = arith.constant 0 : index
      %17 = vector.load %arg1[%c0_23, %16, %c0_24, %c0_25] : memref<1x18x4x18xbf16, #tpu.memory_space<vmem>>, vector<1x1x4x16xbf16>
      %18 = vector.shape_cast %17 : vector<1x1x4x16xbf16> to vector<1x4x16xbf16>
      %19 = vector.shape_cast %18 : vector<1x4x16xbf16> to vector<4x16xbf16>
      %c0_26 = arith.constant 0 : index
      %c1_27 = arith.constant 1 : index
      %c0_28 = arith.constant 0 : index
      %c0_29 = arith.constant 0 : index
      %20 = vector.load %arg2[%c0_26, %c1_27, %c0_28, %c0_29] : memref<4x4x3x4xbf16, #tpu.memory_space<vmem>>, vector<1x1x3x4xbf16>
      %21 = vector.shape_cast %20 : vector<1x1x3x4xbf16> to vector<3x4xbf16>
      %cst_30 = arith.constant dense<0.000000e+00> : vector<3x16xf32>
      %22 = tpu.matmul %21, %19, %cst_30 {dimension_numbers = #tpu.dot_dimension_numbers<[1], [0], [0], [1], [0, 0, 1, 1], [], []>} : vector<3x4xbf16>, vector<4x16xbf16>, vector<3x16xf32> -> vector<3x16xf32>
      %23 = arith.addf %14, %22 : vector<3x16xf32>
      %c0_i32_31 = arith.constant 0 : i32
      %24 = arith.addi %arg5, %c0_i32_31 : i32
      %c0_32 = arith.constant 0 : index
      %25 = arith.index_cast %24 : i32 to index
      %c0_33 = arith.constant 0 : index
      %c1_34 = arith.constant 1 : index
      %26 = vector.load %arg1[%c0_32, %25, %c0_33, %c1_34] : memref<1x18x4x18xbf16, #tpu.memory_space<vmem>>, vector<1x1x4x16xbf16>
      %27 = vector.shape_cast %26 : vector<1x1x4x16xbf16> to vector<1x4x16xbf16>
      %28 = vector.shape_cast %27 : vector<1x4x16xbf16> to vector<4x16xbf16>
      %c0_35 = arith.constant 0 : index
      %c2 = arith.constant 2 : index
      %c0_36 = arith.constant 0 : index
      %c0_37 = arith.constant 0 : index
      %29 = vector.load %arg2[%c0_35, %c2, %c0_36, %c0_37] : memref<4x4x3x4xbf16, #tpu.memory_space<vmem>>, vector<1x1x3x4xbf16>
      %30 = vector.shape_cast %29 : vector<1x1x3x4xbf16> to vector<3x4xbf16>
      %cst_38 = arith.constant dense<0.000000e+00> : vector<3x16xf32>
      %31 = tpu.matmul %30, %28, %cst_38 {dimension_numbers = #tpu.dot_dimension_numbers<[1], [0], [0], [1], [0, 0, 1, 1], [], []>} : vector<3x4xbf16>, vector<4x16xbf16>, vector<3x16xf32> -> vector<3x16xf32>
      %32 = arith.addf %23, %31 : vector<3x16xf32>
      %c0_i32_39 = arith.constant 0 : i32
      %33 = arith.addi %arg5, %c0_i32_39 : i32
      %c0_40 = arith.constant 0 : index
      %34 = arith.index_cast %33 : i32 to index
      %c0_41 = arith.constant 0 : index
      %c0_42 = arith.constant 0 : index
      %35 = vector.load %arg1[%c0_40, %34, %c0_41, %c0_42] : memref<1x18x4x18xbf16, #tpu.memory_space<vmem>>, vector<1x1x4x16xbf16>
      %36 = vector.shape_cast %35 : vector<1x1x4x16xbf16> to vector<1x4x16xbf16>
      %37 = vector.shape_cast %36 : vector<1x4x16xbf16> to vector<4x16xbf16>
      %c0_43 = arith.constant 0 : index
      %c3 = arith.constant 3 : index
      %c0_44 = arith.constant 0 : index
      %c0_45 = arith.constant 0 : index
      %38 = vector.load %arg2[%c0_43, %c3, %c0_44, %c0_45] : memref<4x4x3x4xbf16, #tpu.memory_space<vmem>>, vector<1x1x3x4xbf16>
      %39 = vector.shape_cast %38 : vector<1x1x3x4xbf16> to vector<3x4xbf16>
      %cst_46 = arith.constant dense<0.000000e+00> : vector<3x16xf32>
      %40 = tpu.matmul %39, %37, %cst_46 {dimension_numbers = #tpu.dot_dimension_numbers<[1], [0], [0], [1], [0, 0, 1, 1], [], []>} : vector<3x4xbf16>, vector<4x16xbf16>, vector<3x16xf32> -> vector<3x16xf32>
      %41 = arith.addf %32, %40 : vector<3x16xf32>
      %42 = vector.broadcast %0 : vector<3x1xf32> to vector<3x16xf32>
      %43 = arith.addf %41, %42 : vector<3x16xf32>
      %44 = math.tanh %43 : vector<3x16xf32>
      %45 = vector.shape_cast %44 : vector<3x16xf32> to vector<1x3x16xf32>
      %c0_47 = arith.constant 0 : index
      %c0_48 = arith.constant 0 : index
      %c0_49 = arith.constant 0 : index
      %46 = arith.index_cast %arg5 : i32 to index
      %c0_50 = arith.constant 0 : index
      %c0_51 = arith.constant 0 : index
      %47 = vector.load %arg4[%c0_47, %c0_48, %c0_49, %46, %c0_50, %c0_51] : memref<1x2x2x16x3x16xf32, #tpu.memory_space<vmem>>, vector<1x1x1x1x3x16xf32>
      %48 = vector.shape_cast %47 : vector<1x1x1x1x3x16xf32> to vector<1x3x16xf32>
      %49 = vector.shape_cast %45 : vector<1x3x16xf32> to vector<1x1x1x1x3x16xf32>
      tpu.vector_store %arg4[%c0_47, %c0_48, %c0_49, %46, %c0_50, %c0_51], %49 {strides = array<i32>} : memref<1x2x2x16x3x16xf32, #tpu.memory_space<vmem>>, vector<1x1x1x1x3x16xf32>,
    }
    %c16_i32_1 = arith.constant 16 : i32
    %c0_i32_2 = arith.constant 0 : i32
    %c16_i32_3 = arith.constant 16 : i32
    %2 = arith.addi %c0_i32_2, %c16_i32_3 : i32
    %c1_i32_4 = arith.constant 1 : i32
    scf.for %arg5 = %c0_i32_2 to %2 step %c1_i32_4  : i32 {
      %cst = arith.constant 0.000000e+00 : f32
      %5 = vector.broadcast %cst : f32 to vector<3x16xf32>
      %c1_i32_14 = arith.constant 1 : i32
      %6 = arith.addi %arg5, %c1_i32_14 : i32
      %c0_15 = arith.constant 0 : index
      %7 = arith.index_cast %6 : i32 to index
      %c0_16 = arith.constant 0 : index
      %c2 = arith.constant 2 : index
      %8 = vector.load %arg1[%c0_15, %7, %c0_16, %c2] : memref<1x18x4x18xbf16, #tpu.memory_space<vmem>>, vector<1x1x4x16xbf16>
      %9 = vector.shape_cast %8 : vector<1x1x4x16xbf16> to vector<1x4x16xbf16>
      %10 = vector.shape_cast %9 : vector<1x4x16xbf16> to vector<4x16xbf16>
      %c1 = arith.constant 1 : index
      %c0_17 = arith.constant 0 : index
      %c0_18 = arith.constant 0 : index
      %c0_19 = arith.constant 0 : index
      %11 = vector.load %arg2[%c1, %c0_17, %c0_18, %c0_19] : memref<4x4x3x4xbf16, #tpu.memory_space<vmem>>, vector<1x1x3x4xbf16>
      %12 = vector.shape_cast %11 : vector<1x1x3x4xbf16> to vector<3x4xbf16>
      %cst_20 = arith.constant dense<0.000000e+00> : vector<3x16xf32>
      %13 = tpu.matmul %12, %10, %cst_20 {dimension_numbers = #tpu.dot_dimension_numbers<[1], [0], [0], [1], [0, 0, 1, 1], [], []>} : vector<3x4xbf16>, vector<4x16xbf16>, vector<3x16xf32> -> vector<3x16xf32>
      %14 = arith.addf %5, %13 : vector<3x16xf32>
      %c1_i32_21 = arith.constant 1 : i32
      %15 = arith.addi %arg5, %c1_i32_21 : i32
      %c0_22 = arith.constant 0 : index
      %16 = arith.index_cast %15 : i32 to index
      %c0_23 = arith.constant 0 : index
      %c1_24 = arith.constant 1 : index
      %17 = vector.load %arg1[%c0_22, %16, %c0_23, %c1_24] : memref<1x18x4x18xbf16, #tpu.memory_space<vmem>>, vector<1x1x4x16xbf16>
      %18 = vector.shape_cast %17 : vector<1x1x4x16xbf16> to vector<1x4x16xbf16>
      %19 = vector.shape_cast %18 : vector<1x4x16xbf16> to vector<4x16xbf16>
      %c1_25 = arith.constant 1 : index
      %c1_26 = arith.constant 1 : index
      %c0_27 = arith.constant 0 : index
      %c0_28 = arith.constant 0 : index
      %20 = vector.load %arg2[%c1_25, %c1_26, %c0_27, %c0_28] : memref<4x4x3x4xbf16, #tpu.memory_space<vmem>>, vector<1x1x3x4xbf16>
      %21 = vector.shape_cast %20 : vector<1x1x3x4xbf16> to vector<3x4xbf16>
      %cst_29 = arith.constant dense<0.000000e+00> : vector<3x16xf32>
      %22 = tpu.matmul %21, %19, %cst_29 {dimension_numbers = #tpu.dot_dimension_numbers<[1], [0], [0], [1], [0, 0, 1, 1], [], []>} : vector<3x4xbf16>, vector<4x16xbf16>, vector<3x16xf32> -> vector<3x16xf32>
      %23 = arith.addf %14, %22 : vector<3x16xf32>
      %c0_i32_30 = arith.constant 0 : i32
      %24 = arith.addi %arg5, %c0_i32_30 : i32
      %c0_31 = arith.constant 0 : index
      %25 = arith.index_cast %24 : i32 to index
      %c0_32 = arith.constant 0 : index
      %c2_33 = arith.constant 2 : index
      %26 = vector.load %arg1[%c0_31, %25, %c0_32, %c2_33] : memref<1x18x4x18xbf16, #tpu.memory_space<vmem>>, vector<1x1x4x16xbf16>
      %27 = vector.shape_cast %26 : vector<1x1x4x16xbf16> to vector<1x4x16xbf16>
      %28 = vector.shape_cast %27 : vector<1x4x16xbf16> to vector<4x16xbf16>
      %c1_34 = arith.constant 1 : index
      %c2_35 = arith.constant 2 : index
      %c0_36 = arith.constant 0 : index
      %c0_37 = arith.constant 0 : index
      %29 = vector.load %arg2[%c1_34, %c2_35, %c0_36, %c0_37] : memref<4x4x3x4xbf16, #tpu.memory_space<vmem>>, vector<1x1x3x4xbf16>
      %30 = vector.shape_cast %29 : vector<1x1x3x4xbf16> to vector<3x4xbf16>
      %cst_38 = arith.constant dense<0.000000e+00> : vector<3x16xf32>
      %31 = tpu.matmul %30, %28, %cst_38 {dimension_numbers = #tpu.dot_dimension_numbers<[1], [0], [0], [1], [0, 0, 1, 1], [], []>} : vector<3x4xbf16>, vector<4x16xbf16>, vector<3x16xf32> -> vector<3x16xf32>
      %32 = arith.addf %23, %31 : vector<3x16xf32>
      %c0_i32_39 = arith.constant 0 : i32
      %33 = arith.addi %arg5, %c0_i32_39 : i32
      %c0_40 = arith.constant 0 : index
      %34 = arith.index_cast %33 : i32 to index
      %c0_41 = arith.constant 0 : index
      %c1_42 = arith.constant 1 : index
      %35 = vector.load %arg1[%c0_40, %34, %c0_41, %c1_42] : memref<1x18x4x18xbf16, #tpu.memory_space<vmem>>, vector<1x1x4x16xbf16>
      %36 = vector.shape_cast %35 : vector<1x1x4x16xbf16> to vector<1x4x16xbf16>
      %37 = vector.shape_cast %36 : vector<1x4x16xbf16> to vector<4x16xbf16>
      %c1_43 = arith.constant 1 : index
      %c3 = arith.constant 3 : index
      %c0_44 = arith.constant 0 : index
      %c0_45 = arith.constant 0 : index
      %38 = vector.load %arg2[%c1_43, %c3, %c0_44, %c0_45] : memref<4x4x3x4xbf16, #tpu.memory_space<vmem>>, vector<1x1x3x4xbf16>
      %39 = vector.shape_cast %38 : vector<1x1x3x4xbf16> to vector<3x4xbf16>
      %cst_46 = arith.constant dense<0.000000e+00> : vector<3x16xf32>
      %40 = tpu.matmul %39, %37, %cst_46 {dimension_numbers = #tpu.dot_dimension_numbers<[1], [0], [0], [1], [0, 0, 1, 1], [], []>} : vector<3x4xbf16>, vector<4x16xbf16>, vector<3x16xf32> -> vector<3x16xf32>
      %41 = arith.addf %32, %40 : vector<3x16xf32>
      %42 = vector.broadcast %0 : vector<3x1xf32> to vector<3x16xf32>
      %43 = arith.addf %41, %42 : vector<3x16xf32>
      %44 = math.tanh %43 : vector<3x16xf32>
      %45 = vector.shape_cast %44 : vector<3x16xf32> to vector<1x3x16xf32>
      %c0_47 = arith.constant 0 : index
      %c0_48 = arith.constant 0 : index
      %c1_49 = arith.constant 1 : index
      %46 = arith.index_cast %arg5 : i32 to index
      %c0_50 = arith.constant 0 : index
      %c0_51 = arith.constant 0 : index
      %47 = vector.load %arg4[%c0_47, %c0_48, %c1_49, %46, %c0_50, %c0_51] : memref<1x2x2x16x3x16xf32, #tpu.memory_space<vmem>>, vector<1x1x1x1x3x16xf32>
      %48 = vector.shape_cast %47 : vector<1x1x1x1x3x16xf32> to vector<1x3x16xf32>
      %49 = vector.shape_cast %45 : vector<1x3x16xf32> to vector<1x1x1x1x3x16xf32>
      tpu.vector_store %arg4[%c0_47, %c0_48, %c1_49, %46, %c0_50, %c0_51], %49 {strides = array<i32>} : memref<1x2x2x16x3x16xf32, #tpu.memory_space<vmem>>, vector<1x1x1x1x3x16xf32>,
    }
    %c16_i32_5 = arith.constant 16 : i32
    %c0_i32_6 = arith.constant 0 : i32
    %c16_i32_7 = arith.constant 16 : i32
    %3 = arith.addi %c0_i32_6, %c16_i32_7 : i32
    %c1_i32_8 = arith.constant 1 : i32
    scf.for %arg5 = %c0_i32_6 to %3 step %c1_i32_8  : i32 {
      %cst = arith.constant 0.000000e+00 : f32
      %5 = vector.broadcast %cst : f32 to vector<3x16xf32>
      %c2_i32 = arith.constant 2 : i32
      %6 = arith.addi %arg5, %c2_i32 : i32
      %c0_14 = arith.constant 0 : index
      %7 = arith.index_cast %6 : i32 to index
      %c0_15 = arith.constant 0 : index
      %c1 = arith.constant 1 : index
      %8 = vector.load %arg1[%c0_14, %7, %c0_15, %c1] : memref<1x18x4x18xbf16, #tpu.memory_space<vmem>>, vector<1x1x4x16xbf16>
      %9 = vector.shape_cast %8 : vector<1x1x4x16xbf16> to vector<1x4x16xbf16>
      %10 = vector.shape_cast %9 : vector<1x4x16xbf16> to vector<4x16xbf16>
      %c2 = arith.constant 2 : index
      %c0_16 = arith.constant 0 : index
      %c0_17 = arith.constant 0 : index
      %c0_18 = arith.constant 0 : index
      %11 = vector.load %arg2[%c2, %c0_16, %c0_17, %c0_18] : memref<4x4x3x4xbf16, #tpu.memory_space<vmem>>, vector<1x1x3x4xbf16>
      %12 = vector.shape_cast %11 : vector<1x1x3x4xbf16> to vector<3x4xbf16>
      %cst_19 = arith.constant dense<0.000000e+00> : vector<3x16xf32>
      %13 = tpu.matmul %12, %10, %cst_19 {dimension_numbers = #tpu.dot_dimension_numbers<[1], [0], [0], [1], [0, 0, 1, 1], [], []>} : vector<3x4xbf16>, vector<4x16xbf16>, vector<3x16xf32> -> vector<3x16xf32>
      %14 = arith.addf %5, %13 : vector<3x16xf32>
      %c2_i32_20 = arith.constant 2 : i32
      %15 = arith.addi %arg5, %c2_i32_20 : i32
      %c0_21 = arith.constant 0 : index
      %16 = arith.index_cast %15 : i32 to index
      %c0_22 = arith.constant 0 : index
      %c0_23 = arith.constant 0 : index
      %17 = vector.load %arg1[%c0_21, %16, %c0_22, %c0_23] : memref<1x18x4x18xbf16, #tpu.memory_space<vmem>>, vector<1x1x4x16xbf16>
      %18 = vector.shape_cast %17 : vector<1x1x4x16xbf16> to vector<1x4x16xbf16>
      %19 = vector.shape_cast %18 : vector<1x4x16xbf16> to vector<4x16xbf16>
      %c2_24 = arith.constant 2 : index
      %c1_25 = arith.constant 1 : index
      %c0_26 = arith.constant 0 : index
      %c0_27 = arith.constant 0 : index
      %20 = vector.load %arg2[%c2_24, %c1_25, %c0_26, %c0_27] : memref<4x4x3x4xbf16, #tpu.memory_space<vmem>>, vector<1x1x3x4xbf16>
      %21 = vector.shape_cast %20 : vector<1x1x3x4xbf16> to vector<3x4xbf16>
      %cst_28 = arith.constant dense<0.000000e+00> : vector<3x16xf32>
      %22 = tpu.matmul %21, %19, %cst_28 {dimension_numbers = #tpu.dot_dimension_numbers<[1], [0], [0], [1], [0, 0, 1, 1], [], []>} : vector<3x4xbf16>, vector<4x16xbf16>, vector<3x16xf32> -> vector<3x16xf32>
      %23 = arith.addf %14, %22 : vector<3x16xf32>
      %c1_i32_29 = arith.constant 1 : i32
      %24 = arith.addi %arg5, %c1_i32_29 : i32
      %c0_30 = arith.constant 0 : index
      %25 = arith.index_cast %24 : i32 to index
      %c0_31 = arith.constant 0 : index
      %c1_32 = arith.constant 1 : index
      %26 = vector.load %arg1[%c0_30, %25, %c0_31, %c1_32] : memref<1x18x4x18xbf16, #tpu.memory_space<vmem>>, vector<1x1x4x16xbf16>
      %27 = vector.shape_cast %26 : vector<1x1x4x16xbf16> to vector<1x4x16xbf16>
      %28 = vector.shape_cast %27 : vector<1x4x16xbf16> to vector<4x16xbf16>
      %c2_33 = arith.constant 2 : index
      %c2_34 = arith.constant 2 : index
      %c0_35 = arith.constant 0 : index
      %c0_36 = arith.constant 0 : index
      %29 = vector.load %arg2[%c2_33, %c2_34, %c0_35, %c0_36] : memref<4x4x3x4xbf16, #tpu.memory_space<vmem>>, vector<1x1x3x4xbf16>
      %30 = vector.shape_cast %29 : vector<1x1x3x4xbf16> to vector<3x4xbf16>
      %cst_37 = arith.constant dense<0.000000e+00> : vector<3x16xf32>
      %31 = tpu.matmul %30, %28, %cst_37 {dimension_numbers = #tpu.dot_dimension_numbers<[1], [0], [0], [1], [0, 0, 1, 1], [], []>} : vector<3x4xbf16>, vector<4x16xbf16>, vector<3x16xf32> -> vector<3x16xf32>
      %32 = arith.addf %23, %31 : vector<3x16xf32>
      %c1_i32_38 = arith.constant 1 : i32
      %33 = arith.addi %arg5, %c1_i32_38 : i32
      %c0_39 = arith.constant 0 : index
      %34 = arith.index_cast %33 : i32 to index
      %c0_40 = arith.constant 0 : index
      %c0_41 = arith.constant 0 : index
      %35 = vector.load %arg1[%c0_39, %34, %c0_40, %c0_41] : memref<1x18x4x18xbf16, #tpu.memory_space<vmem>>, vector<1x1x4x16xbf16>
      %36 = vector.shape_cast %35 : vector<1x1x4x16xbf16> to vector<1x4x16xbf16>
      %37 = vector.shape_cast %36 : vector<1x4x16xbf16> to vector<4x16xbf16>
      %c2_42 = arith.constant 2 : index
      %c3 = arith.constant 3 : index
      %c0_43 = arith.constant 0 : index
      %c0_44 = arith.constant 0 : index
      %38 = vector.load %arg2[%c2_42, %c3, %c0_43, %c0_44] : memref<4x4x3x4xbf16, #tpu.memory_space<vmem>>, vector<1x1x3x4xbf16>
      %39 = vector.shape_cast %38 : vector<1x1x3x4xbf16> to vector<3x4xbf16>
      %cst_45 = arith.constant dense<0.000000e+00> : vector<3x16xf32>
      %40 = tpu.matmul %39, %37, %cst_45 {dimension_numbers = #tpu.dot_dimension_numbers<[1], [0], [0], [1], [0, 0, 1, 1], [], []>} : vector<3x4xbf16>, vector<4x16xbf16>, vector<3x16xf32> -> vector<3x16xf32>
      %41 = arith.addf %32, %40 : vector<3x16xf32>
      %42 = vector.broadcast %0 : vector<3x1xf32> to vector<3x16xf32>
      %43 = arith.addf %41, %42 : vector<3x16xf32>
      %44 = math.tanh %43 : vector<3x16xf32>
      %45 = vector.shape_cast %44 : vector<3x16xf32> to vector<1x3x16xf32>
      %c0_46 = arith.constant 0 : index
      %c1_47 = arith.constant 1 : index
      %c0_48 = arith.constant 0 : index
      %46 = arith.index_cast %arg5 : i32 to index
      %c0_49 = arith.constant 0 : index
      %c0_50 = arith.constant 0 : index
      %47 = vector.load %arg4[%c0_46, %c1_47, %c0_48, %46, %c0_49, %c0_50] : memref<1x2x2x16x3x16xf32, #tpu.memory_space<vmem>>, vector<1x1x1x1x3x16xf32>
      %48 = vector.shape_cast %47 : vector<1x1x1x1x3x16xf32> to vector<1x3x16xf32>
      %49 = vector.shape_cast %45 : vector<1x3x16xf32> to vector<1x1x1x1x3x16xf32>
      tpu.vector_store %arg4[%c0_46, %c1_47, %c0_48, %46, %c0_49, %c0_50], %49 {strides = array<i32>} : memref<1x2x2x16x3x16xf32, #tpu.memory_space<vmem>>, vector<1x1x1x1x3x16xf32>,
    }
    %c16_i32_9 = arith.constant 16 : i32
    %c0_i32_10 = arith.constant 0 : i32
    %c16_i32_11 = arith.constant 16 : i32
    %4 = arith.addi %c0_i32_10, %c16_i32_11 : i32
    %c1_i32_12 = arith.constant 1 : i32
    scf.for %arg5 = %c0_i32_10 to %4 step %c1_i32_12  : i32 {
      %cst = arith.constant 0.000000e+00 : f32
      %5 = vector.broadcast %cst : f32 to vector<3x16xf32>
      %c2_i32 = arith.constant 2 : i32
      %6 = arith.addi %arg5, %c2_i32 : i32
      %c0_14 = arith.constant 0 : index
      %7 = arith.index_cast %6 : i32 to index
      %c0_15 = arith.constant 0 : index
      %c2 = arith.constant 2 : index
      %8 = vector.load %arg1[%c0_14, %7, %c0_15, %c2] : memref<1x18x4x18xbf16, #tpu.memory_space<vmem>>, vector<1x1x4x16xbf16>
      %9 = vector.shape_cast %8 : vector<1x1x4x16xbf16> to vector<1x4x16xbf16>
      %10 = vector.shape_cast %9 : vector<1x4x16xbf16> to vector<4x16xbf16>
      %c3 = arith.constant 3 : index
      %c0_16 = arith.constant 0 : index
      %c0_17 = arith.constant 0 : index
      %c0_18 = arith.constant 0 : index
      %11 = vector.load %arg2[%c3, %c0_16, %c0_17, %c0_18] : memref<4x4x3x4xbf16, #tpu.memory_space<vmem>>, vector<1x1x3x4xbf16>
      %12 = vector.shape_cast %11 : vector<1x1x3x4xbf16> to vector<3x4xbf16>
      %cst_19 = arith.constant dense<0.000000e+00> : vector<3x16xf32>
      %13 = tpu.matmul %12, %10, %cst_19 {dimension_numbers = #tpu.dot_dimension_numbers<[1], [0], [0], [1], [0, 0, 1, 1], [], []>} : vector<3x4xbf16>, vector<4x16xbf16>, vector<3x16xf32> -> vector<3x16xf32>
      %14 = arith.addf %5, %13 : vector<3x16xf32>
      %c2_i32_20 = arith.constant 2 : i32
      %15 = arith.addi %arg5, %c2_i32_20 : i32
      %c0_21 = arith.constant 0 : index
      %16 = arith.index_cast %15 : i32 to index
      %c0_22 = arith.constant 0 : index
      %c1 = arith.constant 1 : index
      %17 = vector.load %arg1[%c0_21, %16, %c0_22, %c1] : memref<1x18x4x18xbf16, #tpu.memory_space<vmem>>, vector<1x1x4x16xbf16>
      %18 = vector.shape_cast %17 : vector<1x1x4x16xbf16> to vector<1x4x16xbf16>
      %19 = vector.shape_cast %18 : vector<1x4x16xbf16> to vector<4x16xbf16>
      %c3_23 = arith.constant 3 : index
      %c1_24 = arith.constant 1 : index
      %c0_25 = arith.constant 0 : index
      %c0_26 = arith.constant 0 : index
      %20 = vector.load %arg2[%c3_23, %c1_24, %c0_25, %c0_26] : memref<4x4x3x4xbf16, #tpu.memory_space<vmem>>, vector<1x1x3x4xbf16>
      %21 = vector.shape_cast %20 : vector<1x1x3x4xbf16> to vector<3x4xbf16>
      %cst_27 = arith.constant dense<0.000000e+00> : vector<3x16xf32>
      %22 = tpu.matmul %21, %19, %cst_27 {dimension_numbers = #tpu.dot_dimension_numbers<[1], [0], [0], [1], [0, 0, 1, 1], [], []>} : vector<3x4xbf16>, vector<4x16xbf16>, vector<3x16xf32> -> vector<3x16xf32>
      %23 = arith.addf %14, %22 : vector<3x16xf32>
      %c1_i32_28 = arith.constant 1 : i32
      %24 = arith.addi %arg5, %c1_i32_28 : i32
      %c0_29 = arith.constant 0 : index
      %25 = arith.index_cast %24 : i32 to index
      %c0_30 = arith.constant 0 : index
      %c2_31 = arith.constant 2 : index
      %26 = vector.load %arg1[%c0_29, %25, %c0_30, %c2_31] : memref<1x18x4x18xbf16, #tpu.memory_space<vmem>>, vector<1x1x4x16xbf16>
      %27 = vector.shape_cast %26 : vector<1x1x4x16xbf16> to vector<1x4x16xbf16>
      %28 = vector.shape_cast %27 : vector<1x4x16xbf16> to vector<4x16xbf16>
      %c3_32 = arith.constant 3 : index
      %c2_33 = arith.constant 2 : index
      %c0_34 = arith.constant 0 : index
      %c0_35 = arith.constant 0 : index
      %29 = vector.load %arg2[%c3_32, %c2_33, %c0_34, %c0_35] : memref<4x4x3x4xbf16, #tpu.memory_space<vmem>>, vector<1x1x3x4xbf16>
      %30 = vector.shape_cast %29 : vector<1x1x3x4xbf16> to vector<3x4xbf16>
      %cst_36 = arith.constant dense<0.000000e+00> : vector<3x16xf32>
      %31 = tpu.matmul %30, %28, %cst_36 {dimension_numbers = #tpu.dot_dimension_numbers<[1], [0], [0], [1], [0, 0, 1, 1], [], []>} : vector<3x4xbf16>, vector<4x16xbf16>, vector<3x16xf32> -> vector<3x16xf32>
      %32 = arith.addf %23, %31 : vector<3x16xf32>
      %c1_i32_37 = arith.constant 1 : i32
      %33 = arith.addi %arg5, %c1_i32_37 : i32
      %c0_38 = arith.constant 0 : index
      %34 = arith.index_cast %33 : i32 to index
      %c0_39 = arith.constant 0 : index
      %c1_40 = arith.constant 1 : index
      %35 = vector.load %arg1[%c0_38, %34, %c0_39, %c1_40] : memref<1x18x4x18xbf16, #tpu.memory_space<vmem>>, vector<1x1x4x16xbf16>
      %36 = vector.shape_cast %35 : vector<1x1x4x16xbf16> to vector<1x4x16xbf16>
      %37 = vector.shape_cast %36 : vector<1x4x16xbf16> to vector<4x16xbf16>
      %c3_41 = arith.constant 3 : index
      %c3_42 = arith.constant 3 : index
      %c0_43 = arith.constant 0 : index
      %c0_44 = arith.constant 0 : index
      %38 = vector.load %arg2[%c3_41, %c3_42, %c0_43, %c0_44] : memref<4x4x3x4xbf16, #tpu.memory_space<vmem>>, vector<1x1x3x4xbf16>
      %39 = vector.shape_cast %38 : vector<1x1x3x4xbf16> to vector<3x4xbf16>
      %cst_45 = arith.constant dense<0.000000e+00> : vector<3x16xf32>
      %40 = tpu.matmul %39, %37, %cst_45 {dimension_numbers = #tpu.dot_dimension_numbers<[1], [0], [0], [1], [0, 0, 1, 1], [], []>} : vector<3x4xbf16>, vector<4x16xbf16>, vector<3x16xf32> -> vector<3x16xf32>
      %41 = arith.addf %32, %40 : vector<3x16xf32>
      %42 = vector.broadcast %0 : vector<3x1xf32> to vector<3x16xf32>
      %43 = arith.addf %41, %42 : vector<3x16xf32>
      %44 = math.tanh %43 : vector<3x16xf32>
      %45 = vector.shape_cast %44 : vector<3x16xf32> to vector<1x3x16xf32>
      %c0_46 = arith.constant 0 : index
      %c1_47 = arith.constant 1 : index
      %c1_48 = arith.constant 1 : index
      %46 = arith.index_cast %arg5 : i32 to index
      %c0_49 = arith.constant 0 : index
      %c0_50 = arith.constant 0 : index
      %47 = vector.load %arg4[%c0_46, %c1_47, %c1_48, %46, %c0_49, %c0_50] : memref<1x2x2x16x3x16xf32, #tpu.memory_space<vmem>>, vector<1x1x1x1x3x16xf32>
      %48 = vector.shape_cast %47 : vector<1x1x1x1x3x16xf32> to vector<1x3x16xf32>
      %49 = vector.shape_cast %45 : vector<1x3x16xf32> to vector<1x1x1x1x3x16xf32>
      tpu.vector_store %arg4[%c0_46, %c1_47, %c1_48, %46, %c0_49, %c0_50], %49 {strides = array<i32>} : memref<1x2x2x16x3x16xf32, #tpu.memory_space<vmem>>, vector<1x1x1x1x3x16xf32>,
    }
    %c16_i32_13 = arith.constant 16 : i32
    return
  }
  func.func @transform_0(%arg0: i32) -> (i32, i32, i32, i32) {
    %c0_i32 = arith.constant 0 : i32
    %c0_i32_0 = arith.constant 0 : i32
    %c0_i32_1 = arith.constant 0 : i32
    %c0_i32_2 = arith.constant 0 : i32
    return %arg0, %c0_i32, %c0_i32_0, %c0_i32_1 : i32, i32, i32, i32
  }
  func.func @transform_1(%arg0: i32) -> (i32, i32, i32, i32) {
    %c0_i32 = arith.constant 0 : i32
    %c0_i32_0 = arith.constant 0 : i32
    %c0_i32_1 = arith.constant 0 : i32
    %c0_i32_2 = arith.constant 0 : i32
    %c0_i32_3 = arith.constant 0 : i32
    return %c0_i32, %c0_i32_0, %c0_i32_1, %c0_i32_2 : i32, i32, i32, i32
  }
  func.func @transform_2(%arg0: i32) -> (i32, i32) {
    %c0_i32 = arith.constant 0 : i32
    %c0_i32_0 = arith.constant 0 : i32
    %c0_i32_1 = arith.constant 0 : i32
    return %c0_i32, %c0_i32_0 : i32, i32
  }
  func.func @transform_3(%arg0: i32) -> (i32, i32, i32, i32, i32, i32) {
    %c0_i32 = arith.constant 0 : i32
    %c0_i32_0 = arith.constant 0 : i32
    %c0_i32_1 = arith.constant 0 : i32
    %c0_i32_2 = arith.constant 0 : i32
    %c0_i32_3 = arith.constant 0 : i32
    %c0_i32_4 = arith.constant 0 : i32
    return %arg0, %c0_i32, %c0_i32_0, %c0_i32_1, %c0_i32_2, %c0_i32_3 : i32, i32, i32, i32, i32, i32
  }
}

</mosaic_0001>

<bundles_post_ra>
// kernel: loom_generator_forward.19
= control target key start
LH: loop header
LB: loop body
LE: loop exit
PB: predicated region body
PF: predicated region fallthrough
CT: control target
= control target key end

     0   :  { %s805_s12 = smov 0   ;;  %s885_s0 = inlined_call_operand.vmem [shape: bf16[2,17,17,12], index: 0, kind: input, shape index: {}]   ;;  %s886_s1 = inlined_call_operand.vmem [shape: bf16[1,4,12,4], index: 1, kind: input, shape index: {}]   ;;  %s887_s2 = inlined_call_operand.vmem [shape: bf16[2,1,16,16,4], index: 2, kind: output, shape index: {0}]   ;;  %s888_s3 = inlined_call_operand.vmem [shape: f32[2,2,4], index: 3, kind: output, shape index: {1}]  }
   0x1 LB: > { %s620_s13 = sadd.s32 4294967295, %s769_s12   ;;  %p624_p0 = scmp.ge.s32.totalorder %s769_s12, 1  ;;  %s769_s12 = sphi %s805_s12, %s14_s12  }
   0x2   : > { %p140_p1 = scmp.lt.s32.totalorder %s769_s12, 3 }
   0x4   : > { %p141_p2 = pnand %p624_p0, %p140_p1 }
   0x5   : > { %p168_p3 = scmp.lt.s32.totalorder (!%p141_p2), %s620_s13, 1  ;;  %v828_v0 = vmov (!%p141_p2), 0.0   ;;  %v830_v1 = vmov (!%p141_p2), 0.0   ;;  %s832_s26 = smov (!%p141_p2), 0  }
   0x6   : > { %144 = sbr.rel (%p141_p2) target bundleno = 276 (0x114), region = 28 }
   0xd   : > { %s892_s13 = smov (!%p168_p3, %s620_s13), 1 }
   0xe   : > { %s707_s14 = smul.u32 204, %s892_s13  ;;  %s660_s15 = sshll.u32 %s892_s13, 7 }
   0xf   : > { %s816_s18 = scalar_lea.vmem %s887_s2, %s660_s15  ;;  %s628_s19 = sshll.u32 %s892_s13, 1 }
  0x10   : > { %s821_s22 = scalar_lea.vmem %s885_s0, %s707_s14  ;;  %s826_s25 = scalar_lea.vmem %s888_s3, %s628_s19 }
  0x11 LB: >> { %vm232_vm0 = vcmask 1045504   ;;  %v783_v2 = vmov 0.0   ;;  %v742_v3 = vld [vmem:[%s886_s1 + $0x10] sm:$0x3f]   ;;  %vm784_vm1 = vmmov 0   ;;  %s661_s29 = smul.u32 12, %s781_s26  ;;  %s781_s26 = sphi %s832_s26, %s188_s26   ;;  %v777_v1 = vphi %v830_v1, %v890_v1   ;;  %v773_v0 = vphi %v828_v0, %v889_v0  }
  0x12   : >> { %685 = vmatprep.subr.bf16.mxu0 %v783_v2  ;;  %673 = vmatprep.subr.bf16.mxu1 %v783_v2  ;;  %v744_v4 = vld [vmem:[%s886_s1 + $0x8] sm:$0x3f]   ;;  %v351_v5 = vsel %vm232_vm0, %v742_v3, 0  ;;  %vm228_vm2 = vcmask 97280   ;;  %v747_v11 = vld [vmem:[%s886_s1] sm:$0x3f]  }
  0x13   : >> { %687 = vmatprep.mubr.msk.bf16.mxu0 %vm784_vm1, %v783_v2  ;;  %675 = vmatprep.mubr.msk.bf16.mxu1 %vm784_vm1, %v783_v2  ;;  %s193_s5 = scalar_lea.vmem %s821_s22, %s661_s29  ;;  %v234_v6 = vsel %vm232_vm0, %v744_v4, 0  ;;  %v748_v12 = vld [vmem:[%s886_s1 + $0x18] sm:$0x3f]   ;;  %vm210_vm3 = vsmask.f32 7424  ;;  %v285_v25 = vsel %vm232_vm0, %v747_v11, 0 }
  0x14   : >> { %686 = vmatpush3.bf16.msra.mxu0 %v351_v5  ;;  %v743_v7 = vld [vmem:[%s193_s5 + $0xc] sm:$0xff]   ;;  %674 = vmatpush3.bf16.msra.mxu1 %v234_v6  ;;  %v745_v8 = vld [vmem:[%s193_s5] sm:$0xff]   ;;  %v746_v9 = vld [vmem:[%s193_s5 + $0x8] ss:$0 sps:$4 sm:$0x11]   ;;  %v431_v17 = vsel %vm232_vm0, %v748_v12, 0 }
  0x15   : >> { %691 = vmatprep.subr.bf16.mxu0 %v783_v2  ;;  %679 = vmatprep.subr.bf16.mxu1 %v783_v2  ;;  %v749_v10 = vld [vmem:[%s193_s5 + $0xc] sm:$0xff]   ;;  %v212_v13 = vshrl.u32 %v745_v8, 16  ;;  %v214_v14 = vshll.u32 %v745_v8, 16  ;;  %v219_v15 = vshll.u32 %v746_v9, 16  ;;  %s664_s10 = sshll.u32 %s781_s26, 3  ;;  %vm487_vm4 = vcmask 27648  }
  0x16   : >> { %v411_v16 = vshrl.u32 %v749_v10, 16  ;;  %v413_v18 = vshll.u32 %v749_v10, 16  ;;  %v750_v21 = vld [vmem:[%s193_s5 + $0x14] ss:$0 sps:$4 sm:$0x11]   ;;  %s486_s11 = scalar_lea.vmem %s816_s18, %s664_s10  ;;  %vm490_vm5 = vcmask 31744  }
  0x17   : >> { %688 = vmatmul.mubr.msk.bf16.vlgmr.msra.gmra.mrb[0].mxu0 %vm228_vm2, %v743_v7  ;;  %v216_v19 = vrot.slane %v214_v14, 1  ;;  %v221_v20 = vrot.slane %v219_v15, 1  ;;  %v418_v24 = vshll.u32 %v750_v21, 16  ;;  %s188_s26 = sadd.s32 1, %s781_s26  }
  0x18   : >> { %693 = vmatprep.mubr.msk.bf16.mxu0 %vm784_vm1, %v783_v2  ;;  %692 = vmatpush3.bf16.msra.mxu0 %v431_v17  ;;  %v415_v22 = vrot.slane %v413_v18, 1  ;;  %p185_p4 = scmp.ge.s32.totalorder %s188_s26, 16  }
  0x19   : >> { %v217_v23 = vor.u32 %v216_v19, %v212_v13  ;;  %v420_v28 = vrot.slane %v418_v24, 1  ;;  %vm513_vm6 = vcmask (%p185_p4), 24576  }
  0x1a   : >> { %v416_v26 = vor.u32 %v415_v22, %v411_v16 }
  0x1b   : >> { %v222_v27 = vsel %vm210_vm3, %v217_v23, %v221_v20 }
  0x1c   : >> { %676 = vmatmul.mubr.msk.bf16.vlgmr.msra.gmra.mrb[0].mxu1 %vm228_vm2, %v222_v27  ;;  %v421_v29 = vsel %vm210_vm3, %v416_v26, %v420_v28 }
  0x1d   : >> { %680 = vmatpush3.bf16.msra.mxu1 %v285_v25  ;;  %681 = vmatprep.mubr.msk.bf16.mxu1 %vm784_vm1, %v783_v2 }
  0x23   : >> { %694 = vmatmul.mubr.msk.bf16.vlgmr.msra.gmra.mrb[0].mxu0 %vm228_vm2, %v421_v29 }
  0x28   : >> { %682 = vmatmul.mubr.msk.bf16.vlgmr.msra.gmra.mrb[0].mxu1 %vm228_vm2, %v745_v8 }
  0xf6   : >> { %v467_v30 = vpop.f32.mrb[0].mxu0 }
  0xf7   : >> { %v695_v31 = vpop.f32.mrb[1].mxu0 }
  0xf8   : >> { %v470_v32 = vpop.f32.mrb[2].mxu0 }
  0xf9   : >> { %v696_v33 = vpop.f32.mrb[3].mxu0 }
  0xfb   : >> { %v321_v34 = vpop.f32.mrb[0].mxu1 }
  0xfc   : >> { %v697_v35 = vadd.f32 %v467_v30, %v321_v34  ;;  %v683_v36 = vpop.f32.mrb[1].mxu1 }
  0xfd   : >> { %v324_v37 = vpop.f32.mrb[2].mxu1 }
  0xfe   : >> { %v662_v38 = vpack.c.bf16 %v697_v35, %v697_v35  ;;  %v501_v39 = vmul.f32 %v697_v35, %v697_v35  ;;  %v698_v40 = vadd.f32 %v470_v32, %v324_v37  ;;  %v684_v41 = vpop.f32.mrb[3].mxu1  ;;  %v491_v42 = vsel %vm490_vm5, %v697_v35, 0.0 }
 0x100   : >> { %488 = vst.msk [vmem:[%s486_s11] sm:$0xf] %vm487_vm4, %v662_v38  ;;  %v663_v43 = vpack.c.bf16 %v698_v40, %v698_v40  ;;  %v492_v44 = vsel %vm490_vm5, %v698_v40, 0.0  ;;  %v502_v45 = vmul.f32 %v698_v40, %v698_v40  ;;  %v503_v47 = vsel %vm490_vm5, %v501_v39, 0.0 }
 0x101   : >> { %v493_v46 = vadd.f32 %v492_v44, %v491_v42 }
 0x102   : >> { %489 = vst.msk [vmem:[%s486_s11 + $0x4] sm:$0xf] %vm487_vm4, %v663_v43  ;;  %v504_v48 = vsel %vm490_vm5, %v502_v45, 0.0 }
 0x103   : >> { %v494_v49 = vrot.slane %v493_v46, 4  ;;  %v505_v50 = vadd.f32 %v504_v48, %v503_v47 }
 0x105   : >> { %v495_v51 = vadd.f32 %v494_v49, %v493_v46  ;;  %v506_v52 = vrot.slane %v505_v50, 4 }
 0x107   : >> { %v496_v53 = vrot.slane %v495_v51, 2  ;;  %v507_v54 = vadd.f32 %v506_v52, %v505_v50 }
 0x109   : >> { %v497_v55 = vadd.f32 %v496_v53, %v495_v51  ;;  %v508_v56 = vrot.slane %v507_v54, 2 }
 0x10b   : >> { %v498_v57 = vrot.slane %v497_v55, 1  ;;  %v509_v58 = vadd.f32 %v508_v56, %v507_v54 }
 0x10d   : >> { %v499_v59 = vadd.f32 %v498_v57, %v497_v55  ;;  %v510_v60 = vrot.slane %v509_v58, 1  ;;  %187 = sbr.rel (!%p185_p4) target bundleno = 17 (0x11), region = 83 }
 0x10f   : >> { %v500_v61 = vadd.f32 %v777_v1, %v499_v59   ;;  %v511_v62 = vadd.f32 %v510_v60, %v509_v58 }
 0x111   : >> { %v512_v63 = vadd.f32 %v773_v0, %v511_v62   ;;  %v890_v1 = vmov %v500_v61  ;;  %514 = vst.msk [vmem:[%s826_s25] sm:$0x1] (%p185_p4), %vm513_vm6, %v500_v61 }
 0x113   : >> { %v889_v0 = vmov %v512_v63  ;;  %515 = vst.msk [vmem:[%s826_s25 + $0x1] sm:$0x1] (%p185_p4), %vm513_vm6, %v512_v63 }
 0x114 PF: > { %s14_s12 = sadd.s32 1, %s769_s12  }
 0x115   : > { %p11_p5 = scmp.ge.s32.totalorder %s14_s12, 4  }
 0x117   :  { %13 = sbr.rel (!%p11_p5) target bundleno = 1 (0x1), region = 94 }

// kernel: loom_generator_forward.20
= control target key start
LH: loop header
LB: loop body
LE: loop exit
PB: predicated region body
PF: predicated region fallthrough
CT: control target
= control target key end

     0   :  { %s992_s12 = smov 0   ;;  %s994_s13 = smov 0   ;;  %s1190_s0 = inlined_call_operand.vmem [shape: bf16[2,1,16,16,4], index: 0, kind: input, shape index: {}]   ;;  %s1191_s1 = inlined_call_operand.vmem [shape: f32[1,4], index: 1, kind: input, shape index: {}]   ;;  %s1192_s2 = inlined_call_operand.vmem [shape: f32[1,4], index: 2, kind: input, shape index: {}]   ;;  %s1193_s3 = inlined_call_operand.vmem [shape: bf16[2,1,16,16,4], index: 3, kind: output, shape index: {}]  }
   0x1   :  { %s996_s14 = smov 0  }
   0x2 LB: > { %s32_s15 = sadd.s32 1, %s966_s13  ;;  %p770_p0 = scmp.ge.s32.totalorder %s970_s14, 1  ;;  %s970_s14 = sphi %s996_s14, %s13_s14   ;;  %s966_s13 = sphi %s994_s13, %s1195_s13   ;;  %s962_s12 = sphi %s992_s12, %s1194_s12  }
   0x3   : > { %p34_p1 = scmp.ge.s32.totalorder %s32_s15, 2  ;;  %p174_p2 = scmp.lt.s32.totalorder %s970_s14, 3 }
   0x5   : > { %s1197_s15 = smov (%p34_p1, %s32_s15), 0  ;;  %p175_p3 = pnand %p770_p0, %p174_p2 }
   0x6   : > { %p217_p4 = scmp.lt.s32.totalorder (!%p175_p3), %s962_s12, 1  ;;  %v1023_v0 = vld [vmem:[%s1191_s1] ss:$0 sm:$0xff] (!%p175_p3)  ;;  %vm612_vm0 = vcmask (!%p175_p3), 27648  }
   0x7   : > { %178 = sbr.rel (%p175_p3) target bundleno = 78 (0x4e), region = 32  ;;  %v1032_v9 = vld [vmem:[%s1192_s2] ss:$0 sm:$0xff] (!%p175_p3) }
   0xe   : > { %s1199_s12 = smov (!%p217_p4, %s962_s12), 1 }
   0xf   : > { %s811_s16 = sshll.u32 %s1199_s12, 7 }
  0x10   : > { %s1018_s19 = scalar_lea.vmem %s1190_s0, %s811_s16  ;;  %s1055_s26 = scalar_lea.vmem %s1193_s3, %s811_s16 }
  0x11   : > { %v846_v1 = vld [vmem:[%s1018_s19] sm:$0xff]   ;;  %v909_v2 = vld [vmem:[%s1018_s19 + $0x8] sm:$0xff]   ;;  %v910_v3 = vld [vmem:[%s1018_s19 + $0x10] sm:$0xff]  }
  0x12   : > { %v847_v4 = vunpack.c.l.bf16 %v846_v1  ;;  %v848_v5 = vunpack.c.h.bf16 %v846_v1  ;;  %v851_v6 = vunpack.c.l.bf16 %v909_v2  ;;  %v852_v7 = vunpack.c.h.bf16 %v909_v2  ;;  %v911_v8 = vld [vmem:[%s1018_s19 + $0x18] sm:$0xff]   ;;  %v912_v41 = vld [vmem:[%s1018_s19 + $0x20] sm:$0xff]   ;;  %v913_v45 = vld [vmem:[%s1018_s19 + $0x28] sm:$0xff]  }
  0x13   : > { %v855_v10 = vunpack.c.l.bf16 %v910_v3  ;;  %v856_v11 = vunpack.c.h.bf16 %v910_v3  ;;  %v859_v12 = vunpack.c.l.bf16 %v911_v8  ;;  %v860_v13 = vunpack.c.h.bf16 %v911_v8  ;;  %v914_v56 = vld [vmem:[%s1018_s19 + $0x30] sm:$0xff]   ;;  %v915_v57 = vld [vmem:[%s1018_s19 + $0x38] sm:$0xff]  }
  0x14   : > { %v317_v14 = vmul.f32 %v847_v4, %v1023_v0  ;;  %v318_v15 = vmul.f32 %v848_v5, %v1023_v0  ;;  %v319_v16 = vmul.f32 %v851_v6, %v1023_v0  ;;  %v320_v17 = vmul.f32 %v852_v7, %v1023_v0 }
  0x15   : > { %v321_v18 = vmul.f32 %v855_v10, %v1023_v0  ;;  %v322_v19 = vmul.f32 %v856_v11, %v1023_v0  ;;  %v323_v20 = vmul.f32 %v859_v12, %v1023_v0  ;;  %v324_v21 = vmul.f32 %v860_v13, %v1023_v0 }
  0x16   : > { %v356_v22 = vadd.f32 %v1032_v9, %v317_v14  ;;  %v357_v23 = vadd.f32 %v1032_v9, %v318_v15  ;;  %v358_v24 = vadd.f32 %v1032_v9, %v319_v16  ;;  %v359_v25 = vadd.f32 %v1032_v9, %v320_v17 }
  0x17   : > { %v360_v26 = vadd.f32 %v1032_v9, %v321_v18  ;;  %v361_v27 = vadd.f32 %v1032_v9, %v322_v19  ;;  %v362_v28 = vadd.f32 %v1032_v9, %v323_v20  ;;  %v363_v29 = vadd.f32 %v1032_v9, %v324_v21 }
  0x18   : > { %vm388_vm1 = vcmp.ge.f32.partialorder %v356_v22, 0.0  ;;  %v420_v30 = vmul.f32 0.2, %v356_v22  ;;  %vm389_vm2 = vcmp.ge.f32.partialorder %v357_v23, 0.0  ;;  %v421_v31 = vmul.f32 0.2, %v357_v23 }
  0x19   : > { %vm390_vm3 = vcmp.ge.f32.partialorder %v358_v24, 0.0  ;;  %v422_v32 = vmul.f32 0.2, %v358_v24  ;;  %vm391_vm4 = vcmp.ge.f32.partialorder %v359_v25, 0.0  ;;  %v423_v33 = vmul.f32 0.2, %v359_v25 }
  0x1a   : > { %v452_v34 = vsel %vm388_vm1, %v356_v22, %v420_v30  ;;  %v453_v35 = vsel %vm389_vm2, %v357_v23, %v421_v31  ;;  %vm392_vm5 = vcmp.ge.f32.partialorder %v360_v26, 0.0  ;;  %v424_v36 = vmul.f32 0.2, %v360_v26 }
  0x1b   : > { %v813_v37 = vpack.c.bf16 %v452_v34, %v452_v34  ;;  %v814_v38 = vpack.c.bf16 %v453_v35, %v453_v35  ;;  %v454_v39 = vsel %vm390_vm3, %v358_v24, %v422_v32  ;;  %v455_v40 = vsel %vm391_vm4, %v359_v25, %v423_v33  ;;  %v916_v24 = vld [vmem:[%s1018_s19 + $0x40] sm:$0xff]  }
  0x1c   : > { %v815_v42 = vpack.c.bf16 %v454_v39, %v454_v39  ;;  %v816_v43 = vpack.c.bf16 %v455_v40, %v455_v40  ;;  %v456_v44 = vsel %vm392_vm5, %v360_v26, %v424_v36  ;;  %vm393_vm6 = vcmp.ge.f32.partialorder %v361_v27, 0.0 }
  0x1d   : > { %613 = vst.msk [vmem:[%s1055_s26] sm:$0xf] %vm612_vm0, %v813_v37  ;;  %614 = vst.msk [vmem:[%s1055_s26 + $0x4] sm:$0xf] %vm612_vm0, %v814_v38  ;;  %v817_v46 = vpack.c.bf16 %v456_v44, %v456_v44  ;;  %v425_v47 = vmul.f32 0.2, %v361_v27  ;;  %v863_v50 = vunpack.c.l.bf16 %v912_v41  ;;  %v864_v51 = vunpack.c.h.bf16 %v912_v41 }
  0x1e   : > { %vm394_vm7 = vcmp.ge.f32.partialorder %v362_v28, 0.0  ;;  %v426_v48 = vmul.f32 0.2, %v362_v28  ;;  %615 = vst.msk [vmem:[%s1055_s26 + $0x8] sm:$0xf] %vm612_vm0, %v815_v42  ;;  %vm395_vm8 = vcmp.ge.f32.partialorder %v363_v29, 0.0  ;;  %v867_v54 = vunpack.c.l.bf16 %v913_v45 }
  0x1f   : > { %616 = vst.msk [vmem:[%s1055_s26 + $0xc] sm:$0xf] %vm612_vm0, %v816_v43  ;;  %v427_v49 = vmul.f32 0.2, %v363_v29  ;;  %617 = vst.msk [vmem:[%s1055_s26 + $0x10] sm:$0xf] %vm612_vm0, %v817_v46  ;;  %v457_v52 = vsel %vm393_vm6, %v361_v27, %v425_v47  ;;  %v868_v55 = vunpack.c.h.bf16 %v913_v45  ;;  %v325_v61 = vmul.f32 %v863_v50, %v1023_v0 }
  0x20   : > { %v458_v53 = vsel %vm394_vm7, %v362_v28, %v426_v48  ;;  %v818_v58 = vpack.c.bf16 %v457_v52, %v457_v52  ;;  %v326_v63 = vmul.f32 %v864_v51, %v1023_v0  ;;  %v327_v1 = vmul.f32 %v867_v54, %v1023_v0  ;;  %v917_v28 = vld [vmem:[%s1018_s19 + $0x48] sm:$0xff]   ;;  %v918_v48 = vld [vmem:[%s1018_s19 + $0x50] sm:$0xff]  }
  0x21   : > { %v819_v59 = vpack.c.bf16 %v458_v53, %v458_v53  ;;  %v459_v60 = vsel %vm395_vm8, %v363_v29, %v427_v49  ;;  %v328_v2 = vmul.f32 %v868_v55, %v1023_v0  ;;  %v364_v3 = vadd.f32 %v1032_v9, %v325_v61 }
  0x22   : > { %v820_v62 = vpack.c.bf16 %v459_v60, %v459_v60  ;;  %618 = vst.msk [vmem:[%s1055_s26 + $0x14] sm:$0xf] %vm612_vm0, %v818_v58  ;;  %v871_v4 = vunpack.c.l.bf16 %v914_v56  ;;  %v872_v5 = vunpack.c.h.bf16 %v914_v56  ;;  %v875_v6 = vunpack.c.l.bf16 %v915_v57 }
  0x23   : > { %619 = vst.msk [vmem:[%s1055_s26 + $0x18] sm:$0xf] %vm612_vm0, %v819_v59  ;;  %v365_v7 = vadd.f32 %v1032_v9, %v326_v63  ;;  %v366_v8 = vadd.f32 %v1032_v9, %v327_v1  ;;  %v367_v10 = vadd.f32 %v1032_v9, %v328_v2  ;;  %v876_v11 = vunpack.c.h.bf16 %v915_v57 }
  0x24   : > { %620 = vst.msk [vmem:[%s1055_s26 + $0x1c] sm:$0xf] %vm612_vm0, %v820_v62  ;;  %vm396_vm9 = vcmp.ge.f32.partialorder %v364_v3, 0.0  ;;  %v428_v12 = vmul.f32 0.2, %v364_v3  ;;  %v329_v13 = vmul.f32 %v871_v4, %v1023_v0  ;;  %v330_v14 = vmul.f32 %v872_v5, %v1023_v0  ;;  %v919_v4 = vld [vmem:[%s1018_s19 + $0x58] sm:$0xff]  }
  0x25   : > { %vm397_vm10 = vcmp.ge.f32.partialorder %v365_v7, 0.0  ;;  %v429_v15 = vmul.f32 0.2, %v365_v7  ;;  %vm398_vm11 = vcmp.ge.f32.partialorder %v366_v8, 0.0  ;;  %v430_v16 = vmul.f32 0.2, %v366_v8 }
  0x26   : > { %v460_v17 = vsel %vm396_vm9, %v364_v3, %v428_v12  ;;  %vm399_vm12 = vcmp.ge.f32.partialorder %v367_v10, 0.0  ;;  %v431_v18 = vmul.f32 0.2, %v367_v10  ;;  %v368_v19 = vadd.f32 %v1032_v9, %v329_v13 }
  0x27   : > { %v821_v20 = vpack.c.bf16 %v460_v17, %v460_v17  ;;  %v461_v21 = vsel %vm397_vm10, %v365_v7, %v429_v15  ;;  %v462_v22 = vsel %vm398_vm11, %v366_v8, %v430_v16  ;;  %v369_v23 = vadd.f32 %v1032_v9, %v330_v14 }
  0x28   : > { %v822_v25 = vpack.c.bf16 %v461_v21, %v461_v21  ;;  %v823_v26 = vpack.c.bf16 %v462_v22, %v462_v22  ;;  %v463_v27 = vsel %vm399_vm12, %v367_v10, %v431_v18  ;;  %vm400_vm13 = vcmp.ge.f32.partialorder %v368_v19, 0.0  ;;  %v920_v10 = vld [vmem:[%s1018_s19 + $0x60] sm:$0xff]  }
  0x29   : > { %621 = vst.msk [vmem:[%s1055_s26 + $0x20] sm:$0xf] %vm612_vm0, %v821_v20  ;;  %v824_v29 = vpack.c.bf16 %v463_v27, %v463_v27  ;;  %v432_v30 = vmul.f32 0.2, %v368_v19  ;;  %vm401_vm14 = vcmp.ge.f32.partialorder %v369_v23, 0.0  ;;  %v331_v32 = vmul.f32 %v875_v6, %v1023_v0 }
  0x2a   : > { %v433_v31 = vmul.f32 0.2, %v369_v23  ;;  %622 = vst.msk [vmem:[%s1055_s26 + $0x24] sm:$0xf] %vm612_vm0, %v822_v25  ;;  %623 = vst.msk [vmem:[%s1055_s26 + $0x28] sm:$0xf] %vm612_vm0, %v823_v26  ;;  %v332_v33 = vmul.f32 %v876_v11, %v1023_v0  ;;  %v879_v34 = vunpack.c.l.bf16 %v916_v24  ;;  %v880_v35 = vunpack.c.h.bf16 %v916_v24 }
  0x2b   : > { %624 = vst.msk [vmem:[%s1055_s26 + $0x2c] sm:$0xf] %vm612_vm0, %v824_v29  ;;  %v464_v36 = vsel %vm400_vm13, %v368_v19, %v432_v30  ;;  %v883_v38 = vunpack.c.l.bf16 %v917_v28  ;;  %v884_v39 = vunpack.c.h.bf16 %v917_v28  ;;  %v370_v42 = vadd.f32 %v1032_v9, %v331_v32  ;;  %v921_v19 = vld [vmem:[%s1018_s19 + $0x68] sm:$0xff]  }
  0x2c   : > { %v465_v37 = vsel %vm401_vm14, %v369_v23, %v433_v31  ;;  %v825_v40 = vpack.c.bf16 %v464_v36, %v464_v36  ;;  %v371_v43 = vadd.f32 %v1032_v9, %v332_v33  ;;  %v333_v44 = vmul.f32 %v879_v34, %v1023_v0 }
  0x2d   : > { %v826_v41 = vpack.c.bf16 %v465_v37, %v465_v37  ;;  %v334_v45 = vmul.f32 %v880_v35, %v1023_v0  ;;  %v335_v46 = vmul.f32 %v883_v38, %v1023_v0  ;;  %v336_v47 = vmul.f32 %v884_v39, %v1023_v0 }
  0x2e   : > { %625 = vst.msk [vmem:[%s1055_s26 + $0x30] sm:$0xf] %vm612_vm0, %v825_v40  ;;  %vm402_vm15 = vcmp.ge.f32.partialorder %v370_v42, 0.0  ;;  %v434_v49 = vmul.f32 0.2, %v370_v42  ;;  %vm403_vm1 = vcmp.ge.f32.partialorder %v371_v43, 0.0  ;;  %v372_v51 = vadd.f32 %v1032_v9, %v333_v44 }
  0x2f   : > { %626 = vst.msk [vmem:[%s1055_s26 + $0x34] sm:$0xf] %vm612_vm0, %v826_v41  ;;  %v435_v50 = vmul.f32 0.2, %v371_v43  ;;  %v373_v52 = vadd.f32 %v1032_v9, %v334_v45  ;;  %v374_v53 = vadd.f32 %v1032_v9, %v335_v46  ;;  %v375_v54 = vadd.f32 %v1032_v9, %v336_v47  ;;  %v922_v46 = vld [vmem:[%s1018_s19 + $0x70] sm:$0xff]   ;;  %v923_v47 = vld [vmem:[%s1018_s19 + $0x78] sm:$0xff]  }
  0x30   : > { %v466_v55 = vsel %vm402_vm15, %v370_v42, %v434_v49  ;;  %v887_v57 = vunpack.c.l.bf16 %v918_v48  ;;  %v888_v58 = vunpack.c.h.bf16 %v918_v48  ;;  %vm404_vm2 = vcmp.ge.f32.partialorder %v372_v51, 0.0 }
  0x31   : > { %v467_v56 = vsel %vm403_vm1, %v371_v43, %v435_v50  ;;  %v827_v59 = vpack.c.bf16 %v466_v55, %v466_v55  ;;  %v436_v61 = vmul.f32 0.2, %v372_v51  ;;  %vm405_vm3 = vcmp.ge.f32.partialorder %v373_v52, 0.0 }
  0x32   : > { %v828_v60 = vpack.c.bf16 %v467_v56, %v467_v56  ;;  %v437_v62 = vmul.f32 0.2, %v373_v52  ;;  %vm406_vm4 = vcmp.ge.f32.partialorder %v374_v53, 0.0  ;;  %v438_v63 = vmul.f32 0.2, %v374_v53 }
  0x33   : > { %627 = vst.msk [vmem:[%s1055_s26 + $0x38] sm:$0xf] %vm612_vm0, %v827_v59  ;;  %v468_v1 = vsel %vm404_vm2, %v372_v51, %v436_v61  ;;  %vm407_vm5 = vcmp.ge.f32.partialorder %v375_v54, 0.0  ;;  %v439_v2 = vmul.f32 0.2, %v375_v54  ;;  %v337_v3 = vmul.f32 %v887_v57, %v1023_v0 }
  0x34   : > { %628 = vst.msk [vmem:[%s1055_s26 + $0x3c] sm:$0xf] %vm612_vm0, %v828_v60  ;;  %v829_v5 = vpack.c.bf16 %v468_v1, %v468_v1  ;;  %v469_v6 = vsel %vm405_vm3, %v373_v52, %v437_v62  ;;  %v470_v7 = vsel %vm406_vm4, %v374_v53, %v438_v63  ;;  %v338_v8 = vmul.f32 %v888_v58, %v1023_v0 }
  0x35   : > { %v830_v11 = vpack.c.bf16 %v469_v6, %v469_v6  ;;  %v831_v12 = vpack.c.bf16 %v470_v7, %v470_v7  ;;  %v471_v13 = vsel %vm407_vm5, %v375_v54, %v439_v2  ;;  %v376_v14 = vadd.f32 %v1032_v9, %v337_v3 }
  0x36   : > { %629 = vst.msk [vmem:[%s1055_s26 + $0x40] sm:$0xf] %vm612_vm0, %v829_v5  ;;  %v832_v15 = vpack.c.bf16 %v471_v13, %v471_v13  ;;  %v377_v16 = vadd.f32 %v1032_v9, %v338_v8  ;;  %v891_v17 = vunpack.c.l.bf16 %v919_v4  ;;  %v892_v18 = vunpack.c.h.bf16 %v919_v4 }
  0x37   : > { %630 = vst.msk [vmem:[%s1055_s26 + $0x44] sm:$0xf] %vm612_vm0, %v830_v11  ;;  %631 = vst.msk [vmem:[%s1055_s26 + $0x48] sm:$0xf] %vm612_vm0, %v831_v12  ;;  %vm408_vm6 = vcmp.ge.f32.partialorder %v376_v14, 0.0  ;;  %v895_v21 = vunpack.c.l.bf16 %v920_v10  ;;  %v896_v22 = vunpack.c.h.bf16 %v920_v10  ;;  %v899_v29 = vunpack.c.l.bf16 %v921_v19 }
  0x38   : > { %v440_v20 = vmul.f32 0.2, %v376_v14  ;;  %632 = vst.msk [vmem:[%s1055_s26 + $0x4c] sm:$0xf] %vm612_vm0, %v832_v15  ;;  %vm409_vm7 = vcmp.ge.f32.partialorder %v377_v16, 0.0  ;;  %v339_v24 = vmul.f32 %v891_v17, %v1023_v0  ;;  %v340_v25 = vmul.f32 %v892_v18, %v1023_v0 }
  0x39   : > { %v441_v23 = vmul.f32 0.2, %v377_v16  ;;  %v341_v27 = vmul.f32 %v895_v21, %v1023_v0  ;;  %v342_v28 = vmul.f32 %v896_v22, %v1023_v0  ;;  %v343_v37 = vmul.f32 %v899_v29, %v1023_v0 }
  0x3a   : > { %v472_v26 = vsel %vm408_vm6, %v376_v14, %v440_v20  ;;  %v378_v32 = vadd.f32 %v1032_v9, %v339_v24  ;;  %v379_v33 = vadd.f32 %v1032_v9, %v340_v25  ;;  %v900_v45 = vunpack.c.h.bf16 %v921_v19 }
  0x3b   : > { %v833_v30 = vpack.c.bf16 %v472_v26, %v472_v26  ;;  %v473_v31 = vsel %vm409_vm7, %v377_v16, %v441_v23  ;;  %v380_v35 = vadd.f32 %v1032_v9, %v341_v27  ;;  %v381_v36 = vadd.f32 %v1032_v9, %v342_v28 }
  0x3c   : > { %v834_v34 = vpack.c.bf16 %v473_v31, %v473_v31  ;;  %vm410_vm8 = vcmp.ge.f32.partialorder %v378_v32, 0.0  ;;  %v442_v38 = vmul.f32 0.2, %v378_v32  ;;  %vm411_vm9 = vcmp.ge.f32.partialorder %v379_v33, 0.0 }
  0x3d   : > { %633 = vst.msk [vmem:[%s1055_s26 + $0x50] sm:$0xf] %vm612_vm0, %v833_v30  ;;  %v443_v39 = vmul.f32 0.2, %v379_v33  ;;  %vm412_vm10 = vcmp.ge.f32.partialorder %v380_v35, 0.0  ;;  %vm413_vm11 = vcmp.ge.f32.partialorder %v381_v36, 0.0  ;;  %v382_v44 = vadd.f32 %v1032_v9, %v343_v37 }
  0x3e   : > { %634 = vst.msk [vmem:[%s1055_s26 + $0x54] sm:$0xf] %vm612_vm0, %v834_v34  ;;  %v444_v40 = vmul.f32 0.2, %v380_v35  ;;  %v445_v41 = vmul.f32 0.2, %v381_v36  ;;  %v474_v42 = vsel %vm410_vm8, %v378_v32, %v442_v38  ;;  %v344_v55 = vmul.f32 %v900_v45, %v1023_v0 }
  0x3f   : > { %v475_v43 = vsel %vm411_vm9, %v379_v33, %v443_v39  ;;  %v835_v48 = vpack.c.bf16 %v474_v42, %v474_v42  ;;  %vm414_vm12 = vcmp.ge.f32.partialorder %v382_v44, 0.0  ;;  %v446_v54 = vmul.f32 0.2, %v382_v44 }
  0x40   : > { %v836_v49 = vpack.c.bf16 %v475_v43, %v475_v43  ;;  %v476_v50 = vsel %vm412_vm10, %v380_v35, %v444_v40  ;;  %v477_v51 = vsel %vm413_vm11, %v381_v36, %v445_v41  ;;  %v903_v56 = vunpack.c.l.bf16 %v922_v46 }
  0x41   : > { %v837_v52 = vpack.c.bf16 %v476_v50, %v476_v50  ;;  %v838_v53 = vpack.c.bf16 %v477_v51, %v477_v51  ;;  %635 = vst.msk [vmem:[%s1055_s26 + $0x58] sm:$0xf] %vm612_vm0, %v835_v48  ;;  %v904_v57 = vunpack.c.h.bf16 %v922_v46  ;;  %v907_v58 = vunpack.c.l.bf16 %v923_v47 }
  0x42   : > { %636 = vst.msk [vmem:[%s1055_s26 + $0x5c] sm:$0xf] %vm612_vm0, %v836_v49  ;;  %v478_v59 = vsel %vm414_vm12, %v382_v44, %v446_v54  ;;  %v908_v60 = vunpack.c.h.bf16 %v923_v47  ;;  %v383_v62 = vadd.f32 %v1032_v9, %v344_v55  ;;  %v345_v63 = vmul.f32 %v903_v56, %v1023_v0 }
  0x43   : > { %637 = vst.msk [vmem:[%s1055_s26 + $0x60] sm:$0xf] %vm612_vm0, %v837_v52  ;;  %638 = vst.msk [vmem:[%s1055_s26 + $0x64] sm:$0xf] %vm612_vm0, %v838_v53  ;;  %v839_v61 = vpack.c.bf16 %v478_v59, %v478_v59  ;;  %v346_v1 = vmul.f32 %v904_v57, %v1023_v0  ;;  %v347_v2 = vmul.f32 %v907_v58, %v1023_v0 }
  0x44   : > { %v348_v3 = vmul.f32 %v908_v60, %v1023_v0  ;;  %vm415_vm13 = vcmp.ge.f32.partialorder %v383_v62, 0.0  ;;  %v447_v4 = vmul.f32 0.2, %v383_v62  ;;  %v384_v5 = vadd.f32 %v1032_v9, %v345_v63 }
  0x45   : > { %639 = vst.msk [vmem:[%s1055_s26 + $0x68] sm:$0xf] %vm612_vm0, %v839_v61  ;;  %v385_v6 = vadd.f32 %v1032_v9, %v346_v1  ;;  %v386_v7 = vadd.f32 %v1032_v9, %v347_v2 }
  0x46   : > { %v387_v8 = vadd.f32 %v1032_v9, %v348_v3  ;;  %v479_v10 = vsel %vm415_vm13, %v383_v62, %v447_v4  ;;  %vm416_vm14 = vcmp.ge.f32.partialorder %v384_v5, 0.0  ;;  %v448_v11 = vmul.f32 0.2, %v384_v5 }
  0x47   : > { %vm417_vm15 = vcmp.ge.f32.partialorder %v385_v6, 0.0  ;;  %v840_v12 = vpack.c.bf16 %v479_v10, %v479_v10  ;;  %v449_v0 = vmul.f32 0.2, %v385_v6  ;;  %vm418_vm1 = vcmp.ge.f32.partialorder %v386_v7, 0.0 }
  0x48   : > { %v450_v13 = vmul.f32 0.2, %v386_v7  ;;  %v480_v14 = vsel %vm416_vm14, %v384_v5, %v448_v11  ;;  %vm419_vm2 = vcmp.ge.f32.partialorder %v387_v8, 0.0  ;;  %v451_v15 = vmul.f32 0.2, %v387_v8 }
  0x49   : > { %640 = vst.msk [vmem:[%s1055_s26 + $0x6c] sm:$0xf] %vm612_vm0, %v840_v12  ;;  %v841_v16 = vpack.c.bf16 %v480_v14, %v480_v14  ;;  %v481_v17 = vsel %vm417_vm15, %v385_v6, %v449_v0 }
  0x4a   : > { %v482_v9 = vsel %vm418_vm1, %v386_v7, %v450_v13  ;;  %v842_v18 = vpack.c.bf16 %v481_v17, %v481_v17  ;;  %v483_v20 = vsel %vm419_vm2, %v387_v8, %v451_v15 }
  0x4b   : > { %v843_v19 = vpack.c.bf16 %v482_v9, %v482_v9  ;;  %641 = vst.msk [vmem:[%s1055_s26 + $0x70] sm:$0xf] %vm612_vm0, %v841_v16  ;;  %v844_v21 = vpack.c.bf16 %v483_v20, %v483_v20 }
  0x4c   : > { %642 = vst.msk [vmem:[%s1055_s26 + $0x74] sm:$0xf] %vm612_vm0, %v842_v18 }
  0x4d   : > { %643 = vst.msk [vmem:[%s1055_s26 + $0x78] sm:$0xf] %vm612_vm0, %v843_v19  ;;  %644 = vst.msk [vmem:[%s1055_s26 + $0x7c] sm:$0xf] %vm612_vm0, %v844_v21 }
  0x4e PF: > { %s13_s14 = sadd.s32 1, %s970_s14   ;;  %s1194_s12 = smov %s966_s13 }
  0x4f   : > { %p10_p5 = scmp.ge.s32.totalorder %s13_s14, 4   ;;  %s1195_s13 = smov %s1197_s15 }
  0x51   :  { %12 = sbr.rel (!%p10_p5) target bundleno = 2 (0x2), region = 62 }

// kernel: loom_generator_forward.21
= control target key start
LH: loop header
LB: loop body
LE: loop exit
PB: predicated region body
PF: predicated region fallthrough
CT: control target
= control target key end

     0   :  { %s739_s12 = smov 0   ;;  %s815_s0 = inlined_call_operand.vmem [shape: bf16[2,9,9,16], index: 0, kind: input, shape index: {}]   ;;  %s816_s1 = inlined_call_operand.vmem [shape: bf16[1,4,16,8], index: 1, kind: input, shape index: {}]   ;;  %s817_s2 = inlined_call_operand.vmem [shape: bf16[2,1,8,8,8], index: 2, kind: output, shape index: {0}]   ;;  %s818_s3 = inlined_call_operand.vmem [shape: f32[2,2,8], index: 3, kind: output, shape index: {1}]  }
   0x1 LB: > { %s567_s13 = sadd.s32 4294967295, %s703_s12   ;;  %p571_p0 = scmp.ge.s32.totalorder %s703_s12, 1  ;;  %s703_s12 = sphi %s739_s12, %s14_s12  }
   0x2   : > { %p140_p1 = scmp.lt.s32.totalorder %s703_s12, 3 }
   0x4   : > { %p141_p2 = pnand %p571_p0, %p140_p1 }
   0x5   : > { %p168_p3 = scmp.lt.s32.totalorder (!%p141_p2), %s567_s13, 1  ;;  %v762_v0 = vmov (!%p141_p2), 0.0   ;;  %v764_v1 = vmov (!%p141_p2), 0.0   ;;  %s766_s26 = smov (!%p141_p2), 0  }
   0x6   : > { %144 = sbr.rel (%p141_p2) target bundleno = 272 (0x110), region = 28 }
   0xd   : > { %s822_s13 = smov (!%p168_p3, %s567_s13), 1 }
   0xe   : > { %s644_s14 = smul.u32 72, %s822_s13  ;;  %s601_s15 = sshll.u32 %s822_s13, 5 }
   0xf   : > { %s750_s18 = scalar_lea.vmem %s817_s2, %s601_s15  ;;  %s575_s19 = sshll.u32 %s822_s13, 1 }
  0x10   : > { %s755_s22 = scalar_lea.vmem %s815_s0, %s644_s14  ;;  %s760_s25 = scalar_lea.vmem %s818_s3, %s575_s19 }
  0x11 LB: >> { %v679_v2 = vld [vmem:[%s816_s1 + $0x10] sm:$0xff]   ;;  %v717_v3 = vmov 0.0   ;;  %vm219_vm0 = vcmask 130048   ;;  %vm718_vm1 = vmmov 0   ;;  %s602_s29 = sshll.u32 %s715_s26, 3  ;;  %v680_v4 = vld [vmem:[%s816_s1 + $0x8] sm:$0xff]   ;;  %s715_s26 = sphi %s766_s26, %s188_s26   ;;  %v711_v1 = vphi %v764_v1, %v820_v1   ;;  %v707_v0 = vphi %v762_v0, %v819_v0  }
  0x12   : >> { %623 = vmatprep.subr.bf16.mxu0 %v717_v3  ;;  %611 = vmatprep.subr.bf16.mxu1 %v717_v3  ;;  %s193_s5 = scalar_lea.vmem %s755_s22, %s602_s29  ;;  %v683_v8 = vld [vmem:[%s816_s1 + $0x18] sm:$0xff]   ;;  %v682_v17 = vld [vmem:[%s816_s1] sm:$0xff]   ;;  %s598_s10 = sshll.u32 %s715_s26, 2  ;;  %vm442_vm2 = vcmask 64512   ;;  %vm440_vm3 = vcmask 60416  }
  0x13   : >> { %624 = vmatpush3.bf16.msra.mxu0 %v679_v2  ;;  %625 = vmatprep.mubr.msk.bf16.mxu0 %vm718_vm1, %v717_v3  ;;  %v586_v5 = vld [vmem:[%s193_s5 + $0x8] sm:$0xf]  ;;  %v194_v6 = vld [vmem:[%s193_s5] sm:$0xf]  ;;  %v197_v7 = vld [vmem:[%s193_s5 + $0x4] sm:$0x1]  ;;  %s439_s11 = scalar_lea.vmem %s750_s18, %s598_s10 }
  0x14   : >> { %613 = vmatprep.mubr.msk.bf16.mxu1 %vm718_vm1, %v717_v3  ;;  %629 = vmatprep.subr.bf16.mxu0 %v717_v3  ;;  %v580_v9 = vcombine.low %v194_v6, %v197_v7  ;;  %v684_v10 = vld [vmem:[%s193_s5 + $0x8] sm:$0x1f]   ;;  %s188_s26 = sadd.s32 1, %s715_s26  }
  0x15   : >> { %612 = vmatpush3.bf16.msra.mxu1 %v680_v4  ;;  %v383_v13 = vshll.u32 %v684_v10, 16  ;;  %v381_v14 = vshrl.u32 %v684_v10, 16  ;;  %p185_p4 = scmp.ge.s32.totalorder %s188_s26, 8  }
  0x16   : >> { %626 = vmatmul.mubr.msk.bf16.vlgmr.msra.gmra.mrb[0].mxu0 %vm219_vm0, %v586_v5  ;;  %617 = vmatprep.subr.bf16.mxu1 %v717_v3  ;;  %v207_v11 = vshrl.u32 %v580_v9, 16  ;;  %v209_v12 = vshll.u32 %v580_v9, 16  ;;  %vm460_vm4 = vcmask (%p185_p4), 57344  }
  0x17   : >> { %631 = vmatprep.mubr.msk.bf16.mxu0 %vm718_vm1, %v717_v3  ;;  %630 = vmatpush3.bf16.msra.mxu0 %v683_v8  ;;  %v385_v16 = vrot.slane %v383_v13, 1 }
  0x18   : >> { %v211_v15 = vrot.slane %v209_v12, 1 }
  0x19   : >> { %v386_v19 = vor.u32 %v385_v16, %v381_v14 }
  0x1a   : >> { %v212_v18 = vor.u32 %v211_v15, %v207_v11 }
  0x1c   : >> { %614 = vmatmul.mubr.msk.bf16.vlgmr.msra.gmra.mrb[0].mxu1 %vm219_vm0, %v212_v18 }
  0x1d   : >> { %618 = vmatpush3.bf16.msra.mxu1 %v682_v17  ;;  %619 = vmatprep.mubr.msk.bf16.mxu1 %vm718_vm1, %v717_v3 }
  0x22   : >> { %632 = vmatmul.mubr.msk.bf16.vlgmr.msra.gmra.mrb[0].mxu0 %vm219_vm0, %v386_v19 }
  0x28   : >> { %620 = vmatmul.mubr.msk.bf16.vlgmr.msra.gmra.mrb[0].mxu1 %vm219_vm0, %v194_v6 }
  0xf5   : >> { %v430_v20 = vpop.f32.mrb[0].mxu0 }
  0xf6   : >> { %v633_v21 = vpop.f32.mrb[1].mxu0 }
  0xf7   : >> { %v433_v22 = vpop.f32.mrb[2].mxu0 }
  0xf8   : >> { %v634_v23 = vpop.f32.mrb[3].mxu0 }
  0xfb   : >> { %v306_v24 = vpop.f32.mrb[0].mxu1 }
  0xfc   : >> { %v635_v25 = vadd.f32 %v430_v20, %v306_v24  ;;  %v621_v26 = vpop.f32.mrb[1].mxu1 }
  0xfd   : >> { %v309_v27 = vpop.f32.mrb[2].mxu1 }
  0xfe   : >> { %v437_v28 = vpack.c.bf16 %v635_v25, %v635_v25  ;;  %v443_v29 = vsel %vm442_vm2, %v635_v25, 0.0  ;;  %v451_v30 = vmul.f32 %v635_v25, %v635_v25  ;;  %v622_v31 = vpop.f32.mrb[3].mxu1 }
  0xff   : >> { %v444_v32 = vrot.slane %v443_v29, 4 }
 0x100   : >> { %441 = vst.msk [vmem:[%s439_s11] sm:$0xf] %vm440_vm3, %v437_v28  ;;  %v452_v33 = vsel %vm442_vm2, %v451_v30, 0.0 }
 0x101   : >> { %v445_v34 = vadd.f32 %v444_v32, %v443_v29  ;;  %v453_v35 = vrot.slane %v452_v33, 4 }
 0x103   : >> { %v446_v36 = vrot.slane %v445_v34, 2  ;;  %v454_v37 = vadd.f32 %v453_v35, %v452_v33 }
 0x105   : >> { %v447_v38 = vadd.f32 %v446_v36, %v445_v34  ;;  %v455_v39 = vrot.slane %v454_v37, 2 }
 0x107   : >> { %v448_v40 = vrot.slane %v447_v38, 1  ;;  %v456_v41 = vadd.f32 %v455_v39, %v454_v37 }
 0x109   : >> { %v449_v42 = vadd.f32 %v448_v40, %v447_v38  ;;  %v457_v43 = vrot.slane %v456_v41, 1  ;;  %187 = sbr.rel (!%p185_p4) target bundleno = 17 (0x11), region = 83 }
 0x10b   : >> { %v450_v44 = vadd.f32 %v711_v1, %v449_v42   ;;  %v458_v45 = vadd.f32 %v457_v43, %v456_v41 }
 0x10d   : >> { %v459_v46 = vadd.f32 %v707_v0, %v458_v45   ;;  %v820_v1 = vmov %v450_v44  ;;  %461 = vst.msk [vmem:[%s760_s25] sm:$0x1] (%p185_p4), %vm460_vm4, %v450_v44 }
 0x10f   : >> { %v819_v0 = vmov %v459_v46  ;;  %462 = vst.msk [vmem:[%s760_s25 + $0x1] sm:$0x1] (%p185_p4), %vm460_vm4, %v459_v46 }
 0x110 PF: > { %s14_s12 = sadd.s32 1, %s703_s12  }
 0x111   : > { %p11_p5 = scmp.ge.s32.totalorder %s14_s12, 4  }
 0x113   :  { %13 = sbr.rel (!%p11_p5) target bundleno = 1 (0x1), region = 94 }

// kernel: loom_generator_forward.22
= control target key start
LH: loop header
LB: loop body
LE: loop exit
PB: predicated region body
PF: predicated region fallthrough
CT: control target
= control target key end

     0   :  { %s542_s12 = smov 0   ;;  %s544_s13 = smov 0   ;;  %s606_s0 = inlined_call_operand.vmem [shape: bf16[2,1,8,8,8], index: 0, kind: input, shape index: {}]   ;;  %s607_s1 = inlined_call_operand.vmem [shape: f32[1,8], index: 1, kind: input, shape index: {}]   ;;  %s608_s2 = inlined_call_operand.vmem [shape: f32[1,8], index: 2, kind: input, shape index: {}]   ;;  %s609_s3 = inlined_call_operand.vmem [shape: bf16[2,1,8,8,8], index: 3, kind: output, shape index: {}]  }
   0x1   :  { %s546_s14 = smov 0  }
   0x2 LB: > { %s32_s15 = sadd.s32 1, %s516_s13  ;;  %p444_p0 = scmp.ge.s32.totalorder %s520_s14, 1  ;;  %s520_s14 = sphi %s546_s14, %s13_s14   ;;  %s516_s13 = sphi %s544_s13, %s611_s13   ;;  %s512_s12 = sphi %s542_s12, %s610_s12  }
   0x3   : > { %p34_p1 = scmp.ge.s32.totalorder %s32_s15, 2  ;;  %p173_p2 = scmp.lt.s32.totalorder %s520_s14, 3 }
   0x5   : > { %s613_s15 = smov (%p34_p1, %s32_s15), 0  ;;  %p174_p3 = pnand %p444_p0, %p173_p2 }
   0x6   : > { %p214_p4 = scmp.lt.s32.totalorder (!%p174_p3), %s512_s12, 1  ;;  %v449_v0 = vld [vmem:[%s607_s1] ss:$0 sm:$0xff] (!%p174_p3)  ;;  %vm319_vm0 = vcmask (!%p174_p3), 60416  }
   0x7   : > { %177 = sbr.rel (%p174_p3) target bundleno = 37 (0x25), region = 32  ;;  %v450_v9 = vld [vmem:[%s608_s2] ss:$0 sm:$0xff] (!%p174_p3) }
   0xe   : > { %s615_s12 = smov (!%p214_p4, %s512_s12), 1 }
   0xf   : > { %s453_s16 = sshll.u32 %s615_s12, 5 }
  0x10   : > { %s225_s19 = scalar_lea.vmem %s606_s0, %s453_s16  ;;  %s579_s26 = scalar_lea.vmem %s609_s3, %s453_s16 }
  0x11   : > { %v456_v1 = vld [vmem:[%s225_s19] sm:$0xff]   ;;  %v471_v2 = vld [vmem:[%s225_s19 + $0x8] sm:$0xff]   ;;  %v472_v3 = vld [vmem:[%s225_s19 + $0x10] sm:$0xff]  }
  0x12   : > { %v457_v4 = vunpack.c.l.bf16 %v456_v1  ;;  %v458_v5 = vunpack.c.h.bf16 %v456_v1  ;;  %v461_v6 = vunpack.c.l.bf16 %v471_v2  ;;  %v462_v7 = vunpack.c.h.bf16 %v471_v2  ;;  %v473_v8 = vld [vmem:[%s225_s19 + $0x18] sm:$0xff]  }
  0x13   : > { %v465_v10 = vunpack.c.l.bf16 %v472_v3  ;;  %v466_v11 = vunpack.c.h.bf16 %v472_v3  ;;  %v469_v12 = vunpack.c.l.bf16 %v473_v8  ;;  %v470_v13 = vunpack.c.h.bf16 %v473_v8 }
  0x14   : > { %v264_v14 = vmul.f32 %v457_v4, %v449_v0  ;;  %v265_v15 = vmul.f32 %v458_v5, %v449_v0  ;;  %v266_v16 = vmul.f32 %v461_v6, %v449_v0  ;;  %v267_v17 = vmul.f32 %v462_v7, %v449_v0 }
  0x15   : > { %v268_v18 = vmul.f32 %v465_v10, %v449_v0  ;;  %v269_v19 = vmul.f32 %v466_v11, %v449_v0  ;;  %v270_v20 = vmul.f32 %v469_v12, %v449_v0  ;;  %v271_v21 = vmul.f32 %v470_v13, %v449_v0 }
  0x16   : > { %v279_v22 = vadd.f32 %v450_v9, %v264_v14  ;;  %v280_v23 = vadd.f32 %v450_v9, %v265_v15  ;;  %v281_v24 = vadd.f32 %v450_v9, %v266_v16  ;;  %v282_v25 = vadd.f32 %v450_v9, %v267_v17 }
  0x17   : > { %v283_v26 = vadd.f32 %v450_v9, %v268_v18  ;;  %v284_v27 = vadd.f32 %v450_v9, %v269_v19  ;;  %v285_v28 = vadd.f32 %v450_v9, %v270_v20  ;;  %v286_v29 = vadd.f32 %v450_v9, %v271_v21 }
  0x18   : > { %vm287_vm1 = vcmp.ge.f32.partialorder %v279_v22, 0.0  ;;  %v295_v30 = vmul.f32 0.2, %v279_v22  ;;  %vm288_vm2 = vcmp.ge.f32.partialorder %v280_v23, 0.0  ;;  %v296_v31 = vmul.f32 0.2, %v280_v23 }
  0x19   : > { %vm289_vm3 = vcmp.ge.f32.partialorder %v281_v24, 0.0  ;;  %v297_v32 = vmul.f32 0.2, %v281_v24  ;;  %vm290_vm4 = vcmp.ge.f32.partialorder %v282_v25, 0.0  ;;  %v298_v33 = vmul.f32 0.2, %v282_v25 }
  0x1a   : > { %v303_v34 = vsel %vm287_vm1, %v279_v22, %v295_v30  ;;  %v304_v35 = vsel %vm288_vm2, %v280_v23, %v296_v31  ;;  %vm291_vm5 = vcmp.ge.f32.partialorder %v283_v26, 0.0  ;;  %v299_v36 = vmul.f32 0.2, %v283_v26 }
  0x1b   : > { %v311_v37 = vpack.c.bf16 %v303_v34, %v303_v34  ;;  %v312_v38 = vpack.c.bf16 %v304_v35, %v304_v35  ;;  %v305_v39 = vsel %vm289_vm3, %v281_v24, %v297_v32  ;;  %v306_v40 = vsel %vm290_vm4, %v282_v25, %v298_v33 }
  0x1c   : > { %v313_v41 = vpack.c.bf16 %v305_v39, %v305_v39  ;;  %v314_v42 = vpack.c.bf16 %v306_v40, %v306_v40  ;;  %v307_v43 = vsel %vm291_vm5, %v283_v26, %v299_v36  ;;  %vm292_vm6 = vcmp.ge.f32.partialorder %v284_v27, 0.0 }
  0x1d   : > { %320 = vst.msk [vmem:[%s579_s26] sm:$0xf] %vm319_vm0, %v311_v37  ;;  %321 = vst.msk [vmem:[%s579_s26 + $0x4] sm:$0xf] %vm319_vm0, %v312_v38  ;;  %v315_v44 = vpack.c.bf16 %v307_v43, %v307_v43  ;;  %v300_v45 = vmul.f32 0.2, %v284_v27 }
  0x1e   : > { %vm293_vm7 = vcmp.ge.f32.partialorder %v285_v28, 0.0  ;;  %v301_v46 = vmul.f32 0.2, %v285_v28  ;;  %322 = vst.msk [vmem:[%s579_s26 + $0x8] sm:$0xf] %vm319_vm0, %v313_v41  ;;  %vm294_vm8 = vcmp.ge.f32.partialorder %v286_v29, 0.0 }
  0x1f   : > { %323 = vst.msk [vmem:[%s579_s26 + $0xc] sm:$0xf] %vm319_vm0, %v314_v42  ;;  %v302_v47 = vmul.f32 0.2, %v286_v29  ;;  %324 = vst.msk [vmem:[%s579_s26 + $0x10] sm:$0xf] %vm319_vm0, %v315_v44  ;;  %v308_v48 = vsel %vm292_vm6, %v284_v27, %v300_v45 }
  0x20   : > { %v309_v49 = vsel %vm293_vm7, %v285_v28, %v301_v46  ;;  %v316_v50 = vpack.c.bf16 %v308_v48, %v308_v48 }
  0x21   : > { %v317_v51 = vpack.c.bf16 %v309_v49, %v309_v49  ;;  %v310_v52 = vsel %vm294_vm8, %v286_v29, %v302_v47 }
  0x22   : > { %v318_v53 = vpack.c.bf16 %v310_v52, %v310_v52  ;;  %325 = vst.msk [vmem:[%s579_s26 + $0x14] sm:$0xf] %vm319_vm0, %v316_v50 }
  0x23   : > { %326 = vst.msk [vmem:[%s579_s26 + $0x18] sm:$0xf] %vm319_vm0, %v317_v51 }
  0x24   : > { %327 = vst.msk [vmem:[%s579_s26 + $0x1c] sm:$0xf] %vm319_vm0, %v318_v53 }
  0x25 PF: > { %s13_s14 = sadd.s32 1, %s520_s14   ;;  %s610_s12 = smov %s516_s13 }
  0x26   : > { %p10_p5 = scmp.ge.s32.totalorder %s13_s14, 4   ;;  %s611_s13 = smov %s613_s15 }
  0x28   :  { %12 = sbr.rel (!%p10_p5) target bundleno = 2 (0x2), region = 62 }

// kernel: loom_generator_forward.24
= control target key start
LH: loop header
LB: loop body
LE: loop exit
PB: predicated region body
PF: predicated region fallthrough
CT: control target
= control target key end

     0   :  { %s487_s12 = smov 0   ;;  %s489_s13 = smov 0   ;;  %s529_s0 = inlined_call_operand.vmem [shape: bf16[2,1,4,4,16], index: 0, kind: input, shape index: {}]   ;;  %s530_s1 = inlined_call_operand.vmem [shape: f32[1,16], index: 1, kind: input, shape index: {}]   ;;  %s531_s2 = inlined_call_operand.vmem [shape: f32[1,16], index: 2, kind: input, shape index: {}]   ;;  %s532_s3 = inlined_call_operand.vmem [shape: bf16[2,1,4,4,16], index: 3, kind: output, shape index: {}]  }
   0x1   :  { %s491_s14 = smov 0  }
   0x2 LB: > { %s32_s15 = sadd.s32 1, %s461_s13  ;;  %p408_p0 = scmp.ge.s32.totalorder %s465_s14, 1  ;;  %s465_s14 = sphi %s491_s14, %s13_s14   ;;  %s461_s13 = sphi %s489_s13, %s534_s13   ;;  %s457_s12 = sphi %s487_s12, %s533_s12  }
   0x3   : > { %p34_p1 = scmp.ge.s32.totalorder %s32_s15, 2  ;;  %p173_p2 = scmp.lt.s32.totalorder %s465_s14, 3 }
   0x5   : > { %s536_s15 = smov (%p34_p1, %s32_s15), 0  ;;  %p174_p3 = pnand %p408_p0, %p173_p2 }
   0x6   : > { %p214_p4 = scmp.lt.s32.totalorder (!%p174_p3), %s457_s12, 1  ;;  %v413_v0 = vld [vmem:[%s530_s1] ss:$0 sm:$0xff] (!%p174_p3)  ;;  %vm287_vm4 = vcmask (!%p174_p3), 123904  }
   0x7   : > { %177 = sbr.rel (%p174_p3) target bundleno = 31 (0x1f), region = 32  ;;  %v414_v9 = vld [vmem:[%s531_s2] ss:$0 sm:$0xff] (!%p174_p3) }
   0xe   : > { %s538_s12 = smov (!%p214_p4, %s457_s12), 1 }
   0xf   : > { %s417_s16 = sshll.u32 %s538_s12, 3 }
  0x10   : > { %s225_s19 = scalar_lea.vmem %s529_s0, %s417_s16  ;;  %s239_s26 = scalar_lea.vmem %s532_s3, %s417_s16 }
  0x11   : > { %v241_v1 = vld [vmem:[%s225_s19] sm:$0x3]  ;;  %v242_v2 = vld [vmem:[%s225_s19 + $0x2] sm:$0x3]  ;;  %v243_v3 = vld [vmem:[%s225_s19 + $0x4] sm:$0x3] }
  0x12   : > { %v244_v4 = vld [vmem:[%s225_s19 + $0x6] sm:$0x3]  ;;  %v245_v5 = vunpack.c.l.bf16 %v241_v1  ;;  %v246_v6 = vunpack.c.l.bf16 %v242_v2  ;;  %v247_v7 = vunpack.c.l.bf16 %v243_v3 }
  0x13   : > { %v248_v8 = vunpack.c.l.bf16 %v244_v4 }
  0x14   : > { %v256_v10 = vmul.f32 %v413_v0, %v245_v5  ;;  %v257_v11 = vmul.f32 %v413_v0, %v246_v6  ;;  %v258_v12 = vmul.f32 %v413_v0, %v247_v7 }
  0x15   : > { %v259_v13 = vmul.f32 %v413_v0, %v248_v8 }
  0x16   : > { %v267_v14 = vadd.f32 %v414_v9, %v256_v10  ;;  %v268_v15 = vadd.f32 %v414_v9, %v257_v11  ;;  %v269_v16 = vadd.f32 %v414_v9, %v258_v12 }
  0x17   : > { %v270_v17 = vadd.f32 %v414_v9, %v259_v13 }
  0x18   : > { %vm271_vm0 = vcmp.ge.f32.partialorder %v267_v14, 0.0  ;;  %v275_v18 = vmul.f32 0.2, %v267_v14  ;;  %vm272_vm1 = vcmp.ge.f32.partialorder %v268_v15, 0.0  ;;  %v276_v19 = vmul.f32 0.2, %v268_v15 }
  0x19   : > { %vm273_vm2 = vcmp.ge.f32.partialorder %v269_v16, 0.0  ;;  %v277_v20 = vmul.f32 0.2, %v269_v16  ;;  %vm274_vm3 = vcmp.ge.f32.partialorder %v270_v17, 0.0  ;;  %v278_v21 = vmul.f32 0.2, %v270_v17 }
  0x1a   : > { %v279_v22 = vsel %vm271_vm0, %v267_v14, %v275_v18  ;;  %v280_v23 = vsel %vm272_vm1, %v268_v15, %v276_v19 }
  0x1b   : > { %v283_v24 = vpack.c.bf16 %v279_v22, %v279_v22  ;;  %v284_v25 = vpack.c.bf16 %v280_v23, %v280_v23  ;;  %v281_v26 = vsel %vm273_vm2, %v269_v16, %v277_v20  ;;  %v282_v27 = vsel %vm274_vm3, %v270_v17, %v278_v21 }
  0x1c   : > { %v285_v28 = vpack.c.bf16 %v281_v26, %v281_v26  ;;  %v286_v29 = vpack.c.bf16 %v282_v27, %v282_v27 }
  0x1d   : > { %288 = vst.msk [vmem:[%s239_s26] sm:$0x3] %vm287_vm4, %v283_v24  ;;  %289 = vst.msk [vmem:[%s239_s26 + $0x2] sm:$0x3] %vm287_vm4, %v284_v25 }
  0x1e   : > { %290 = vst.msk [vmem:[%s239_s26 + $0x4] sm:$0x3] %vm287_vm4, %v285_v28  ;;  %291 = vst.msk [vmem:[%s239_s26 + $0x6] sm:$0x3] %vm287_vm4, %v286_v29 }
  0x1f PF: > { %s13_s14 = sadd.s32 1, %s465_s14   ;;  %s533_s12 = smov %s461_s13 }
  0x20   : > { %p10_p5 = scmp.ge.s32.totalorder %s13_s14, 4   ;;  %s534_s13 = smov %s536_s15 }
  0x22   :  { %12 = sbr.rel (!%p10_p5) target bundleno = 2 (0x2), region = 62 }

// kernel: loom_generator_forward.23
= control target key start
LH: loop header
LB: loop body
LE: loop exit
PB: predicated region body
PF: predicated region fallthrough
CT: control target
= control target key end

     0   :  { %s787_s12 = smov 0   ;;  %s881_s0 = inlined_call_operand.vmem [shape: bf16[2,5,5,32], index: 0, kind: input, shape index: {}]   ;;  %s882_s1 = inlined_call_operand.vmem [shape: bf16[1,4,32,16], index: 1, kind: input, shape index: {}]   ;;  %s883_s2 = inlined_call_operand.vmem [shape: bf16[2,1,4,4,16], index: 2, kind: output, shape index: {0}]   ;;  %s884_s3 = inlined_call_operand.vmem [shape: f32[2,2,16], index: 3, kind: output, shape index: {1}]  }
   0x1 LB: > { %s592_s13 = sadd.s32 4294967295, %s751_s12   ;;  %p596_p0 = scmp.ge.s32.totalorder %s751_s12, 1  ;;  %s751_s12 = sphi %s787_s12, %s14_s12  }
   0x2   : > { %p140_p1 = scmp.lt.s32.totalorder %s751_s12, 3 }
   0x4   : > { %p141_p2 = pnand %p596_p0, %p140_p1 }
   0x5   : > { %p168_p3 = scmp.lt.s32.totalorder (!%p141_p2), %s592_s13, 1  ;;  %v810_v0 = vmov (!%p141_p2), 0.0   ;;  %v812_v1 = vmov (!%p141_p2), 0.0   ;;  %s814_s26 = smov (!%p141_p2), 0  }
   0x6   : > { %144 = sbr.rel (%p141_p2) target bundleno = 272 (0x110), region = 28 }
   0xd   : > { %s888_s13 = smov (!%p168_p3, %s592_s13), 1 }
   0xe   : > { %s688_s14 = smul.u32 20, %s888_s13  ;;  %s634_s15 = sshll.u32 %s888_s13, 3 }
   0xf   : > { %s798_s18 = scalar_lea.vmem %s883_s2, %s634_s15  ;;  %s600_s19 = sshll.u32 %s888_s13, 1 }
  0x10   : > { %s803_s22 = scalar_lea.vmem %s881_s0, %s688_s14  ;;  %s808_s25 = scalar_lea.vmem %s884_s3, %s600_s19 }
  0x11 LB: >> { %v723_v2 = vld [vmem:[%s882_s1 + $0x20] sm:$0xff]   ;;  %v765_v3 = vmov 0.0   ;;  %v724_v4 = vld [vmem:[%s882_s1 + $0x10] sm:$0xff]   ;;  %v725_v5 = vld [vmem:[%s882_s1 + $0x28] sm:$0xff]   ;;  %vm766_vm0 = vmmov 0   ;;  %s601_s6 = sshll.u32 %s763_s26, 2  ;;  %s763_s26 = sphi %s814_s26, %s188_s26   ;;  %v759_v1 = vphi %v812_v1, %v886_v1   ;;  %v755_v0 = vphi %v810_v0, %v885_v0  }
  0x12   : >> { %663 = vmatprep.subr.bf16.mxu0 %v765_v3  ;;  %647 = vmatprep.subr.bf16.mxu1 %v765_v3  ;;  %v726_v6 = vld [vmem:[%s882_s1 + $0x18] sm:$0xff]   ;;  %s840_s9 = scalar_lea.vmem %s803_s22, %s601_s6  ;;  %vm226_vm1 = vcmask 261120   ;;  %v730_v13 = vld [vmem:[%s882_s1 + $0x30] sm:$0xff]   ;;  %v729_v16 = vld [vmem:[%s882_s1] sm:$0xff]   ;;  %s631_s20 = sshll.u32 %s763_s26, 1  ;;  %vm467_vm2 = vcmask 125952  }
  0x13   : >> { %664 = vmatpush3.bf16.msra.mxu0 %v723_v2  ;;  %667 = vmatprep.mubr.msk.bf16.mxu0 %vm766_vm0, %v765_v3  ;;  %v614_v7 = vld [vmem:[%s840_s9 + $0x4] sm:$0x3]  ;;  %v728_v9 = vld [vmem:[%s840_s9] ss:$0 sps:$4 sm:$0x77]   ;;  %v732_v15 = vld [vmem:[%s882_s1 + $0x38] sm:$0xff]   ;;  %s464_s21 = scalar_lea.vmem %s798_s18, %s631_s20 }
  0x14   : >> { %648 = vmatpush3.bf16.msra.mxu1 %v724_v4  ;;  %665 = vmatprep.subr.bf16.mxu0 %v765_v3  ;;  %v727_v8 = vld [vmem:[%s840_s9 + $0x4] ss:$0 sps:$4 sm:$0x77]   ;;  %v208_v11 = vshrl.u32 %v728_v9, 16  ;;  %v210_v12 = vshll.u32 %v728_v9, 16  ;;  %v731_v20 = vld [vmem:[%s882_s1 + $0x8] sm:$0xff]  }
  0x15   : >> { %649 = vmatprep.subr.bf16.mxu1 %v765_v3  ;;  %651 = vmatprep.mubr.msk.bf16.mxu1 %vm766_vm0, %v765_v3  ;;  %v402_v10 = vshll.u32 %v727_v8, 16  ;;  %v400_v18 = vshrl.u32 %v727_v8, 16  ;;  %v193_v22 = vld [vmem:[%s840_s9] sm:$0x3]  ;;  %vm465_vm3 = vcmask 123904   ;;  %s188_s26 = sadd.s32 1, %s763_s26  }
  0x16   : >> { %v212_v14 = vrot.slane %v210_v12, 1  ;;  %p185_p4 = scmp.ge.s32.totalorder %s188_s26, 4  }
  0x17   : >> { %666 = vmatpush3.bf16.msra.mxu0 %v725_v5  ;;  %v404_v19 = vrot.slane %v402_v10, 1  ;;  %vm485_vm4 = vcmask (%p185_p4), 122880  }
  0x18   : >> { %650 = vmatpush3.bf16.msra.mxu1 %v726_v6  ;;  %671 = vmatprep.subr.bf16.mxu0 %v765_v3  ;;  %v213_v17 = vor.u32 %v212_v14, %v208_v11 }
  0x19   : >> { %655 = vmatprep.subr.bf16.mxu1 %v765_v3  ;;  %v405_v21 = vor.u32 %v404_v19, %v400_v18 }
  0x1a   : >> { %668 = vmatmul.mubr.msk.bf16.vlgmr.msra.gmra.mrb[0].mxu0 %vm226_vm1, %v614_v7 }
  0x1b   : >> { %672 = vmatpush3.bf16.msra.mxu0 %v730_v13  ;;  %675 = vmatprep.mubr.msk.bf16.mxu0 %vm766_vm0, %v765_v3 }
  0x1c   : >> { %673 = vmatprep.subr.bf16.mxu0 %v765_v3  ;;  %652 = vmatmul.mubr.msk.bf16.vlgmr.msra.gmra.mrb[0].mxu1 %vm226_vm1, %v213_v17 }
  0x1d   : >> { %656 = vmatpush3.bf16.msra.mxu1 %v729_v16  ;;  %659 = vmatprep.mubr.msk.bf16.mxu1 %vm766_vm0, %v765_v3 }
  0x1e   : >> { %657 = vmatprep.subr.bf16.mxu1 %v765_v3 }
  0x1f   : >> { %674 = vmatpush3.bf16.msra.mxu0 %v732_v15 }
  0x21   : >> { %658 = vmatpush3.bf16.msra.mxu1 %v731_v20 }
  0x26   : >> { %676 = vmatmul.mubr.msk.bf16.vlgmr.msra.gmra.mrb[0].mxu0 %vm226_vm1, %v405_v21 }
  0x28   : >> { %660 = vmatmul.mubr.msk.bf16.vlgmr.msra.gmra.mrb[0].mxu1 %vm226_vm1, %v193_v22 }
  0xf9   : >> { %v455_v23 = vpop.f32.mrb[0].mxu0 }
  0xfa   : >> { %v677_v24 = vpop.f32.mrb[1].mxu0 }
  0xfb   : >> { %v458_v25 = vpop.f32.mrb[2].mxu0  ;;  %v319_v27 = vpop.f32.mrb[0].mxu1 }
  0xfc   : >> { %v678_v26 = vpop.f32.mrb[3].mxu0  ;;  %v679_v28 = vadd.f32 %v455_v23, %v319_v27  ;;  %v661_v29 = vpop.f32.mrb[1].mxu1 }
  0xfd   : >> { %v322_v30 = vpop.f32.mrb[2].mxu1 }
  0xfe   : >> { %v462_v31 = vpack.c.bf16 %v679_v28, %v679_v28  ;;  %v468_v32 = vsel %vm467_vm2, %v679_v28, 0.0  ;;  %v476_v33 = vmul.f32 %v679_v28, %v679_v28  ;;  %v662_v34 = vpop.f32.mrb[3].mxu1 }
  0xff   : >> { %v469_v35 = vrot.slane %v468_v32, 4 }
 0x100   : >> { %466 = vst.msk [vmem:[%s464_s21] sm:$0x3] %vm465_vm3, %v462_v31  ;;  %v477_v36 = vsel %vm467_vm2, %v476_v33, 0.0 }
 0x101   : >> { %v470_v37 = vadd.f32 %v469_v35, %v468_v32  ;;  %v478_v38 = vrot.slane %v477_v36, 4 }
 0x103   : >> { %v471_v39 = vrot.slane %v470_v37, 2  ;;  %v479_v40 = vadd.f32 %v478_v38, %v477_v36 }
 0x105   : >> { %v472_v41 = vadd.f32 %v471_v39, %v470_v37  ;;  %v480_v42 = vrot.slane %v479_v40, 2 }
 0x107   : >> { %v473_v43 = vrot.slane %v472_v41, 1  ;;  %v481_v44 = vadd.f32 %v480_v42, %v479_v40 }
 0x109   : >> { %v474_v45 = vadd.f32 %v473_v43, %v472_v41  ;;  %v482_v46 = vrot.slane %v481_v44, 1  ;;  %187 = sbr.rel (!%p185_p4) target bundleno = 17 (0x11), region = 83 }
 0x10b   : >> { %v475_v47 = vadd.f32 %v759_v1, %v474_v45   ;;  %v483_v48 = vadd.f32 %v482_v46, %v481_v44 }
 0x10d   : >> { %v484_v49 = vadd.f32 %v755_v0, %v483_v48   ;;  %v886_v1 = vmov %v475_v47  ;;  %486 = vst.msk [vmem:[%s808_s25] sm:$0x1] (%p185_p4), %vm485_vm4, %v475_v47 }
 0x10f   : >> { %v885_v0 = vmov %v484_v49  ;;  %487 = vst.msk [vmem:[%s808_s25 + $0x1] sm:$0x1] (%p185_p4), %vm485_vm4, %v484_v49 }
 0x110 PF: > { %s14_s12 = sadd.s32 1, %s751_s12  }
 0x111   : > { %p11_p5 = scmp.ge.s32.totalorder %s14_s12, 4  }
 0x113   :  { %13 = sbr.rel (!%p11_p5) target bundleno = 1 (0x1), region = 94 }

// kernel: loom_generator_forward.26
= control target key start
LH: loop header
LB: loop body
LE: loop exit
PB: predicated region body
PF: predicated region fallthrough
CT: control target
= control target key end

     0   :  { %s451_s12 = smov 0   ;;  %s453_s13 = smov 0   ;;  %s490_s0 = inlined_call_operand.vmem [shape: bf16[2,1,2,2,32], index: 0, kind: input, shape index: {}]   ;;  %s491_s1 = inlined_call_operand.vmem [shape: f32[1,32], index: 1, kind: input, shape index: {}]   ;;  %s492_s2 = inlined_call_operand.vmem [shape: f32[1,32], index: 2, kind: input, shape index: {}]   ;;  %s493_s3 = inlined_call_operand.vmem [shape: bf16[2,1,2,2,32], index: 3, kind: output, shape index: {}]  }
   0x1   :  { %s455_s14 = smov 0  }
   0x2 LB: > { %s32_s15 = sadd.s32 1, %s425_s13  ;;  %p376_p0 = scmp.ge.s32.totalorder %s429_s14, 1  ;;  %s429_s14 = sphi %s455_s14, %s13_s14   ;;  %s425_s13 = sphi %s453_s13, %s495_s13   ;;  %s421_s12 = sphi %s451_s12, %s494_s12  }
   0x3   : > { %p34_p1 = scmp.ge.s32.totalorder %s32_s15, 2  ;;  %p172_p2 = scmp.lt.s32.totalorder %s429_s14, 3 }
   0x5   : > { %s497_s15 = smov (%p34_p1, %s32_s15), 0  ;;  %p173_p3 = pnand %p376_p0, %p172_p2 }
   0x6   : > { %p211_p4 = scmp.lt.s32.totalorder (!%p173_p3), %s421_s12, 1  ;;  %v379_v2 = vld [vmem:[%s491_s1] ss:$0 sm:$0xff] (!%p173_p3)  ;;  %vm266_vm2 = vcmask (!%p173_p3), 253952  }
   0x7   : > { %176 = sbr.rel (%p173_p3) target bundleno = 30 (0x1e), region = 32  ;;  %v380_v5 = vld [vmem:[%s492_s2] ss:$0 sm:$0xff] (!%p173_p3) }
   0xe   : > { %s499_s12 = smov (!%p211_p4, %s421_s12), 1 }
   0xf   : > { %s377_s16 = sshll.u32 %s499_s12, 1 }
  0x10   : > { %s221_s19 = scalar_lea.vmem %s490_s0, %s377_s16  ;;  %s234_s26 = scalar_lea.vmem %s493_s3, %s377_s16 }
  0x11   : > { %v236_v0 = vld [vmem:[%s221_s19] sm:$0x1]  ;;  %v237_v1 = vld [vmem:[%s221_s19 + $0x1] sm:$0x1] }
  0x12   : > { %v238_v3 = vunpack.c.l.bf16 %v236_v0  ;;  %v239_v4 = vunpack.c.l.bf16 %v237_v1 }
  0x14   : > { %v247_v6 = vmul.f32 %v379_v2, %v238_v3  ;;  %v248_v7 = vmul.f32 %v379_v2, %v239_v4 }
  0x16   : > { %v256_v8 = vadd.f32 %v380_v5, %v247_v6  ;;  %v257_v9 = vadd.f32 %v380_v5, %v248_v7 }
  0x18   : > { %vm258_vm0 = vcmp.ge.f32.partialorder %v256_v8, 0.0  ;;  %v260_v10 = vmul.f32 0.2, %v256_v8  ;;  %vm259_vm1 = vcmp.ge.f32.partialorder %v257_v9, 0.0  ;;  %v261_v11 = vmul.f32 0.2, %v257_v9 }
  0x1a   : > { %v262_v12 = vsel %vm258_vm0, %v256_v8, %v260_v10  ;;  %v263_v13 = vsel %vm259_vm1, %v257_v9, %v261_v11 }
  0x1b   : > { %v264_v14 = vpack.c.bf16 %v262_v12, %v262_v12  ;;  %v265_v15 = vpack.c.bf16 %v263_v13, %v263_v13 }
  0x1d   : > { %267 = vst.msk [vmem:[%s234_s26] sm:$0x1] %vm266_vm2, %v264_v14  ;;  %268 = vst.msk [vmem:[%s234_s26 + $0x1] sm:$0x1] %vm266_vm2, %v265_v15 }
  0x1e PF: > { %s13_s14 = sadd.s32 1, %s429_s14   ;;  %s494_s12 = smov %s425_s13 }
  0x1f   : > { %p10_p5 = scmp.ge.s32.totalorder %s13_s14, 4   ;;  %s495_s13 = smov %s497_s15 }
  0x21   :  { %12 = sbr.rel (!%p10_p5) target bundleno = 2 (0x2), region = 62 }

// kernel: loom_generator_forward.25
= control target key start
LH: loop header
LB: loop body
LE: loop exit
PB: predicated region body
PF: predicated region fallthrough
CT: control target
= control target key end

     0   :  { %s902_s12 = smov 0   ;;  %s1043_s0 = inlined_call_operand.vmem [shape: bf16[2,3,3,64], index: 0, kind: input, shape index: {}]   ;;  %s1044_s1 = inlined_call_operand.vmem [shape: bf16[1,4,64,32], index: 1, kind: input, shape index: {}]   ;;  %s1045_s2 = inlined_call_operand.vmem [shape: bf16[2,1,2,2,32], index: 2, kind: output, shape index: {0}]   ;;  %s1046_s3 = inlined_call_operand.vmem [shape: f32[2,2,32], index: 3, kind: output, shape index: {1}]  }
   0x1 LB: > { %s660_s13 = sadd.s32 4294967295, %s866_s12   ;;  %p664_p0 = scmp.ge.s32.totalorder %s866_s12, 1  ;;  %s866_s12 = sphi %s902_s12, %s14_s12  }
   0x2   : > { %p140_p1 = scmp.lt.s32.totalorder %s866_s12, 3 }
   0x4   : > { %p141_p2 = pnand %p664_p0, %p140_p1 }
   0x5   : > { %p167_p3 = scmp.lt.s32.totalorder (!%p141_p2), %s660_s13, 1  ;;  %v925_v0 = vmov (!%p141_p2), 0.0   ;;  %v927_v1 = vmov (!%p141_p2), 0.0   ;;  %s929_s25 = smov (!%p141_p2), 0  }
   0x6   : > { %144 = sbr.rel (%p141_p2) target bundleno = 283 (0x11b), region = 28 }
   0xd   : > { %s1050_s13 = smov (!%p167_p3, %s660_s13), 1 }
   0xe   : > { %s797_s14 = smul.u32 6, %s1050_s13  ;;  %s666_s15 = sshll.u32 %s1050_s13, 1 }
   0xf   : > { %s913_s18 = scalar_lea.vmem %s1045_s2, %s666_s15  ;;  %s918_s21 = scalar_lea.vmem %s1046_s3, %s666_s15 }
  0x10   : > { %s923_s24 = scalar_lea.vmem %s1043_s0, %s797_s14 }
  0x11 LB: >> { %v832_v2 = vld [vmem:[%s1044_s1 + $0x20] sm:$0xff]   ;;  %v880_v3 = vmov 0.0   ;;  %v834_v5 = vld [vmem:[%s1044_s1 + $0x28] sm:$0xff]   ;;  %vm881_vm0 = vmmov 0   ;;  %s668_s5 = sshll.u32 %s878_s25, 1  ;;  %v836_v7 = vld [vmem:[%s1044_s1 + $0x30] sm:$0xff]   ;;  %s535_s13 = scalar_lea.vmem %s913_s18, %s878_s25  ;;  %s878_s25 = sphi %s929_s25, %s186_s25   ;;  %v874_v1 = vphi %v927_v1, %v1048_v1   ;;  %v870_v0 = vphi %v925_v0, %v1047_v0  }
  0x12   : >> { %740 = vmatprep.subr.bf16.mxu1 %v880_v3  ;;  %764 = vmatprep.subr.bf16.mxu0 %v880_v3  ;;  %v833_v4 = vld [vmem:[%s1044_s1 + $0x40] sm:$0xff]   ;;  %v835_v6 = vld [vmem:[%s1044_s1 + $0x48] sm:$0xff]   ;;  %s962_s8 = scalar_lea.vmem %s923_s24, %s668_s5  ;;  %v837_v8 = vld [vmem:[%s1044_s1 + $0x50] sm:$0xff]   ;;  %vm249_vm1 = vcmask 523264   ;;  %vm538_vm2 = vcmask 254976   ;;  %vm536_vm3 = vcmask 253952  }
  0x13   : >> { %741 = vmatpush3.bf16.msra.mxu1 %v832_v2  ;;  %748 = vmatprep.mubr.msk.bf16.mxu1 %vm881_vm0, %v880_v3  ;;  %v677_v9 = vld.sshfl [vmem:[%s962_s8] sm:$0x3 pattern:$0x76325410]  ;;  %v838_v12 = vld [vmem:[%s1044_s1 + $0x38] sm:$0xff]   ;;  %v842_v19 = vld [vmem:[%s1044_s1 + $0x8] sm:$0xff]  }
  0x14   : >> { %765 = vmatpush3.bf16.msra.mxu0 %v833_v4  ;;  %742 = vmatprep.subr.bf16.mxu1 %v880_v3  ;;  %v219_v10 = vshrl.u32 %v677_v9, 16  ;;  %v221_v11 = vshll.u32 %v677_v9, 16  ;;  %v839_v13 = vld [vmem:[%s1044_s1 + $0x58] sm:$0xff]   ;;  %v840_v16 = vld [vmem:[%s1044_s1] sm:$0xff]   ;;  %v843_v20 = vld [vmem:[%s1044_s1 + $0x68] sm:$0xff]   ;;  %s186_s25 = sadd.s32 1, %s878_s25  }
  0x15   : >> { %766 = vmatprep.subr.bf16.mxu0 %v880_v3  ;;  %772 = vmatprep.mubr.msk.bf16.mxu0 %vm881_vm0, %v880_v3  ;;  %v841_v17 = vld [vmem:[%s1044_s1 + $0x60] sm:$0xff]   ;;  %v844_v22 = vld [vmem:[%s1044_s1 + $0x10] sm:$0xff]   ;;  %v846_v25 = vld [vmem:[%s1044_s1 + $0x18] sm:$0xff]   ;;  %p183_p4 = scmp.ge.s32.totalorder %s186_s25, 2  }
  0x16   : >> { %v223_v14 = vrot.slane %v221_v11, 1  ;;  %v689_v18 = vld [vmem:[%s962_s8 + $0x2] sm:$0x1]  ;;  %v845_v24 = vld [vmem:[%s1044_s1 + $0x70] sm:$0xff]   ;;  %v847_v28 = vld [vmem:[%s1044_s1 + $0x78] sm:$0xff]  }
  0x17   : >> { %743 = vmatpush3.bf16.msra.mxu1 %v834_v5  ;;  %v712_v21 = vld.sshfl [vmem:[%s962_s8 + $0x2] sm:$0x3 pattern:$0x76325410]  ;;  %v191_v29 = vld [vmem:[%s962_s8] sm:$0x1] }
  0x18   : >> { %767 = vmatpush3.bf16.msra.mxu0 %v835_v6  ;;  %744 = vmatprep.subr.bf16.mxu1 %v880_v3  ;;  %v224_v15 = vor.u32 %v223_v14, %v219_v10  ;;  %v462_v23 = vshll.u32 %v712_v21, 16  ;;  %v460_v26 = vshrl.u32 %v712_v21, 16 }
  0x19   : >> { %768 = vmatprep.subr.bf16.mxu0 %v880_v3 }
  0x1a   : >> { %v464_v27 = vrot.slane %v462_v23, 1 }
  0x1b   : >> { %745 = vmatpush3.bf16.msra.mxu1 %v836_v7 }
  0x1c   : >> { %769 = vmatpush3.bf16.msra.mxu0 %v837_v8  ;;  %746 = vmatprep.subr.bf16.mxu1 %v880_v3  ;;  %v465_v30 = vor.u32 %v464_v27, %v460_v26 }
  0x1d   : >> { %770 = vmatprep.subr.bf16.mxu0 %v880_v3 }
  0x1f   : >> { %747 = vmatpush3.bf16.msra.mxu1 %v838_v12 }
  0x20   : >> { %771 = vmatpush3.bf16.msra.mxu0 %v839_v13  ;;  %752 = vmatprep.subr.bf16.mxu1 %v880_v3 }
  0x21   : >> { %776 = vmatprep.subr.bf16.mxu0 %v880_v3 }
  0x22   : >> { %749 = vmatmul.mubr.msk.bf16.vlgmr.msra.gmra.mrb[0].mxu1 %vm249_vm1, %v224_v15 }
  0x23   : >> { %753 = vmatpush3.bf16.msra.mxu1 %v840_v16  ;;  %773 = vmatmul.mubr.msk.bf16.vlgmr.msra.gmra.mrb[0].mxu0 %vm249_vm1, %v689_v18 }
  0x24   : >> { %777 = vmatpush3.bf16.msra.mxu0 %v841_v17  ;;  %754 = vmatprep.subr.bf16.mxu1 %v880_v3 }
  0x25   : >> { %778 = vmatprep.subr.bf16.mxu0 %v880_v3  ;;  %760 = vmatprep.mubr.msk.bf16.mxu1 %vm881_vm0, %v880_v3 }
  0x26   : >> { %784 = vmatprep.mubr.msk.bf16.mxu0 %vm881_vm0, %v880_v3 }
  0x27   : >> { %755 = vmatpush3.bf16.msra.mxu1 %v842_v19 }
  0x28   : >> { %779 = vmatpush3.bf16.msra.mxu0 %v843_v20  ;;  %756 = vmatprep.subr.bf16.mxu1 %v880_v3 }
  0x29   : >> { %780 = vmatprep.subr.bf16.mxu0 %v880_v3 }
  0x2b   : >> { %757 = vmatpush3.bf16.msra.mxu1 %v844_v22 }
  0x2c   : >> { %781 = vmatpush3.bf16.msra.mxu0 %v845_v24  ;;  %758 = vmatprep.subr.bf16.mxu1 %v880_v3 }
  0x2d   : >> { %782 = vmatprep.subr.bf16.mxu0 %v880_v3 }
  0x2f   : >> { %759 = vmatpush3.bf16.msra.mxu1 %v846_v25 }
  0x30   : >> { %783 = vmatpush3.bf16.msra.mxu0 %v847_v28 }
  0x32   : >> { %761 = vmatmul.mubr.msk.bf16.vlgmr.msra.gmra.mrb[0].mxu1 %vm249_vm1, %v191_v29 }
  0x33   : >> { %785 = vmatmul.mubr.msk.bf16.vlgmr.msra.gmra.mrb[0].mxu0 %vm249_vm1, %v465_v30 }
 0x105   : >> { %v354_v31 = vpop.f32.mrb[0].mxu1 }
 0x106   : >> { %v527_v32 = vpop.f32.mrb[0].mxu0  ;;  %v762_v33 = vpop.f32.mrb[1].mxu1 }
 0x107   : >> { %v788_v34 = vadd.f32 %v527_v32, %v354_v31  ;;  %v786_v35 = vpop.f32.mrb[1].mxu0  ;;  %v357_v36 = vpop.f32.mrb[2].mxu1 }
 0x108   : >> { %v530_v37 = vpop.f32.mrb[2].mxu0  ;;  %v763_v38 = vpop.f32.mrb[3].mxu1 }
 0x109   : >> { %v534_v39 = vpack.c.bf16 %v788_v34, %v788_v34  ;;  %v539_v40 = vsel %vm538_vm2, %v788_v34, 0.0  ;;  %v547_v41 = vmul.f32 %v788_v34, %v788_v34  ;;  %v787_v42 = vpop.f32.mrb[3].mxu0 }
 0x10a   : >> { %v540_v43 = vrot.slane %v539_v40, 4 }
 0x10b   : >> { %537 = vst.msk [vmem:[%s535_s13] sm:$0x1] %vm536_vm3, %v534_v39  ;;  %v548_v44 = vsel %vm538_vm2, %v547_v41, 0.0 }
 0x10c   : >> { %v541_v45 = vadd.f32 %v540_v43, %v539_v40  ;;  %v549_v46 = vrot.slane %v548_v44, 4 }
 0x10e   : >> { %v542_v47 = vrot.slane %v541_v45, 2  ;;  %v550_v48 = vadd.f32 %v549_v46, %v548_v44 }
 0x110   : >> { %v543_v49 = vadd.f32 %v542_v47, %v541_v45  ;;  %v551_v50 = vrot.slane %v550_v48, 2 }
 0x112   : >> { %v544_v51 = vrot.slane %v543_v49, 1  ;;  %v552_v52 = vadd.f32 %v551_v50, %v550_v48 }
 0x114   : >> { %v545_v53 = vadd.f32 %v544_v51, %v543_v49  ;;  %v553_v54 = vrot.slane %v552_v52, 1  ;;  %185 = sbr.rel (!%p183_p4) target bundleno = 17 (0x11), region = 83 }
 0x116   : >> { %v546_v55 = vadd.f32 %v874_v1, %v545_v53   ;;  %v554_v56 = vadd.f32 %v553_v54, %v552_v52 }
 0x118   : >> { %v555_v57 = vadd.f32 %v870_v0, %v554_v56   ;;  %v1048_v1 = vmov %v546_v55  ;;  %557 = vst.msk [vmem:[%s918_s21] sm:$0x1] (%p183_p4), %vm536_vm3, %v546_v55 }
 0x11a   : >> { %v1047_v0 = vmov %v555_v57  ;;  %558 = vst.msk [vmem:[%s918_s21 + $0x1] sm:$0x1] (%p183_p4), %vm536_vm3, %v555_v57 }
 0x11b PF: > { %s14_s12 = sadd.s32 1, %s866_s12  }
 0x11c   : > { %p11_p5 = scmp.ge.s32.totalorder %s14_s12, 4  }
 0x11e   :  { %13 = sbr.rel (!%p11_p5) target bundleno = 1 (0x1), region = 94 }

// kernel: loom_generator_forward.28
= control target key start
LH: loop header
LB: loop body
LE: loop exit
PB: predicated region body
PF: predicated region fallthrough
CT: control target
= control target key end

     0   :  { %s390_s12 = smov 0   ;;  %s392_s13 = smov 0   ;;  %s426_s0 = inlined_call_operand.vmem [shape: bf16[2,1,1,1,64], index: 0, kind: input, shape index: {}]   ;;  %s427_s1 = inlined_call_operand.vmem [shape: f32[1,64], index: 1, kind: input, shape index: {}]   ;;  %s428_s2 = inlined_call_operand.vmem [shape: f32[1,64], index: 2, kind: input, shape index: {}]   ;;  %s429_s3 = inlined_call_operand.vmem [shape: bf16[2,1,1,1,64], index: 3, kind: output, shape index: {}]  }
   0x1   :  { %s394_s14 = smov 0  }
   0x2 LB: > { %s32_s15 = sadd.s32 1, %s364_s13  ;;  %p319_p0 = scmp.ge.s32.totalorder %s368_s14, 1  ;;  %s368_s14 = sphi %s394_s14, %s13_s14   ;;  %s364_s13 = sphi %s392_s13, %s431_s13   ;;  %s360_s12 = sphi %s390_s12, %s430_s12  }
   0x3   : > { %p34_p1 = scmp.ge.s32.totalorder %s32_s15, 2  ;;  %p168_p2 = scmp.lt.s32.totalorder %s368_s14, 3 }
   0x5   : > { %s433_s15 = smov (%p34_p1, %s32_s15), 0  ;;  %p169_p3 = pnand %p319_p0, %p168_p2 }
   0x6   : > { %p200_p4 = scmp.lt.s32.totalorder (!%p169_p3), %s360_s12, 1  ;;  %v220_v1 = vld [vmem:[%s427_s1] sm:$0x1] (!%p169_p3)  ;;  %vm228_vm0 = vcmask (!%p169_p3), 516096   ;;  %vm229_vm1 = vsmask.f32 (!%p169_p3), 256 }
   0x7   : > { %172 = sbr.rel (%p169_p3) target bundleno = 30 (0x1e), region = 32  ;;  %v222_v3 = vld [vmem:[%s428_s2] sm:$0x1] (!%p169_p3)  ;;  %vm230_vm3 = vmand (!%p169_p3), %vm228_vm0, %vm229_vm1 }
   0xe   : > { %s435_s12 = smov (!%p200_p4, %s360_s12), 1 }
   0xf   : > { %s208_s18 = scalar_lea.vmem %s426_s0, %s435_s12  ;;  %s217_s25 = scalar_lea.vmem %s429_s3, %s435_s12 }
  0x10   : > { %v218_v0 = vld [vmem:[%s208_s18] sm:$0x1] }
  0x11   : > { %v219_v2 = vunpack.c.l.bf16 %v218_v0  ;;  %v231_v8 = vld [vmem:[%s217_s25] sm:$0x1] }
  0x13   : > { %v221_v4 = vmul.f32 %v220_v1, %v219_v2 }
  0x15   : > { %v223_v5 = vadd.f32 %v222_v3, %v221_v4 }
  0x17   : > { %vm224_vm2 = vcmp.ge.f32.partialorder %v223_v5, 0.0  ;;  %v225_v6 = vmul.f32 0.2, %v223_v5 }
  0x19   : > { %v226_v7 = vsel %vm224_vm2, %v223_v5, %v225_v6 }
  0x1a   : > { %v227_v9 = vpack.c.bf16 %v226_v7, %v226_v7 }
  0x1c   : > { %v232_v10 = vsel %vm230_vm3, %v227_v9, %v231_v8 }
  0x1d   : > { %233 = vst [vmem:[%s217_s25] sm:$0x1] %v232_v10 }
  0x1e PF: > { %s13_s14 = sadd.s32 1, %s368_s14   ;;  %s430_s12 = smov %s364_s13 }
  0x1f   : > { %p10_p5 = scmp.ge.s32.totalorder %s13_s14, 4   ;;  %s431_s13 = smov %s433_s15 }
  0x21   :  { %12 = sbr.rel (!%p10_p5) target bundleno = 2 (0x2), region = 62 }

// kernel: loom_generator_forward.27
= control target key start
LH: loop header
LB: loop body
LE: loop exit
PB: predicated region body
PF: predicated region fallthrough
CT: control target
= control target key end

     0   :  { %s1020_s12 = smov 0   ;;  %s1197_s0 = inlined_call_operand.vmem [shape: bf16[2,2,2,128], index: 0, kind: input, shape index: {}]   ;;  %s1198_s1 = inlined_call_operand.vmem [shape: bf16[1,4,128,64], index: 1, kind: input, shape index: {}]   ;;  %s1199_s2 = inlined_call_operand.vmem [shape: bf16[2,1,1,1,64], index: 2, kind: output, shape index: {0}]   ;;  %s1200_s3 = inlined_call_operand.vmem [shape: f32[2,2,64], index: 3, kind: output, shape index: {1}]  }
   0x1 LB: > { %s731_s13 = sadd.s32 4294967295, %s995_s12   ;;  %p735_p0 = scmp.ge.s32.totalorder %s995_s12, 1  ;;  %s995_s12 = sphi %s1020_s12, %s14_s12  }
   0x2   : > { %p139_p1 = scmp.lt.s32.totalorder %s995_s12, 3 }
   0x4   : > { %p140_p2 = pnand %p735_p0, %p139_p1 }
   0x5   : > { %v957_v0 = vld [vmem:[%s1198_s1 + $0x40] sm:$0xff] (!%p140_p2)   ;;  %v997_v1 = vmov (!%p140_p2), 0.0   ;;  %v959_v3 = vld [vmem:[%s1198_s1 + $0x48] sm:$0xff] (!%p140_p2)   ;;  %vm998_vm0 = vmmov (!%p140_p2), 0   ;;  %v961_v5 = vld [vmem:[%s1198_s1 + $0x50] sm:$0xff] (!%p140_p2)   ;;  %p164_p3 = scmp.lt.s32.totalorder (!%p140_p2), %s731_s13, 1  ;;  %v214_v9 = vlaneseq (!%p140_p2) }
   0x6   : > { %143 = sbr.rel (%p140_p2) target bundleno = 289 (0x121), region = 28  ;;  %857 = vmatprep.subr.bf16.mxu1 (!%p140_p2), %v997_v1  ;;  %897 = vmatprep.subr.bf16.mxu0 (!%p140_p2), %v997_v1  ;;  %v958_v2 = vld [vmem:[%s1198_s1 + $0x80] sm:$0xff] (!%p140_p2)   ;;  %v960_v4 = vld [vmem:[%s1198_s1 + $0x88] sm:$0xff] (!%p140_p2)   ;;  %v962_v6 = vld [vmem:[%s1198_s1 + $0x90] sm:$0xff] (!%p140_p2)   ;;  %v999_v12 = vmov (!%p140_p2), 1966171168  }
   0x7   : > { %858 = vmatpush3.bf16.msra.mxu1 (!%p140_p2), %v957_v0  ;;  %873 = vmatprep.mubr.msk.bf16.mxu1 (!%p140_p2), %vm998_vm0, %v997_v1  ;;  %v963_v7 = vld [vmem:[%s1198_s1 + $0x58] sm:$0xff] (!%p140_p2)   ;;  %v965_v10 = vld [vmem:[%s1198_s1 + $0x60] sm:$0xff] (!%p140_p2)   ;;  %v212_v13 = vunpack.c.l.s4 (!%p140_p2), %v999_v12  ;;  %v215_v14 = vshrl.u32 (!%p140_p2), %v214_v9, 7  ;;  %v967_v15 = vld [vmem:[%s1198_s1 + $0x68] sm:$0xff] (!%p140_p2)   ;;  %vm639_vm1 = vcmask (!%p140_p2), 516096  }
   0x8   : > { %898 = vmatpush3.bf16.msra.mxu0 (!%p140_p2), %v958_v2  ;;  %859 = vmatprep.subr.bf16.mxu1 (!%p140_p2), %v997_v1  ;;  %v964_v8 = vld [vmem:[%s1198_s1 + $0x98] sm:$0xff] (!%p140_p2)   ;;  %v966_v11 = vld [vmem:[%s1198_s1 + $0xa0] sm:$0xff] (!%p140_p2)   ;;  %v968_v16 = vld [vmem:[%s1198_s1 + $0xa8] sm:$0xff] (!%p140_p2)   ;;  %vm640_vm2 = vsmask.f32 (!%p140_p2), 256 }
   0x9   : > { %899 = vmatprep.subr.bf16.mxu0 (!%p140_p2), %v997_v1  ;;  %913 = vmatprep.mubr.msk.bf16.mxu0 (!%p140_p2), %vm998_vm0, %v997_v1  ;;  %v213_v17 = vunpack.c.0.s8 (!%p140_p2), %v212_v13  ;;  %v969_v20 = vld [vmem:[%s1198_s1 + $0x70] sm:$0xff] (!%p140_p2)   ;;  %v971_v24 = vld [vmem:[%s1198_s1 + $0x78] sm:$0xff] (!%p140_p2)   ;;  %v973_v27 = vld [vmem:[%s1198_s1] sm:$0xff] (!%p140_p2)  }
   0xa   : > { %v970_v21 = vld [vmem:[%s1198_s1 + $0xb0] sm:$0xff] (!%p140_p2)   ;;  %v972_v25 = vld [vmem:[%s1198_s1 + $0xb8] sm:$0xff] (!%p140_p2)   ;;  %v974_v29 = vld [vmem:[%s1198_s1 + $0xc0] sm:$0xff] (!%p140_p2)  }
   0xb   : > { %860 = vmatpush3.bf16.msra.mxu1 (!%p140_p2), %v959_v3  ;;  %v1090_v19 = vsub.s32 (!%p140_p2), %v213_v17, %v215_v14  ;;  %v975_v30 = vld [vmem:[%s1198_s1 + $0x8] sm:$0xff] (!%p140_p2)   ;;  %v977_v32 = vld [vmem:[%s1198_s1 + $0x10] sm:$0xff] (!%p140_p2)   ;;  %v979_v34 = vld [vmem:[%s1198_s1 + $0x18] sm:$0xff] (!%p140_p2)  }
   0xc   : > { %900 = vmatpush3.bf16.msra.mxu0 (!%p140_p2), %v960_v4  ;;  %861 = vmatprep.subr.bf16.mxu1 (!%p140_p2), %v997_v1  ;;  %v976_v31 = vld [vmem:[%s1198_s1 + $0xc8] sm:$0xff] (!%p140_p2)   ;;  %v978_v33 = vld [vmem:[%s1198_s1 + $0xd0] sm:$0xff] (!%p140_p2)   ;;  %v980_v35 = vld [vmem:[%s1198_s1 + $0xd8] sm:$0xff] (!%p140_p2)  }
   0xd   : > { %901 = vmatprep.subr.bf16.mxu0 %v997_v1  ;;  %s1202_s13 = smov (!%p164_p3, %s731_s13), 1  ;;  %v981_v36 = vld [vmem:[%s1198_s1 + $0x20] sm:$0xff]   ;;  %v983_v38 = vld [vmem:[%s1198_s1 + $0x28] sm:$0xff]   ;;  %v985_v41 = vld [vmem:[%s1198_s1 + $0x30] sm:$0xff]  }
   0xe   : > { %s736_s5 = sshll.u32 %s1202_s13, 1  ;;  %v982_v37 = vld [vmem:[%s1198_s1 + $0xe0] sm:$0xff]   ;;  %v984_v39 = vld [vmem:[%s1198_s1 + $0xe8] sm:$0xff]   ;;  %v986_v42 = vld [vmem:[%s1198_s1 + $0xf0] sm:$0xff]   ;;  %s170_s9 = scalar_lea.vmem %s1199_s2, %s1202_s13 }
   0xf   : > { %862 = vmatpush3.bf16.msra.mxu1 %v961_v5  ;;  %s167_s10 = scalar_lea.vmem %s1197_s0, %s736_s5  ;;  %v987_v44 = vld [vmem:[%s1198_s1 + $0x38] sm:$0xff]   ;;  %s174_s14 = scalar_lea.vmem %s1200_s3, %s736_s5  ;;  %vm641_vm3 = vmand %vm639_vm1, %vm640_vm2  ;;  %v642_v53 = vld [vmem:[%s170_s9] sm:$0x1] }
  0x10   : > { %902 = vmatpush3.bf16.msra.mxu0 %v962_v6  ;;  %863 = vmatprep.subr.bf16.mxu1 %v997_v1  ;;  %v1088_v18 = vld [vmem:[%s167_s10] sm:$0x1]  ;;  %v770_v28 = vld [vmem:[%s167_s10 + $0x1] sm:$0x1]  ;;  %v988_v45 = vld [vmem:[%s1198_s1 + $0xf8] sm:$0xff]  }
  0x11   : > { %903 = vmatprep.subr.bf16.mxu0 %v997_v1  ;;  %v217_v22 = vrot.slane %v1088_v18, %v1090_v19  ;;  %v537_v40 = vrot.slane %v770_v28, %v1090_v19 }
  0x13   : > { %864 = vmatpush3.bf16.msra.mxu1 %v963_v7  ;;  %v224_v23 = vrot.slane %v217_v22, %v1090_v19  ;;  %v544_v43 = vrot.slane %v537_v40, %v1090_v19 }
  0x14   : > { %904 = vmatpush3.bf16.msra.mxu0 %v964_v8  ;;  %865 = vmatprep.subr.bf16.mxu1 %v997_v1 }
  0x15   : > { %905 = vmatprep.subr.bf16.mxu0 %v997_v1  ;;  %v226_v26 = vshrl.u32 %v224_v23, 16  ;;  %v546_v46 = vshrl.u32 %v544_v43, 16 }
  0x17   : > { %866 = vmatpush3.bf16.msra.mxu1 %v965_v10 }
  0x18   : > { %906 = vmatpush3.bf16.msra.mxu0 %v966_v11  ;;  %867 = vmatprep.subr.bf16.mxu1 %v997_v1 }
  0x19   : > { %907 = vmatprep.subr.bf16.mxu0 %v997_v1 }
  0x1b   : > { %868 = vmatpush3.bf16.msra.mxu1 %v967_v15 }
  0x1c   : > { %908 = vmatpush3.bf16.msra.mxu0 %v968_v16  ;;  %869 = vmatprep.subr.bf16.mxu1 %v997_v1 }
  0x1d   : > { %909 = vmatprep.subr.bf16.mxu0 %v997_v1 }
  0x1f   : > { %870 = vmatpush3.bf16.msra.mxu1 %v969_v20 }
  0x20   : > { %910 = vmatpush3.bf16.msra.mxu0 %v970_v21  ;;  %871 = vmatprep.subr.bf16.mxu1 %v997_v1 }
  0x21   : > { %911 = vmatprep.subr.bf16.mxu0 %v997_v1 }
  0x23   : > { %872 = vmatpush3.bf16.msra.mxu1 %v971_v24 }
  0x24   : > { %912 = vmatpush3.bf16.msra.mxu0 %v972_v25  ;;  %877 = vmatprep.subr.bf16.mxu1 %v997_v1 }
  0x25   : > { %917 = vmatprep.subr.bf16.mxu0 %v997_v1 }
  0x26   : > { %874 = vmatmul.mubr.bf16.vlgmr.msra.gmra.mrb[0].mxu1 %v226_v26 }
  0x27   : > { %878 = vmatpush3.bf16.msra.mxu1 %v973_v27  ;;  %914 = vmatmul.mubr.bf16.vlgmr.msra.gmra.mrb[0].mxu0 %v770_v28 }
  0x28   : > { %918 = vmatpush3.bf16.msra.mxu0 %v974_v29  ;;  %879 = vmatprep.subr.bf16.mxu1 %v997_v1 }
  0x29   : > { %919 = vmatprep.subr.bf16.mxu0 %v997_v1  ;;  %893 = vmatprep.mubr.msk.bf16.mxu1 %vm998_vm0, %v997_v1 }
  0x2a   : > { %933 = vmatprep.mubr.msk.bf16.mxu0 %vm998_vm0, %v997_v1 }
  0x2b   : > { %880 = vmatpush3.bf16.msra.mxu1 %v975_v30 }
  0x2c   : > { %920 = vmatpush3.bf16.msra.mxu0 %v976_v31  ;;  %881 = vmatprep.subr.bf16.mxu1 %v997_v1 }
  0x2d   : > { %921 = vmatprep.subr.bf16.mxu0 %v997_v1 }
  0x2f   : > { %882 = vmatpush3.bf16.msra.mxu1 %v977_v32 }
  0x30   : > { %922 = vmatpush3.bf16.msra.mxu0 %v978_v33  ;;  %883 = vmatprep.subr.bf16.mxu1 %v997_v1 }
  0x31   : > { %923 = vmatprep.subr.bf16.mxu0 %v997_v1 }
  0x33   : > { %884 = vmatpush3.bf16.msra.mxu1 %v979_v34 }
  0x34   : > { %924 = vmatpush3.bf16.msra.mxu0 %v980_v35  ;;  %885 = vmatprep.subr.bf16.mxu1 %v997_v1 }
  0x35   : > { %925 = vmatprep.subr.bf16.mxu0 %v997_v1 }
  0x37   : > { %886 = vmatpush3.bf16.msra.mxu1 %v981_v36 }
  0x38   : > { %926 = vmatpush3.bf16.msra.mxu0 %v982_v37  ;;  %887 = vmatprep.subr.bf16.mxu1 %v997_v1 }
  0x39   : > { %927 = vmatprep.subr.bf16.mxu0 %v997_v1 }
  0x3b   : > { %888 = vmatpush3.bf16.msra.mxu1 %v983_v38 }
  0x3c   : > { %928 = vmatpush3.bf16.msra.mxu0 %v984_v39  ;;  %889 = vmatprep.subr.bf16.mxu1 %v997_v1 }
  0x3d   : > { %929 = vmatprep.subr.bf16.mxu0 %v997_v1 }
  0x3f   : > { %890 = vmatpush3.bf16.msra.mxu1 %v985_v41 }
  0x40   : > { %930 = vmatpush3.bf16.msra.mxu0 %v986_v42  ;;  %891 = vmatprep.subr.bf16.mxu1 %v997_v1 }
  0x41   : > { %931 = vmatprep.subr.bf16.mxu0 %v997_v1 }
  0x43   : > { %892 = vmatpush3.bf16.msra.mxu1 %v987_v44 }
  0x44   : > { %932 = vmatpush3.bf16.msra.mxu0 %v988_v45 }
  0x46   : > { %894 = vmatmul.mubr.bf16.vlgmr.msra.gmra.mrb[0].mxu1 %v1088_v18 }
  0x47   : > { %934 = vmatmul.mubr.bf16.vlgmr.msra.gmra.mrb[0].mxu0 %v546_v46 }
 0x119   : > { %v399_v47 = vpop.f32.mrb[0].mxu1 }
 0x11a   : > { %v631_v48 = vpop.f32.mrb[0].mxu0  ;;  %v895_v49 = vpop.f32.mrb[1].mxu1 }
 0x11b   : > { %v937_v50 = vadd.f32 %v631_v48, %v399_v47  ;;  %v935_v51 = vpop.f32.mrb[1].mxu0  ;;  %v402_v52 = vpop.f32.mrb[2].mxu1 }
 0x11c   : > { %v634_v54 = vpop.f32.mrb[2].mxu0  ;;  %v896_v55 = vpop.f32.mrb[3].mxu1 }
 0x11d   : > { %v638_v56 = vpack.c.bf16 %v937_v50, %v937_v50  ;;  %v647_v57 = vmul.f32 %v937_v50, %v937_v50  ;;  %651 = vst.msk [vmem:[%s174_s14] sm:$0x1] %vm639_vm1, %v937_v50  ;;  %v936_v58 = vpop.f32.mrb[3].mxu0 }
 0x11f   : > { %v643_v59 = vsel %vm641_vm3, %v638_v56, %v642_v53  ;;  %652 = vst.msk [vmem:[%s174_s14 + $0x1] sm:$0x1] %vm639_vm1, %v647_v57 }
 0x120   : > { %644 = vst [vmem:[%s170_s9] sm:$0x1] %v643_v59 }
 0x121 PF: > { %s14_s12 = sadd.s32 1, %s995_s12  }
 0x122   : > { %p11_p4 = scmp.ge.s32.totalorder %s14_s12, 4  }
 0x124   :  { %13 = sbr.rel (!%p11_p4) target bundleno = 1 (0x1), region = 74 }

// kernel: loom_generator_forward.30
= control target key start
LH: loop header
LB: loop body
LE: loop exit
PB: predicated region body
PF: predicated region fallthrough
CT: control target
= control target key end

     0   :  { %s439_s12 = smov 0   ;;  %s441_s13 = smov 0   ;;  %s496_s0 = inlined_call_operand.vmem [shape: bf16[2,4,1,1,32], index: 0, kind: input, shape index: {}]   ;;  %s497_s1 = inlined_call_operand.vmem [shape: f32[1,32], index: 1, kind: input, shape index: {}]   ;;  %s498_s2 = inlined_call_operand.vmem [shape: f32[1,32], index: 2, kind: input, shape index: {}]   ;;  %s499_s3 = inlined_call_operand.vmem [shape: bf16[2,4,1,1,32], index: 3, kind: output, shape index: {}]  }
   0x1   :  { %s443_s14 = smov 0   ;;  %s445_s15 = smov 0  }
   0x2   :  { %s447_s16 = smov 0  }
   0x3 LB: > { %s28_s17 = sadd.s32 1, %s409_s14  ;;  %s32_s18 = sadd.s32 1, %s413_s15  ;;  %s417_s16 = sphi %s447_s16, %s13_s16   ;;  %s413_s15 = sphi %s445_s15, %s503_s15   ;;  %s409_s14 = sphi %s443_s14, %s502_s14   ;;  %s405_s13 = sphi %s441_s13, %s501_s13   ;;  %s401_s12 = sphi %s439_s12, %s500_s12  }
   0x4   : > { %p30_p0 = scmp.ge.s32.totalorder %s28_s17, 4  ;;  %p334_p1 = scmp.ge.s32.totalorder %s417_s16, 1 }
   0x5   : > { %p169_p2 = scmp.lt.s32.totalorder %s417_s16, 9 }
   0x6   : > { %s505_s17 = smov (%p30_p0, %s28_s17), 0  ;;  %s507_s18 = smov (!%p30_p0, %s32_s18), %s413_s15 }
   0x7   : > { %p170_p3 = pnand %p334_p1, %p169_p2  ;;  %p34_p4 = scmp.ge.s32.totalorder %s507_s18, 2 }
   0x8   : > { %p203_p5 = scmp.lt.s32.totalorder (!%p170_p3), %s405_s13, 1  ;;  %p205_p6 = scmp.lt.s32.totalorder (!%p170_p3), %s401_s12, 3  ;;  %v225_v1 = vld [vmem:[%s497_s1] sm:$0x1] (!%p170_p3)  ;;  %vm231_vm0 = vcmask (!%p170_p3), 253952  }
   0x9   : > { %s509_s18 = smov (%p34_p4, %s507_s18), 0  ;;  %173 = sbr.rel (%p170_p3) target bundleno = 33 (0x21), region = 32 }
   0xa   : > { %v227_v3 = vld [vmem:[%s498_s2] sm:$0x1] (!%p170_p3)  ;;  %vm232_vm1 = vsmask.f32 (!%p170_p3), 256 }
   0xb   : > { %vm233_vm2 = vmand (!%p170_p3), %vm231_vm0, %vm232_vm1 }
  0x10   : > { %s511_s13 = smov (!%p203_p5, %s405_s13), 1  ;;  %s513_s12 = smov (!%p205_p6, %s401_s12), 3 }
  0x11   : > { %s335_s19 = sshll.u32 %s511_s13, 2 }
  0x12   : > { %s211_s20 = sadd.s32 %s335_s19, %s513_s12 }
  0x13   : > { %s212_s23 = scalar_lea.vmem %s496_s0, %s211_s20  ;;  %s222_s30 = scalar_lea.vmem %s499_s3, %s211_s20 }
  0x14   : > { %v223_v0 = vld [vmem:[%s212_s23] sm:$0x1] }
  0x15   : > { %v224_v2 = vunpack.c.l.bf16 %v223_v0  ;;  %v234_v7 = vld [vmem:[%s222_s30] sm:$0x1] }
  0x17   : > { %v226_v4 = vmul.f32 %v225_v1, %v224_v2 }
  0x19   : > { %v228_v5 = vadd.f32 %v227_v3, %v226_v4 }
  0x1b   : > { %v229_v6 = vmax.f32 %v228_v5, 0.0 }
  0x1d   : > { %v230_v8 = vpack.c.bf16 %v229_v6, %v229_v6 }
  0x1f   : > { %v235_v9 = vsel %vm233_vm2, %v230_v8, %v234_v7 }
  0x20   : > { %236 = vst [vmem:[%s222_s30] sm:$0x1] %v235_v9 }
  0x21 PF: > { %s13_s16 = sadd.s32 1, %s417_s16   ;;  %s500_s12 = smov %s409_s14 }
  0x22   : > { %p10_p7 = scmp.ge.s32.totalorder %s13_s16, 10   ;;  %s501_s13 = smov %s413_s15 }
  0x23   : > { %s502_s14 = smov %s505_s17  ;;  %s503_s15 = smov %s509_s18 }
  0x24   :  { %12 = sbr.rel (!%p10_p7) target bundleno = 3 (0x3), region = 62 }

// kernel: loom_generator_forward.32
= control target key start
LH: loop header
LB: loop body
LE: loop exit
PB: predicated region body
PF: predicated region fallthrough
CT: control target
= control target key end

     0   :  { %s484_s12 = smov 0   ;;  %s486_s13 = smov 0   ;;  %s541_s0 = inlined_call_operand.vmem [shape: bf16[2,4,2,2,16], index: 0, kind: input, shape index: {}]   ;;  %s542_s1 = inlined_call_operand.vmem [shape: f32[1,16], index: 1, kind: input, shape index: {}]   ;;  %s543_s2 = inlined_call_operand.vmem [shape: f32[1,16], index: 2, kind: input, shape index: {}]   ;;  %s544_s3 = inlined_call_operand.vmem [shape: bf16[2,4,2,2,16], index: 3, kind: output, shape index: {}]  }
   0x1   :  { %s488_s14 = smov 0   ;;  %s490_s15 = smov 0  }
   0x2   :  { %s492_s16 = smov 0  }
   0x3 LB: > { %s28_s17 = sadd.s32 1, %s454_s14  ;;  %s32_s18 = sadd.s32 1, %s458_s15  ;;  %s462_s16 = sphi %s492_s16, %s13_s16   ;;  %s458_s15 = sphi %s490_s15, %s548_s15   ;;  %s454_s14 = sphi %s488_s14, %s547_s14   ;;  %s450_s13 = sphi %s486_s13, %s546_s13   ;;  %s446_s12 = sphi %s484_s12, %s545_s12  }
   0x4   : > { %p30_p0 = scmp.ge.s32.totalorder %s28_s17, 4  ;;  %p375_p1 = scmp.ge.s32.totalorder %s462_s16, 1 }
   0x5   : > { %p172_p2 = scmp.lt.s32.totalorder %s462_s16, 9 }
   0x6   : > { %s550_s17 = smov (%p30_p0, %s28_s17), 0  ;;  %s552_s18 = smov (!%p30_p0, %s32_s18), %s458_s15 }
   0x7   : > { %p173_p3 = pnand %p375_p1, %p172_p2  ;;  %p34_p4 = scmp.ge.s32.totalorder %s552_s18, 2 }
   0x8   : > { %p211_p5 = scmp.lt.s32.totalorder (!%p173_p3), %s450_s13, 1  ;;  %p213_p6 = scmp.lt.s32.totalorder (!%p173_p3), %s446_s12, 3  ;;  %v380_v2 = vld [vmem:[%s542_s1] ss:$0 sm:$0xff] (!%p173_p3)  ;;  %vm262_vm0 = vcmask (!%p173_p3), 122880  }
   0x9   : > { %s554_s18 = smov (%p34_p4, %s552_s18), 0  ;;  %176 = sbr.rel (%p173_p3) target bundleno = 32 (0x20), region = 32 }
   0xa   : > { %v381_v5 = vld [vmem:[%s543_s2] ss:$0 sm:$0xff] (!%p173_p3) }
  0x10   : > { %s556_s13 = smov (!%p211_p5, %s450_s13), 1  ;;  %s558_s12 = smov (!%p213_p6, %s446_s12), 3 }
  0x11   : > { %s377_s19 = sshll.u32 %s556_s13, 3  ;;  %s376_s20 = sshll.u32 %s558_s12, 1 }
  0x12   : > { %s220_s21 = sadd.s32 %s377_s19, %s376_s20 }
  0x13   : > { %s221_s24 = scalar_lea.vmem %s541_s0, %s220_s21  ;;  %s234_s4 = scalar_lea.vmem %s544_s3, %s220_s21 }
  0x14   : > { %v236_v0 = vld [vmem:[%s221_s24] sm:$0x1]  ;;  %v237_v1 = vld [vmem:[%s221_s24 + $0x1] sm:$0x1] }
  0x15   : > { %v238_v3 = vunpack.c.l.bf16 %v236_v0  ;;  %v239_v4 = vunpack.c.l.bf16 %v237_v1 }
  0x17   : > { %v247_v6 = vmul.f32 %v380_v2, %v238_v3  ;;  %v248_v7 = vmul.f32 %v380_v2, %v239_v4 }
  0x19   : > { %v256_v8 = vadd.f32 %v381_v5, %v247_v6  ;;  %v257_v9 = vadd.f32 %v381_v5, %v248_v7 }
  0x1b   : > { %v258_v10 = vmax.f32 %v256_v8, 0.0  ;;  %v259_v11 = vmax.f32 %v257_v9, 0.0 }
  0x1d   : > { %v260_v12 = vpack.c.bf16 %v258_v10, %v258_v10  ;;  %v261_v13 = vpack.c.bf16 %v259_v11, %v259_v11 }
  0x1f   : > { %263 = vst.msk [vmem:[%s234_s4] sm:$0x1] %vm262_vm0, %v260_v12  ;;  %264 = vst.msk [vmem:[%s234_s4 + $0x1] sm:$0x1] %vm262_vm0, %v261_v13 }
  0x20 PF: > { %s13_s16 = sadd.s32 1, %s462_s16   ;;  %s545_s12 = smov %s454_s14 }
  0x21   : > { %p10_p7 = scmp.ge.s32.totalorder %s13_s16, 10   ;;  %s546_s13 = smov %s458_s15 }
  0x22   : > { %s547_s14 = smov %s550_s17  ;;  %s548_s15 = smov %s554_s18 }
  0x23   :  { %12 = sbr.rel (!%p10_p7) target bundleno = 3 (0x3), region = 62 }

// kernel: loom_generator_forward.29
= control target key start
LH: loop header
LB: loop body
LE: loop exit
PB: predicated region body
PF: predicated region fallthrough
CT: control target
= control target key end

     0   :  { %s2337_s12 = smov 0   ;;  %s2726_s0 = inlined_call_operand.vmem [shape: bf16[2,3,3,64], index: 0, kind: input, shape index: {}]   ;;  %s2727_s1 = inlined_call_operand.vmem [shape: bf16[4,4,64,32], index: 1, kind: input, shape index: {}]   ;;  %s2728_s2 = inlined_call_operand.vmem [shape: bf16[2,4,1,1,32], index: 2, kind: output, shape index: {0}]   ;;  %s2729_s3 = inlined_call_operand.vmem [shape: f32[2,2,32], index: 3, kind: output, shape index: {1}]  }
   0x1 LB: > { %s1674_s13 = sadd.s32 4294967295, %s2312_s12   ;;  %p1678_p0 = scmp.ge.s32.totalorder %s2312_s12, 1  ;;  %s2312_s12 = sphi %s2337_s12, %s14_s12  }
   0x2   : > { %p140_p1 = scmp.lt.s32.totalorder %s2312_s12, 3 }
   0x4   : > { %p141_p2 = pnand %p1678_p0, %p140_p1 }
   0x5   : > { %v2242_v0 = vld [vmem:[%s2727_s1 + $0x20] sm:$0xff] (!%p141_p2)   ;;  %v2314_v1 = vmov (!%p141_p2), 0.0   ;;  %v2244_v3 = vld [vmem:[%s2727_s1 + $0x28] sm:$0xff] (!%p141_p2)   ;;  %vm2315_vm0 = vmmov (!%p141_p2), 0   ;;  %p167_p3 = scmp.lt.s32.totalorder (!%p141_p2), %s1674_s13, 1  ;;  %v2246_v5 = vld [vmem:[%s2727_s1 + $0x30] sm:$0xff] (!%p141_p2)   ;;  %v272_v13 = vlaneseq (!%p141_p2) }
   0x6   : > { %144 = sbr.rel (%p141_p2) target bundleno = 353 (0x161), region = 28  ;;  %1990 = vmatprep.subr.bf16.mxu0 (!%p141_p2), %v2314_v1  ;;  %2038 = vmatprep.subr.bf16.mxu1 (!%p141_p2), %v2314_v1  ;;  %v2243_v2 = vld [vmem:[%s2727_s1 + $0xa0] sm:$0xff] (!%p141_p2)   ;;  %v2245_v4 = vld [vmem:[%s2727_s1 + $0xa8] sm:$0xff] (!%p141_p2)   ;;  %v2247_v6 = vld [vmem:[%s2727_s1 + $0xb0] sm:$0xff] (!%p141_p2)   ;;  %vm224_vm1 = vcmask (!%p141_p2), 523264   ;;  %vm514_vm2 = vcmask (!%p141_p2), 253952  }
   0x7   : > { %1991 = vmatpush3.bf16.msra.mxu0 (!%p141_p2), %v2242_v0  ;;  %1998 = vmatprep.mubr.msk.bf16.mxu0 (!%p141_p2), %vm2315_vm0, %v2314_v1  ;;  %v2248_v7 = vld [vmem:[%s2727_s1 + $0x38] sm:$0xff] (!%p141_p2)   ;;  %v2316_v11 = vmov (!%p141_p2), 1983009808   ;;  %v2250_v14 = vld [vmem:[%s2727_s1] sm:$0xff] (!%p141_p2)   ;;  %v273_v18 = vshrl.u32 (!%p141_p2), %v272_v13, 7  ;;  %v2252_v19 = vld [vmem:[%s2727_s1 + $0x8] sm:$0xff] (!%p141_p2)  }
   0x8   : > { %2039 = vmatpush3.bf16.msra.mxu1 (!%p141_p2), %v2243_v2  ;;  %1992 = vmatprep.subr.bf16.mxu0 (!%p141_p2), %v2314_v1  ;;  %v2249_v9 = vld [vmem:[%s2727_s1 + $0xb8] sm:$0xff] (!%p141_p2)   ;;  %v270_v12 = vunpack.c.l.s4 (!%p141_p2), %v2316_v11  ;;  %v2251_v16 = vld [vmem:[%s2727_s1 + $0x80] sm:$0xff] (!%p141_p2)   ;;  %v2253_v20 = vld [vmem:[%s2727_s1 + $0x88] sm:$0xff] (!%p141_p2)   ;;  %vm515_vm3 = vsmask.f32 (!%p141_p2), 256 }
   0x9   : > { %2040 = vmatprep.subr.bf16.mxu1 (!%p141_p2), %v2314_v1  ;;  %2046 = vmatprep.mubr.msk.bf16.mxu1 (!%p141_p2), %vm2315_vm0, %v2314_v1  ;;  %v2254_v22 = vld [vmem:[%s2727_s1 + $0x10] sm:$0xff] (!%p141_p2)   ;;  %v2256_v25 = vld [vmem:[%s2727_s1 + $0x18] sm:$0xff] (!%p141_p2)   ;;  %v2258_v29 = vld [vmem:[%s2727_s1 + $0x40] sm:$0xff] (!%p141_p2)  }
   0xa   : > { %v271_v17 = vunpack.c.0.s8 (!%p141_p2), %v270_v12  ;;  %v2255_v23 = vld [vmem:[%s2727_s1 + $0x90] sm:$0xff] (!%p141_p2)   ;;  %v2257_v26 = vld [vmem:[%s2727_s1 + $0x98] sm:$0xff] (!%p141_p2)   ;;  %v2259_v31 = vld [vmem:[%s2727_s1 + $0xc0] sm:$0xff] (!%p141_p2)  }
   0xb   : > { %1993 = vmatpush3.bf16.msra.mxu0 (!%p141_p2), %v2244_v3  ;;  %v2260_v32 = vld [vmem:[%s2727_s1 + $0x48] sm:$0xff] (!%p141_p2)   ;;  %v2262_v34 = vld [vmem:[%s2727_s1 + $0x50] sm:$0xff] (!%p141_p2)   ;;  %v2264_v38 = vld [vmem:[%s2727_s1 + $0x58] sm:$0xff] (!%p141_p2)  }
   0xc   : > { %2041 = vmatpush3.bf16.msra.mxu1 (!%p141_p2), %v2245_v4  ;;  %1994 = vmatprep.subr.bf16.mxu0 (!%p141_p2), %v2314_v1  ;;  %v2414_v21 = vsub.s32 (!%p141_p2), %v271_v17, %v273_v18  ;;  %v2261_v33 = vld [vmem:[%s2727_s1 + $0xc8] sm:$0xff] (!%p141_p2)   ;;  %v2263_v35 = vld [vmem:[%s2727_s1 + $0xd0] sm:$0xff] (!%p141_p2)   ;;  %v2265_v39 = vld [vmem:[%s2727_s1 + $0xd8] sm:$0xff] (!%p141_p2)  }
   0xd   : > { %s2733_s13 = smov (!%p167_p3, %s1674_s13), 1  ;;  %2042 = vmatprep.subr.bf16.mxu1 %v2314_v1  ;;  %v2266_v43 = vld [vmem:[%s2727_s1 + $0x60] sm:$0xff]   ;;  %v2268_v46 = vld [vmem:[%s2727_s1 + $0x68] sm:$0xff]   ;;  %v2270_v48 = vld [vmem:[%s2727_s1 + $0x70] sm:$0xff]  }
   0xe   : > { %s2230_s24 = smul.u32 6, %s2733_s13  ;;  %v2267_v45 = vld [vmem:[%s2727_s1 + $0xe0] sm:$0xff]   ;;  %v2269_v47 = vld [vmem:[%s2727_s1 + $0xe8] sm:$0xff]   ;;  %v2271_v49 = vld [vmem:[%s2727_s1 + $0xf0] sm:$0xff]   ;;  %s1680_s25 = sshll.u32 %s2733_s13, 2 }
   0xf   : > { %1995 = vmatpush3.bf16.msra.mxu0 %v2246_v5  ;;  %v2272_v50 = vld [vmem:[%s2727_s1 + $0x78] sm:$0xff]   ;;  %v2274_v53 = vld [vmem:[%s2727_s1 + $0x120] sm:$0xff]   ;;  %v2276_v55 = vld [vmem:[%s2727_s1 + $0x128] sm:$0xff]   ;;  %s2694_s28 = scalar_lea.vmem %s2728_s2, %s1680_s25 }
  0x10   : > { %s2379_s29 = scalar_lea.vmem %s2726_s0, %s2230_s24  ;;  %2043 = vmatpush3.bf16.msra.mxu1 %v2247_v6  ;;  %1996 = vmatprep.subr.bf16.mxu0 %v2314_v1  ;;  %v2273_v51 = vld [vmem:[%s2727_s1 + $0xf8] sm:$0xff]   ;;  %v2275_v54 = vld [vmem:[%s2727_s1 + $0x1a0] sm:$0xff]   ;;  %v2277_v56 = vld [vmem:[%s2727_s1 + $0x1a8] sm:$0xff]  }
  0x11   : > { %v1746_v8 = vld.sshfl [vmem:[%s2379_s29 + $0x2] sm:$0x1 pattern:$0x76325410]  ;;  %2044 = vmatprep.subr.bf16.mxu1 %v2314_v1  ;;  %v2481_v40 = vld [vmem:[%s2379_s29 + $0x4] sm:$0x1]  ;;  %vm2697_vm4 = vmand %vm514_vm2, %vm515_vm3 }
  0x12   : > { %v1682_v10 = vld [vmem:[%s2379_s29 + $0x2] sm:$0x1]  ;;  %v2394_v15 = vshrl.u32 %v1746_v8, 16  ;;  %v979_v41 = vrot.slane %v2481_v40, %v2414_v21  ;;  %v435_v52 = vld [vmem:[%s2379_s29] sm:$0x1]  ;;  %v2278_v57 = vld [vmem:[%s2727_s1 + $0x130] sm:$0xff]  }
  0x13   : > { %1997 = vmatpush3.bf16.msra.mxu0 %v2248_v7  ;;  %v275_v24 = vrot.slane %v1682_v10, %v2414_v21  ;;  %v2435_v27 = vld.sshfl [vmem:[%s2379_s29 + $0x2] sm:$0x2 pattern:$0x76325410]  ;;  %v2279_v58 = vld [vmem:[%s2727_s1 + $0x1b0] sm:$0xff]   ;;  %v2280_v59 = vld [vmem:[%s2727_s1 + $0x138] sm:$0xff]  }
  0x14   : > { %2045 = vmatpush3.bf16.msra.mxu1 %v2249_v9  ;;  %2002 = vmatprep.subr.bf16.mxu0 %v2314_v1  ;;  %v631_v30 = vrot.slane %v2435_v27, 1  ;;  %v1709_v36 = vld.sshfl [vmem:[%s2379_s29] sm:$0x1 pattern:$0x76325410]  ;;  %v2281_v60 = vld [vmem:[%s2727_s1 + $0x1b8] sm:$0xff]  }
  0x15   : > { %2050 = vmatprep.subr.bf16.mxu1 %v2314_v1  ;;  %v277_v28 = vshrl.u32 %v275_v24, 16  ;;  %v1766_v37 = vld.sshfl [vmem:[%s2379_s29] sm:$0x2 pattern:$0x76325410]  ;;  %v365_v42 = vshrl.u32 %v1709_v36, 16 }
  0x16   : > { %1999 = vmatmul.mubr.msk.bf16.vlgmr.msra.gmra.mrb[0].mxu0 %vm224_vm1, %v1682_v10  ;;  %v717_v44 = vrot.slane %v1766_v37, 1  ;;  %v1864_v61 = vld.sshfl [vmem:[%s2379_s29 + $0x4] sm:$0x1 pattern:$0x76325410]  ;;  %v2284_v2 = vld [vmem:[%s2727_s1 + $0x108] sm:$0xff]  }
  0x17   : > { %2003 = vmatpush3.bf16.msra.mxu0 %v2250_v14  ;;  %2047 = vmatmul.mubr.msk.bf16.vlgmr.msra.gmra.mrb[0].mxu1 %vm224_vm1, %v2394_v15  ;;  %v2282_v62 = vld [vmem:[%s2727_s1 + $0x100] sm:$0xff]   ;;  %v1256_v63 = vshrl.u32 %v1864_v61, 16  ;;  %v2285_v3 = vld [vmem:[%s2727_s1 + $0x188] sm:$0xff]   ;;  %v2286_v4 = vld [vmem:[%s2727_s1 + $0x110] sm:$0xff]   ;;  %v981_v9 = vshrl.u32 %v979_v41, 16 }
  0x18   : > { %2051 = vmatpush3.bf16.msra.mxu1 %v2251_v16  ;;  %2004 = vmatprep.subr.bf16.mxu0 %v2314_v1  ;;  %v2283_v0 = vld [vmem:[%s2727_s1 + $0x180] sm:$0xff]   ;;  %v2287_v5 = vld [vmem:[%s2727_s1 + $0x190] sm:$0xff]   ;;  %v2288_v6 = vld [vmem:[%s2727_s1 + $0x118] sm:$0xff]  }
  0x19   : > { %2052 = vmatprep.subr.bf16.mxu1 %v2314_v1  ;;  %2010 = vmatprep.mubr.msk.bf16.mxu0 %vm2315_vm0, %v2314_v1  ;;  %v2289_v7 = vld [vmem:[%s2727_s1 + $0x198] sm:$0xff]   ;;  %v1870_v8 = vld.sshfl [vmem:[%s2379_s29 + $0x4] sm:$0x2 pattern:$0x76325410]  ;;  %v2292_v13 = vld [vmem:[%s2727_s1 + $0x148] sm:$0xff]  }
  0x1a   : > { %2058 = vmatprep.mubr.msk.bf16.mxu1 %vm2315_vm0, %v2314_v1  ;;  %v2290_v10 = vld [vmem:[%s2727_s1 + $0x140] sm:$0xff]   ;;  %v1333_v11 = vrot.slane %v1870_v8, 1  ;;  %v2293_v14 = vld [vmem:[%s2727_s1 + $0x1c8] sm:$0xff]   ;;  %v2294_v16 = vld [vmem:[%s2727_s1 + $0x150] sm:$0xff]  }
  0x1b   : > { %2005 = vmatpush3.bf16.msra.mxu0 %v2252_v19  ;;  %v2291_v12 = vld [vmem:[%s2727_s1 + $0x1c0] sm:$0xff]   ;;  %v2295_v17 = vld [vmem:[%s2727_s1 + $0x1d0] sm:$0xff]   ;;  %v2296_v18 = vld [vmem:[%s2727_s1 + $0x158] sm:$0xff]  }
  0x1c   : > { %2053 = vmatpush3.bf16.msra.mxu1 %v2253_v20  ;;  %2006 = vmatprep.subr.bf16.mxu0 %v2314_v1  ;;  %v2297_v19 = vld [vmem:[%s2727_s1 + $0x1d8] sm:$0xff]   ;;  %v2298_v20 = vld [vmem:[%s2727_s1 + $0x160] sm:$0xff]   ;;  %v2302_v24 = vld [vmem:[%s2727_s1 + $0x170] sm:$0xff]  }
  0x1d   : > { %2054 = vmatprep.subr.bf16.mxu1 %v2314_v1  ;;  %v2299_v21 = vld [vmem:[%s2727_s1 + $0x1e0] sm:$0xff]   ;;  %v2305_v27 = vld [vmem:[%s2727_s1 + $0x1f8] sm:$0xff]  }
  0x1f   : > { %2007 = vmatpush3.bf16.msra.mxu0 %v2254_v22  ;;  %v2300_v22 = vld [vmem:[%s2727_s1 + $0x168] sm:$0xff]  }
  0x20   : > { %2055 = vmatpush3.bf16.msra.mxu1 %v2255_v23  ;;  %2008 = vmatprep.subr.bf16.mxu0 %v2314_v1  ;;  %v2301_v23 = vld [vmem:[%s2727_s1 + $0x1e8] sm:$0xff]  }
  0x21   : > { %2056 = vmatprep.subr.bf16.mxu1 %v2314_v1 }
  0x23   : > { %2009 = vmatpush3.bf16.msra.mxu0 %v2256_v25  ;;  %v2303_v25 = vld [vmem:[%s2727_s1 + $0x1f0] sm:$0xff]  }
  0x24   : > { %2057 = vmatpush3.bf16.msra.mxu1 %v2257_v26  ;;  %2014 = vmatprep.subr.bf16.mxu0 %v2314_v1  ;;  %v2304_v26 = vld [vmem:[%s2727_s1 + $0x178] sm:$0xff]  }
  0x25   : > { %2062 = vmatprep.subr.bf16.mxu1 %v2314_v1 }
  0x26   : > { %2011 = vmatmul.mubr.msk.bf16.vlgmr.msra.gmra.mrb[0].mxu0 %vm224_vm1, %v277_v28  ;;  %v1830_v28 = vld [vmem:[%s2379_s29 + $0x2] sm:$0x1]  ;;  %s1681_s29 = sshll.u32 %s2733_s13, 1 }
  0x27   : > { %2015 = vmatpush3.bf16.msra.mxu0 %v2258_v29  ;;  %2059 = vmatmul.mubr.msk.bf16.vlgmr.msra.gmra.mrb[0].mxu1 %vm224_vm1, %v631_v30  ;;  %s179_s5 = scalar_lea.vmem %s2729_s3, %s1681_s29 }
  0x28   : > { %2063 = vmatpush3.bf16.msra.mxu1 %v2259_v31  ;;  %2016 = vmatprep.subr.bf16.mxu0 %v2314_v1 }
  0x29   : > { %2064 = vmatprep.subr.bf16.mxu1 %v2314_v1  ;;  %2022 = vmatprep.mubr.msk.bf16.mxu0 %vm2315_vm0, %v2314_v1 }
  0x2a   : > { %2070 = vmatprep.mubr.msk.bf16.mxu1 %vm2315_vm0, %v2314_v1 }
  0x2b   : > { %2017 = vmatpush3.bf16.msra.mxu0 %v2260_v32 }
  0x2c   : > { %2065 = vmatpush3.bf16.msra.mxu1 %v2261_v33  ;;  %2018 = vmatprep.subr.bf16.mxu0 %v2314_v1  ;;  %v1786_v33 = vld [vmem:[%s2694_s28 + $0x1] sm:$0x1] }
  0x2d   : > { %2066 = vmatprep.subr.bf16.mxu1 %v2314_v1 }
  0x2f   : > { %2019 = vmatpush3.bf16.msra.mxu0 %v2262_v34 }
  0x30   : > { %2067 = vmatpush3.bf16.msra.mxu1 %v2263_v35  ;;  %2020 = vmatprep.subr.bf16.mxu0 %v2314_v1 }
  0x31   : > { %2068 = vmatprep.subr.bf16.mxu1 %v2314_v1 }
  0x33   : > { %2021 = vmatpush3.bf16.msra.mxu0 %v2264_v38 }
  0x34   : > { %2069 = vmatpush3.bf16.msra.mxu1 %v2265_v39  ;;  %2026 = vmatprep.subr.bf16.mxu0 %v2314_v1 }
  0x35   : > { %2074 = vmatprep.subr.bf16.mxu1 %v2314_v1 }
  0x36   : > { %2023 = vmatmul.mubr.msk.bf16.vlgmr.msra.gmra.mrb[0].mxu0 %vm224_vm1, %v365_v42 }
  0x37   : > { %2027 = vmatpush3.bf16.msra.mxu0 %v2266_v43  ;;  %2071 = vmatmul.mubr.msk.bf16.vlgmr.msra.gmra.mrb[0].mxu1 %vm224_vm1, %v717_v44 }
  0x38   : > { %2075 = vmatpush3.bf16.msra.mxu1 %v2267_v45  ;;  %2028 = vmatprep.subr.bf16.mxu0 %v2314_v1 }
  0x39   : > { %2076 = vmatprep.subr.bf16.mxu1 %v2314_v1  ;;  %2034 = vmatprep.mubr.msk.bf16.mxu0 %vm2315_vm0, %v2314_v1 }
  0x3a   : > { %2082 = vmatprep.mubr.msk.bf16.mxu1 %vm2315_vm0, %v2314_v1 }
  0x3b   : > { %2029 = vmatpush3.bf16.msra.mxu0 %v2268_v46 }
  0x3c   : > { %2077 = vmatpush3.bf16.msra.mxu1 %v2269_v47  ;;  %2030 = vmatprep.subr.bf16.mxu0 %v2314_v1  ;;  %v1844_v47 = vld [vmem:[%s2694_s28 + $0x2] sm:$0x1] }
  0x3d   : > { %2078 = vmatprep.subr.bf16.mxu1 %v2314_v1 }
  0x3f   : > { %2031 = vmatpush3.bf16.msra.mxu0 %v2270_v48 }
  0x40   : > { %2079 = vmatpush3.bf16.msra.mxu1 %v2271_v49  ;;  %2032 = vmatprep.subr.bf16.mxu0 %v2314_v1 }
  0x41   : > { %2080 = vmatprep.subr.bf16.mxu1 %v2314_v1 }
  0x43   : > { %2033 = vmatpush3.bf16.msra.mxu0 %v2272_v50 }
  0x44   : > { %2081 = vmatpush3.bf16.msra.mxu1 %v2273_v51  ;;  %2086 = vmatprep.subr.bf16.mxu0 %v2314_v1 }
  0x45   : > { %2134 = vmatprep.subr.bf16.mxu1 %v2314_v1 }
  0x46   : > { %2035 = vmatmul.mubr.msk.bf16.vlgmr.msra.gmra.mrb[0].mxu0 %vm224_vm1, %v435_v52  ;;  %v1906_v52 = vld [vmem:[%s2694_s28 + $0x3] sm:$0x1] }
  0x47   : > { %2083 = vmatmul.mubr.msk.bf16.vlgmr.msra.gmra.mrb[0].mxu1 %vm224_vm1, %v365_v42  ;;  %2087 = vmatpush3.bf16.msra.mxu0 %v2274_v53 }
  0x48   : > { %2135 = vmatpush3.bf16.msra.mxu1 %v2275_v54  ;;  %2088 = vmatprep.subr.bf16.mxu0 %v2314_v1 }
  0x49   : > { %2136 = vmatprep.subr.bf16.mxu1 %v2314_v1  ;;  %2094 = vmatprep.mubr.msk.bf16.mxu0 %vm2315_vm0, %v2314_v1 }
  0x4a   : > { %2142 = vmatprep.mubr.msk.bf16.mxu1 %vm2315_vm0, %v2314_v1 }
  0x4b   : > { %2089 = vmatpush3.bf16.msra.mxu0 %v2276_v55 }
  0x4c   : > { %2137 = vmatpush3.bf16.msra.mxu1 %v2277_v56  ;;  %2090 = vmatprep.subr.bf16.mxu0 %v2314_v1 }
  0x4d   : > { %2138 = vmatprep.subr.bf16.mxu1 %v2314_v1 }
  0x4f   : > { %2091 = vmatpush3.bf16.msra.mxu0 %v2278_v57 }
  0x50   : > { %2139 = vmatpush3.bf16.msra.mxu1 %v2279_v58  ;;  %2092 = vmatprep.subr.bf16.mxu0 %v2314_v1 }
  0x51   : > { %2140 = vmatprep.subr.bf16.mxu1 %v2314_v1 }
  0x53   : > { %2093 = vmatpush3.bf16.msra.mxu0 %v2280_v59 }
  0x54   : > { %2141 = vmatpush3.bf16.msra.mxu1 %v2281_v60  ;;  %2098 = vmatprep.subr.bf16.mxu0 %v2314_v1 }
  0x55   : > { %2146 = vmatprep.subr.bf16.mxu1 %v2314_v1 }
  0x56   : > { %2095 = vmatmul.mubr.msk.bf16.vlgmr.msra.gmra.mrb[4].mxu0 %vm224_vm1, %v2481_v40 }
  0x57   : > { %2099 = vmatpush3.bf16.msra.mxu0 %v2282_v62  ;;  %2143 = vmatmul.mubr.msk.bf16.vlgmr.msra.gmra.mrb[4].mxu1 %vm224_vm1, %v1256_v63 }
  0x58   : > { %2147 = vmatpush3.bf16.msra.mxu1 %v2283_v0  ;;  %2100 = vmatprep.subr.bf16.mxu0 %v2314_v1 }
  0x59   : > { %2148 = vmatprep.subr.bf16.mxu1 %v2314_v1  ;;  %2106 = vmatprep.mubr.msk.bf16.mxu0 %vm2315_vm0, %v2314_v1 }
  0x5a   : > { %2154 = vmatprep.mubr.msk.bf16.mxu1 %vm2315_vm0, %v2314_v1 }
  0x5b   : > { %2101 = vmatpush3.bf16.msra.mxu0 %v2284_v2 }
  0x5c   : > { %2149 = vmatpush3.bf16.msra.mxu1 %v2285_v3  ;;  %2102 = vmatprep.subr.bf16.mxu0 %v2314_v1 }
  0x5d   : > { %2150 = vmatprep.subr.bf16.mxu1 %v2314_v1 }
  0x5f   : > { %2103 = vmatpush3.bf16.msra.mxu0 %v2286_v4 }
  0x60   : > { %2151 = vmatpush3.bf16.msra.mxu1 %v2287_v5  ;;  %2104 = vmatprep.subr.bf16.mxu0 %v2314_v1 }
  0x61   : > { %2152 = vmatprep.subr.bf16.mxu1 %v2314_v1 }
  0x63   : > { %2105 = vmatpush3.bf16.msra.mxu0 %v2288_v6 }
  0x64   : > { %2153 = vmatpush3.bf16.msra.mxu1 %v2289_v7  ;;  %2110 = vmatprep.subr.bf16.mxu0 %v2314_v1 }
  0x65   : > { %2158 = vmatprep.subr.bf16.mxu1 %v2314_v1 }
  0x66   : > { %2107 = vmatmul.mubr.msk.bf16.vlgmr.msra.gmra.mrb[4].mxu0 %vm224_vm1, %v981_v9 }
  0x67   : > { %2111 = vmatpush3.bf16.msra.mxu0 %v2290_v10  ;;  %2155 = vmatmul.mubr.msk.bf16.vlgmr.msra.gmra.mrb[4].mxu1 %vm224_vm1, %v1333_v11 }
  0x68   : > { %2159 = vmatpush3.bf16.msra.mxu1 %v2291_v12  ;;  %2112 = vmatprep.subr.bf16.mxu0 %v2314_v1 }
  0x69   : > { %2160 = vmatprep.subr.bf16.mxu1 %v2314_v1  ;;  %2118 = vmatprep.mubr.msk.bf16.mxu0 %vm2315_vm0, %v2314_v1 }
  0x6a   : > { %2166 = vmatprep.mubr.msk.bf16.mxu1 %vm2315_vm0, %v2314_v1 }
  0x6b   : > { %2113 = vmatpush3.bf16.msra.mxu0 %v2292_v13 }
  0x6c   : > { %2161 = vmatpush3.bf16.msra.mxu1 %v2293_v14  ;;  %2114 = vmatprep.subr.bf16.mxu0 %v2314_v1 }
  0x6d   : > { %2162 = vmatprep.subr.bf16.mxu1 %v2314_v1 }
  0x6f   : > { %2115 = vmatpush3.bf16.msra.mxu0 %v2294_v16 }
  0x70   : > { %2163 = vmatpush3.bf16.msra.mxu1 %v2295_v17  ;;  %2116 = vmatprep.subr.bf16.mxu0 %v2314_v1 }
  0x71   : > { %2164 = vmatprep.subr.bf16.mxu1 %v2314_v1 }
  0x73   : > { %2117 = vmatpush3.bf16.msra.mxu0 %v2296_v18 }
  0x74   : > { %2165 = vmatpush3.bf16.msra.mxu1 %v2297_v19  ;;  %2122 = vmatprep.subr.bf16.mxu0 %v2314_v1 }
  0x75   : > { %2170 = vmatprep.subr.bf16.mxu1 %v2314_v1 }
  0x76   : > { %2119 = vmatmul.mubr.msk.bf16.vlgmr.msra.gmra.mrb[4].mxu0 %vm224_vm1, %v2394_v15 }
  0x77   : > { %2123 = vmatpush3.bf16.msra.mxu0 %v2298_v20  ;;  %2167 = vmatmul.mubr.msk.bf16.vlgmr.msra.gmra.mrb[4].mxu1 %vm224_vm1, %v631_v30  ;;  %v517_v30 = vld [vmem:[%s2694_s28] sm:$0x1] }
  0x78   : > { %2171 = vmatpush3.bf16.msra.mxu1 %v2299_v21  ;;  %2124 = vmatprep.subr.bf16.mxu0 %v2314_v1 }
  0x79   : > { %2172 = vmatprep.subr.bf16.mxu1 %v2314_v1  ;;  %2130 = vmatprep.mubr.msk.bf16.mxu0 %vm2315_vm0, %v2314_v1 }
  0x7a   : > { %2178 = vmatprep.mubr.msk.bf16.mxu1 %vm2315_vm0, %v2314_v1 }
  0x7b   : > { %2125 = vmatpush3.bf16.msra.mxu0 %v2300_v22 }
  0x7c   : > { %2173 = vmatpush3.bf16.msra.mxu1 %v2301_v23  ;;  %2126 = vmatprep.subr.bf16.mxu0 %v2314_v1 }
  0x7d   : > { %2174 = vmatprep.subr.bf16.mxu1 %v2314_v1 }
  0x7f   : > { %2127 = vmatpush3.bf16.msra.mxu0 %v2302_v24 }
  0x80   : > { %2175 = vmatpush3.bf16.msra.mxu1 %v2303_v25  ;;  %2128 = vmatprep.subr.bf16.mxu0 %v2314_v1 }
  0x81   : > { %2176 = vmatprep.subr.bf16.mxu1 %v2314_v1 }
  0x83   : > { %2129 = vmatpush3.bf16.msra.mxu0 %v2304_v26 }
  0x84   : > { %2177 = vmatpush3.bf16.msra.mxu1 %v2305_v27 }
  0x86   : > { %2131 = vmatmul.mubr.msk.bf16.vlgmr.msra.gmra.mrb[4].mxu0 %vm224_vm1, %v1830_v28 }
  0x87   : > { %2179 = vmatmul.mubr.msk.bf16.vlgmr.msra.gmra.mrb[4].mxu1 %vm224_vm1, %v2394_v15 }
 0x119   : > { %v506_v29 = vpop.f32.mrb[0].mxu0 }
 0x11a   : > { %v513_v31 = vpack.c.bf16 %v506_v29, %v506_v29  ;;  %v522_v15 = vmul.f32 %v506_v29, %v506_v29  ;;  %v868_v32 = vpop.f32.mrb[0].mxu1  ;;  %v2036_v34 = vpop.f32.mrb[1].mxu0 }
 0x11b   : > { %v875_v35 = vpack.c.bf16 %v868_v32, %v868_v32  ;;  %v881_v36 = vadd.f32 %v868_v32, %v506_v29  ;;  %v882_v37 = vmul.f32 %v868_v32, %v868_v32  ;;  %v2084_v38 = vpop.f32.mrb[1].mxu1  ;;  %v509_v39 = vpop.f32.mrb[2].mxu0 }
 0x11c   : > { %v518_v40 = vsel %vm2697_vm4, %v513_v31, %v517_v30  ;;  %v871_v41 = vpop.f32.mrb[2].mxu1  ;;  %v2037_v42 = vpop.f32.mrb[3].mxu0 }
 0x11d   : > { %519 = vst [vmem:[%s2694_s28] sm:$0x1] %v518_v40  ;;  %v878_v43 = vsel %vm2697_vm4, %v875_v35, %v1786_v33  ;;  %v884_v44 = vadd.f32 %v882_v37, %v522_v15  ;;  %v2085_v45 = vpop.f32.mrb[3].mxu1 }
 0x11e   : > { %1787 = vst [vmem:[%s2694_s28 + $0x1] sm:$0x1] %v878_v43 }
 0x159   : > { %v1210_v46 = vpop.f32.mrb[4].mxu0 }
 0x15a   : > { %v1217_v48 = vpack.c.bf16 %v1210_v46, %v1210_v46  ;;  %v1223_v49 = vadd.f32 %v1210_v46, %v881_v36  ;;  %v1224_v50 = vmul.f32 %v1210_v46, %v1210_v46  ;;  %v1570_v51 = vpop.f32.mrb[4].mxu1  ;;  %v2132_v53 = vpop.f32.mrb[5].mxu0 }
 0x15b   : > { %v1577_v54 = vpack.c.bf16 %v1570_v51, %v1570_v51  ;;  %v2180_v55 = vpop.f32.mrb[5].mxu1  ;;  %v1213_v56 = vpop.f32.mrb[6].mxu0  ;;  %v1584_v60 = vmul.f32 %v1570_v51, %v1570_v51 }
 0x15c   : > { %v1220_v57 = vsel %vm2697_vm4, %v1217_v48, %v1844_v47  ;;  %v1226_v58 = vadd.f32 %v1224_v50, %v884_v44  ;;  %v1583_v59 = vadd.f32 %v1570_v51, %v1223_v49  ;;  %v1573_v61 = vpop.f32.mrb[6].mxu1  ;;  %v2133_v62 = vpop.f32.mrb[7].mxu0 }
 0x15d   : > { %1845 = vst [vmem:[%s2694_s28 + $0x2] sm:$0x1] %v1220_v57  ;;  %v1580_v63 = vsel %vm2697_vm4, %v1577_v54, %v1906_v52  ;;  %v2181_v0 = vpop.f32.mrb[7].mxu1 }
 0x15e   : > { %1907 = vst [vmem:[%s2694_s28 + $0x3] sm:$0x1] %v1580_v63  ;;  %v1586_v2 = vadd.f32 %v1584_v60, %v1226_v58  ;;  %1588 = vst.msk [vmem:[%s179_s5] sm:$0x1] %vm514_vm2, %v1583_v59 }
 0x160   : > { %1589 = vst.msk [vmem:[%s179_s5 + $0x1] sm:$0x1] %vm514_vm2, %v1586_v2 }
 0x161 PF: > { %s14_s12 = sadd.s32 1, %s2312_s12  }
 0x162   : > { %p11_p4 = scmp.ge.s32.totalorder %s14_s12, 4  }
 0x164   :  { %13 = sbr.rel (!%p11_p4) target bundleno = 1 (0x1), region = 90 }

// kernel: loom_generator_forward.31
= control target key start
LH: loop header
LB: loop body
LE: loop exit
PB: predicated region body
PF: predicated region fallthrough
CT: control target
= control target key end

     0   :  { %s2272_s12 = smov 0   ;;  %s2578_s0 = inlined_call_operand.vmem [shape: bf16[2,4,4,32], index: 0, kind: input, shape index: {}]   ;;  %s2579_s1 = inlined_call_operand.vmem [shape: bf16[4,4,32,16], index: 1, kind: input, shape index: {}]   ;;  %s2580_s2 = inlined_call_operand.vmem [shape: bf16[2,4,2,2,16], index: 2, kind: output, shape index: {0}]   ;;  %s2581_s3 = inlined_call_operand.vmem [shape: f32[2,2,16], index: 3, kind: output, shape index: {1}]  }
   0x1 LB: > { %s1629_s13 = sadd.s32 4294967295, %s2194_s12   ;;  %p1633_p0 = scmp.ge.s32.totalorder %s2194_s12, 1  ;;  %s2194_s12 = sphi %s2272_s12, %s14_s12  }
   0x2   : > { %p140_p1 = scmp.lt.s32.totalorder %s2194_s12, 3 }
   0x4   : > { %p141_p2 = pnand %p1633_p0, %p140_p1 }
   0x5   : > { %p167_p3 = scmp.lt.s32.totalorder (!%p141_p2), %s1629_s13, 1  ;;  %v2295_v0 = vmov (!%p141_p2), 0.0   ;;  %v2297_v1 = vmov (!%p141_p2), 0.0   ;;  %s2299_s25 = smov (!%p141_p2), 0  }
   0x6   : > { %144 = sbr.rel (%p141_p2) target bundleno = 1035 (0x40b), region = 28 }
   0xd   : > { %s2591_s13 = smov (!%p167_p3, %s1629_s13), 1 }
   0xe   : > { %s1783_s14 = sshll.u32 %s2591_s13, 3  ;;  %s1637_s15 = sshll.u32 %s2591_s13, 1 }
   0xf   : > { %s2283_s18 = scalar_lea.vmem %s2578_s0, %s1783_s14  ;;  %s2288_s21 = scalar_lea.vmem %s2580_s2, %s1783_s14 }
  0x10   : > { %s2293_s24 = scalar_lea.vmem %s2581_s3, %s1637_s15 }
  0x11 LB: >> { %v2108_v2 = vld [vmem:[%s2579_s1 + $0x10] sm:$0xff]   ;;  %v2244_v3 = vmov 0.0   ;;  %v2109_v4 = vld [vmem:[%s2579_s1 + $0x20] sm:$0xff]   ;;  %v2110_v5 = vld [vmem:[%s2579_s1 + $0x18] sm:$0xff]   ;;  %vm2245_vm0 = vmmov 0   ;;  %s1638_s5 = sshll.u32 %s2206_s25, 1  ;;  %s471_s19 = scalar_lea.vmem %s2288_s21, %s2206_s25  ;;  %s2206_s25 = sphi %s2299_s25, %s186_s25   ;;  %v2202_v1 = vphi %v2297_v1, %v2583_v1   ;;  %v2198_v0 = vphi %v2295_v0, %v2582_v0  }
  0x12   : >> { %1832 = vmatprep.subr.bf16.mxu1 %v2244_v3  ;;  %1848 = vmatprep.subr.bf16.mxu0 %v2244_v3  ;;  %v2111_v6 = vld [vmem:[%s2579_s1 + $0x28] sm:$0xff]   ;;  %s2325_s8 = scalar_lea.vmem %s2283_s18, %s1638_s5  ;;  %vm215_vm1 = vcmask 261120   ;;  %v2112_v9 = vld [vmem:[%s2579_s1] sm:$0xff]   ;;  %v2113_v15 = vld [vmem:[%s2579_s1 + $0x30] sm:$0xff]   ;;  %vm474_vm2 = vcmask 123904   ;;  %vm472_vm3 = vcmask 122880  }
  0x13   : >> { %1833 = vmatpush3.bf16.msra.mxu1 %v2108_v2  ;;  %1836 = vmatprep.mubr.msk.bf16.mxu1 %vm2245_vm0, %v2244_v3  ;;  %v1648_v7 = vld.sshfl [vmem:[%s2325_s8 + $0x2] sm:$0x3 pattern:$0x76325410]  ;;  %v2114_v16 = vld [vmem:[%s2579_s1 + $0x8] sm:$0xff]   ;;  %v2115_v20 = vld [vmem:[%s2579_s1 + $0x38] sm:$0xff]  }
  0x14   : >> { %1849 = vmatpush3.bf16.msra.mxu0 %v2109_v4  ;;  %1834 = vmatprep.subr.bf16.mxu1 %v2244_v3  ;;  %v1640_v8 = vld [vmem:[%s2325_s8 + $0x2] sm:$0x1]  ;;  %v1657_v10 = vld.sshfl [vmem:[%s2325_s8] sm:$0x3 pattern:$0x76325410] }
  0x15   : >> { %1850 = vmatprep.subr.bf16.mxu0 %v2244_v3  ;;  %1852 = vmatprep.mubr.msk.bf16.mxu0 %vm2245_vm0, %v2244_v3  ;;  %v346_v11 = vshrl.u32 %v1657_v10, 16  ;;  %v348_v12 = vshll.u32 %v1657_v10, 16  ;;  %v270_v13 = vshll.u32 %v1648_v7, 16  ;;  %v268_v18 = vshrl.u32 %v1648_v7, 16  ;;  %v408_v22 = vld [vmem:[%s2325_s8] sm:$0x1] }
  0x16   : >> { %s186_s25 = sadd.s32 1, %s2206_s25  }
  0x17   : >> { %1835 = vmatpush3.bf16.msra.mxu1 %v2110_v5  ;;  %v350_v14 = vrot.slane %v348_v12, 1  ;;  %v272_v19 = vrot.slane %v270_v13, 1  ;;  %p183_p4 = scmp.ge.s32.totalorder %s186_s25, 2  }
  0x18   : >> { %1851 = vmatpush3.bf16.msra.mxu0 %v2111_v6  ;;  %1840 = vmatprep.subr.bf16.mxu1 %v2244_v3  ;;  %s2368_s20 = smov (%p183_p4), 0  }
  0x19   : >> { %1856 = vmatprep.subr.bf16.mxu0 %v2244_v3  ;;  %v351_v17 = vor.u32 %v350_v14, %v346_v11  ;;  %v273_v21 = vor.u32 %v272_v19, %v268_v18 }
  0x1a   : >> { %1837 = vmatmul.mubr.msk.bf16.vlgmr.msra.gmra.mrb[0].mxu1 %vm215_vm1, %v1640_v8 }
  0x1b   : >> { %1841 = vmatpush3.bf16.msra.mxu1 %v2112_v9  ;;  %1844 = vmatprep.mubr.msk.bf16.mxu1 %vm2245_vm0, %v2244_v3 }
  0x1c   : >> { %1842 = vmatprep.subr.bf16.mxu1 %v2244_v3  ;;  %1853 = vmatmul.mubr.msk.bf16.vlgmr.msra.gmra.mrb[0].mxu0 %vm215_vm1, %v351_v17 }
  0x1d   : >> { %1857 = vmatpush3.bf16.msra.mxu0 %v2113_v15  ;;  %1860 = vmatprep.mubr.msk.bf16.mxu0 %vm2245_vm0, %v2244_v3 }
  0x1e   : >> { %1858 = vmatprep.subr.bf16.mxu0 %v2244_v3 }
  0x1f   : >> { %1843 = vmatpush3.bf16.msra.mxu1 %v2114_v16 }
  0x21   : >> { %1859 = vmatpush3.bf16.msra.mxu0 %v2115_v20 }
  0x26   : >> { %1845 = vmatmul.mubr.msk.bf16.vlgmr.msra.gmra.mrb[0].mxu1 %vm215_vm1, %v273_v21 }
  0x28   : >> { %1861 = vmatmul.mubr.msk.bf16.vlgmr.msra.gmra.mrb[0].mxu0 %vm215_vm1, %v408_v22 }
  0xf9   : >> { %v323_v23 = vpop.f32.mrb[0].mxu1 }
  0xfa   : >> { %v1846_v24 = vpop.f32.mrb[1].mxu1 }
  0xfb   : >> { %v326_v25 = vpop.f32.mrb[2].mxu1  ;;  %v463_v27 = vpop.f32.mrb[0].mxu0 }
  0xfc   : >> { %v1847_v26 = vpop.f32.mrb[3].mxu1  ;;  %v1960_v28 = vadd.f32 %v463_v27, %v323_v23  ;;  %v1862_v29 = vpop.f32.mrb[1].mxu0 }
  0xfd   : >> { %v466_v30 = vpop.f32.mrb[2].mxu0 }
  0xfe   : >> { %v470_v31 = vpack.c.bf16 %v1960_v28, %v1960_v28  ;;  %v475_v32 = vsel %vm474_vm2, %v1960_v28, 0.0  ;;  %v483_v33 = vmul.f32 %v1960_v28, %v1960_v28  ;;  %v1863_v34 = vpop.f32.mrb[3].mxu0 }
  0xff   : >> { %v476_v35 = vrot.slane %v475_v32, 4 }
 0x100   : >> { %473 = vst.msk [vmem:[%s471_s19] sm:$0x1] %vm472_vm3, %v470_v31  ;;  %v484_v36 = vsel %vm474_vm2, %v483_v33, 0.0 }
 0x101   : >> { %v477_v37 = vadd.f32 %v476_v35, %v475_v32  ;;  %v485_v38 = vrot.slane %v484_v36, 4 }
 0x103   : >> { %v478_v39 = vrot.slane %v477_v37, 2  ;;  %v486_v40 = vadd.f32 %v485_v38, %v484_v36 }
 0x105   : >> { %v479_v41 = vadd.f32 %v478_v39, %v477_v37  ;;  %v487_v42 = vrot.slane %v486_v40, 2 }
 0x107   : >> { %v480_v43 = vrot.slane %v479_v41, 1  ;;  %v488_v44 = vadd.f32 %v487_v42, %v486_v40 }
 0x109   : >> { %v481_v45 = vadd.f32 %v480_v43, %v479_v41  ;;  %v489_v46 = vrot.slane %v488_v44, 1  ;;  %185 = sbr.rel (!%p183_p4) target bundleno = 17 (0x11), region = 125 }
 0x10b   : >> { %v482_v47 = vadd.f32 %v2202_v1, %v481_v45   ;;  %v490_v48 = vadd.f32 %v489_v46, %v488_v44 }
 0x10d   : >> { %v491_v49 = vadd.f32 %v2198_v0, %v490_v48   ;;  %v2583_v1 = vmov %v482_v47 }
 0x10f   : >> { %v2582_v0 = vmov %v491_v49 }
 0x110 LB: >> { %v2116_v50 = vld [vmem:[%s2579_s1 + $0x50] sm:$0xff]   ;;  %v2246_v51 = vmov 0.0   ;;  %v2117_v52 = vld [vmem:[%s2579_s1 + $0x60] sm:$0xff]   ;;  %v2118_v53 = vld [vmem:[%s2579_s1 + $0x58] sm:$0xff]   ;;  %vm2247_vm4 = vmmov 0   ;;  %s1668_s29 = sshll.u32 %s2218_s20, 1  ;;  %s1530_s15 = scalar_lea.vmem %s2288_s21, %s2218_s20  ;;  %s2218_s20 = sphi %s2368_s20, %s497_s20   ;;  %v2214_v47 = vphi %v482_v47, %v2585_v47   ;;  %v2210_v49 = vphi %v491_v49, %v2584_v49  }
 0x111   : >> { %1864 = vmatprep.subr.bf16.mxu1 %v2246_v51  ;;  %1880 = vmatprep.subr.bf16.mxu0 %v2246_v51  ;;  %v2119_v54 = vld [vmem:[%s2579_s1 + $0x68] sm:$0xff]   ;;  %s2394_s5 = scalar_lea.vmem %s2283_s18, %s1668_s29  ;;  %v2121_v60 = vld [vmem:[%s2579_s1 + $0x70] sm:$0xff]   ;;  %v2120_v62 = vld [vmem:[%s2579_s1 + $0x40] sm:$0xff]   ;;  %s497_s20 = sadd.s32 1, %s2218_s20  }
 0x112   : >> { %1865 = vmatpush3.bf16.msra.mxu1 %v2116_v50  ;;  %1884 = vmatprep.mubr.msk.bf16.mxu0 %vm2247_vm4, %v2246_v51  ;;  %v1692_v55 = vld.sshfl [vmem:[%s2394_s5] sm:$0x2 pattern:$0x76325410]  ;;  %v2123_v1 = vld [vmem:[%s2579_s1 + $0x78] sm:$0xff]   ;;  %v2122_v3 = vld [vmem:[%s2579_s1 + $0x48] sm:$0xff]  }
 0x113   : >> { %1881 = vmatpush3.bf16.msra.mxu0 %v2117_v52  ;;  %1866 = vmatprep.subr.bf16.mxu1 %v2246_v51  ;;  %v666_v56 = vrot.slane %v1692_v55, 1  ;;  %v1679_v57 = vld.sshfl [vmem:[%s2394_s5 + $0x2] sm:$0x3 pattern:$0x76325410]  ;;  %p494_p5 = scmp.ge.s32.totalorder %s497_s20, 2  }
 0x114   : >> { %1882 = vmatprep.subr.bf16.mxu0 %v2246_v51  ;;  %1868 = vmatprep.mubr.msk.bf16.mxu1 %vm2247_vm4, %v2246_v51  ;;  %v524_v58 = vshrl.u32 %v1679_v57, 16  ;;  %v526_v59 = vshll.u32 %v1679_v57, 16  ;;  %v1700_v0 = vld.sshfl [vmem:[%s2394_s5] sm:$0x3 pattern:$0x76325410] }
 0x115   : >> { %v740_v2 = vshll.u32 %v1700_v0, 16  ;;  %v738_v4 = vshrl.u32 %v1700_v0, 16  ;;  %v1683_v6 = vld.sshfl [vmem:[%s2394_s5 + $0x2] sm:$0x2 pattern:$0x76325410] }
 0x116   : >> { %1867 = vmatpush3.bf16.msra.mxu1 %v2118_v53  ;;  %v528_v61 = vrot.slane %v526_v59, 1  ;;  %v594_v8 = vrot.slane %v1683_v6, 1  ;;  %s2437_s16 = smov (%p494_p5), 0  }
 0x117   : >> { %1883 = vmatpush3.bf16.msra.mxu0 %v2119_v54  ;;  %1872 = vmatprep.subr.bf16.mxu1 %v2246_v51  ;;  %v742_v5 = vrot.slane %v740_v2, 1 }
 0x118   : >> { %1888 = vmatprep.subr.bf16.mxu0 %v2246_v51  ;;  %v529_v63 = vor.u32 %v528_v61, %v524_v58 }
 0x119   : >> { %v743_v7 = vor.u32 %v742_v5, %v738_v4 }
 0x11a   : >> { %1885 = vmatmul.mubr.msk.bf16.vlgmr.msra.gmra.mrb[0].mxu0 %vm215_vm1, %v666_v56  ;;  %1869 = vmatmul.mubr.msk.bf16.vlgmr.msra.gmra.mrb[0].mxu1 %vm215_vm1, %v529_v63 }
 0x11b   : >> { %1889 = vmatpush3.bf16.msra.mxu0 %v2121_v60  ;;  %1892 = vmatprep.mubr.msk.bf16.mxu0 %vm2247_vm4, %v2246_v51 }
 0x11c   : >> { %1890 = vmatprep.subr.bf16.mxu0 %v2246_v51  ;;  %1873 = vmatpush3.bf16.msra.mxu1 %v2120_v62 }
 0x11d   : >> { %1876 = vmatprep.mubr.msk.bf16.mxu1 %vm2247_vm4, %v2246_v51  ;;  %1874 = vmatprep.subr.bf16.mxu1 %v2246_v51 }
 0x11f   : >> { %1891 = vmatpush3.bf16.msra.mxu0 %v2123_v1 }
 0x120   : >> { %1875 = vmatpush3.bf16.msra.mxu1 %v2122_v3 }
 0x126   : >> { %1893 = vmatmul.mubr.msk.bf16.vlgmr.msra.gmra.mrb[0].mxu0 %vm215_vm1, %v743_v7  ;;  %1877 = vmatmul.mubr.msk.bf16.vlgmr.msra.gmra.mrb[0].mxu1 %vm215_vm1, %v594_v8 }
 0x1f9   : >> { %v793_v9 = vpop.f32.mrb[0].mxu0  ;;  %v644_v11 = vpop.f32.mrb[0].mxu1 }
 0x1fa   : >> { %v1894_v10 = vpop.f32.mrb[1].mxu0  ;;  %v1969_v13 = vadd.f32 %v793_v9, %v644_v11  ;;  %v1878_v14 = vpop.f32.mrb[1].mxu1 }
 0x1fb   : >> { %v796_v12 = vpop.f32.mrb[2].mxu0  ;;  %v647_v16 = vpop.f32.mrb[2].mxu1 }
 0x1fc   : >> { %v1895_v15 = vpop.f32.mrb[3].mxu0  ;;  %v800_v17 = vpack.c.bf16 %v1969_v13, %v1969_v13  ;;  %v806_v18 = vsel %vm474_vm2, %v1969_v13, 0.0  ;;  %v814_v19 = vmul.f32 %v1969_v13, %v1969_v13  ;;  %v1879_v20 = vpop.f32.mrb[3].mxu1 }
 0x1fd   : >> { %v807_v21 = vrot.slane %v806_v18, 4 }
 0x1fe   : >> { %1704 = vst.msk [vmem:[%s1530_s15 + $0x2] sm:$0x1] %vm472_vm3, %v800_v17  ;;  %v815_v22 = vsel %vm474_vm2, %v814_v19, 0.0 }
 0x1ff   : >> { %v808_v23 = vadd.f32 %v807_v21, %v806_v18  ;;  %v816_v24 = vrot.slane %v815_v22, 4 }
 0x201   : >> { %v809_v25 = vrot.slane %v808_v23, 2  ;;  %v817_v26 = vadd.f32 %v816_v24, %v815_v22 }
 0x203   : >> { %v810_v27 = vadd.f32 %v809_v25, %v808_v23  ;;  %v818_v28 = vrot.slane %v817_v26, 2 }
 0x205   : >> { %v811_v29 = vrot.slane %v810_v27, 1  ;;  %v819_v30 = vadd.f32 %v818_v28, %v817_v26 }
 0x207   : >> { %v812_v31 = vadd.f32 %v811_v29, %v810_v27  ;;  %v820_v32 = vrot.slane %v819_v30, 1  ;;  %496 = sbr.rel (!%p494_p5) target bundleno = 272 (0x110), region = 136 }
 0x209   : >> { %v813_v33 = vadd.f32 %v2214_v47, %v812_v31   ;;  %v821_v34 = vadd.f32 %v820_v32, %v819_v30 }
 0x20b   : >> { %v822_v35 = vadd.f32 %v2210_v49, %v821_v34   ;;  %v2585_v47 = vmov %v813_v33 }
 0x20d   : >> { %v2584_v49 = vmov %v822_v35 }
 0x20e LB: >> { %v2124_v36 = vld [vmem:[%s2579_s1 + $0x90] sm:$0xff]   ;;  %v2248_v37 = vmov 0.0   ;;  %v2125_v38 = vld [vmem:[%s2579_s1 + $0xa0] sm:$0xff]   ;;  %v2126_v39 = vld [vmem:[%s2579_s1 + $0x98] sm:$0xff]   ;;  %vm2249_vm5 = vmmov 0   ;;  %s1705_s26 = sshll.u32 %s2230_s16, 1  ;;  %s1538_s11 = scalar_lea.vmem %s2288_s21, %s2230_s16  ;;  %s2230_s16 = sphi %s2437_s16, %s828_s16   ;;  %v2226_v33 = vphi %v813_v33, %v2587_v33   ;;  %v2222_v35 = vphi %v822_v35, %v2586_v35  }
 0x20f   : >> { %1896 = vmatprep.subr.bf16.mxu1 %v2248_v37  ;;  %1912 = vmatprep.subr.bf16.mxu0 %v2248_v37  ;;  %v2127_v40 = vld [vmem:[%s2579_s1 + $0xa8] sm:$0xff]   ;;  %s2463_s29 = scalar_lea.vmem %s2283_s18, %s1705_s26  ;;  %v2128_v43 = vld [vmem:[%s2579_s1 + $0x80] sm:$0xff]   ;;  %v2129_v49 = vld [vmem:[%s2579_s1 + $0xb0] sm:$0xff]   ;;  %s828_s16 = sadd.s32 1, %s2230_s16  }
 0x210   : >> { %1897 = vmatpush3.bf16.msra.mxu1 %v2124_v36  ;;  %1900 = vmatprep.mubr.msk.bf16.mxu1 %vm2249_vm5, %v2248_v37  ;;  %v1719_v41 = vld.sshfl [vmem:[%s2463_s29 + $0x4] sm:$0x3 pattern:$0x76325410]  ;;  %v2130_v50 = vld [vmem:[%s2579_s1 + $0x88] sm:$0xff]   ;;  %v2131_v54 = vld [vmem:[%s2579_s1 + $0xb8] sm:$0xff]  }
 0x211   : >> { %1913 = vmatpush3.bf16.msra.mxu0 %v2125_v38  ;;  %1898 = vmatprep.subr.bf16.mxu1 %v2248_v37  ;;  %v1711_v42 = vld [vmem:[%s2463_s29 + $0x4] sm:$0x1]  ;;  %v1729_v44 = vld.sshfl [vmem:[%s2463_s29 + $0x2] sm:$0x3 pattern:$0x76325410] }
 0x212   : >> { %1914 = vmatprep.subr.bf16.mxu0 %v2248_v37  ;;  %1916 = vmatprep.mubr.msk.bf16.mxu0 %vm2249_vm5, %v2248_v37  ;;  %v990_v45 = vshrl.u32 %v1729_v44, 16  ;;  %v992_v46 = vshll.u32 %v1729_v44, 16  ;;  %v913_v48 = vshll.u32 %v1719_v41, 16  ;;  %v911_v52 = vshrl.u32 %v1719_v41, 16  ;;  %v1733_v56 = vld [vmem:[%s2463_s29 + $0x2] sm:$0x1] }
 0x213   : >> { %p825_p6 = scmp.ge.s32.totalorder %s828_s16, 2  }
 0x214   : >> { %1899 = vmatpush3.bf16.msra.mxu1 %v2126_v39  ;;  %v994_v47 = vrot.slane %v992_v46, 1  ;;  %v915_v53 = vrot.slane %v913_v48, 1  ;;  %s2506_s13 = smov (%p825_p6), 0  }
 0x215   : >> { %1915 = vmatpush3.bf16.msra.mxu0 %v2127_v40  ;;  %1904 = vmatprep.subr.bf16.mxu1 %v2248_v37 }
 0x216   : >> { %1920 = vmatprep.subr.bf16.mxu0 %v2248_v37  ;;  %v995_v51 = vor.u32 %v994_v47, %v990_v45  ;;  %v916_v55 = vor.u32 %v915_v53, %v911_v52 }
 0x217   : >> { %1901 = vmatmul.mubr.msk.bf16.vlgmr.msra.gmra.mrb[0].mxu1 %vm215_vm1, %v1711_v42 }
 0x218   : >> { %1905 = vmatpush3.bf16.msra.mxu1 %v2128_v43  ;;  %1908 = vmatprep.mubr.msk.bf16.mxu1 %vm2249_vm5, %v2248_v37 }
 0x219   : >> { %1906 = vmatprep.subr.bf16.mxu1 %v2248_v37  ;;  %1917 = vmatmul.mubr.msk.bf16.vlgmr.msra.gmra.mrb[0].mxu0 %vm215_vm1, %v995_v51 }
 0x21a   : >> { %1921 = vmatpush3.bf16.msra.mxu0 %v2129_v49  ;;  %1924 = vmatprep.mubr.msk.bf16.mxu0 %vm2249_vm5, %v2248_v37 }
 0x21b   : >> { %1922 = vmatprep.subr.bf16.mxu0 %v2248_v37 }
 0x21c   : >> { %1907 = vmatpush3.bf16.msra.mxu1 %v2130_v50 }
 0x21e   : >> { %1923 = vmatpush3.bf16.msra.mxu0 %v2131_v54 }
 0x223   : >> { %1909 = vmatmul.mubr.msk.bf16.vlgmr.msra.gmra.mrb[0].mxu1 %vm215_vm1, %v916_v55 }
 0x225   : >> { %1925 = vmatmul.mubr.msk.bf16.vlgmr.msra.gmra.mrb[0].mxu0 %vm215_vm1, %v1733_v56 }
 0x2f6   : >> { %v966_v57 = vpop.f32.mrb[0].mxu1 }
 0x2f7   : >> { %v1910_v58 = vpop.f32.mrb[1].mxu1 }
 0x2f8   : >> { %v969_v59 = vpop.f32.mrb[2].mxu1  ;;  %v1107_v61 = vpop.f32.mrb[0].mxu0 }
 0x2f9   : >> { %v1911_v60 = vpop.f32.mrb[3].mxu1  ;;  %v1978_v62 = vadd.f32 %v1107_v61, %v966_v57  ;;  %v1926_v63 = vpop.f32.mrb[1].mxu0 }
 0x2fa   : >> { %v1110_v0 = vpop.f32.mrb[2].mxu0 }
 0x2fb   : >> { %v1114_v1 = vpack.c.bf16 %v1978_v62, %v1978_v62  ;;  %v1120_v2 = vsel %vm474_vm2, %v1978_v62, 0.0  ;;  %v1128_v3 = vmul.f32 %v1978_v62, %v1978_v62  ;;  %v1927_v4 = vpop.f32.mrb[3].mxu0 }
 0x2fc   : >> { %v1121_v5 = vrot.slane %v1120_v2, 4 }
 0x2fd   : >> { %1741 = vst.msk [vmem:[%s1538_s11 + $0x4] sm:$0x1] %vm472_vm3, %v1114_v1  ;;  %v1129_v6 = vsel %vm474_vm2, %v1128_v3, 0.0 }
 0x2fe   : >> { %v1122_v7 = vadd.f32 %v1121_v5, %v1120_v2  ;;  %v1130_v8 = vrot.slane %v1129_v6, 4 }
 0x300   : >> { %v1123_v9 = vrot.slane %v1122_v7, 2  ;;  %v1131_v10 = vadd.f32 %v1130_v8, %v1129_v6 }
 0x302   : >> { %v1124_v11 = vadd.f32 %v1123_v9, %v1122_v7  ;;  %v1132_v12 = vrot.slane %v1131_v10, 2 }
 0x304   : >> { %v1125_v13 = vrot.slane %v1124_v11, 1  ;;  %v1133_v14 = vadd.f32 %v1132_v12, %v1131_v10 }
 0x306   : >> { %v1126_v15 = vadd.f32 %v1125_v13, %v1124_v11  ;;  %v1134_v16 = vrot.slane %v1133_v14, 1  ;;  %827 = sbr.rel (!%p825_p6) target bundleno = 526 (0x20e), region = 147 }
 0x308   : >> { %v1127_v17 = vadd.f32 %v2226_v33, %v1126_v15   ;;  %v1135_v18 = vadd.f32 %v1134_v16, %v1133_v14 }
 0x30a   : >> { %v1136_v19 = vadd.f32 %v2222_v35, %v1135_v18   ;;  %v2587_v33 = vmov %v1127_v17 }
 0x30c   : >> { %v2586_v35 = vmov %v1136_v19 }
 0x30d LB: >> { %v2132_v20 = vld [vmem:[%s2579_s1 + $0xd0] sm:$0xff]   ;;  %v2250_v21 = vmov 0.0   ;;  %v2133_v22 = vld [vmem:[%s2579_s1 + $0xe0] sm:$0xff]   ;;  %v2134_v23 = vld [vmem:[%s2579_s1 + $0xd8] sm:$0xff]   ;;  %vm2251_vm6 = vmmov 0   ;;  %s1742_s22 = sshll.u32 %s2242_s13, 1  ;;  %s1546_s8 = scalar_lea.vmem %s2288_s21, %s2242_s13  ;;  %s2242_s13 = sphi %s2506_s13, %s1142_s13   ;;  %v2238_v17 = vphi %v1127_v17, %v2589_v17   ;;  %v2234_v19 = vphi %v1136_v19, %v2588_v19  }
 0x30e   : >> { %1928 = vmatprep.subr.bf16.mxu1 %v2250_v21  ;;  %1944 = vmatprep.subr.bf16.mxu0 %v2250_v21  ;;  %v2135_v24 = vld [vmem:[%s2579_s1 + $0xe8] sm:$0xff]   ;;  %s2532_s26 = scalar_lea.vmem %s2283_s18, %s1742_s22  ;;  %v2137_v30 = vld [vmem:[%s2579_s1 + $0xf0] sm:$0xff]   ;;  %v2136_v32 = vld [vmem:[%s2579_s1 + $0xc0] sm:$0xff]   ;;  %s1142_s13 = sadd.s32 1, %s2242_s13  }
 0x30f   : >> { %1929 = vmatpush3.bf16.msra.mxu1 %v2132_v20  ;;  %1948 = vmatprep.mubr.msk.bf16.mxu0 %vm2251_vm6, %v2250_v21  ;;  %v1767_v25 = vld.sshfl [vmem:[%s2532_s26 + $0x2] sm:$0x2 pattern:$0x76325410]  ;;  %v2139_v35 = vld [vmem:[%s2579_s1 + $0xf8] sm:$0xff]   ;;  %v2138_v37 = vld [vmem:[%s2579_s1 + $0xc8] sm:$0xff]  }
 0x310   : >> { %1945 = vmatpush3.bf16.msra.mxu0 %v2133_v22  ;;  %1930 = vmatprep.subr.bf16.mxu1 %v2250_v21  ;;  %v1312_v26 = vrot.slane %v1767_v25, 1  ;;  %v1753_v27 = vld.sshfl [vmem:[%s2532_s26 + $0x4] sm:$0x3 pattern:$0x76325410]  ;;  %p1139_p7 = scmp.ge.s32.totalorder %s1142_s13, 2  }
 0x311   : >> { %1946 = vmatprep.subr.bf16.mxu0 %v2250_v21  ;;  %1932 = vmatprep.mubr.msk.bf16.mxu1 %vm2251_vm6, %v2250_v21  ;;  %v1169_v28 = vshrl.u32 %v1753_v27, 16  ;;  %v1171_v29 = vshll.u32 %v1753_v27, 16  ;;  %v1776_v34 = vld.sshfl [vmem:[%s2532_s26 + $0x2] sm:$0x3 pattern:$0x76325410] }
 0x312   : >> { %v1386_v36 = vshll.u32 %v1776_v34, 16  ;;  %v1384_v38 = vshrl.u32 %v1776_v34, 16  ;;  %v1757_v40 = vld.sshfl [vmem:[%s2532_s26 + $0x4] sm:$0x2 pattern:$0x76325410] }
 0x313   : >> { %1931 = vmatpush3.bf16.msra.mxu1 %v2134_v23  ;;  %v1173_v31 = vrot.slane %v1171_v29, 1  ;;  %v1239_v42 = vrot.slane %v1757_v40, 1 }
 0x314   : >> { %1947 = vmatpush3.bf16.msra.mxu0 %v2135_v24  ;;  %1936 = vmatprep.subr.bf16.mxu1 %v2250_v21  ;;  %v1388_v39 = vrot.slane %v1386_v36, 1 }
 0x315   : >> { %1952 = vmatprep.subr.bf16.mxu0 %v2250_v21  ;;  %v1174_v33 = vor.u32 %v1173_v31, %v1169_v28 }
 0x316   : >> { %v1389_v41 = vor.u32 %v1388_v39, %v1384_v38 }
 0x317   : >> { %1949 = vmatmul.mubr.msk.bf16.vlgmr.msra.gmra.mrb[0].mxu0 %vm215_vm1, %v1312_v26  ;;  %1933 = vmatmul.mubr.msk.bf16.vlgmr.msra.gmra.mrb[0].mxu1 %vm215_vm1, %v1174_v33 }
 0x318   : >> { %1953 = vmatpush3.bf16.msra.mxu0 %v2137_v30  ;;  %1956 = vmatprep.mubr.msk.bf16.mxu0 %vm2251_vm6, %v2250_v21 }
 0x319   : >> { %1954 = vmatprep.subr.bf16.mxu0 %v2250_v21  ;;  %1937 = vmatpush3.bf16.msra.mxu1 %v2136_v32 }
 0x31a   : >> { %1940 = vmatprep.mubr.msk.bf16.mxu1 %vm2251_vm6, %v2250_v21  ;;  %1938 = vmatprep.subr.bf16.mxu1 %v2250_v21 }
 0x31c   : >> { %1955 = vmatpush3.bf16.msra.mxu0 %v2139_v35 }
 0x31d   : >> { %1939 = vmatpush3.bf16.msra.mxu1 %v2138_v37 }
 0x323   : >> { %1957 = vmatmul.mubr.msk.bf16.vlgmr.msra.gmra.mrb[0].mxu0 %vm215_vm1, %v1389_v41  ;;  %1941 = vmatmul.mubr.msk.bf16.vlgmr.msra.gmra.mrb[0].mxu1 %vm215_vm1, %v1239_v42 }
 0x3f6   : >> { %v1439_v43 = vpop.f32.mrb[0].mxu0  ;;  %v1289_v45 = vpop.f32.mrb[0].mxu1 }
 0x3f7   : >> { %v1958_v44 = vpop.f32.mrb[1].mxu0  ;;  %v1987_v47 = vadd.f32 %v1439_v43, %v1289_v45  ;;  %v1942_v48 = vpop.f32.mrb[1].mxu1 }
 0x3f8   : >> { %v1442_v46 = vpop.f32.mrb[2].mxu0  ;;  %v1292_v50 = vpop.f32.mrb[2].mxu1 }
 0x3f9   : >> { %v1959_v49 = vpop.f32.mrb[3].mxu0  ;;  %v1446_v51 = vpack.c.bf16 %v1987_v47, %v1987_v47  ;;  %v1452_v52 = vsel %vm474_vm2, %v1987_v47, 0.0  ;;  %v1460_v53 = vmul.f32 %v1987_v47, %v1987_v47  ;;  %v1943_v54 = vpop.f32.mrb[3].mxu1 }
 0x3fa   : >> { %v1453_v55 = vrot.slane %v1452_v52, 4 }
 0x3fb   : >> { %1780 = vst.msk [vmem:[%s1546_s8 + $0x6] sm:$0x1] %vm472_vm3, %v1446_v51  ;;  %v1461_v56 = vsel %vm474_vm2, %v1460_v53, 0.0 }
 0x3fc   : >> { %v1454_v57 = vadd.f32 %v1453_v55, %v1452_v52  ;;  %v1462_v58 = vrot.slane %v1461_v56, 4 }
 0x3fe   : >> { %v1455_v59 = vrot.slane %v1454_v57, 2  ;;  %v1463_v60 = vadd.f32 %v1462_v58, %v1461_v56 }
 0x400   : >> { %v1456_v61 = vadd.f32 %v1455_v59, %v1454_v57  ;;  %v1464_v62 = vrot.slane %v1463_v60, 2 }
 0x402   : >> { %v1457_v63 = vrot.slane %v1456_v61, 1  ;;  %v1465_v0 = vadd.f32 %v1464_v62, %v1463_v60 }
 0x404   : >> { %v1458_v1 = vadd.f32 %v1457_v63, %v1456_v61  ;;  %v1466_v2 = vrot.slane %v1465_v0, 1  ;;  %1141 = sbr.rel (!%p1139_p7) target bundleno = 781 (0x30d), region = 158 }
 0x406   : >> { %v1459_v3 = vadd.f32 %v2238_v17, %v1458_v1   ;;  %v1467_v4 = vadd.f32 %v1466_v2, %v1465_v0 }
 0x408   : >> { %v1468_v5 = vadd.f32 %v2234_v19, %v1467_v4   ;;  %v2589_v17 = vmov %v1459_v3  ;;  %1470 = vst.msk [vmem:[%s2293_s24] sm:$0x1] (%p1139_p7), %vm472_vm3, %v1459_v3 }
 0x40a   : >> { %v2588_v19 = vmov %v1468_v5  ;;  %1471 = vst.msk [vmem:[%s2293_s24 + $0x1] sm:$0x1] (%p1139_p7), %vm472_vm3, %v1468_v5 }
 0x40b PF: > { %s14_s12 = sadd.s32 1, %s2194_s12  }
 0x40c   : > { %p11_p8 = scmp.ge.s32.totalorder %s14_s12, 4  }
 0x40e   :  { %13 = sbr.rel (!%p11_p8) target bundleno = 1 (0x1), region = 169 }

// kernel: loom_generator_forward.34
= control target key start
LH: loop header
LB: loop body
LE: loop exit
PB: predicated region body
PF: predicated region fallthrough
CT: control target
= control target key end

     0   :  { %s514_s12 = smov 0   ;;  %s516_s13 = smov 0   ;;  %s571_s0 = inlined_call_operand.vmem [shape: bf16[2,4,4,4,8], index: 0, kind: input, shape index: {}]   ;;  %s572_s1 = inlined_call_operand.vmem [shape: f32[1,8], index: 1, kind: input, shape index: {}]   ;;  %s573_s2 = inlined_call_operand.vmem [shape: f32[1,8], index: 2, kind: input, shape index: {}]   ;;  %s574_s3 = inlined_call_operand.vmem [shape: bf16[2,4,4,4,8], index: 3, kind: output, shape index: {}]  }
   0x1   :  { %s518_s14 = smov 0   ;;  %s520_s15 = smov 0  }
   0x2   :  { %s522_s16 = smov 0  }
   0x3 LB: > { %s28_s17 = sadd.s32 1, %s484_s14  ;;  %s32_s18 = sadd.s32 1, %s488_s15  ;;  %s492_s16 = sphi %s522_s16, %s13_s16   ;;  %s488_s15 = sphi %s520_s15, %s578_s15   ;;  %s484_s14 = sphi %s518_s14, %s577_s14   ;;  %s480_s13 = sphi %s516_s13, %s576_s13   ;;  %s476_s12 = sphi %s514_s12, %s575_s12  }
   0x4   : > { %p30_p0 = scmp.ge.s32.totalorder %s28_s17, 4  ;;  %p403_p1 = scmp.ge.s32.totalorder %s492_s16, 1 }
   0x5   : > { %p173_p2 = scmp.lt.s32.totalorder %s492_s16, 9 }
   0x6   : > { %s580_s17 = smov (%p30_p0, %s28_s17), 0  ;;  %s582_s18 = smov (!%p30_p0, %s32_s18), %s488_s15 }
   0x7   : > { %p174_p3 = pnand %p403_p1, %p173_p2  ;;  %p34_p4 = scmp.ge.s32.totalorder %s582_s18, 2 }
   0x8   : > { %p214_p5 = scmp.lt.s32.totalorder (!%p174_p3), %s480_s13, 1  ;;  %p216_p6 = scmp.lt.s32.totalorder (!%p174_p3), %s476_s12, 3  ;;  %v410_v0 = vld [vmem:[%s572_s1] ss:$0 sm:$0xff] (!%p174_p3)  ;;  %vm279_vm0 = vcmask (!%p174_p3), 58368  }
   0x9   : > { %s584_s18 = smov (%p34_p4, %s582_s18), 0  ;;  %177 = sbr.rel (%p174_p3) target bundleno = 34 (0x22), region = 32 }
   0xa   : > { %v411_v8 = vld [vmem:[%s573_s2] ss:$0 sm:$0xff] (!%p174_p3) }
  0x10   : > { %s586_s13 = smov (!%p214_p5, %s480_s13), 1  ;;  %s588_s12 = smov (!%p216_p6, %s476_s12), 3 }
  0x11   : > { %s405_s19 = sshll.u32 %s586_s13, 4  ;;  %s404_s20 = sshll.u32 %s588_s12, 2 }
  0x12   : > { %s223_s21 = sadd.s32 %s405_s19, %s404_s20 }
  0x13   : > { %s406_s22 = sshll.u32 %s223_s21, 1 }
  0x14   : > { %s225_s25 = scalar_lea.vmem %s571_s0, %s406_s22  ;;  %s239_s5 = scalar_lea.vmem %s574_s3, %s406_s22 }
  0x15   : > { %v241_v1 = vld [vmem:[%s225_s25] sm:$0x3]  ;;  %v242_v2 = vld [vmem:[%s225_s25 + $0x2] sm:$0x3]  ;;  %v243_v3 = vld [vmem:[%s225_s25 + $0x4] sm:$0x3] }
  0x16   : > { %v245_v4 = vunpack.c.l.bf16 %v241_v1  ;;  %v246_v5 = vunpack.c.l.bf16 %v242_v2  ;;  %v247_v6 = vunpack.c.l.bf16 %v243_v3  ;;  %v244_v7 = vld [vmem:[%s225_s25 + $0x6] sm:$0x3] }
  0x17   : > { %v248_v9 = vunpack.c.l.bf16 %v244_v7 }
  0x18   : > { %v256_v10 = vmul.f32 %v410_v0, %v245_v4  ;;  %v257_v11 = vmul.f32 %v410_v0, %v246_v5  ;;  %v258_v12 = vmul.f32 %v410_v0, %v247_v6 }
  0x19   : > { %v259_v13 = vmul.f32 %v410_v0, %v248_v9 }
  0x1a   : > { %v267_v14 = vadd.f32 %v411_v8, %v256_v10  ;;  %v268_v15 = vadd.f32 %v411_v8, %v257_v11  ;;  %v269_v16 = vadd.f32 %v411_v8, %v258_v12 }
  0x1b   : > { %v270_v17 = vadd.f32 %v411_v8, %v259_v13 }
  0x1c   : > { %v271_v18 = vmax.f32 %v267_v14, 0.0  ;;  %v272_v19 = vmax.f32 %v268_v15, 0.0  ;;  %v273_v20 = vmax.f32 %v269_v16, 0.0 }
  0x1d   : > { %v274_v21 = vmax.f32 %v270_v17, 0.0 }
  0x1e   : > { %v275_v22 = vpack.c.bf16 %v271_v18, %v271_v18  ;;  %v276_v23 = vpack.c.bf16 %v272_v19, %v272_v19  ;;  %v277_v24 = vpack.c.bf16 %v273_v20, %v273_v20 }
  0x1f   : > { %v278_v25 = vpack.c.bf16 %v274_v21, %v274_v21 }
  0x20   : > { %280 = vst.msk [vmem:[%s239_s5] sm:$0x3] %vm279_vm0, %v275_v22  ;;  %281 = vst.msk [vmem:[%s239_s5 + $0x2] sm:$0x3] %vm279_vm0, %v276_v23 }
  0x21   : > { %282 = vst.msk [vmem:[%s239_s5 + $0x4] sm:$0x3] %vm279_vm0, %v277_v24  ;;  %283 = vst.msk [vmem:[%s239_s5 + $0x6] sm:$0x3] %vm279_vm0, %v278_v25 }
  0x22 PF: > { %s13_s16 = sadd.s32 1, %s492_s16   ;;  %s575_s12 = smov %s484_s14 }
  0x23   : > { %p10_p7 = scmp.ge.s32.totalorder %s13_s16, 10   ;;  %s576_s13 = smov %s488_s15 }
  0x24   : > { %s577_s14 = smov %s580_s17  ;;  %s578_s15 = smov %s584_s18 }
  0x25   :  { %12 = sbr.rel (!%p10_p7) target bundleno = 3 (0x3), region = 62 }

// kernel: loom_generator_forward.33
= control target key start
LH: loop header
LB: loop body
LE: loop exit
PB: predicated region body
PF: predicated region fallthrough
CT: control target
= control target key end

     0   :  { %s2003_s12 = smov 0   ;;  %s2235_s0 = inlined_call_operand.vmem [shape: bf16[2,6,6,16], index: 0, kind: input, shape index: {}]   ;;  %s2236_s1 = inlined_call_operand.vmem [shape: bf16[4,4,16,8], index: 1, kind: input, shape index: {}]   ;;  %s2237_s2 = inlined_call_operand.vmem [shape: bf16[2,4,4,4,8], index: 2, kind: output, shape index: {0}]   ;;  %s2238_s3 = inlined_call_operand.vmem [shape: f32[2,2,8], index: 3, kind: output, shape index: {1}]  }
   0x1 LB: > { %s1453_s13 = sadd.s32 4294967295, %s1925_s12   ;;  %p1457_p0 = scmp.ge.s32.totalorder %s1925_s12, 1  ;;  %s1925_s12 = sphi %s2003_s12, %s14_s12  }
   0x2   : > { %p140_p1 = scmp.lt.s32.totalorder %s1925_s12, 3 }
   0x4   : > { %p141_p2 = pnand %p1457_p0, %p140_p1 }
   0x5   : > { %p168_p3 = scmp.lt.s32.totalorder (!%p141_p2), %s1453_s13, 1  ;;  %v2026_v0 = vmov (!%p141_p2), 0.0   ;;  %v2028_v1 = vmov (!%p141_p2), 0.0   ;;  %s2030_s26 = smov (!%p141_p2), 0  }
   0x6   : > { %144 = sbr.rel (%p141_p2) target bundleno = 1029 (0x405), region = 28 }
   0xd   : > { %s2248_s13 = smov (!%p168_p3, %s1453_s13), 1 }
   0xe   : > { %s1730_s14 = smul.u32 24, %s2248_s13  ;;  %s1565_s15 = sshll.u32 %s2248_s13, 5 }
   0xf   : > { %s2014_s18 = scalar_lea.vmem %s2237_s2, %s1565_s15  ;;  %s1461_s19 = sshll.u32 %s2248_s13, 1 }
  0x10   : > { %s2019_s22 = scalar_lea.vmem %s2235_s0, %s1730_s14  ;;  %s2024_s25 = scalar_lea.vmem %s2238_s3, %s1461_s19 }
  0x11 LB: >> { %v1843_v2 = vld [vmem:[%s2236_s1 + $0x8] sm:$0xff]   ;;  %v1975_v3 = vmov 0.0   ;;  %vm1976_vm0 = vmmov 0   ;;  %s1462_s29 = sshll.u32 %s1937_s26, 2  ;;  %vm207_vm1 = vcmask 130048   ;;  %v1845_v4 = vld [vmem:[%s2236_s1 + $0x10] sm:$0xff]   ;;  %s1937_s26 = sphi %s2030_s26, %s188_s26   ;;  %v1933_v1 = vphi %v2028_v1, %v2240_v1   ;;  %v1929_v0 = vphi %v2026_v0, %v2239_v0  }
  0x12   : >> { %1598 = vmatprep.subr.bf16.mxu1 %v1975_v3  ;;  %1610 = vmatprep.subr.bf16.mxu0 %v1975_v3  ;;  %v1846_v5 = vld [vmem:[%s2236_s1] sm:$0xff]   ;;  %s1340_s7 = scalar_lea.vmem %s2019_s22, %s1462_s29  ;;  %v1848_v15 = vld [vmem:[%s2236_s1 + $0x18] sm:$0xff]   ;;  %s1482_s10 = sshll.u32 %s1937_s26, 1  ;;  %vm435_vm2 = vcmask 60416   ;;  %vm433_vm3 = vcmask 58368  }
  0x13   : >> { %1599 = vmatpush3.bf16.msra.mxu1 %v1843_v2  ;;  %1600 = vmatprep.mubr.msk.bf16.mxu1 %vm1976_vm0, %v1975_v3  ;;  %v1464_v6 = vld [vmem:[%s1340_s7 + $0x4] sm:$0x3]  ;;  %v1847_v8 = vld [vmem:[%s1340_s7] ss:$0 sps:$4 sm:$0x77]   ;;  %s432_s11 = scalar_lea.vmem %s2014_s18, %s1482_s10  ;;  %s188_s26 = sadd.s32 1, %s1937_s26  }
  0x14   : >> { %1604 = vmatprep.subr.bf16.mxu1 %v1975_v3  ;;  %1612 = vmatprep.mubr.msk.bf16.mxu0 %vm1976_vm0, %v1975_v3  ;;  %v1844_v7 = vld [vmem:[%s1340_s7 + $0x4] ss:$0 sps:$4 sm:$0x77]   ;;  %v320_v10 = vshrl.u32 %v1847_v8, 16  ;;  %v322_v11 = vshll.u32 %v1847_v8, 16  ;;  %p185_p4 = scmp.ge.s32.totalorder %s188_s26, 4  }
  0x15   : >> { %1611 = vmatpush3.bf16.msra.mxu0 %v1845_v4  ;;  %v257_v9 = vshll.u32 %v1844_v7, 16  ;;  %v255_v12 = vshrl.u32 %v1844_v7, 16  ;;  %v376_v18 = vld [vmem:[%s1340_s7] sm:$0x3]  ;;  %s2081_s13 = smov (%p185_p4), 0  }
  0x16   : >> { %1601 = vmatmul.mubr.msk.bf16.vlgmr.msra.gmra.mrb[0].mxu1 %vm207_vm1, %v1464_v6  ;;  %1616 = vmatprep.subr.bf16.mxu0 %v1975_v3  ;;  %v324_v13 = vrot.slane %v322_v11, 1 }
  0x17   : >> { %1605 = vmatpush3.bf16.msra.mxu1 %v1846_v5  ;;  %1606 = vmatprep.mubr.msk.bf16.mxu1 %vm1976_vm0, %v1975_v3  ;;  %v259_v14 = vrot.slane %v257_v9, 1 }
  0x18   : >> { %v325_v16 = vor.u32 %v324_v13, %v320_v10 }
  0x19   : >> { %v260_v17 = vor.u32 %v259_v14, %v255_v12 }
  0x1a   : >> { %1613 = vmatmul.mubr.msk.bf16.vlgmr.msra.gmra.mrb[0].mxu0 %vm207_vm1, %v325_v16 }
  0x1b   : >> { %1617 = vmatpush3.bf16.msra.mxu0 %v1848_v15  ;;  %1618 = vmatprep.mubr.msk.bf16.mxu0 %vm1976_vm0, %v1975_v3 }
  0x22   : >> { %1607 = vmatmul.mubr.msk.bf16.vlgmr.msra.gmra.mrb[0].mxu1 %vm207_vm1, %v260_v17 }
  0x26   : >> { %1619 = vmatmul.mubr.msk.bf16.vlgmr.msra.gmra.mrb[0].mxu0 %vm207_vm1, %v376_v18 }
  0xf5   : >> { %v304_v19 = vpop.f32.mrb[0].mxu1 }
  0xf6   : >> { %v1608_v20 = vpop.f32.mrb[1].mxu1 }
  0xf7   : >> { %v307_v21 = vpop.f32.mrb[2].mxu1 }
  0xf8   : >> { %v1609_v22 = vpop.f32.mrb[3].mxu1 }
  0xf9   : >> { %v423_v23 = vpop.f32.mrb[0].mxu0 }
  0xfa   : >> { %v1694_v24 = vadd.f32 %v423_v23, %v304_v19  ;;  %v1620_v25 = vpop.f32.mrb[1].mxu0 }
  0xfb   : >> { %v426_v26 = vpop.f32.mrb[2].mxu0 }
  0xfc   : >> { %v430_v27 = vpack.c.bf16 %v1694_v24, %v1694_v24  ;;  %v436_v28 = vsel %vm435_vm2, %v1694_v24, 0.0  ;;  %v444_v29 = vmul.f32 %v1694_v24, %v1694_v24  ;;  %v1621_v30 = vpop.f32.mrb[3].mxu0 }
  0xfd   : >> { %v437_v31 = vrot.slane %v436_v28, 4 }
  0xfe   : >> { %434 = vst.msk [vmem:[%s432_s11] sm:$0x3] %vm433_vm3, %v430_v27  ;;  %v445_v32 = vsel %vm435_vm2, %v444_v29, 0.0 }
  0xff   : >> { %v438_v33 = vadd.f32 %v437_v31, %v436_v28  ;;  %v446_v34 = vrot.slane %v445_v32, 4 }
 0x101   : >> { %v439_v35 = vrot.slane %v438_v33, 2  ;;  %v447_v36 = vadd.f32 %v446_v34, %v445_v32 }
 0x103   : >> { %v440_v37 = vadd.f32 %v439_v35, %v438_v33  ;;  %v448_v38 = vrot.slane %v447_v36, 2 }
 0x105   : >> { %v441_v39 = vrot.slane %v440_v37, 1  ;;  %v449_v40 = vadd.f32 %v448_v38, %v447_v36 }
 0x107   : >> { %v442_v41 = vadd.f32 %v441_v39, %v440_v37  ;;  %v450_v42 = vrot.slane %v449_v40, 1  ;;  %187 = sbr.rel (!%p185_p4) target bundleno = 17 (0x11), region = 125 }
 0x109   : >> { %v443_v43 = vadd.f32 %v1933_v1, %v442_v41   ;;  %v451_v44 = vadd.f32 %v450_v42, %v449_v40 }
 0x10b   : >> { %v452_v45 = vadd.f32 %v1929_v0, %v451_v44   ;;  %v2240_v1 = vmov %v443_v43 }
 0x10d   : >> { %v2239_v0 = vmov %v452_v45 }
 0x10e LB: >> { %v1849_v46 = vld [vmem:[%s2236_s1 + $0x30] sm:$0xff]   ;;  %v1977_v47 = vmov 0.0   ;;  %v1850_v48 = vld [vmem:[%s2236_s1 + $0x28] sm:$0xff]   ;;  %vm1978_vm4 = vmmov 0   ;;  %s1483_s19 = sshll.u32 %s1949_s13, 2  ;;  %v1854_v51 = vld [vmem:[%s2236_s1 + $0x38] sm:$0xff]   ;;  %s1949_s13 = sphi %s2081_s13, %s458_s13   ;;  %v1945_v43 = vphi %v443_v43, %v2242_v43   ;;  %v1941_v45 = vphi %v452_v45, %v2241_v45  }
 0x10f   : >> { %1634 = vmatprep.subr.bf16.mxu0 %v1977_v47  ;;  %1622 = vmatprep.subr.bf16.mxu1 %v1977_v47  ;;  %s1347_s20 = scalar_lea.vmem %s2019_s22, %s1483_s19  ;;  %v1853_v58 = vld [vmem:[%s2236_s1 + $0x20] sm:$0xff]   ;;  %s1507_s27 = sshll.u32 %s1949_s13, 1 }
 0x110   : >> { %1635 = vmatpush3.bf16.msra.mxu0 %v1849_v46  ;;  %1636 = vmatprep.mubr.msk.bf16.mxu0 %vm1978_vm4, %v1977_v47  ;;  %v1851_v49 = vld [vmem:[%s1347_s20] ss:$0 sps:$4 sm:$0x66]   ;;  %v1852_v50 = vld [vmem:[%s1347_s20 + $0x4] ss:$0 sps:$4 sm:$0x77]   ;;  %s1352_s28 = scalar_lea.vmem %s2014_s18, %s1507_s27 }
 0x111   : >> { %1623 = vmatpush3.bf16.msra.mxu1 %v1850_v48  ;;  %1624 = vmatprep.mubr.msk.bf16.mxu1 %vm1978_vm4, %v1977_v47  ;;  %v594_v52 = vrot.slane %v1851_v49, 1  ;;  %v1855_v53 = vld [vmem:[%s1347_s20] ss:$0 sps:$4 sm:$0x77]   ;;  %v476_v54 = vshrl.u32 %v1852_v50, 16  ;;  %v478_v55 = vshll.u32 %v1852_v50, 16 }
 0x112   : >> { %1628 = vmatprep.subr.bf16.mxu1 %v1977_v47  ;;  %1640 = vmatprep.subr.bf16.mxu0 %v1977_v47  ;;  %v655_v56 = vshll.u32 %v1855_v53, 16  ;;  %v653_v60 = vshrl.u32 %v1855_v53, 16  ;;  %v1856_v63 = vld [vmem:[%s1347_s20 + $0x4] ss:$0 sps:$4 sm:$0x66]   ;;  %s458_s13 = sadd.s32 1, %s1949_s13  }
 0x113   : >> { %1637 = vmatmul.mubr.msk.bf16.vlgmr.msra.gmra.mrb[0].mxu0 %vm207_vm1, %v594_v52  ;;  %v480_v57 = vrot.slane %v478_v55, 1  ;;  %v535_v0 = vrot.slane %v1856_v63, 1  ;;  %p455_p5 = scmp.ge.s32.totalorder %s458_s13, 4  }
 0x114   : >> { %1641 = vmatpush3.bf16.msra.mxu0 %v1854_v51  ;;  %1642 = vmatprep.mubr.msk.bf16.mxu0 %vm1978_vm4, %v1977_v47  ;;  %v657_v61 = vrot.slane %v655_v56, 1  ;;  %s2132_s29 = smov (%p455_p5), 0  }
 0x115   : >> { %v481_v59 = vor.u32 %v480_v57, %v476_v54 }
 0x116   : >> { %v658_v62 = vor.u32 %v657_v61, %v653_v60 }
 0x117   : >> { %1625 = vmatmul.mubr.msk.bf16.vlgmr.msra.gmra.mrb[0].mxu1 %vm207_vm1, %v481_v59 }
 0x118   : >> { %1629 = vmatpush3.bf16.msra.mxu1 %v1853_v58  ;;  %1630 = vmatprep.mubr.msk.bf16.mxu1 %vm1978_vm4, %v1977_v47 }
 0x11f   : >> { %1643 = vmatmul.mubr.msk.bf16.vlgmr.msra.gmra.mrb[0].mxu0 %vm207_vm1, %v658_v62 }
 0x123   : >> { %1631 = vmatmul.mubr.msk.bf16.vlgmr.msra.gmra.mrb[0].mxu1 %vm207_vm1, %v535_v0 }
 0x1f2   : >> { %v702_v1 = vpop.f32.mrb[0].mxu0 }
 0x1f3   : >> { %v1644_v2 = vpop.f32.mrb[1].mxu0 }
 0x1f4   : >> { %v705_v3 = vpop.f32.mrb[2].mxu0 }
 0x1f5   : >> { %v1645_v4 = vpop.f32.mrb[3].mxu0 }
 0x1f6   : >> { %v579_v5 = vpop.f32.mrb[0].mxu1 }
 0x1f7   : >> { %v1703_v6 = vadd.f32 %v702_v1, %v579_v5  ;;  %v1632_v7 = vpop.f32.mrb[1].mxu1 }
 0x1f8   : >> { %v582_v8 = vpop.f32.mrb[2].mxu1 }
 0x1f9   : >> { %v709_v9 = vpack.c.bf16 %v1703_v6, %v1703_v6  ;;  %v716_v10 = vsel %vm435_vm2, %v1703_v6, 0.0  ;;  %v724_v11 = vmul.f32 %v1703_v6, %v1703_v6  ;;  %v1633_v12 = vpop.f32.mrb[3].mxu1 }
 0x1fa   : >> { %v717_v13 = vrot.slane %v716_v10, 4 }
 0x1fb   : >> { %1508 = vst.msk [vmem:[%s1352_s28 + $0x8] sm:$0x3] %vm433_vm3, %v709_v9  ;;  %v725_v14 = vsel %vm435_vm2, %v724_v11, 0.0 }
 0x1fc   : >> { %v718_v15 = vadd.f32 %v717_v13, %v716_v10  ;;  %v726_v16 = vrot.slane %v725_v14, 4 }
 0x1fe   : >> { %v719_v17 = vrot.slane %v718_v15, 2  ;;  %v727_v18 = vadd.f32 %v726_v16, %v725_v14 }
 0x200   : >> { %v720_v19 = vadd.f32 %v719_v17, %v718_v15  ;;  %v728_v20 = vrot.slane %v727_v18, 2 }
 0x202   : >> { %v721_v21 = vrot.slane %v720_v19, 1  ;;  %v729_v22 = vadd.f32 %v728_v20, %v727_v18 }
 0x204   : >> { %v722_v23 = vadd.f32 %v721_v21, %v720_v19  ;;  %v730_v24 = vrot.slane %v729_v22, 1  ;;  %457 = sbr.rel (!%p455_p5) target bundleno = 270 (0x10e), region = 136 }
 0x206   : >> { %v723_v25 = vadd.f32 %v1945_v43, %v722_v23   ;;  %v731_v26 = vadd.f32 %v730_v24, %v729_v22 }
 0x208   : >> { %v732_v27 = vadd.f32 %v1941_v45, %v731_v26   ;;  %v2242_v43 = vmov %v723_v25 }
 0x20a   : >> { %v2241_v45 = vmov %v732_v27 }
 0x20b LB: >> { %v1857_v28 = vld [vmem:[%s2236_s1 + $0x48] sm:$0xff]   ;;  %v1979_v29 = vmov 0.0   ;;  %v1859_v30 = vld [vmem:[%s2236_s1 + $0x50] sm:$0xff]   ;;  %vm1980_vm5 = vmmov 0   ;;  %s1509_s7 = sshll.u32 %s1961_s29, 2  ;;  %v1860_v31 = vld [vmem:[%s2236_s1 + $0x40] sm:$0xff]   ;;  %s1961_s29 = sphi %s2132_s29, %s738_s29   ;;  %v1957_v25 = vphi %v723_v25, %v2244_v25   ;;  %v1953_v27 = vphi %v732_v27, %v2243_v27  }
 0x20c   : >> { %1646 = vmatprep.subr.bf16.mxu1 %v1979_v29  ;;  %1658 = vmatprep.subr.bf16.mxu0 %v1979_v29  ;;  %s1355_s8 = scalar_lea.vmem %s2019_s22, %s1509_s7  ;;  %v1862_v41 = vld [vmem:[%s2236_s1 + $0x58] sm:$0xff]   ;;  %s1533_s14 = sshll.u32 %s1961_s29, 1 }
 0x20d   : >> { %1647 = vmatpush3.bf16.msra.mxu1 %v1857_v28  ;;  %1648 = vmatprep.mubr.msk.bf16.mxu1 %vm1980_vm5, %v1979_v29  ;;  %v1513_v32 = vld [vmem:[%s1355_s8 + $0x8] sm:$0x3]  ;;  %v1861_v34 = vld [vmem:[%s1355_s8 + $0x4] ss:$0 sps:$4 sm:$0x77]   ;;  %s1361_s15 = scalar_lea.vmem %s2014_s18, %s1533_s14  ;;  %s738_s29 = sadd.s32 1, %s1961_s29  }
 0x20e   : >> { %1659 = vmatpush3.bf16.msra.mxu0 %v1859_v30  ;;  %1652 = vmatprep.subr.bf16.mxu1 %v1979_v29  ;;  %v1858_v33 = vld [vmem:[%s1355_s8 + $0x8] ss:$0 sps:$4 sm:$0x77]   ;;  %v872_v35 = vshrl.u32 %v1861_v34, 16  ;;  %v874_v36 = vshll.u32 %v1861_v34, 16  ;;  %p735_p6 = scmp.ge.s32.totalorder %s738_s29, 4  }
 0x20f   : >> { %1660 = vmatprep.mubr.msk.bf16.mxu0 %vm1980_vm5, %v1979_v29  ;;  %1664 = vmatprep.subr.bf16.mxu0 %v1979_v29  ;;  %v808_v37 = vshll.u32 %v1858_v33, 16  ;;  %v806_v39 = vshrl.u32 %v1858_v33, 16  ;;  %v1528_v44 = vld [vmem:[%s1355_s8 + $0x4] sm:$0x3]  ;;  %s2183_s16 = smov (%p735_p6), 0  }
 0x210   : >> { %1649 = vmatmul.mubr.msk.bf16.vlgmr.msra.gmra.mrb[0].mxu1 %vm207_vm1, %v1513_v32  ;;  %v876_v38 = vrot.slane %v874_v36, 1 }
 0x211   : >> { %1653 = vmatpush3.bf16.msra.mxu1 %v1860_v31  ;;  %1654 = vmatprep.mubr.msk.bf16.mxu1 %vm1980_vm5, %v1979_v29  ;;  %v810_v40 = vrot.slane %v808_v37, 1 }
 0x212   : >> { %v877_v42 = vor.u32 %v876_v38, %v872_v35 }
 0x213   : >> { %v811_v43 = vor.u32 %v810_v40, %v806_v39 }
 0x214   : >> { %1661 = vmatmul.mubr.msk.bf16.vlgmr.msra.gmra.mrb[0].mxu0 %vm207_vm1, %v877_v42 }
 0x215   : >> { %1665 = vmatpush3.bf16.msra.mxu0 %v1862_v41  ;;  %1666 = vmatprep.mubr.msk.bf16.mxu0 %vm1980_vm5, %v1979_v29 }
 0x21c   : >> { %1655 = vmatmul.mubr.msk.bf16.vlgmr.msra.gmra.mrb[0].mxu1 %vm207_vm1, %v811_v43 }
 0x220   : >> { %1667 = vmatmul.mubr.msk.bf16.vlgmr.msra.gmra.mrb[0].mxu0 %vm207_vm1, %v1528_v44 }
 0x2ef   : >> { %v855_v45 = vpop.f32.mrb[0].mxu1 }
 0x2f0   : >> { %v1656_v46 = vpop.f32.mrb[1].mxu1 }
 0x2f1   : >> { %v858_v47 = vpop.f32.mrb[2].mxu1 }
 0x2f2   : >> { %v1657_v48 = vpop.f32.mrb[3].mxu1 }
 0x2f3   : >> { %v975_v49 = vpop.f32.mrb[0].mxu0 }
 0x2f4   : >> { %v1712_v50 = vadd.f32 %v975_v49, %v855_v45  ;;  %v1668_v51 = vpop.f32.mrb[1].mxu0 }
 0x2f5   : >> { %v978_v52 = vpop.f32.mrb[2].mxu0 }
 0x2f6   : >> { %v982_v53 = vpack.c.bf16 %v1712_v50, %v1712_v50  ;;  %v989_v54 = vsel %vm435_vm2, %v1712_v50, 0.0  ;;  %v997_v55 = vmul.f32 %v1712_v50, %v1712_v50  ;;  %v1669_v56 = vpop.f32.mrb[3].mxu0 }
 0x2f7   : >> { %v990_v57 = vrot.slane %v989_v54, 4 }
 0x2f8   : >> { %1534 = vst.msk [vmem:[%s1361_s15 + $0x10] sm:$0x3] %vm433_vm3, %v982_v53  ;;  %v998_v58 = vsel %vm435_vm2, %v997_v55, 0.0 }
 0x2f9   : >> { %v991_v59 = vadd.f32 %v990_v57, %v989_v54  ;;  %v999_v60 = vrot.slane %v998_v58, 4 }
 0x2fb   : >> { %v992_v61 = vrot.slane %v991_v59, 2  ;;  %v1000_v62 = vadd.f32 %v999_v60, %v998_v58 }
 0x2fd   : >> { %v993_v63 = vadd.f32 %v992_v61, %v991_v59  ;;  %v1001_v0 = vrot.slane %v1000_v62, 2 }
 0x2ff   : >> { %v994_v1 = vrot.slane %v993_v63, 1  ;;  %v1002_v2 = vadd.f32 %v1001_v0, %v1000_v62 }
 0x301   : >> { %v995_v3 = vadd.f32 %v994_v1, %v993_v63  ;;  %v1003_v4 = vrot.slane %v1002_v2, 1  ;;  %737 = sbr.rel (!%p735_p6) target bundleno = 523 (0x20b), region = 147 }
 0x303   : >> { %v996_v5 = vadd.f32 %v1957_v25, %v995_v3   ;;  %v1004_v6 = vadd.f32 %v1003_v4, %v1002_v2 }
 0x305   : >> { %v1005_v7 = vadd.f32 %v1953_v27, %v1004_v6   ;;  %v2244_v25 = vmov %v996_v5 }
 0x307   : >> { %v2243_v27 = vmov %v1005_v7 }
 0x308 LB: >> { %v1863_v8 = vld [vmem:[%s2236_s1 + $0x70] sm:$0xff]   ;;  %v1981_v9 = vmov 0.0   ;;  %v1864_v10 = vld [vmem:[%s2236_s1 + $0x68] sm:$0xff]   ;;  %vm1982_vm6 = vmmov 0   ;;  %s1535_s23 = sshll.u32 %s1973_s16, 2  ;;  %v1868_v13 = vld [vmem:[%s2236_s1 + $0x78] sm:$0xff]   ;;  %s1973_s16 = sphi %s2183_s16, %s1011_s16   ;;  %v1969_v5 = vphi %v996_v5, %v2246_v5   ;;  %v1965_v7 = vphi %v1005_v7, %v2245_v7  }
 0x309   : >> { %1682 = vmatprep.subr.bf16.mxu0 %v1981_v9  ;;  %1670 = vmatprep.subr.bf16.mxu1 %v1981_v9  ;;  %s1364_s24 = scalar_lea.vmem %s2019_s22, %s1535_s23  ;;  %v1867_v20 = vld [vmem:[%s2236_s1 + $0x60] sm:$0xff]   ;;  %s1561_s30 = sshll.u32 %s1973_s16, 1 }
 0x30a   : >> { %1683 = vmatpush3.bf16.msra.mxu0 %v1863_v8  ;;  %1684 = vmatprep.mubr.msk.bf16.mxu0 %vm1982_vm6, %v1981_v9  ;;  %v1865_v11 = vld [vmem:[%s1364_s24 + $0x4] ss:$0 sps:$4 sm:$0x66]   ;;  %v1866_v12 = vld [vmem:[%s1364_s24 + $0x8] ss:$0 sps:$4 sm:$0x77]   ;;  %s1370_s4 = scalar_lea.vmem %s2014_s18, %s1561_s30 }
 0x30b   : >> { %1671 = vmatpush3.bf16.msra.mxu1 %v1864_v10  ;;  %1672 = vmatprep.mubr.msk.bf16.mxu1 %vm1982_vm6, %v1981_v9  ;;  %v1148_v14 = vrot.slane %v1865_v11, 1  ;;  %v1869_v15 = vld [vmem:[%s1364_s24 + $0x4] ss:$0 sps:$4 sm:$0x77]   ;;  %v1029_v16 = vshrl.u32 %v1866_v12, 16  ;;  %v1031_v17 = vshll.u32 %v1866_v12, 16 }
 0x30c   : >> { %1676 = vmatprep.subr.bf16.mxu1 %v1981_v9  ;;  %1688 = vmatprep.subr.bf16.mxu0 %v1981_v9  ;;  %v1209_v18 = vshll.u32 %v1869_v15, 16  ;;  %v1207_v22 = vshrl.u32 %v1869_v15, 16  ;;  %v1870_v25 = vld [vmem:[%s1364_s24 + $0x8] ss:$0 sps:$4 sm:$0x66]   ;;  %s1011_s16 = sadd.s32 1, %s1973_s16  }
 0x30d   : >> { %1685 = vmatmul.mubr.msk.bf16.vlgmr.msra.gmra.mrb[0].mxu0 %vm207_vm1, %v1148_v14  ;;  %v1033_v19 = vrot.slane %v1031_v17, 1  ;;  %v1088_v26 = vrot.slane %v1870_v25, 1  ;;  %p1008_p7 = scmp.ge.s32.totalorder %s1011_s16, 4  }
 0x30e   : >> { %1689 = vmatpush3.bf16.msra.mxu0 %v1868_v13  ;;  %1690 = vmatprep.mubr.msk.bf16.mxu0 %vm1982_vm6, %v1981_v9  ;;  %v1211_v23 = vrot.slane %v1209_v18, 1  ;;  %vm1287_vm7 = vcmask (%p1008_p7), 57344  }
 0x30f   : >> { %v1034_v21 = vor.u32 %v1033_v19, %v1029_v16 }
 0x310   : >> { %v1212_v24 = vor.u32 %v1211_v23, %v1207_v22 }
 0x311   : >> { %1673 = vmatmul.mubr.msk.bf16.vlgmr.msra.gmra.mrb[0].mxu1 %vm207_vm1, %v1034_v21 }
 0x312   : >> { %1677 = vmatpush3.bf16.msra.mxu1 %v1867_v20  ;;  %1678 = vmatprep.mubr.msk.bf16.mxu1 %vm1982_vm6, %v1981_v9 }
 0x319   : >> { %1691 = vmatmul.mubr.msk.bf16.vlgmr.msra.gmra.mrb[0].mxu0 %vm207_vm1, %v1212_v24 }
 0x31d   : >> { %1679 = vmatmul.mubr.msk.bf16.vlgmr.msra.gmra.mrb[0].mxu1 %vm207_vm1, %v1088_v26 }
 0x3ec   : >> { %v1256_v27 = vpop.f32.mrb[0].mxu0 }
 0x3ed   : >> { %v1692_v28 = vpop.f32.mrb[1].mxu0 }
 0x3ee   : >> { %v1259_v29 = vpop.f32.mrb[2].mxu0 }
 0x3ef   : >> { %v1693_v30 = vpop.f32.mrb[3].mxu0 }
 0x3f0   : >> { %v1132_v31 = vpop.f32.mrb[0].mxu1 }
 0x3f1   : >> { %v1721_v32 = vadd.f32 %v1256_v27, %v1132_v31  ;;  %v1680_v33 = vpop.f32.mrb[1].mxu1 }
 0x3f2   : >> { %v1135_v34 = vpop.f32.mrb[2].mxu1 }
 0x3f3   : >> { %v1263_v35 = vpack.c.bf16 %v1721_v32, %v1721_v32  ;;  %v1270_v36 = vsel %vm435_vm2, %v1721_v32, 0.0  ;;  %v1278_v37 = vmul.f32 %v1721_v32, %v1721_v32  ;;  %v1681_v38 = vpop.f32.mrb[3].mxu1 }
 0x3f4   : >> { %v1271_v39 = vrot.slane %v1270_v36, 4 }
 0x3f5   : >> { %1562 = vst.msk [vmem:[%s1370_s4 + $0x18] sm:$0x3] %vm433_vm3, %v1263_v35  ;;  %v1279_v40 = vsel %vm435_vm2, %v1278_v37, 0.0 }
 0x3f6   : >> { %v1272_v41 = vadd.f32 %v1271_v39, %v1270_v36  ;;  %v1280_v42 = vrot.slane %v1279_v40, 4 }
 0x3f8   : >> { %v1273_v43 = vrot.slane %v1272_v41, 2  ;;  %v1281_v44 = vadd.f32 %v1280_v42, %v1279_v40 }
 0x3fa   : >> { %v1274_v45 = vadd.f32 %v1273_v43, %v1272_v41  ;;  %v1282_v46 = vrot.slane %v1281_v44, 2 }
 0x3fc   : >> { %v1275_v47 = vrot.slane %v1274_v45, 1  ;;  %v1283_v48 = vadd.f32 %v1282_v46, %v1281_v44 }
 0x3fe   : >> { %v1276_v49 = vadd.f32 %v1275_v47, %v1274_v45  ;;  %v1284_v50 = vrot.slane %v1283_v48, 1  ;;  %1010 = sbr.rel (!%p1008_p7) target bundleno = 776 (0x308), region = 158 }
 0x400   : >> { %v1277_v51 = vadd.f32 %v1969_v5, %v1276_v49   ;;  %v1285_v52 = vadd.f32 %v1284_v50, %v1283_v48 }
 0x402   : >> { %v1286_v53 = vadd.f32 %v1965_v7, %v1285_v52   ;;  %v2246_v5 = vmov %v1277_v51  ;;  %1288 = vst.msk [vmem:[%s2024_s25] sm:$0x1] (%p1008_p7), %vm1287_vm7, %v1277_v51 }
 0x404   : >> { %v2245_v7 = vmov %v1286_v53  ;;  %1289 = vst.msk [vmem:[%s2024_s25 + $0x1] sm:$0x1] (%p1008_p7), %vm1287_vm7, %v1286_v53 }
 0x405 PF: > { %s14_s12 = sadd.s32 1, %s1925_s12  }
 0x406   : > { %p11_p8 = scmp.ge.s32.totalorder %s14_s12, 4  }
 0x408   :  { %13 = sbr.rel (!%p11_p8) target bundleno = 1 (0x1), region = 169 }

// kernel: loom_generator_forward.36
= control target key start
LH: loop header
LB: loop body
LE: loop exit
PB: predicated region body
PF: predicated region fallthrough
CT: control target
= control target key end

     0   :  { %s561_s12 = smov 0   ;;  %s563_s13 = smov 0   ;;  %s633_s0 = inlined_call_operand.vmem [shape: bf16[2,4,8,8,4], index: 0, kind: input, shape index: {}]   ;;  %s634_s1 = inlined_call_operand.vmem [shape: f32[1,4], index: 1, kind: input, shape index: {}]   ;;  %s635_s2 = inlined_call_operand.vmem [shape: f32[1,4], index: 2, kind: input, shape index: {}]   ;;  %s636_s3 = inlined_call_operand.vmem [shape: bf16[2,4,8,8,4], index: 3, kind: output, shape index: {}]  }
   0x1   :  { %s565_s14 = smov 0   ;;  %s567_s15 = smov 0  }
   0x2   :  { %s569_s16 = smov 0  }
   0x3 LB: > { %s28_s17 = sadd.s32 1, %s531_s14  ;;  %s32_s18 = sadd.s32 1, %s535_s15  ;;  %s539_s16 = sphi %s569_s16, %s13_s16   ;;  %s535_s15 = sphi %s567_s15, %s640_s15   ;;  %s531_s14 = sphi %s565_s14, %s639_s14   ;;  %s527_s13 = sphi %s563_s13, %s638_s13   ;;  %s523_s12 = sphi %s561_s12, %s637_s12  }
   0x4   : > { %p30_p0 = scmp.ge.s32.totalorder %s28_s17, 4  ;;  %p431_p1 = scmp.ge.s32.totalorder %s539_s16, 1 }
   0x5   : > { %p173_p2 = scmp.lt.s32.totalorder %s539_s16, 9 }
   0x6   : > { %s642_s17 = smov (%p30_p0, %s28_s17), 0  ;;  %s644_s18 = smov (!%p30_p0, %s32_s18), %s535_s15 }
   0x7   : > { %p174_p3 = pnand %p431_p1, %p173_p2  ;;  %p34_p4 = scmp.ge.s32.totalorder %s644_s18, 2 }
   0x8   : > { %p214_p5 = scmp.lt.s32.totalorder (!%p174_p3), %s527_s13, 1  ;;  %p216_p6 = scmp.lt.s32.totalorder (!%p174_p3), %s523_s12, 3  ;;  %v438_v0 = vld [vmem:[%s634_s1] ss:$0 sm:$0xff] (!%p174_p3)  ;;  %vm303_vm0 = vcmask (!%p174_p3), 27648  }
   0x9   : > { %s646_s18 = smov (%p34_p4, %s644_s18), 0  ;;  %177 = sbr.rel (%p174_p3) target bundleno = 36 (0x24), region = 32 }
   0xa   : > { %v439_v9 = vld [vmem:[%s635_s2] ss:$0 sm:$0xff] (!%p174_p3) }
  0x10   : > { %s648_s13 = smov (!%p214_p5, %s527_s13), 1  ;;  %s650_s12 = smov (!%p216_p6, %s523_s12), 3 }
  0x11   : > { %s433_s19 = sshll.u32 %s648_s13, 5  ;;  %s432_s20 = sshll.u32 %s650_s12, 3 }
  0x12   : > { %s591_s21 = sadd.s32 %s433_s19, %s432_s20 }
  0x13   : > { %s434_s22 = sshll.u32 %s591_s21, 2 }
  0x14   : > { %s225_s25 = scalar_lea.vmem %s633_s0, %s434_s22  ;;  %s239_s5 = scalar_lea.vmem %s636_s3, %s434_s22 }
  0x15   : > { %v443_v1 = vld [vmem:[%s225_s25] sm:$0xff]   ;;  %v458_v2 = vld [vmem:[%s225_s25 + $0x8] sm:$0xff]   ;;  %v459_v3 = vld [vmem:[%s225_s25 + $0x10] sm:$0xff]  }
  0x16   : > { %v444_v4 = vunpack.c.l.bf16 %v443_v1  ;;  %v445_v5 = vunpack.c.h.bf16 %v443_v1  ;;  %v448_v6 = vunpack.c.l.bf16 %v458_v2  ;;  %v449_v7 = vunpack.c.h.bf16 %v458_v2  ;;  %v460_v8 = vld [vmem:[%s225_s25 + $0x18] sm:$0xff]  }
  0x17   : > { %v452_v10 = vunpack.c.l.bf16 %v459_v3  ;;  %v453_v11 = vunpack.c.h.bf16 %v459_v3  ;;  %v456_v12 = vunpack.c.l.bf16 %v460_v8  ;;  %v457_v13 = vunpack.c.h.bf16 %v460_v8 }
  0x18   : > { %v264_v14 = vmul.f32 %v444_v4, %v438_v0  ;;  %v265_v15 = vmul.f32 %v445_v5, %v438_v0  ;;  %v266_v16 = vmul.f32 %v448_v6, %v438_v0  ;;  %v267_v17 = vmul.f32 %v449_v7, %v438_v0 }
  0x19   : > { %v268_v18 = vmul.f32 %v452_v10, %v438_v0  ;;  %v269_v19 = vmul.f32 %v453_v11, %v438_v0  ;;  %v270_v20 = vmul.f32 %v456_v12, %v438_v0  ;;  %v271_v21 = vmul.f32 %v457_v13, %v438_v0 }
  0x1a   : > { %v279_v22 = vadd.f32 %v439_v9, %v264_v14  ;;  %v280_v23 = vadd.f32 %v439_v9, %v265_v15  ;;  %v281_v24 = vadd.f32 %v439_v9, %v266_v16  ;;  %v282_v25 = vadd.f32 %v439_v9, %v267_v17 }
  0x1b   : > { %v283_v26 = vadd.f32 %v439_v9, %v268_v18  ;;  %v284_v27 = vadd.f32 %v439_v9, %v269_v19  ;;  %v285_v28 = vadd.f32 %v439_v9, %v270_v20  ;;  %v286_v29 = vadd.f32 %v439_v9, %v271_v21 }
  0x1c   : > { %v287_v30 = vmax.f32 %v279_v22, 0.0  ;;  %v288_v31 = vmax.f32 %v280_v23, 0.0  ;;  %v289_v32 = vmax.f32 %v281_v24, 0.0  ;;  %v290_v33 = vmax.f32 %v282_v25, 0.0 }
  0x1d   : > { %v291_v34 = vmax.f32 %v283_v26, 0.0  ;;  %v292_v35 = vmax.f32 %v284_v27, 0.0  ;;  %v293_v36 = vmax.f32 %v285_v28, 0.0  ;;  %v294_v37 = vmax.f32 %v286_v29, 0.0 }
  0x1e   : > { %v295_v38 = vpack.c.bf16 %v287_v30, %v287_v30  ;;  %v296_v39 = vpack.c.bf16 %v288_v31, %v288_v31  ;;  %v297_v40 = vpack.c.bf16 %v289_v32, %v289_v32  ;;  %v298_v41 = vpack.c.bf16 %v290_v33, %v290_v33 }
  0x1f   : > { %v299_v42 = vpack.c.bf16 %v291_v34, %v291_v34  ;;  %v300_v43 = vpack.c.bf16 %v292_v35, %v292_v35  ;;  %v301_v44 = vpack.c.bf16 %v293_v36, %v293_v36  ;;  %v302_v45 = vpack.c.bf16 %v294_v37, %v294_v37 }
  0x20   : > { %304 = vst.msk [vmem:[%s239_s5] sm:$0xf] %vm303_vm0, %v295_v38  ;;  %305 = vst.msk [vmem:[%s239_s5 + $0x4] sm:$0xf] %vm303_vm0, %v296_v39 }
  0x21   : > { %306 = vst.msk [vmem:[%s239_s5 + $0x8] sm:$0xf] %vm303_vm0, %v297_v40  ;;  %307 = vst.msk [vmem:[%s239_s5 + $0xc] sm:$0xf] %vm303_vm0, %v298_v41 }
  0x22   : > { %308 = vst.msk [vmem:[%s239_s5 + $0x10] sm:$0xf] %vm303_vm0, %v299_v42  ;;  %309 = vst.msk [vmem:[%s239_s5 + $0x14] sm:$0xf] %vm303_vm0, %v300_v43 }
  0x23   : > { %310 = vst.msk [vmem:[%s239_s5 + $0x18] sm:$0xf] %vm303_vm0, %v301_v44  ;;  %311 = vst.msk [vmem:[%s239_s5 + $0x1c] sm:$0xf] %vm303_vm0, %v302_v45 }
  0x24 PF: > { %s13_s16 = sadd.s32 1, %s539_s16   ;;  %s637_s12 = smov %s531_s14 }
  0x25   : > { %p10_p7 = scmp.ge.s32.totalorder %s13_s16, 10   ;;  %s638_s13 = smov %s535_s15 }
  0x26   : > { %s639_s14 = smov %s642_s17  ;;  %s640_s15 = smov %s646_s18 }
  0x27   :  { %12 = sbr.rel (!%p10_p7) target bundleno = 3 (0x3), region = 62 }

// kernel: loom_generator_forward.35
= control target key start
LH: loop header
LB: loop body
LE: loop exit
PB: predicated region body
PF: predicated region fallthrough
CT: control target
= control target key end

     0   :  { %s1934_s12 = smov 0   ;;  %s2182_s0 = inlined_call_operand.vmem [shape: bf16[2,10,10,8], index: 0, kind: input, shape index: {}]   ;;  %s2183_s1 = inlined_call_operand.vmem [shape: bf16[4,4,8,4], index: 1, kind: input, shape index: {}]   ;;  %s2184_s2 = inlined_call_operand.vmem [shape: bf16[2,4,8,8,4], index: 2, kind: output, shape index: {0}]   ;;  %s2185_s3 = inlined_call_operand.vmem [shape: f32[2,2,4], index: 3, kind: output, shape index: {1}]  }
   0x1 LB: > { %s1423_s13 = sadd.s32 4294967295, %s1856_s12   ;;  %p1427_p0 = scmp.ge.s32.totalorder %s1856_s12, 1  ;;  %s1856_s12 = sphi %s1934_s12, %s14_s12  }
   0x2   : > { %p140_p1 = scmp.lt.s32.totalorder %s1856_s12, 3 }
   0x4   : > { %p141_p2 = pnand %p1427_p0, %p140_p1 }
   0x5   : > { %p168_p3 = scmp.lt.s32.totalorder (!%p141_p2), %s1423_s13, 1  ;;  %v1957_v0 = vmov (!%p141_p2), 0.0   ;;  %v1959_v1 = vmov (!%p141_p2), 0.0   ;;  %s1961_s26 = smov (!%p141_p2), 0  }
   0x6   : > { %144 = sbr.rel (%p141_p2) target bundleno = 1039 (0x40f), region = 28 }
   0xd   : > { %s2195_s13 = smov (!%p168_p3, %s1423_s13), 1 }
   0xe   : > { %s1677_s14 = smul.u32 80, %s2195_s13  ;;  %s1510_s15 = sshll.u32 %s2195_s13, 7 }
   0xf   : > { %s1945_s18 = scalar_lea.vmem %s2184_s2, %s1510_s15  ;;  %s1431_s19 = sshll.u32 %s2195_s13, 1 }
  0x10   : > { %s1950_s22 = scalar_lea.vmem %s2182_s0, %s1677_s14  ;;  %s1955_s25 = scalar_lea.vmem %s2185_s3, %s1431_s19 }
  0x11 LB: >> { %v1435_v2 = vld [vmem:[%s2183_s1 + $0x4] sm:$0xf]  ;;  %vm204_vm0 = vcmask 1043456   ;;  %v1906_v3 = vmov 0.0   ;;  %vm1907_vm1 = vmmov 0   ;;  %s1432_s6 = sshll.u32 %s1868_s26, 3  ;;  %s1868_s26 = sphi %s1961_s26, %s188_s26   ;;  %v1864_v1 = vphi %v1959_v1, %v2187_v1   ;;  %v1860_v0 = vphi %v1957_v0, %v2186_v0  }
  0x12   : >> { %1545 = vmatprep.subr.bf16.mxu1 %v1906_v3  ;;  %v206_v4 = vsel %vm204_vm0, %v1435_v2, 0  ;;  %1547 = vmatprep.mubr.msk.bf16.mxu1 %vm1907_vm1, %v1906_v3  ;;  %v1441_v5 = vld [vmem:[%s2183_s1 + $0x8] sm:$0xf]  ;;  %v197_v6 = vld [vmem:[%s2183_s1] sm:$0xf]  ;;  %vm200_vm2 = vcmask 64512   ;;  %s1310_s7 = scalar_lea.vmem %s1950_s22, %s1432_s6 }
  0x13   : >> { %1546 = vmatpush3.bf16.msra.mxu1 %v206_v4  ;;  %1557 = vmatprep.subr.bf16.mxu0 %v1906_v3  ;;  %v329_v7 = vsel %vm204_vm0, %v1441_v5, 0  ;;  %v264_v8 = vsel %vm204_vm0, %v197_v6, 0  ;;  %v1433_v9 = vld [vmem:[%s1310_s7 + $0x8] sm:$0xf]  ;;  %v1434_v10 = vld [vmem:[%s1310_s7 + $0xc] sm:$0x1] }
  0x14   : >> { %1558 = vmatpush3.bf16.msra.mxu0 %v329_v7  ;;  %1551 = vmatprep.subr.bf16.mxu1 %v1906_v3  ;;  %v1437_v11 = vcombine.low %v1433_v9, %v1434_v10  ;;  %v1791_v12 = vld [vmem:[%s1310_s7] sm:$0x1f]   ;;  %v1444_v16 = vld [vmem:[%s2183_s1 + $0xc] sm:$0xf]  ;;  %s1446_s10 = sshll.u32 %s1868_s26, 2  ;;  %vm427_vm3 = vcmask 31744  }
  0x15   : >> { %1559 = vmatprep.mubr.msk.bf16.mxu0 %vm1907_vm1, %v1906_v3  ;;  %1563 = vmatprep.subr.bf16.mxu0 %v1906_v3  ;;  %v319_v14 = vshrl.u32 %v1791_v12, 16  ;;  %v321_v15 = vshll.u32 %v1791_v12, 16  ;;  %v379_v21 = vsel %vm204_vm0, %v1444_v16, 0  ;;  %v372_v23 = vld [vmem:[%s1310_s7] sm:$0xf]  ;;  %s424_s11 = scalar_lea.vmem %s1945_s18, %s1446_s10  ;;  %vm425_vm4 = vcmask 27648  }
  0x16   : >> { %1548 = vmatmul.mubr.msk.bf16.vlgmr.msra.gmra.mrb[0].mxu1 %vm200_vm2, %v1433_v9  ;;  %v256_v13 = vshll.u32 %v1437_v11, 16  ;;  %v254_v17 = vshrl.u32 %v1437_v11, 16  ;;  %s188_s26 = sadd.s32 1, %s1868_s26  }
  0x17   : >> { %1552 = vmatpush3.bf16.msra.mxu1 %v264_v8  ;;  %1553 = vmatprep.mubr.msk.bf16.mxu1 %vm1907_vm1, %v1906_v3  ;;  %v323_v19 = vrot.slane %v321_v15, 1  ;;  %p185_p4 = scmp.ge.s32.totalorder %s188_s26, 8  }
  0x18   : >> { %v258_v18 = vrot.slane %v256_v13, 1  ;;  %s2016_s13 = smov (%p185_p4), 0  }
  0x19   : >> { %v324_v20 = vor.u32 %v323_v19, %v319_v14 }
  0x1a   : >> { %v259_v22 = vor.u32 %v258_v18, %v254_v17 }
  0x1b   : >> { %1560 = vmatmul.mubr.msk.bf16.vlgmr.msra.gmra.mrb[0].mxu0 %vm200_vm2, %v324_v20 }
  0x1c   : >> { %1564 = vmatpush3.bf16.msra.mxu0 %v379_v21  ;;  %1565 = vmatprep.mubr.msk.bf16.mxu0 %vm1907_vm1, %v1906_v3 }
  0x22   : >> { %1554 = vmatmul.mubr.msk.bf16.vlgmr.msra.gmra.mrb[0].mxu1 %vm200_vm2, %v259_v22 }
  0x27   : >> { %1566 = vmatmul.mubr.msk.bf16.vlgmr.msra.gmra.mrb[0].mxu0 %vm200_vm2, %v372_v23 }
  0xf5   : >> { %v300_v24 = vpop.f32.mrb[0].mxu1 }
  0xf6   : >> { %v1555_v25 = vpop.f32.mrb[1].mxu1 }
  0xf7   : >> { %v303_v26 = vpop.f32.mrb[2].mxu1 }
  0xf8   : >> { %v1556_v27 = vpop.f32.mrb[3].mxu1 }
  0xfa   : >> { %v415_v28 = vpop.f32.mrb[0].mxu0 }
  0xfb   : >> { %v1641_v29 = vadd.f32 %v415_v28, %v300_v24  ;;  %v1567_v30 = vpop.f32.mrb[1].mxu0 }
  0xfc   : >> { %v418_v31 = vpop.f32.mrb[2].mxu0 }
  0xfd   : >> { %v422_v32 = vpack.c.bf16 %v1641_v29, %v1641_v29  ;;  %v428_v33 = vsel %vm427_vm3, %v1641_v29, 0.0  ;;  %v436_v34 = vmul.f32 %v1641_v29, %v1641_v29  ;;  %v1568_v35 = vpop.f32.mrb[3].mxu0 }
  0xfe   : >> { %v429_v36 = vrot.slane %v428_v33, 4 }
  0xff   : >> { %426 = vst.msk [vmem:[%s424_s11] sm:$0xf] %vm425_vm4, %v422_v32  ;;  %v437_v37 = vsel %vm427_vm3, %v436_v34, 0.0 }
 0x100   : >> { %v430_v38 = vadd.f32 %v429_v36, %v428_v33  ;;  %v438_v39 = vrot.slane %v437_v37, 4 }
 0x102   : >> { %v431_v40 = vrot.slane %v430_v38, 2  ;;  %v439_v41 = vadd.f32 %v438_v39, %v437_v37 }
 0x104   : >> { %v432_v42 = vadd.f32 %v431_v40, %v430_v38  ;;  %v440_v43 = vrot.slane %v439_v41, 2 }
 0x106   : >> { %v433_v44 = vrot.slane %v432_v42, 1  ;;  %v441_v45 = vadd.f32 %v440_v43, %v439_v41 }
 0x108   : >> { %v434_v46 = vadd.f32 %v433_v44, %v432_v42  ;;  %v442_v47 = vrot.slane %v441_v45, 1  ;;  %187 = sbr.rel (!%p185_p4) target bundleno = 17 (0x11), region = 125 }
 0x10a   : >> { %v435_v48 = vadd.f32 %v1864_v1, %v434_v46   ;;  %v443_v49 = vadd.f32 %v442_v47, %v441_v45 }
 0x10c   : >> { %v444_v50 = vadd.f32 %v1860_v0, %v443_v49   ;;  %v2187_v1 = vmov %v435_v48 }
 0x10e   : >> { %v2186_v0 = vmov %v444_v50 }
 0x10f LB: >> { %v1459_v51 = vld [vmem:[%s2183_s1 + $0x18] sm:$0xf]  ;;  %v1452_v52 = vld [vmem:[%s2183_s1 + $0x14] sm:$0xf]  ;;  %v1908_v53 = vmov 0.0   ;;  %vm1909_vm5 = vmmov 0   ;;  %s1880_s13 = sphi %s2016_s13, %s450_s13   ;;  %v1876_v48 = vphi %v435_v48, %v2189_v48   ;;  %v1872_v50 = vphi %v444_v50, %v2188_v50  }
 0x110   : >> { %1581 = vmatprep.subr.bf16.mxu0 %v1908_v53  ;;  %v591_v54 = vsel %vm204_vm0, %v1459_v51, 0  ;;  %1569 = vmatprep.subr.bf16.mxu1 %v1908_v53  ;;  %v482_v55 = vsel %vm204_vm0, %v1452_v52, 0  ;;  %s1447_s19 = sshll.u32 %s1880_s13, 3  ;;  %v1462_v56 = vld [vmem:[%s2183_s1 + $0x1c] sm:$0xf]  ;;  %s1465_s27 = sshll.u32 %s1880_s13, 2 }
 0x111   : >> { %1582 = vmatpush3.bf16.msra.mxu0 %v591_v54  ;;  %1583 = vmatprep.mubr.msk.bf16.mxu0 %vm1909_vm5, %v1908_v53  ;;  %s1317_s20 = scalar_lea.vmem %s1950_s22, %s1447_s19  ;;  %v651_v2 = vsel %vm204_vm0, %v1462_v56, 0  ;;  %v1450_v6 = vld [vmem:[%s2183_s1 + $0x10] sm:$0xf]  ;;  %s1322_s28 = scalar_lea.vmem %s1945_s18, %s1465_s27 }
 0x112   : >> { %1570 = vmatpush3.bf16.msra.mxu1 %v482_v55  ;;  %1571 = vmatprep.mubr.msk.bf16.mxu1 %vm1909_vm5, %v1908_v53  ;;  %v577_v57 = vld [vmem:[%s1317_s20] sm:$0xe]  ;;  %v578_v58 = vld [vmem:[%s1317_s20 + $0x4] sm:$0x1]  ;;  %v1449_v62 = vld [vmem:[%s1317_s20 + $0xc] sm:$0x1] }
 0x113   : >> { %v634_v59 = vld [vmem:[%s1317_s20] sm:$0xf]  ;;  %1575 = vmatprep.subr.bf16.mxu1 %v1908_v53  ;;  %1587 = vmatprep.subr.bf16.mxu0 %v1908_v53  ;;  %v1460_v60 = vcombine.low %v577_v57, %v578_v58  ;;  %v1451_v63 = vld [vmem:[%s1317_s20 + $0x8] sm:$0xf]  ;;  %v532_v9 = vsel %vm204_vm0, %v1450_v6, 0  ;;  %s450_s13 = sadd.s32 1, %s1880_s13  }
 0x114   : >> { %v1463_v61 = vcombine.low %v634_v59, %v578_v58  ;;  %v1453_v0 = vcombine.low %v1451_v63, %v1449_v62  ;;  %v1448_v12 = vld [vmem:[%s1317_s20 + $0x8] sm:$0xe]  ;;  %p447_p5 = scmp.ge.s32.totalorder %s450_s13, 8  }
 0x115   : >> { %v586_v1 = vrot.slane %v1460_v60, 1  ;;  %v1455_v14 = vcombine.low %v1448_v12, %v1449_v62  ;;  %s2071_s29 = smov (%p447_p5), 0  }
 0x116   : >> { %v470_v3 = vshrl.u32 %v1453_v0, 16  ;;  %v472_v4 = vshll.u32 %v1453_v0, 16  ;;  %v643_v5 = vshll.u32 %v1463_v61, 16  ;;  %v641_v10 = vshrl.u32 %v1463_v61, 16 }
 0x117   : >> { %1584 = vmatmul.mubr.msk.bf16.vlgmr.msra.gmra.mrb[0].mxu0 %vm200_vm2, %v586_v1  ;;  %v527_v15 = vrot.slane %v1455_v14, 1 }
 0x118   : >> { %v474_v7 = vrot.slane %v472_v4, 1  ;;  %1588 = vmatpush3.bf16.msra.mxu0 %v651_v2  ;;  %1589 = vmatprep.mubr.msk.bf16.mxu0 %vm1909_vm5, %v1908_v53  ;;  %v645_v11 = vrot.slane %v643_v5, 1 }
 0x11a   : >> { %v475_v8 = vor.u32 %v474_v7, %v470_v3  ;;  %v646_v13 = vor.u32 %v645_v11, %v641_v10 }
 0x11c   : >> { %1572 = vmatmul.mubr.msk.bf16.vlgmr.msra.gmra.mrb[0].mxu1 %vm200_vm2, %v475_v8 }
 0x11d   : >> { %1576 = vmatpush3.bf16.msra.mxu1 %v532_v9  ;;  %1577 = vmatprep.mubr.msk.bf16.mxu1 %vm1909_vm5, %v1908_v53 }
 0x123   : >> { %1590 = vmatmul.mubr.msk.bf16.vlgmr.msra.gmra.mrb[0].mxu0 %vm200_vm2, %v646_v13 }
 0x128   : >> { %1578 = vmatmul.mubr.msk.bf16.vlgmr.msra.gmra.mrb[0].mxu1 %vm200_vm2, %v527_v15 }
 0x1f6   : >> { %v687_v16 = vpop.f32.mrb[0].mxu0 }
 0x1f7   : >> { %v1591_v17 = vpop.f32.mrb[1].mxu0 }
 0x1f8   : >> { %v690_v18 = vpop.f32.mrb[2].mxu0 }
 0x1f9   : >> { %v1592_v19 = vpop.f32.mrb[3].mxu0 }
 0x1fb   : >> { %v568_v20 = vpop.f32.mrb[0].mxu1 }
 0x1fc   : >> { %v1650_v21 = vadd.f32 %v687_v16, %v568_v20  ;;  %v1579_v22 = vpop.f32.mrb[1].mxu1 }
 0x1fd   : >> { %v571_v23 = vpop.f32.mrb[2].mxu1 }
 0x1fe   : >> { %v694_v24 = vpack.c.bf16 %v1650_v21, %v1650_v21  ;;  %v701_v25 = vsel %vm427_vm3, %v1650_v21, 0.0  ;;  %v709_v26 = vmul.f32 %v1650_v21, %v1650_v21  ;;  %v1580_v27 = vpop.f32.mrb[3].mxu1 }
 0x1ff   : >> { %v702_v28 = vrot.slane %v701_v25, 4 }
 0x200   : >> { %1466 = vst.msk [vmem:[%s1322_s28 + $0x20] sm:$0xf] %vm425_vm4, %v694_v24  ;;  %v710_v29 = vsel %vm427_vm3, %v709_v26, 0.0 }
 0x201   : >> { %v703_v30 = vadd.f32 %v702_v28, %v701_v25  ;;  %v711_v31 = vrot.slane %v710_v29, 4 }
 0x203   : >> { %v704_v32 = vrot.slane %v703_v30, 2  ;;  %v712_v33 = vadd.f32 %v711_v31, %v710_v29 }
 0x205   : >> { %v705_v34 = vadd.f32 %v704_v32, %v703_v30  ;;  %v713_v35 = vrot.slane %v712_v33, 2 }
 0x207   : >> { %v706_v36 = vrot.slane %v705_v34, 1  ;;  %v714_v37 = vadd.f32 %v713_v35, %v712_v33 }
 0x209   : >> { %v707_v38 = vadd.f32 %v706_v36, %v705_v34  ;;  %v715_v39 = vrot.slane %v714_v37, 1  ;;  %449 = sbr.rel (!%p447_p5) target bundleno = 271 (0x10f), region = 136 }
 0x20b   : >> { %v708_v40 = vadd.f32 %v1876_v48, %v707_v38   ;;  %v716_v41 = vadd.f32 %v715_v39, %v714_v37 }
 0x20d   : >> { %v717_v42 = vadd.f32 %v1872_v50, %v716_v41   ;;  %v2189_v48 = vmov %v708_v40 }
 0x20f   : >> { %v2188_v50 = vmov %v717_v42 }
 0x210 LB: >> { %v1471_v43 = vld [vmem:[%s2183_s1 + $0x24] sm:$0xf]  ;;  %v1478_v44 = vld [vmem:[%s2183_s1 + $0x28] sm:$0xf]  ;;  %v1910_v45 = vmov 0.0   ;;  %vm1911_vm6 = vmmov 0   ;;  %s1892_s29 = sphi %s2071_s29, %s723_s29   ;;  %v1888_v40 = vphi %v708_v40, %v2191_v40   ;;  %v1884_v42 = vphi %v717_v42, %v2190_v42  }
 0x211   : >> { %1593 = vmatprep.subr.bf16.mxu1 %v1910_v45  ;;  %v742_v46 = vsel %vm204_vm0, %v1471_v43, 0  ;;  %1595 = vmatprep.mubr.msk.bf16.mxu1 %vm1911_vm6, %v1910_v45  ;;  %v866_v47 = vsel %vm204_vm0, %v1478_v44, 0  ;;  %v1470_v48 = vld [vmem:[%s2183_s1 + $0x20] sm:$0xf]  ;;  %s1467_s9 = sshll.u32 %s1892_s29, 3  ;;  %s1484_s14 = sshll.u32 %s1892_s29, 2 }
 0x212   : >> { %1594 = vmatpush3.bf16.msra.mxu1 %v742_v46  ;;  %1605 = vmatprep.subr.bf16.mxu0 %v1910_v45  ;;  %s1325_s10 = scalar_lea.vmem %s1950_s22, %s1467_s9  ;;  %v800_v49 = vsel %vm204_vm0, %v1470_v48, 0  ;;  %v1482_v57 = vld [vmem:[%s2183_s1 + $0x2c] sm:$0xf]  ;;  %s1331_s15 = scalar_lea.vmem %s1945_s18, %s1484_s14 }
 0x213   : >> { %1606 = vmatpush3.bf16.msra.mxu0 %v866_v47  ;;  %1599 = vmatprep.subr.bf16.mxu1 %v1910_v45  ;;  %v1468_v50 = vld [vmem:[%s1325_s10 + $0x10] sm:$0xf]  ;;  %v1469_v51 = vld [vmem:[%s1325_s10 + $0x14] sm:$0x1]  ;;  %v1797_v53 = vld [vmem:[%s1325_s10 + $0x8] sm:$0x1f]  }
 0x214   : >> { %1607 = vmatprep.mubr.msk.bf16.mxu0 %vm1911_vm6, %v1910_v45  ;;  %1611 = vmatprep.subr.bf16.mxu0 %v1910_v45  ;;  %v1473_v52 = vcombine.low %v1468_v50, %v1469_v51  ;;  %v856_v55 = vshrl.u32 %v1797_v53, 16  ;;  %v858_v56 = vshll.u32 %v1797_v53, 16  ;;  %v916_v62 = vsel %vm204_vm0, %v1482_v57, 0  ;;  %v1481_v0 = vld [vmem:[%s1325_s10 + $0x8] sm:$0xf]  ;;  %s723_s29 = sadd.s32 1, %s1892_s29  }
 0x215   : >> { %1596 = vmatmul.mubr.msk.bf16.vlgmr.msra.gmra.mrb[0].mxu1 %vm200_vm2, %v1468_v50  ;;  %p720_p6 = scmp.ge.s32.totalorder %s723_s29, 8  }
 0x216   : >> { %1600 = vmatpush3.bf16.msra.mxu1 %v800_v49  ;;  %1601 = vmatprep.mubr.msk.bf16.mxu1 %vm1911_vm6, %v1910_v45  ;;  %v792_v54 = vshll.u32 %v1473_v52, 16  ;;  %v790_v58 = vshrl.u32 %v1473_v52, 16  ;;  %v860_v60 = vrot.slane %v858_v56, 1  ;;  %s2126_s16 = smov (%p720_p6), 0  }
 0x218   : >> { %v794_v59 = vrot.slane %v792_v54, 1  ;;  %v861_v61 = vor.u32 %v860_v60, %v856_v55 }
 0x21a   : >> { %v795_v63 = vor.u32 %v794_v59, %v790_v58  ;;  %1608 = vmatmul.mubr.msk.bf16.vlgmr.msra.gmra.mrb[0].mxu0 %vm200_vm2, %v861_v61 }
 0x21b   : >> { %1612 = vmatpush3.bf16.msra.mxu0 %v916_v62  ;;  %1613 = vmatprep.mubr.msk.bf16.mxu0 %vm1911_vm6, %v1910_v45 }
 0x221   : >> { %1602 = vmatmul.mubr.msk.bf16.vlgmr.msra.gmra.mrb[0].mxu1 %vm200_vm2, %v795_v63 }
 0x226   : >> { %1614 = vmatmul.mubr.msk.bf16.vlgmr.msra.gmra.mrb[0].mxu0 %vm200_vm2, %v1481_v0 }
 0x2f4   : >> { %v836_v1 = vpop.f32.mrb[0].mxu1 }
 0x2f5   : >> { %v1603_v2 = vpop.f32.mrb[1].mxu1 }
 0x2f6   : >> { %v839_v3 = vpop.f32.mrb[2].mxu1 }
 0x2f7   : >> { %v1604_v4 = vpop.f32.mrb[3].mxu1 }
 0x2f9   : >> { %v952_v5 = vpop.f32.mrb[0].mxu0 }
 0x2fa   : >> { %v1659_v6 = vadd.f32 %v952_v5, %v836_v1  ;;  %v1615_v7 = vpop.f32.mrb[1].mxu0 }
 0x2fb   : >> { %v955_v8 = vpop.f32.mrb[2].mxu0 }
 0x2fc   : >> { %v959_v9 = vpack.c.bf16 %v1659_v6, %v1659_v6  ;;  %v966_v10 = vsel %vm427_vm3, %v1659_v6, 0.0  ;;  %v974_v11 = vmul.f32 %v1659_v6, %v1659_v6  ;;  %v1616_v12 = vpop.f32.mrb[3].mxu0 }
 0x2fd   : >> { %v967_v13 = vrot.slane %v966_v10, 4 }
 0x2fe   : >> { %1485 = vst.msk [vmem:[%s1331_s15 + $0x40] sm:$0xf] %vm425_vm4, %v959_v9  ;;  %v975_v14 = vsel %vm427_vm3, %v974_v11, 0.0 }
 0x2ff   : >> { %v968_v15 = vadd.f32 %v967_v13, %v966_v10  ;;  %v976_v16 = vrot.slane %v975_v14, 4 }
 0x301   : >> { %v969_v17 = vrot.slane %v968_v15, 2  ;;  %v977_v18 = vadd.f32 %v976_v16, %v975_v14 }
 0x303   : >> { %v970_v19 = vadd.f32 %v969_v17, %v968_v15  ;;  %v978_v20 = vrot.slane %v977_v18, 2 }
 0x305   : >> { %v971_v21 = vrot.slane %v970_v19, 1  ;;  %v979_v22 = vadd.f32 %v978_v20, %v977_v18 }
 0x307   : >> { %v972_v23 = vadd.f32 %v971_v21, %v970_v19  ;;  %v980_v24 = vrot.slane %v979_v22, 1  ;;  %722 = sbr.rel (!%p720_p6) target bundleno = 528 (0x210), region = 147 }
 0x309   : >> { %v973_v25 = vadd.f32 %v1888_v40, %v972_v23   ;;  %v981_v26 = vadd.f32 %v980_v24, %v979_v22 }
 0x30b   : >> { %v982_v27 = vadd.f32 %v1884_v42, %v981_v26   ;;  %v2191_v40 = vmov %v973_v25 }
 0x30d   : >> { %v2190_v42 = vmov %v982_v27 }
 0x30e LB: >> { %v1499_v28 = vld [vmem:[%s2183_s1 + $0x38] sm:$0xf]  ;;  %v1491_v29 = vld [vmem:[%s2183_s1 + $0x34] sm:$0xf]  ;;  %v1912_v30 = vmov 0.0   ;;  %vm1913_vm7 = vmmov 0   ;;  %s1904_s16 = sphi %s2126_s16, %s988_s16   ;;  %v1900_v25 = vphi %v973_v25, %v2193_v25   ;;  %v1896_v27 = vphi %v982_v27, %v2192_v27  }
 0x30f   : >> { %1629 = vmatprep.subr.bf16.mxu0 %v1912_v30  ;;  %v1130_v31 = vsel %vm204_vm0, %v1499_v28, 0  ;;  %1617 = vmatprep.subr.bf16.mxu1 %v1912_v30  ;;  %v1020_v32 = vsel %vm204_vm0, %v1491_v29, 0  ;;  %s1486_s23 = sshll.u32 %s1904_s16, 3  ;;  %v1503_v33 = vld [vmem:[%s2183_s1 + $0x3c] sm:$0xf]  ;;  %s1506_s30 = sshll.u32 %s1904_s16, 2 }
 0x310   : >> { %1630 = vmatpush3.bf16.msra.mxu0 %v1130_v31  ;;  %1631 = vmatprep.mubr.msk.bf16.mxu0 %vm1913_vm7, %v1912_v30  ;;  %s1334_s24 = scalar_lea.vmem %s1950_s22, %s1486_s23  ;;  %v1190_v43 = vsel %vm204_vm0, %v1503_v33, 0  ;;  %v1489_v47 = vld [vmem:[%s2183_s1 + $0x30] sm:$0xf]  ;;  %s1340_s4 = scalar_lea.vmem %s1945_s18, %s1506_s30 }
 0x311   : >> { %1618 = vmatpush3.bf16.msra.mxu1 %v1020_v32  ;;  %1619 = vmatprep.mubr.msk.bf16.mxu1 %vm1913_vm7, %v1912_v30  ;;  %v1497_v34 = vld [vmem:[%s1334_s24 + $0x8] sm:$0xe]  ;;  %v1498_v35 = vld [vmem:[%s1334_s24 + $0xc] sm:$0x1]  ;;  %v1488_v39 = vld [vmem:[%s1334_s24 + $0x14] sm:$0x1] }
 0x312   : >> { %v1502_v36 = vld [vmem:[%s1334_s24 + $0x8] sm:$0xf]  ;;  %1623 = vmatprep.subr.bf16.mxu1 %v1912_v30  ;;  %1635 = vmatprep.subr.bf16.mxu0 %v1912_v30  ;;  %v1500_v37 = vcombine.low %v1497_v34, %v1498_v35  ;;  %v1490_v40 = vld [vmem:[%s1334_s24 + $0x10] sm:$0xf]  ;;  %v1070_v50 = vsel %vm204_vm0, %v1489_v47, 0  ;;  %s988_s16 = sadd.s32 1, %s1904_s16  }
 0x313   : >> { %v1504_v38 = vcombine.low %v1502_v36, %v1498_v35  ;;  %v1492_v41 = vcombine.low %v1490_v40, %v1488_v39  ;;  %v1487_v53 = vld [vmem:[%s1334_s24 + $0x10] sm:$0xe]  ;;  %p985_p7 = scmp.ge.s32.totalorder %s988_s16, 8  }
 0x314   : >> { %v1125_v42 = vrot.slane %v1500_v37, 1  ;;  %v1494_v55 = vcombine.low %v1487_v53, %v1488_v39  ;;  %vm1257_vm8 = vcmask (%p985_p7), 24576  }
 0x315   : >> { %v1008_v44 = vshrl.u32 %v1492_v41, 16  ;;  %v1010_v45 = vshll.u32 %v1492_v41, 16  ;;  %v1182_v46 = vshll.u32 %v1504_v38, 16  ;;  %v1180_v51 = vshrl.u32 %v1504_v38, 16 }
 0x316   : >> { %1632 = vmatmul.mubr.msk.bf16.vlgmr.msra.gmra.mrb[0].mxu0 %vm200_vm2, %v1125_v42  ;;  %v1065_v56 = vrot.slane %v1494_v55, 1 }
 0x317   : >> { %v1012_v48 = vrot.slane %v1010_v45, 1  ;;  %1636 = vmatpush3.bf16.msra.mxu0 %v1190_v43  ;;  %1637 = vmatprep.mubr.msk.bf16.mxu0 %vm1913_vm7, %v1912_v30  ;;  %v1184_v52 = vrot.slane %v1182_v46, 1 }
 0x319   : >> { %v1013_v49 = vor.u32 %v1012_v48, %v1008_v44  ;;  %v1185_v54 = vor.u32 %v1184_v52, %v1180_v51 }
 0x31b   : >> { %1620 = vmatmul.mubr.msk.bf16.vlgmr.msra.gmra.mrb[0].mxu1 %vm200_vm2, %v1013_v49 }
 0x31c   : >> { %1624 = vmatpush3.bf16.msra.mxu1 %v1070_v50  ;;  %1625 = vmatprep.mubr.msk.bf16.mxu1 %vm1913_vm7, %v1912_v30 }
 0x322   : >> { %1638 = vmatmul.mubr.msk.bf16.vlgmr.msra.gmra.mrb[0].mxu0 %vm200_vm2, %v1185_v54 }
 0x327   : >> { %1626 = vmatmul.mubr.msk.bf16.vlgmr.msra.gmra.mrb[0].mxu1 %vm200_vm2, %v1065_v56 }
 0x3f5   : >> { %v1226_v57 = vpop.f32.mrb[0].mxu0 }
 0x3f6   : >> { %v1639_v58 = vpop.f32.mrb[1].mxu0 }
 0x3f7   : >> { %v1229_v59 = vpop.f32.mrb[2].mxu0 }
 0x3f8   : >> { %v1640_v60 = vpop.f32.mrb[3].mxu0 }
 0x3fa   : >> { %v1106_v61 = vpop.f32.mrb[0].mxu1 }
 0x3fb   : >> { %v1668_v62 = vadd.f32 %v1226_v57, %v1106_v61  ;;  %v1627_v63 = vpop.f32.mrb[1].mxu1 }
 0x3fc   : >> { %v1109_v0 = vpop.f32.mrb[2].mxu1 }
 0x3fd   : >> { %v1233_v1 = vpack.c.bf16 %v1668_v62, %v1668_v62  ;;  %v1240_v2 = vsel %vm427_vm3, %v1668_v62, 0.0  ;;  %v1248_v3 = vmul.f32 %v1668_v62, %v1668_v62  ;;  %v1628_v4 = vpop.f32.mrb[3].mxu1 }
 0x3fe   : >> { %v1241_v5 = vrot.slane %v1240_v2, 4 }
 0x3ff   : >> { %1507 = vst.msk [vmem:[%s1340_s4 + $0x60] sm:$0xf] %vm425_vm4, %v1233_v1  ;;  %v1249_v6 = vsel %vm427_vm3, %v1248_v3, 0.0 }
 0x400   : >> { %v1242_v7 = vadd.f32 %v1241_v5, %v1240_v2  ;;  %v1250_v8 = vrot.slane %v1249_v6, 4 }
 0x402   : >> { %v1243_v9 = vrot.slane %v1242_v7, 2  ;;  %v1251_v10 = vadd.f32 %v1250_v8, %v1249_v6 }
 0x404   : >> { %v1244_v11 = vadd.f32 %v1243_v9, %v1242_v7  ;;  %v1252_v12 = vrot.slane %v1251_v10, 2 }
 0x406   : >> { %v1245_v13 = vrot.slane %v1244_v11, 1  ;;  %v1253_v14 = vadd.f32 %v1252_v12, %v1251_v10 }
 0x408   : >> { %v1246_v15 = vadd.f32 %v1245_v13, %v1244_v11  ;;  %v1254_v16 = vrot.slane %v1253_v14, 1  ;;  %987 = sbr.rel (!%p985_p7) target bundleno = 782 (0x30e), region = 158 }
 0x40a   : >> { %v1247_v17 = vadd.f32 %v1900_v25, %v1246_v15   ;;  %v1255_v18 = vadd.f32 %v1254_v16, %v1253_v14 }
 0x40c   : >> { %v1256_v19 = vadd.f32 %v1896_v27, %v1255_v18   ;;  %v2193_v25 = vmov %v1247_v17  ;;  %1258 = vst.msk [vmem:[%s1955_s25] sm:$0x1] (%p985_p7), %vm1257_vm8, %v1247_v17 }
 0x40e   : >> { %v2192_v27 = vmov %v1256_v19  ;;  %1259 = vst.msk [vmem:[%s1955_s25 + $0x1] sm:$0x1] (%p985_p7), %vm1257_vm8, %v1256_v19 }
 0x40f PF: > { %s14_s12 = sadd.s32 1, %s1856_s12  }
 0x410   : > { %p11_p8 = scmp.ge.s32.totalorder %s14_s12, 4  }
 0x412   :  { %13 = sbr.rel (!%p11_p8) target bundleno = 1 (0x1), region = 169 }

// kernel: loom_generator_forward.37
= control target key start
LH: loop header
LB: loop body
LE: loop exit
PB: predicated region body
PF: predicated region fallthrough
CT: control target
= control target key end

     0   :  { %s1628_s12 = smov 0   ;;  %s1810_s0 = inlined_call_operand.vmem [shape: bf16[2,18,4,18], index: 0, kind: input, shape index: {}]   ;;  %s1811_s1 = inlined_call_operand.vmem [shape: bf16[4,4,3,4], index: 1, kind: input, shape index: {}]   ;;  %s1812_s2 = inlined_call_operand.vmem [shape: f32[3,1], index: 2, kind: input, shape index: {}]   ;;  %s1813_s3 = inlined_call_operand.vmem [shape: f32[2,2,2,16,3,16], index: 3, kind: output, shape index: {}]  }
   0x1 LB: > { %s1274_s13 = sadd.s32 4294967295, %s1571_s12   ;;  %p1278_p0 = scmp.ge.s32.totalorder %s1571_s12, 1  ;;  %s1571_s12 = sphi %s1628_s12, %s13_s12  }
   0x2   : > { %p137_p1 = scmp.lt.s32.totalorder %s1571_s12, 3 }
   0x4   : > { %p138_p2 = pnand %p1278_p0, %p137_p1 }
   0x5   : > { %p161_p3 = scmp.lt.s32.totalorder (!%p138_p2), %s1274_s13, 1  ;;  %v1639_v0 = vld [vmem:[%s1812_s2] sm:$0x7] (!%p138_p2)  ;;  %s1651_s24 = smov (!%p138_p2), 0  }
   0x6   : > { %141 = sbr.rel (%p138_p2) target bundleno = 1465 (0x5b9), region = 32 }
   0xd   : > { %s1815_s13 = smov (!%p161_p3, %s1274_s13), 1 }
   0xe   : > { %s1475_s16 = smul.u32 36, %s1815_s13  ;;  %s1346_s17 = sshll.u32 %s1815_s13, 8 }
   0xf   : > { %s1644_s20 = scalar_lea.vmem %s1813_s3, %s1346_s17 }
  0x10   : > { %s1649_s23 = scalar_lea.vmem %s1810_s0, %s1475_s16 }
  0x11 LB: >> { %v238_v1 = vlaneseq  ;;  %v1589_v2 = vmov 1983009808   ;;  %v1590_v4 = vmov 0.0   ;;  %s1282_s25 = sshll.u32 %s1575_s24, 1  ;;  %vm190_vm0 = vcmask 1041408   ;;  %s1592_s29 = smov 127   ;;  %s1575_s24 = sphi %s1651_s24, %s178_s24  }
  0x12   : >> { %v236_v3 = vunpack.c.l.s4 %v1589_v2  ;;  %1379 = vmatprep.subr.bf16.mxu0 %v1590_v4  ;;  %1385 = vmatprep.subr.bf16.mxu1 %v1590_v4  ;;  %vm1591_vm1 = vmmov 0   ;;  %s1198_s26 = scalar_lea.vmem %s1649_s23, %s1282_s25  ;;  %v1284_v10 = vld [vmem:[%s1811_s1 + $0x2] sm:$0x3]  ;;  %vm186_vm2 = vcmask 31744   ;;  %v1593_v13 = vmov 0   ;;  %s1293_s9 = sshll.u32 %s1575_s24, 2 }
  0x13   : >> { %v239_v5 = vshrl.u32 %v238_v1, 7  ;;  %1381 = vmatprep.mubr.msk.bf16.mxu0 %vm1591_vm1, %v1590_v4  ;;  %1387 = vmatprep.mubr.msk.bf16.mxu1 %vm1591_vm1, %v1590_v4  ;;  %v1283_v7 = vld [vmem:[%s1198_s26 + $0x2] sm:$0x3]  ;;  %v352_v15 = vld [vmem:[%s1198_s26] sm:$0x3]  ;;  %s410_s10 = scalar_lea.vmem %s1644_s20, %s1293_s9  ;;  %vm411_vm3 = vcmask 124928  }
  0x14   : >> { %v237_v6 = vunpack.c.0.s8 %v236_v3  ;;  %v192_v9 = vsel %vm190_vm0, %v1283_v7, 0  ;;  %v1289_v12 = vld.sshfl [vmem:[%s1198_s26] sm:$0x3 pattern:$0x76325410]  ;;  %1535 = vset.pattern.permute.xlu1 %v1593_v13  ;;  %1536 = vset.pattern.permute.xlu0 %v1593_v13  ;;  %v359_v18 = vsel %vm190_vm0, %v352_v15, 0 }
  0x15   : >> { %1380 = vmatpush3.bf16.msra.mxu0 %v192_v9  ;;  %404 = vperm.xlu1 %1535, %v1639_v0   ;;  %v183_v17 = vld [vmem:[%s1811_s1] sm:$0x3]  ;;  %v1288_v21 = vld [vmem:[%s1811_s1 + $0x4] sm:$0x3]  ;;  %v1291_v22 = vld [vmem:[%s1811_s1 + $0x6] sm:$0x3] }
  0x16   : >> { %v1660_v8 = vsub.s32 %v237_v6, %v239_v5  ;;  %1391 = vmatprep.subr.bf16.mxu0 %v1590_v4  ;;  %s178_s24 = sadd.s32 1, %s1575_s24  }
  0x17   : >> { %p175_p4 = scmp.ge.s32.totalorder %s178_s24, 16  }
  0x18   : >> { %v241_v11 = vrot.slane %v1283_v7, %v1660_v8  ;;  %1382 = vmatmul.mubr.msk.bf16.vlgmr.msra.gmra.mrb[0].mxu0 %vm186_vm2, %v1284_v10  ;;  %s1692_s11 = smov (%p175_p4), 0  }
  0x19   : >> { %1393 = vmatprep.mubr.msk.bf16.mxu0 %vm1591_vm1, %v1590_v4 }
  0x1a   : >> { %242 = vrot.lane.b32.xlu0 %v241_v11, %s1592_s29 }
  0x1e   : >> { %303 = vrot.lane.b32.xlu0 %v1289_v12, %s1592_s29 }
  0x8c   : >> { %v243_v14 = vpop.permute.xlu0 %242 }
  0x8d   : >> { %v248_v16 = vsel %vm190_vm0, %v243_v14, 0 }
  0x8e   : >> { %1386 = vmatpush3.bf16.msra.mxu1 %v248_v16 }
  0x8f   : >> { %1397 = vmatprep.subr.bf16.mxu1 %v1590_v4 }
  0x90   : >> { %v304_v19 = vpop.permute.xlu0 %303 }
  0x91   : >> { %v309_v20 = vsel %vm190_vm0, %v304_v19, 0  ;;  %1388 = vmatmul.mubr.msk.bf16.vlgmr.msra.gmra.mrb[0].mxu1 %vm186_vm2, %v183_v17 }
  0x92   : >> { %1392 = vmatpush3.bf16.msra.mxu0 %v309_v20  ;;  %1398 = vmatpush3.bf16.msra.mxu1 %v359_v18 }
  0x93   : >> { %1399 = vmatprep.mubr.msk.bf16.mxu1 %vm1591_vm1, %v1590_v4 }
  0x94   : >> { %v405_v38 = vpop.permute.xlu1 %404 }
  0x95   : >> { %1394 = vmatmul.mubr.msk.bf16.vlgmr.msra.gmra.mrb[4].mxu0 %vm186_vm2, %v1288_v21 }
  0x99   : >> { %1400 = vmatmul.mubr.msk.bf16.vlgmr.msra.gmra.mrb[4].mxu1 %vm186_vm2, %v1291_v22 }
  0xeb   : >> { %v228_v23 = vpop.f32.mrb[0].mxu0 }
  0xec   : >> { %v1383_v24 = vpop.f32.mrb[1].mxu0 }
  0xed   : >> { %v231_v25 = vpop.f32.mrb[2].mxu0 }
  0xee   : >> { %v1384_v26 = vpop.f32.mrb[3].mxu0 }
 0x164   : >> { %v284_v27 = vpop.f32.mrb[0].mxu1 }
 0x165   : >> { %v285_v28 = vadd.f32 %v284_v27, %v228_v23  ;;  %v1389_v29 = vpop.f32.mrb[1].mxu1 }
 0x166   : >> { %v287_v30 = vpop.f32.mrb[2].mxu1 }
 0x167   : >> { %v1390_v31 = vpop.f32.mrb[3].mxu1 }
 0x168   : >> { %v345_v32 = vpop.f32.mrb[4].mxu0 }
 0x169   : >> { %v351_v33 = vadd.f32 %v345_v32, %v285_v28  ;;  %v1395_v34 = vpop.f32.mrb[5].mxu0 }
 0x16a   : >> { %v348_v35 = vpop.f32.mrb[6].mxu0 }
 0x16b   : >> { %v1396_v36 = vpop.f32.mrb[7].mxu0 }
 0x16c   : >> { %v395_v37 = vpop.f32.mrb[4].mxu1 }
 0x16d   : >> { %v401_v39 = vadd.f32 %v395_v37, %v351_v33  ;;  %v1401_v40 = vpop.f32.mrb[5].mxu1 }
 0x16e   : >> { %v398_v41 = vpop.f32.mrb[6].mxu1 }
 0x16f   : >> { %v407_v42 = vadd.f32 %v405_v38, %v401_v39  ;;  %v1402_v43 = vpop.f32.mrb[7].mxu1 }
 0x171   : >> { %1537 = vtanh.f32 %v407_v42 }
 0x176   : > { %177 = sbr.rel (!%p175_p4) target bundleno = 17 (0x11), region = 117 }
 0x17b   : >> { %v1538_v44 = vpop.eup %1537 }
 0x17c   : >> { %412 = vst.msk [vmem:[%s410_s10] sm:$0x7] %vm411_vm3, %v1538_v44 }
 0x17d LB: >> { %v1594_v45 = vmov 0.0   ;;  %vm1595_vm4 = vmmov 0   ;;  %s1294_s13 = sshll.u32 %s1579_s11, 1  ;;  %s1596_s15 = smov 127   ;;  %v1598_v48 = vmov 0   ;;  %s1579_s11 = sphi %s1692_s11, %s418_s11  }
 0x17e   : >> { %1403 = vmatprep.subr.bf16.mxu0 %v1594_v45  ;;  %1405 = vmatprep.mubr.msk.bf16.mxu0 %vm1595_vm4, %v1594_v45  ;;  %s1205_s14 = scalar_lea.vmem %s1649_s23, %s1294_s13  ;;  %s1597_s16 = smov 126   ;;  %v1297_v52 = vld [vmem:[%s1811_s1 + $0xa] sm:$0x3]  ;;  %v1296_v57 = vld [vmem:[%s1811_s1 + $0x8] sm:$0x3] }
 0x17f   : >> { %1409 = vmatprep.subr.bf16.mxu1 %v1594_v45  ;;  %1411 = vmatprep.mubr.msk.bf16.mxu1 %vm1595_vm4, %v1594_v45  ;;  %v1298_v46 = vld.sshfl [vmem:[%s1205_s14 + $0x2] sm:$0x3 pattern:$0x76325410]  ;;  %v1302_v59 = vld [vmem:[%s1811_s1 + $0xc] sm:$0x3] }
 0x180   : >> { %435 = vrot.lane.b32.xlu0 %v1298_v46, %s1596_s15  ;;  %v1303_v47 = vld.sshfl [vmem:[%s1205_s14] sm:$0x3 pattern:$0x76325410]  ;;  %v1305_v60 = vld [vmem:[%s1811_s1 + $0xe] sm:$0x3] }
 0x181   : >> { %546 = vrot.lane.b32.xlu1 %v1303_v47, %s1597_s16  ;;  %1539 = vset.pattern.permute.xlu0 %v1598_v48  ;;  %s1308_s27 = sshll.u32 %s1579_s11, 2  ;;  %s418_s11 = sadd.s32 1, %s1579_s11  }
 0x182   : >> { %s1210_s28 = scalar_lea.vmem %s1644_s20, %s1308_s27  ;;  %p415_p5 = scmp.ge.s32.totalorder %s418_s11, 16  }
 0x183   : > { %s1730_s29 = smov (%p415_p5), 0  }
 0x184   : >> { %485 = vrot.lane.b32.xlu0 %v1298_v46, %s1597_s16 }
 0x185   : >> { %606 = vrot.lane.b32.xlu1 %v1303_v47, %s1596_s15 }
 0x188   : >> { %657 = vperm.xlu0 %1539, %v1639_v0  }
 0x1f2   : >> { %v436_v49 = vpop.permute.xlu0 %435 }
 0x1f3   : >> { %v443_v50 = vsel %vm190_vm0, %v436_v49, 0  ;;  %v547_v51 = vpop.permute.xlu1 %546 }
 0x1f4   : >> { %1404 = vmatpush3.bf16.msra.mxu0 %v443_v50  ;;  %v552_v53 = vsel %vm190_vm0, %v547_v51, 0 }
 0x1f5   : >> { %1415 = vmatprep.subr.bf16.mxu0 %v1594_v45 }
 0x1f6   : >> { %v486_v54 = vpop.permute.xlu0 %485 }
 0x1f7   : >> { %1406 = vmatmul.mubr.msk.bf16.vlgmr.msra.gmra.mrb[0].mxu0 %vm186_vm2, %v1297_v52  ;;  %v491_v55 = vsel %vm190_vm0, %v486_v54, 0  ;;  %v607_v56 = vpop.permute.xlu1 %606 }
 0x1f8   : >> { %1410 = vmatpush3.bf16.msra.mxu1 %v491_v55  ;;  %1416 = vmatpush3.bf16.msra.mxu0 %v552_v53  ;;  %v612_v58 = vsel %vm190_vm0, %v607_v56, 0 }
 0x1f9   : >> { %1421 = vmatprep.subr.bf16.mxu1 %v1594_v45  ;;  %1417 = vmatprep.mubr.msk.bf16.mxu0 %vm1595_vm4, %v1594_v45 }
 0x1fb   : >> { %1412 = vmatmul.mubr.msk.bf16.vlgmr.msra.gmra.mrb[0].mxu1 %vm186_vm2, %v1296_v57 }
 0x1fc   : >> { %1422 = vmatpush3.bf16.msra.mxu1 %v612_v58  ;;  %1423 = vmatprep.mubr.msk.bf16.mxu1 %vm1595_vm4, %v1594_v45 }
 0x1ff   : >> { %1418 = vmatmul.mubr.msk.bf16.vlgmr.msra.gmra.mrb[4].mxu0 %vm186_vm2, %v1302_v59 }
 0x203   : >> { %1424 = vmatmul.mubr.msk.bf16.vlgmr.msra.gmra.mrb[4].mxu1 %vm186_vm2, %v1305_v60 }
 0x207   : >> { %v658_v14 = vpop.permute.xlu0 %657 }
 0x2ca   : >> { %v479_v61 = vpop.f32.mrb[0].mxu0 }
 0x2cb   : >> { %v1407_v62 = vpop.f32.mrb[1].mxu0 }
 0x2cc   : >> { %v482_v63 = vpop.f32.mrb[2].mxu0 }
 0x2cd   : >> { %v1408_v1 = vpop.f32.mrb[3].mxu0 }
 0x2ce   : >> { %v527_v2 = vpop.f32.mrb[0].mxu1 }
 0x2cf   : >> { %v528_v3 = vadd.f32 %v527_v2, %v479_v61  ;;  %v1413_v4 = vpop.f32.mrb[1].mxu1 }
 0x2d0   : >> { %v530_v5 = vpop.f32.mrb[2].mxu1 }
 0x2d1   : >> { %v1414_v6 = vpop.f32.mrb[3].mxu1 }
 0x2d2   : >> { %v588_v7 = vpop.f32.mrb[4].mxu0 }
 0x2d3   : >> { %v594_v9 = vadd.f32 %v588_v7, %v528_v3  ;;  %v1419_v10 = vpop.f32.mrb[5].mxu0 }
 0x2d4   : >> { %v591_v11 = vpop.f32.mrb[6].mxu0 }
 0x2d5   : >> { %v1420_v12 = vpop.f32.mrb[7].mxu0 }
 0x2d6   : >> { %v648_v13 = vpop.f32.mrb[4].mxu1 }
 0x2d7   : >> { %v654_v15 = vadd.f32 %v648_v13, %v594_v9  ;;  %v1425_v16 = vpop.f32.mrb[5].mxu1 }
 0x2d8   : >> { %v651_v17 = vpop.f32.mrb[6].mxu1 }
 0x2d9   : >> { %v660_v18 = vadd.f32 %v658_v14, %v654_v15  ;;  %v1426_v19 = vpop.f32.mrb[7].mxu1 }
 0x2db   : >> { %1540 = vtanh.f32 %v660_v18 }
 0x2e0   : > { %417 = sbr.rel (!%p415_p5) target bundleno = 381 (0x17d), region = 128 }
 0x2e5   : >> { %v1541_v20 = vpop.eup %1540 }
 0x2e6   : >> { %1309 = vst.msk [vmem:[%s1210_s28 + $0x40] sm:$0x7] %vm411_vm3, %v1541_v20 }
 0x2e7 LB: >> { %v1599_v21 = vmov 0.0   ;;  %vm1600_vm5 = vmmov 0   ;;  %s1310_s30 = sshll.u32 %s1583_s29, 1  ;;  %v1313_v25 = vld [vmem:[%s1811_s1 + $0x12] sm:$0x3]  ;;  %s1601_s7 = smov 127   ;;  %s1583_s29 = sphi %s1730_s29, %s672_s29  }
 0x2e8   : >> { %1427 = vmatprep.subr.bf16.mxu0 %v1599_v21  ;;  %1429 = vmatprep.mubr.msk.bf16.mxu0 %vm1600_vm5, %v1599_v21  ;;  %s1213_s4 = scalar_lea.vmem %s1649_s23, %s1310_s30  ;;  %v1602_v27 = vmov 0   ;;  %v1312_v31 = vld [vmem:[%s1811_s1 + $0x10] sm:$0x3]  ;;  %v1318_v35 = vld [vmem:[%s1811_s1 + $0x14] sm:$0x3]  ;;  %s1324_s15 = sshll.u32 %s1583_s29, 2 }
 0x2e9   : >> { %1433 = vmatprep.subr.bf16.mxu1 %v1599_v21  ;;  %1435 = vmatprep.mubr.msk.bf16.mxu1 %vm1600_vm5, %v1599_v21  ;;  %v1311_v22 = vld [vmem:[%s1213_s4 + $0x4] sm:$0x3]  ;;  %v1319_v26 = vld.sshfl [vmem:[%s1213_s4 + $0x2] sm:$0x3 pattern:$0x76325410]  ;;  %s1219_s16 = scalar_lea.vmem %s1644_s20, %s1324_s15 }
 0x2ea   : >> { %v736_v23 = vrot.slane %v1311_v22, %v1660_v8  ;;  %v687_v24 = vsel %vm190_vm0, %v1311_v22, 0  ;;  %1542 = vset.pattern.permute.xlu1 %v1602_v27  ;;  %1543 = vset.pattern.permute.xlu0 %v1602_v27  ;;  %v1321_v29 = vld [vmem:[%s1213_s4 + $0x2] sm:$0x3]  ;;  %v1322_v36 = vld [vmem:[%s1811_s1 + $0x16] sm:$0x3]  ;;  %s672_s29 = sadd.s32 1, %s1583_s29  }
 0x2eb   : >> { %1428 = vmatpush3.bf16.msra.mxu0 %v687_v24  ;;  %900 = vperm.xlu1 %1542, %v1639_v0   ;;  %v855_v32 = vsel %vm190_vm0, %v1321_v29, 0  ;;  %p669_p6 = scmp.ge.s32.totalorder %s672_s29, 16  }
 0x2ec   : >> { %737 = vrot.lane.b32.xlu0 %v736_v23, %s1601_s7  ;;  %1439 = vmatprep.subr.bf16.mxu0 %v1599_v21  ;;  %s1769_s17 = smov (%p669_p6), 0  }
 0x2ee   : >> { %1430 = vmatmul.mubr.msk.bf16.vlgmr.msra.gmra.mrb[0].mxu0 %vm186_vm2, %v1313_v25 }
 0x2ef   : >> { %1441 = vmatprep.mubr.msk.bf16.mxu0 %vm1600_vm5, %v1599_v21 }
 0x2f0   : >> { %799 = vrot.lane.b32.xlu0 %v1319_v26, %s1601_s7 }
 0x35e   : >> { %v738_v28 = vpop.permute.xlu0 %737 }
 0x35f   : >> { %v743_v30 = vsel %vm190_vm0, %v738_v28, 0 }
 0x360   : >> { %1434 = vmatpush3.bf16.msra.mxu1 %v743_v30 }
 0x361   : >> { %1445 = vmatprep.subr.bf16.mxu1 %v1599_v21 }
 0x362   : >> { %v800_v33 = vpop.permute.xlu0 %799 }
 0x363   : >> { %v805_v34 = vsel %vm190_vm0, %v800_v33, 0  ;;  %1436 = vmatmul.mubr.msk.bf16.vlgmr.msra.gmra.mrb[0].mxu1 %vm186_vm2, %v1312_v31 }
 0x364   : >> { %1440 = vmatpush3.bf16.msra.mxu0 %v805_v34  ;;  %1446 = vmatpush3.bf16.msra.mxu1 %v855_v32 }
 0x365   : >> { %1447 = vmatprep.mubr.msk.bf16.mxu1 %vm1600_vm5, %v1599_v21 }
 0x367   : >> { %1442 = vmatmul.mubr.msk.bf16.vlgmr.msra.gmra.mrb[4].mxu0 %vm186_vm2, %v1318_v35 }
 0x36a   : >> { %v901_v52 = vpop.permute.xlu1 %900 }
 0x36b   : >> { %1448 = vmatmul.mubr.msk.bf16.vlgmr.msra.gmra.mrb[4].mxu1 %vm186_vm2, %v1322_v36 }
 0x3c1   : >> { %v723_v37 = vpop.f32.mrb[0].mxu0 }
 0x3c2   : >> { %v1431_v38 = vpop.f32.mrb[1].mxu0 }
 0x3c3   : >> { %v726_v39 = vpop.f32.mrb[2].mxu0 }
 0x3c4   : >> { %v1432_v40 = vpop.f32.mrb[3].mxu0 }
 0x436   : >> { %v779_v41 = vpop.f32.mrb[0].mxu1 }
 0x437   : >> { %v780_v42 = vadd.f32 %v779_v41, %v723_v37  ;;  %v1437_v43 = vpop.f32.mrb[1].mxu1 }
 0x438   : >> { %v782_v44 = vpop.f32.mrb[2].mxu1 }
 0x439   : >> { %v1438_v45 = vpop.f32.mrb[3].mxu1 }
 0x43a   : >> { %v841_v46 = vpop.f32.mrb[4].mxu0 }
 0x43b   : >> { %v847_v47 = vadd.f32 %v841_v46, %v780_v42  ;;  %v1443_v48 = vpop.f32.mrb[5].mxu0 }
 0x43c   : >> { %v844_v49 = vpop.f32.mrb[6].mxu0 }
 0x43d   : >> { %v1444_v50 = vpop.f32.mrb[7].mxu0 }
 0x43e   : >> { %v891_v51 = vpop.f32.mrb[4].mxu1 }
 0x43f   : >> { %v897_v53 = vadd.f32 %v891_v51, %v847_v47  ;;  %v1449_v54 = vpop.f32.mrb[5].mxu1 }
 0x440   : >> { %v894_v55 = vpop.f32.mrb[6].mxu1 }
 0x441   : >> { %v903_v56 = vadd.f32 %v901_v52, %v897_v53  ;;  %v1450_v57 = vpop.f32.mrb[7].mxu1 }
 0x443   : >> { %1544 = vtanh.f32 %v903_v56 }
 0x448   : > { %671 = sbr.rel (!%p669_p6) target bundleno = 743 (0x2e7), region = 139 }
 0x44d   : >> { %v1545_v58 = vpop.eup %1544 }
 0x44e   : >> { %1325 = vst.msk [vmem:[%s1219_s16 + $0x80] sm:$0x7] %vm411_vm3, %v1545_v58 }
 0x44f LB: >> { %v1603_v59 = vmov 0.0   ;;  %vm1604_vm6 = vmmov 0   ;;  %s1326_s18 = sshll.u32 %s1587_s17, 1  ;;  %s1605_s21 = smov 127   ;;  %v1607_v61 = vmov 0   ;;  %s1587_s17 = sphi %s1769_s17, %s915_s17  }
 0x450   : >> { %1451 = vmatprep.subr.bf16.mxu0 %v1603_v59  ;;  %1453 = vmatprep.mubr.msk.bf16.mxu0 %vm1604_vm6, %v1603_v59  ;;  %s1222_s19 = scalar_lea.vmem %s1649_s23, %s1326_s18  ;;  %s1606_s22 = smov 126   ;;  %v1329_v2 = vld [vmem:[%s1811_s1 + $0x1a] sm:$0x3]  ;;  %v1328_v7 = vld [vmem:[%s1811_s1 + $0x18] sm:$0x3] }
 0x451   : >> { %1457 = vmatprep.subr.bf16.mxu1 %v1603_v59  ;;  %1459 = vmatprep.mubr.msk.bf16.mxu1 %vm1604_vm6, %v1603_v59  ;;  %v1330_v60 = vld.sshfl [vmem:[%s1222_s19 + $0x4] sm:$0x3 pattern:$0x76325410]  ;;  %v1335_v10 = vld [vmem:[%s1811_s1 + $0x1c] sm:$0x3] }
 0x452   : >> { %932 = vrot.lane.b32.xlu0 %v1330_v60, %s1605_s21  ;;  %v1336_v8 = vld.sshfl [vmem:[%s1222_s19 + $0x2] sm:$0x3 pattern:$0x76325410]  ;;  %v1339_v11 = vld [vmem:[%s1811_s1 + $0x1e] sm:$0x3] }
 0x453   : >> { %1044 = vrot.lane.b32.xlu1 %v1336_v8, %s1606_s22  ;;  %1546 = vset.pattern.permute.xlu0 %v1607_v61  ;;  %s1342_s5 = sshll.u32 %s1587_s17, 2  ;;  %s915_s17 = sadd.s32 1, %s1587_s17  }
 0x454   : >> { %s1228_s6 = scalar_lea.vmem %s1644_s20, %s1342_s5  ;;  %p912_p7 = scmp.ge.s32.totalorder %s915_s17, 16  }
 0x456   : >> { %982 = vrot.lane.b32.xlu0 %v1330_v60, %s1606_s22 }
 0x457   : >> { %1104 = vrot.lane.b32.xlu1 %v1336_v8, %s1605_s21 }
 0x45a   : >> { %1155 = vperm.xlu0 %1546, %v1639_v0  }
 0x4c4   : >> { %v933_v62 = vpop.permute.xlu0 %932 }
 0x4c5   : >> { %v940_v63 = vsel %vm190_vm0, %v933_v62, 0  ;;  %v1045_v1 = vpop.permute.xlu1 %1044 }
 0x4c6   : >> { %1452 = vmatpush3.bf16.msra.mxu0 %v940_v63  ;;  %v1050_v3 = vsel %vm190_vm0, %v1045_v1, 0 }
 0x4c7   : >> { %1463 = vmatprep.subr.bf16.mxu0 %v1603_v59 }
 0x4c8   : >> { %v983_v4 = vpop.permute.xlu0 %982 }
 0x4c9   : >> { %1454 = vmatmul.mubr.msk.bf16.vlgmr.msra.gmra.mrb[0].mxu0 %vm186_vm2, %v1329_v2  ;;  %v988_v5 = vsel %vm190_vm0, %v983_v4, 0  ;;  %v1105_v6 = vpop.permute.xlu1 %1104 }
 0x4ca   : >> { %1458 = vmatpush3.bf16.msra.mxu1 %v988_v5  ;;  %1464 = vmatpush3.bf16.msra.mxu0 %v1050_v3  ;;  %v1110_v9 = vsel %vm190_vm0, %v1105_v6, 0 }
 0x4cb   : >> { %1469 = vmatprep.subr.bf16.mxu1 %v1603_v59  ;;  %1465 = vmatprep.mubr.msk.bf16.mxu0 %vm1604_vm6, %v1603_v59 }
 0x4cd   : >> { %1460 = vmatmul.mubr.msk.bf16.vlgmr.msra.gmra.mrb[0].mxu1 %vm186_vm2, %v1328_v7 }
 0x4ce   : >> { %1470 = vmatpush3.bf16.msra.mxu1 %v1110_v9  ;;  %1471 = vmatprep.mubr.msk.bf16.mxu1 %vm1604_vm6, %v1603_v59 }
 0x4d1   : >> { %1466 = vmatmul.mubr.msk.bf16.vlgmr.msra.gmra.mrb[4].mxu0 %vm186_vm2, %v1335_v10 }
 0x4d5   : >> { %1472 = vmatmul.mubr.msk.bf16.vlgmr.msra.gmra.mrb[4].mxu1 %vm186_vm2, %v1339_v11 }
 0x4d9   : >> { %v1156_v27 = vpop.permute.xlu0 %1155 }
 0x59c   : >> { %v976_v12 = vpop.f32.mrb[0].mxu0 }
 0x59d   : >> { %v1455_v13 = vpop.f32.mrb[1].mxu0 }
 0x59e   : >> { %v979_v14 = vpop.f32.mrb[2].mxu0 }
 0x59f   : >> { %v1456_v15 = vpop.f32.mrb[3].mxu0 }
 0x5a0   : >> { %v1024_v16 = vpop.f32.mrb[0].mxu1 }
 0x5a1   : >> { %v1025_v17 = vadd.f32 %v1024_v16, %v976_v12  ;;  %v1461_v18 = vpop.f32.mrb[1].mxu1 }
 0x5a2   : >> { %v1027_v19 = vpop.f32.mrb[2].mxu1 }
 0x5a3   : >> { %v1462_v20 = vpop.f32.mrb[3].mxu1 }
 0x5a4   : >> { %v1086_v21 = vpop.f32.mrb[4].mxu0 }
 0x5a5   : >> { %v1092_v22 = vadd.f32 %v1086_v21, %v1025_v17  ;;  %v1467_v23 = vpop.f32.mrb[5].mxu0 }
 0x5a6   : >> { %v1089_v24 = vpop.f32.mrb[6].mxu0 }
 0x5a7   : >> { %v1468_v25 = vpop.f32.mrb[7].mxu0 }
 0x5a8   : >> { %v1146_v26 = vpop.f32.mrb[4].mxu1 }
 0x5a9   : >> { %v1152_v28 = vadd.f32 %v1146_v26, %v1092_v22  ;;  %v1473_v29 = vpop.f32.mrb[5].mxu1 }
 0x5aa   : >> { %v1149_v30 = vpop.f32.mrb[6].mxu1 }
 0x5ab   : >> { %v1158_v31 = vadd.f32 %v1156_v27, %v1152_v28  ;;  %v1474_v32 = vpop.f32.mrb[7].mxu1 }
 0x5ad   : >> { %1547 = vtanh.f32 %v1158_v31 }
 0x5b2   : > { %914 = sbr.rel (!%p912_p7) target bundleno = 1103 (0x44f), region = 150 }
 0x5b7   : >> { %v1548_v33 = vpop.eup %1547 }
 0x5b8   : >> { %1343 = vst.msk [vmem:[%s1228_s6 + $0xc0] sm:$0x7] %vm411_vm3, %v1548_v33 }
 0x5b9 PF: > { %s13_s12 = sadd.s32 1, %s1571_s12  }
 0x5ba   : > { %p10_p8 = scmp.ge.s32.totalorder %s13_s12, 4  }
 0x5bc   :  { %12 = sbr.rel (!%p10_p8) target bundleno = 1 (0x1), region = 161 }

</bundles_post_ra>
